<compile_context>
chip_gen: v7x
topology: tpu7x:2x2x1
jax: 0.10.0
libtpu: 0.0.40
codegen_flags: <defaults>
</compile_context>

<pallas_src>
import functools

import jax
import jax.numpy as jnp
from jax import lax
from jax.experimental import pallas as pl
from jax.experimental.pallas import tpu as pltpu


H1, H2, H3 = 256, 128, 64
H3P = 128                  # layer-3 hidden padded to a full 128-lane register
_LANE = 128
_SUBLANE = 8
_MAX_UNROLL_T = 32         # fully unroll the timestep loop up to this T
_VMEM_BUDGET = 40 << 20    # working-set target (safe inside v7x's 64 MiB)


def _round_up(x, m):
    return (x + m - 1) // m * m


# ---------------------------------------------------------------------------
# Fused Pallas kernel: 3 LSTM layers + Linear, one batch block per grid step.
# ---------------------------------------------------------------------------
def _fused_lstm_kernel(x_ref, wih1_ref, b1_ref, whh1_ref,
                       wih2_ref, b2_ref, whh2_ref,
                       wih3_ref, b3_ref, whh3_ref,
                       wproj_ref, bproj_ref,
                       out_ref,
                       gx1_ref, y1_ref, gx2_ref, y2_ref, gx3_ref,
                       *, bb):
    # x_ref: (T*bb, I), time-major inside the batch block (row = t*bb + b).
    T = x_ref.shape[0] // bb

    def recurrence(gx_ref, whh_ref, hidden, y_ref):
        """One LSTM layer. gx_ref already holds x@W_ih + b for every timestep
        (gate order i,f,o,g); the serial chain is only h@W_hh plus the gate
        nonlinearities, with h (bf16) and c (f32) carried as values."""
        h_bf = jnp.zeros((bb, hidden), jnp.bfloat16)
        c = jnp.zeros((bb, hidden), jnp.float32)

        def step(row, h_prev, c_prev):
            gates = gx_ref[pl.ds(row, bb), :] + jnp.dot(
                h_prev, whh_ref[...], preferred_element_type=jnp.float32)
            sig = jax.nn.sigmoid(gates[:, :3 * hidden])      # i | f | o fused
            g_g = jnp.tanh(gates[:, 3 * hidden:])
            c_new = sig[:, hidden:2 * hidden] * c_prev + sig[:, :hidden] * g_g
            h_f = sig[:, 2 * hidden:3 * hidden] * jnp.tanh(c_new)
            if y_ref is not None:
                y_ref[pl.ds(row, bb), :] = h_f
            return h_f.astype(jnp.bfloat16), c_new

        if T <= _MAX_UNROLL_T:
            for t in range(T):                 # static, fully unrolled
                h_bf, c = step(t * bb, h_bf, c)
        else:
            def body(t, carry):
                h_prev, c_prev = carry
                row = pl.multiple_of(t * bb, bb)
                return step(row, h_prev, c_prev)
            h_bf, c = lax.fori_loop(0, T, body, (h_bf, c), unroll=4)
        return h_bf

    # ---- layer 1: hoisted input projection (one MXU matmul, bias folded)
    gx1_ref[...] = jnp.dot(x_ref[...].astype(jnp.bfloat16), wih1_ref[...],
                           preferred_element_type=jnp.float32) + b1_ref[...]
    recurrence(gx1_ref, whh1_ref, H1, y1_ref)

    # ---- layer 2
    gx2_ref[...] = jnp.dot(y1_ref[...].astype(jnp.bfloat16), wih2_ref[...],
                           preferred_element_type=jnp.float32) + b2_ref[...]
    recurrence(gx2_ref, whh2_ref, H2, y2_ref)

    # ---- layer 3 (hidden padded 64 -> 128; only the final h is consumed, so
    # no per-step output stores at all)
    gx3_ref[...] = jnp.dot(y2_ref[...].astype(jnp.bfloat16), wih3_ref[...],
                           preferred_element_type=jnp.float32) + b3_ref[...]
    h3 = recurrence(gx3_ref, whh3_ref, H3P, None)

    # ---- final projection (padded h3 lanes hit zero rows of wproj; output
    # columns padded to a full lane register -> dense, unmasked stores)
    out_ref[...] = (jnp.dot(h3, wproj_ref[...],
                            preferred_element_type=jnp.float32)
                    + bproj_ref[...])


# ---------------------------------------------------------------------------
# VMEM budgeting + batch-block selection
# ---------------------------------------------------------------------------
def _vmem_bytes(bb, T, num_inputs, out_p):
    tb = T * bb
    gx = 4 * tb * 4 * (H1 + H2 + H3P)                  # f32 gate scratch
    y = 4 * tb * (H1 + H2)                             # f32 per-layer outputs
    w_elems = (num_inputs * 4 * H1 + H1 * 4 * H1 + H1 * 4 * H2 + H2 * 4 * H2
               + H2 * 4 * H3P + H3P * 4 * H3P + H3P * out_p)
    w = 2 * 2 * w_elems                                # bf16, double-buffered
    b = 2 * 4 * (4 * H1 + 4 * H2 + 4 * H3P + out_p)    # f32 biases, x2
    io = 2 * 4 * (tb * num_inputs + bb * out_p)        # x in + out, x2
    return gx + y + w + b + io


def _choose_bb(batch, T, num_inputs, out_p):
    b8 = _round_up(max(batch, 1), _SUBLANE)
    if b8 > _SUBLANE:
        # Keep >= 2 grid programs so the "parallel" axis can span both
        # TensorCores on v7x, while feeding up to 128 rows per MXU pass.
        bb = min(128, _round_up(-(-b8 // 2), _SUBLANE), b8)
    else:
        bb = _SUBLANE
    while bb > _SUBLANE and _vmem_bytes(bb, T, num_inputs, out_p) > _VMEM_BUDGET:
        bb -= _SUBLANE
    return bb


# ---------------------------------------------------------------------------
# pallas_call wrapper
# ---------------------------------------------------------------------------
def _w_spec(arr):
    """Whole-array VMEM block, constant across the batch grid (no re-DMA)."""
    return pl.BlockSpec(arr.shape, lambda g: (0, 0))


def _fused_call(xg, kp, out_p, bb):
    G, tb, num_inputs = xg.shape
    T = tb // bb
    est = _vmem_bytes(bb, T, num_inputs, out_p)
    # Override the 16/32 MiB scoped defaults, but stay under v7x's 64 MiB.
    vmem_limit = min(56 << 20, max(32 << 20, est + (8 << 20)))
    kernel = functools.partial(_fused_lstm_kernel, bb=bb)
    return pl.pallas_call(
        kernel,
        out_shape=jax.ShapeDtypeStruct((G, bb, out_p), jnp.float32),
        grid=(G,),
        in_specs=[
            pl.BlockSpec((None, tb, num_inputs), lambda g: (g, 0, 0)),
            _w_spec(kp["wih1"]), _w_spec(kp["b1"]), _w_spec(kp["whh1"]),
            _w_spec(kp["wih2"]), _w_spec(kp["b2"]), _w_spec(kp["whh2"]),
            _w_spec(kp["wih3"]), _w_spec(kp["b3"]), _w_spec(kp["whh3"]),
            _w_spec(kp["wproj"]), _w_spec(kp["bproj"]),
        ],
        out_specs=pl.BlockSpec((None, bb, out_p), lambda g: (g, 0, 0)),
        scratch_shapes=[
            pltpu.VMEM((tb, 4 * H1), jnp.float32),   # gx1
            pltpu.VMEM((tb, H1), jnp.float32),       # y1
            pltpu.VMEM((tb, 4 * H2), jnp.float32),   # gx2
            pltpu.VMEM((tb, H2), jnp.float32),       # y2
            pltpu.VMEM((tb, 4 * H3P), jnp.float32),  # gx3
        ],
        compiler_params=pltpu.CompilerParams(
            dimension_semantics=("parallel",),        # megacore split on v7x
            vmem_limit_bytes=vmem_limit),
    )(xg, kp["wih1"], kp["b1"], kp["whh1"],
      kp["wih2"], kp["b2"], kp["whh2"],
      kp["wih3"], kp["b3"], kp["whh3"],
      kp["wproj"], kp["bproj"])


# ---------------------------------------------------------------------------
# One-time parameter preparation (PyTorch layout -> kernel layout)
# ---------------------------------------------------------------------------
def prepare_params(params):
    """Transpose weights, reorder gates to (i, f, o, g), fuse biases, pad the
    H=64 layer to 128 lanes, pad the Linear output to a 128-lane multiple and
    cast matmul operands to bf16. Call once at parameter-load time."""

    def lstm(p, pad_to=None):
        w_ih, w_hh, b_ih, b_hh = [jnp.asarray(a, jnp.float32) for a in p]
        H = w_hh.shape[1]

        def reorder(w_t):            # (K, 4H): torch (i,f,g,o) -> (i,f,o,g)
            K = w_t.shape[0]
            g = w_t.reshape(K, 4, H)
            return jnp.concatenate([g[:, 0], g[:, 1], g[:, 3], g[:, 2]], -1)

        wih_t = reorder(w_ih.T)                          # (I, 4H)
        whh_t = reorder(w_hh.T)                          # (H, 4H)
        b = reorder((b_ih + b_hh)[None, :])              # (1, 4H)
        if pad_to is not None and pad_to != H:
            pad = pad_to - H

            def pad_gates(w):                            # (K,4H)->(K,4*pad_to)
                K = w.shape[0]
                return jnp.pad(w.reshape(K, 4, H),
                               ((0, 0), (0, 0), (0, pad))).reshape(K, 4 * pad_to)

            wih_t = pad_gates(wih_t)
            whh_t = jnp.pad(pad_gates(whh_t), ((0, pad), (0, 0)))
            b = pad_gates(b)
        return wih_t.astype(jnp.bfloat16), b, whh_t.astype(jnp.bfloat16)

    wih1, b1, whh1 = lstm(params["lstm1"])
    wih2, b2, whh2 = lstm(params["lstm2"])
    wih3, b3, whh3 = lstm(params["lstm3"], pad_to=H3P)

    w, b = params["proj"]
    out_dim = w.shape[0]
    out_p = _round_up(out_dim, _LANE)
    wproj = jnp.asarray(w, jnp.float32).T                          # (64, out)
    wproj = jnp.pad(wproj, ((0, H3P - H3), (0, out_p - out_dim)))
    bproj = jnp.pad(jnp.asarray(b, jnp.float32)[None, :],
                    ((0, 0), (0, out_p - out_dim)))
    return dict(wih1=wih1, b1=b1, whh1=whh1,
                wih2=wih2, b2=b2, whh2=whh2,
                wih3=wih3, b3=b3, whh3=whh3,
                wproj=wproj.astype(jnp.bfloat16), bproj=bproj)


# ---------------------------------------------------------------------------
# Forward wrapper (matches the PyTorch module semantics)
# ---------------------------------------------------------------------------
def lstm_feature_extractor(x, kparams, *, window_size, num_inputs, output_dim):
    B = x.shape[0]
    T = window_size
    out_p = kparams["bproj"].shape[-1]
    x = x.reshape(B, T, num_inputs).astype(jnp.float32)

    bb = _choose_bb(B, T, num_inputs, out_p)
    G = -(-B // bb)
    b_pad = G * bb
    if b_pad != B:
        x = jnp.pad(x, ((0, b_pad - B), (0, 0), (0, 0)))

    # (G, bb, T, I) -> (G, T, bb, I) -> (G, T*bb, I): time-major inside each
    # batch block so every per-timestep window is a sublane-aligned slab.
    xg = jnp.transpose(x.reshape(G, bb, T, num_inputs), (0, 2, 1, 3))
    xg = xg.reshape(G, T * bb, num_inputs)

    out = _fused_call(xg, kparams, out_p, bb)            # (G, bb, out_p)
    return out.reshape(b_pad, out_p)[:B, :output_dim]


# ---------------------------------------------------------------------------
# Deterministic parameter init (mirrors PyTorch default uniform(-k, k))
# ---------------------------------------------------------------------------
def init_params(key, num_inputs, output_dim):
    def lstm_params(key, in_sz, hid):
        k = 1.0 / jnp.sqrt(hid)
        ks = jax.random.split(key, 4)
        return (jax.random.uniform(ks[0], (4 * hid, in_sz), jnp.float32, -k, k),
                jax.random.uniform(ks[1], (4 * hid, hid), jnp.float32, -k, k),
                jax.random.uniform(ks[2], (4 * hid,), jnp.float32, -k, k),
                jax.random.uniform(ks[3], (4 * hid,), jnp.float32, -k, k))

    def linear_params(key, in_sz, out_sz):
        k = 1.0 / jnp.sqrt(in_sz)
        ks = jax.random.split(key, 2)
        return (jax.random.uniform(ks[0], (out_sz, in_sz), jnp.float32, -k, k),
                jax.random.uniform(ks[1], (out_sz,), jnp.float32, -k, k))

    k1, k2, k3, k4 = jax.random.split(key, 4)
    return {
        "lstm1": lstm_params(k1, num_inputs, H1),
        "lstm2": lstm_params(k2, H1, H2),
        "lstm3": lstm_params(k3, H2, H3),
        "proj": linear_params(k4, H3, output_dim),
    }


# ---------------------------------------------------------------------------
# Pure-JAX reference (mirrors the kernel numerics: bf16 matmul operands,
# f32 accumulation, f32 state, PyTorch gate order) for correctness checks.
# ---------------------------------------------------------------------------
def _ref_lstm(x_bf, w_ih, w_hh, b_ih, b_hh):
    B, T, _ = x_bf.shape
    H = w_hh.shape[1]
    wih_t = jnp.asarray(w_ih, jnp.float32).T.astype(jnp.bfloat16)
    whh_t = jnp.asarray(w_hh, jnp.float32).T.astype(jnp.bfloat16)
    b = jnp.asarray(b_ih, jnp.float32) + jnp.asarray(b_hh, jnp.float32)
    h0 = jnp.zeros((B, H), jnp.float32)
    c0 = jnp.zeros((B, H), jnp.float32)

    def step(carry, x_t):
        h, c = carry
        g = (jnp.dot(x_t.astype(jnp.bfloat16), wih_t,
                     preferred_element_type=jnp.float32)
             + jnp.dot(h.astype(jnp.bfloat16), whh_t,
                       preferred_element_type=jnp.float32)
             + b)
        i = jax.nn.sigmoid(g[:, 0 * H:1 * H])
        f = jax.nn.sigmoid(g[:, 1 * H:2 * H])
        gg = jnp.tanh(g[:, 2 * H:3 * H])
        o = jax.nn.sigmoid(g[:, 3 * H:4 * H])
        c = f * c + i * gg
        h = o * jnp.tanh(c)
        return (h, c), h

    (_, _), ys = lax.scan(step, (h0, c0), jnp.transpose(x_bf, (1, 0, 2)))
    return jnp.transpose(ys, (1, 0, 2))


def _ref_forward(x, params, window_size, num_inputs):
    B = x.shape[0]
    x = x.reshape(B, window_size, num_inputs).astype(jnp.float32)
    x = _ref_lstm(x, *params["lstm1"])
    x = _ref_lstm(x, *params["lstm2"])
    x = _ref_lstm(x, *params["lstm3"])
    feats = x[:, -1, :]                                  # h_n[-1] == y[T-1]
    w, b = params["proj"]
    return (jnp.dot(feats.astype(jnp.bfloat16),
                    jnp.asarray(w, jnp.float32).T.astype(jnp.bfloat16),
                    preferred_element_type=jnp.float32)
            + jnp.asarray(b, jnp.float32))


# ---------------------------------------------------------------------------
if __name__ == "__main__":
    def run_case(name, batch, num_inputs, window_size, output_dim, seed, tol):
        key = jax.random.PRNGKey(seed)
        k_param, k_x = jax.random.split(key)
        params = init_params(k_param, num_inputs, output_dim)
        kparams = prepare_params(params)     # one-time kernel-layout prep
        x = jax.random.normal(k_x, (batch, window_size * num_inputs),
                              jnp.float32)
        fwd = jax.jit(functools.partial(lstm_feature_extractor,
                                        window_size=window_size,
                                        num_inputs=num_inputs,
                                        output_dim=output_dim))
        out = jax.block_until_ready(fwd(x, kparams))
        ref = _ref_forward(x, params, window_size, num_inputs)
        assert out.shape == (batch, output_dim), (name, out.shape)
        err = float(jnp.max(jnp.abs(out - ref)))
        assert jnp.allclose(out, ref, rtol=tol, atol=tol), (name, err)

    # Note: jax.random.PRNGKey(0) is used for the primary case.
    # 1) small batch: batch padding (12 -> 16), 2-program grid, unrolled T.
    run_case("small", batch=12, num_inputs=16, window_size=8, output_dim=32,
             seed=0, tol=2e-3)
    # 2) larger batch: wide (BB=104) MXU block with G=2 (tolerance slightly
    #    looser: more elements -> more chances of a shared-trajectory bf16
    #    rounding flip vs the reference).
    run_case("wide", batch=200, num_inputs=16, window_size=8, output_dim=32,
             seed=1, tol=5e-3)
    # 3) long window: exercises the lax.fori_loop(unroll=4) recurrence path
    #    and non-multiple output padding (7 -> 128).
    run_case("long", batch=4, num_inputs=8, window_size=40, output_dim=7,
             seed=2, tol=1e-2)

    print("KERNEL_OK")
</pallas_src>

<mosaic_0001>
module attributes {stable_mosaic.version = 11 : i64} {
  func.func @_fused_lstm_kernel(%arg0: i32, %arg1: memref<1x64x16xf32, #tpu.memory_space<vmem>>, %arg2: memref<16x1024xbf16, #tpu.memory_space<vmem>>, %arg3: memref<1x1024xf32, #tpu.memory_space<vmem>>, %arg4: memref<256x1024xbf16, #tpu.memory_space<vmem>>, %arg5: memref<256x512xbf16, #tpu.memory_space<vmem>>, %arg6: memref<1x512xf32, #tpu.memory_space<vmem>>, %arg7: memref<128x512xbf16, #tpu.memory_space<vmem>>, %arg8: memref<128x512xbf16, #tpu.memory_space<vmem>>, %arg9: memref<1x512xf32, #tpu.memory_space<vmem>>, %arg10: memref<128x512xbf16, #tpu.memory_space<vmem>>, %arg11: memref<128x128xbf16, #tpu.memory_space<vmem>>, %arg12: memref<1x128xf32, #tpu.memory_space<vmem>>, %arg13: memref<1x8x128xf32, #tpu.memory_space<vmem>>, %arg14: memref<64x1024xf32, #tpu.memory_space<vmem>>, %arg15: memref<64x256xf32, #tpu.memory_space<vmem>>, %arg16: memref<64x512xf32, #tpu.memory_space<vmem>>, %arg17: memref<64x128xf32, #tpu.memory_space<vmem>>, %arg18: memref<64x512xf32, #tpu.memory_space<vmem>>) attributes {dimension_semantics = [#tpu.dimension_semantics<parallel>], iteration_bounds = array<i64: 2>, scalar_prefetch = 0 : i64, scratch_operands = 5 : i64, tpu.core_type = #tpu.core_type<tc>, window_params = [{transform_indices = @transform_0, window_bounds = array<i64: 1, 64, 16>}, {pipeline_mode = #tpu.pipeline_mode<synchronous>, transform_indices = @transform_1, window_bounds = array<i64: 16, 1024>}, {pipeline_mode = #tpu.pipeline_mode<synchronous>, transform_indices = @transform_2, window_bounds = array<i64: 1, 1024>}, {pipeline_mode = #tpu.pipeline_mode<synchronous>, transform_indices = @transform_3, window_bounds = array<i64: 256, 1024>}, {pipeline_mode = #tpu.pipeline_mode<synchronous>, transform_indices = @transform_4, window_bounds = array<i64: 256, 512>}, {pipeline_mode = #tpu.pipeline_mode<synchronous>, transform_indices = @transform_5, window_bounds = array<i64: 1, 512>}, {pipeline_mode = #tpu.pipeline_mode<synchronous>, transform_indices = @transform_6, window_bounds = array<i64: 128, 512>}, {pipeline_mode = #tpu.pipeline_mode<synchronous>, transform_indices = @transform_7, window_bounds = array<i64: 128, 512>}, {pipeline_mode = #tpu.pipeline_mode<synchronous>, transform_indices = @transform_8, window_bounds = array<i64: 1, 512>}, {pipeline_mode = #tpu.pipeline_mode<synchronous>, transform_indices = @transform_9, window_bounds = array<i64: 128, 512>}, {pipeline_mode = #tpu.pipeline_mode<synchronous>, transform_indices = @transform_10, window_bounds = array<i64: 128, 128>}, {pipeline_mode = #tpu.pipeline_mode<synchronous>, transform_indices = @transform_11, window_bounds = array<i64: 1, 128>}, {transform_indices = @transform_12, window_bounds = array<i64: 1, 8, 128>}]} {
    %c0 = arith.constant 0 : index
    %c0_0 = arith.constant 0 : index
    %c0_1 = arith.constant 0 : index
    %0 = vector.load %arg1[%c0, %c0_0, %c0_1] : memref<1x64x16xf32, #tpu.memory_space<vmem>>, vector<1x64x16xf32>
    %1 = vector.shape_cast %0 : vector<1x64x16xf32> to vector<64x16xf32>
    %2 = arith.truncf %1 : vector<64x16xf32> to vector<64x16xbf16>
    %c0_2 = arith.constant 0 : index
    %c0_3 = arith.constant 0 : index
    %3 = vector.load %arg2[%c0_2, %c0_3] : memref<16x1024xbf16, #tpu.memory_space<vmem>>, vector<16x1024xbf16>
    %cst = arith.constant dense<0.000000e+00> : vector<64x1024xf32>
    %4 = tpu.matmul %2, %3, %cst {dimension_numbers = #tpu.dot_dimension_numbers<[1], [0], [0], [1], [0, 0, 1, 1], [], []>} : vector<64x16xbf16>, vector<16x1024xbf16>, vector<64x1024xf32> -> vector<64x1024xf32>
    %c0_4 = arith.constant 0 : index
    %c0_5 = arith.constant 0 : index
    %5 = vector.load %arg3[%c0_4, %c0_5] : memref<1x1024xf32, #tpu.memory_space<vmem>>, vector<1x1024xf32>
    %6 = vector.broadcast %5 : vector<1x1024xf32> to vector<64x1024xf32>
    %7 = arith.addf %4, %6 : vector<64x1024xf32>
    %c0_6 = arith.constant 0 : index
    %c0_7 = arith.constant 0 : index
    %8 = vector.load %arg14[%c0_6, %c0_7] : memref<64x1024xf32, #tpu.memory_space<vmem>>, vector<64x1024xf32>
    tpu.vector_store %arg14[%c0_6, %c0_7], %7 {strides = array<i32>} : memref<64x1024xf32, #tpu.memory_space<vmem>>, vector<64x1024xf32>,
    %cst_8 = arith.constant 0.000000e+00 : bf16
    %9 = vector.broadcast %cst_8 : bf16 to vector<8x256xbf16>
    %cst_9 = arith.constant 0.000000e+00 : f32
    %10 = vector.broadcast %cst_9 : f32 to vector<8x256xf32>
    %c0_10 = arith.constant 0 : index
    %c0_11 = arith.constant 0 : index
    %11 = vector.load %arg14[%c0_10, %c0_11] : memref<64x1024xf32, #tpu.memory_space<vmem>>, vector<8x1024xf32>
    %c0_12 = arith.constant 0 : index
    %c0_13 = arith.constant 0 : index
    %12 = vector.load %arg4[%c0_12, %c0_13] : memref<256x1024xbf16, #tpu.memory_space<vmem>>, vector<256x1024xbf16>
    %cst_14 = arith.constant dense<0.000000e+00> : vector<8x1024xf32>
    %13 = tpu.matmul %9, %12, %cst_14 {dimension_numbers = #tpu.dot_dimension_numbers<[1], [0], [0], [1], [0, 0, 1, 1], [], []>} : vector<8x256xbf16>, vector<256x1024xbf16>, vector<8x1024xf32> -> vector<8x1024xf32>
    %14 = arith.addf %11, %13 : vector<8x1024xf32>
    %15 = vector.extract_strided_slice %14 {offsets = [0, 0], sizes = [8, 768], strides = [1, 1]} : vector<8x1024xf32> to vector<8x768xf32>
    %16 = arith.negf %15 : vector<8x768xf32>
    %17 = math.exp %16 : vector<8x768xf32>
    %cst_15 = arith.constant 1.000000e+00 : f32
    %18 = vector.broadcast %cst_15 : f32 to vector<8x768xf32>
    %19 = arith.addf %18, %17 : vector<8x768xf32>
    %20 = arith.divf %18, %19 : vector<8x768xf32>
    %21 = vector.extract_strided_slice %14 {offsets = [0, 768], sizes = [8, 256], strides = [1, 1]} : vector<8x1024xf32> to vector<8x256xf32>
    %22 = math.tanh %21 : vector<8x256xf32>
    %23 = vector.extract_strided_slice %20 {offsets = [0, 256], sizes = [8, 256], strides = [1, 1]} : vector<8x768xf32> to vector<8x256xf32>
    %24 = arith.mulf %23, %10 : vector<8x256xf32>
    %25 = vector.extract_strided_slice %20 {offsets = [0, 0], sizes = [8, 256], strides = [1, 1]} : vector<8x768xf32> to vector<8x256xf32>
    %26 = arith.mulf %25, %22 : vector<8x256xf32>
    %27 = arith.addf %24, %26 : vector<8x256xf32>
    %28 = vector.extract_strided_slice %20 {offsets = [0, 512], sizes = [8, 256], strides = [1, 1]} : vector<8x768xf32> to vector<8x256xf32>
    %29 = math.tanh %27 : vector<8x256xf32>
    %30 = arith.mulf %28, %29 : vector<8x256xf32>
    %c0_16 = arith.constant 0 : index
    %c0_17 = arith.constant 0 : index
    %31 = vector.load %arg15[%c0_16, %c0_17] : memref<64x256xf32, #tpu.memory_space<vmem>>, vector<8x256xf32>
    tpu.vector_store %arg15[%c0_16, %c0_17], %30 {strides = array<i32>} : memref<64x256xf32, #tpu.memory_space<vmem>>, vector<8x256xf32>,
    %32 = arith.truncf %30 : vector<8x256xf32> to vector<8x256xbf16>
    %c8 = arith.constant 8 : index
    %c0_18 = arith.constant 0 : index
    %33 = vector.load %arg14[%c8, %c0_18] : memref<64x1024xf32, #tpu.memory_space<vmem>>, vector<8x1024xf32>
    %c0_19 = arith.constant 0 : index
    %c0_20 = arith.constant 0 : index
    %34 = vector.load %arg4[%c0_19, %c0_20] : memref<256x1024xbf16, #tpu.memory_space<vmem>>, vector<256x1024xbf16>
    %cst_21 = arith.constant dense<0.000000e+00> : vector<8x1024xf32>
    %35 = tpu.matmul %32, %34, %cst_21 {dimension_numbers = #tpu.dot_dimension_numbers<[1], [0], [0], [1], [0, 0, 1, 1], [], []>} : vector<8x256xbf16>, vector<256x1024xbf16>, vector<8x1024xf32> -> vector<8x1024xf32>
    %36 = arith.addf %33, %35 : vector<8x1024xf32>
    %37 = vector.extract_strided_slice %36 {offsets = [0, 0], sizes = [8, 768], strides = [1, 1]} : vector<8x1024xf32> to vector<8x768xf32>
    %38 = arith.negf %37 : vector<8x768xf32>
    %39 = math.exp %38 : vector<8x768xf32>
    %cst_22 = arith.constant 1.000000e+00 : f32
    %40 = vector.broadcast %cst_22 : f32 to vector<8x768xf32>
    %41 = arith.addf %40, %39 : vector<8x768xf32>
    %42 = arith.divf %40, %41 : vector<8x768xf32>
    %43 = vector.extract_strided_slice %36 {offsets = [0, 768], sizes = [8, 256], strides = [1, 1]} : vector<8x1024xf32> to vector<8x256xf32>
    %44 = math.tanh %43 : vector<8x256xf32>
    %45 = vector.extract_strided_slice %42 {offsets = [0, 256], sizes = [8, 256], strides = [1, 1]} : vector<8x768xf32> to vector<8x256xf32>
    %46 = arith.mulf %45, %27 : vector<8x256xf32>
    %47 = vector.extract_strided_slice %42 {offsets = [0, 0], sizes = [8, 256], strides = [1, 1]} : vector<8x768xf32> to vector<8x256xf32>
    %48 = arith.mulf %47, %44 : vector<8x256xf32>
    %49 = arith.addf %46, %48 : vector<8x256xf32>
    %50 = vector.extract_strided_slice %42 {offsets = [0, 512], sizes = [8, 256], strides = [1, 1]} : vector<8x768xf32> to vector<8x256xf32>
    %51 = math.tanh %49 : vector<8x256xf32>
    %52 = arith.mulf %50, %51 : vector<8x256xf32>
    %c8_23 = arith.constant 8 : index
    %c0_24 = arith.constant 0 : index
    %53 = vector.load %arg15[%c8_23, %c0_24] : memref<64x256xf32, #tpu.memory_space<vmem>>, vector<8x256xf32>
    tpu.vector_store %arg15[%c8_23, %c0_24], %52 {strides = array<i32>} : memref<64x256xf32, #tpu.memory_space<vmem>>, vector<8x256xf32>,
    %54 = arith.truncf %52 : vector<8x256xf32> to vector<8x256xbf16>
    %c16 = arith.constant 16 : index
    %c0_25 = arith.constant 0 : index
    %55 = vector.load %arg14[%c16, %c0_25] : memref<64x1024xf32, #tpu.memory_space<vmem>>, vector<8x1024xf32>
    %c0_26 = arith.constant 0 : index
    %c0_27 = arith.constant 0 : index
    %56 = vector.load %arg4[%c0_26, %c0_27] : memref<256x1024xbf16, #tpu.memory_space<vmem>>, vector<256x1024xbf16>
    %cst_28 = arith.constant dense<0.000000e+00> : vector<8x1024xf32>
    %57 = tpu.matmul %54, %56, %cst_28 {dimension_numbers = #tpu.dot_dimension_numbers<[1], [0], [0], [1], [0, 0, 1, 1], [], []>} : vector<8x256xbf16>, vector<256x1024xbf16>, vector<8x1024xf32> -> vector<8x1024xf32>
    %58 = arith.addf %55, %57 : vector<8x1024xf32>
    %59 = vector.extract_strided_slice %58 {offsets = [0, 0], sizes = [8, 768], strides = [1, 1]} : vector<8x1024xf32> to vector<8x768xf32>
    %60 = arith.negf %59 : vector<8x768xf32>
    %61 = math.exp %60 : vector<8x768xf32>
    %cst_29 = arith.constant 1.000000e+00 : f32
    %62 = vector.broadcast %cst_29 : f32 to vector<8x768xf32>
    %63 = arith.addf %62, %61 : vector<8x768xf32>
    %64 = arith.divf %62, %63 : vector<8x768xf32>
    %65 = vector.extract_strided_slice %58 {offsets = [0, 768], sizes = [8, 256], strides = [1, 1]} : vector<8x1024xf32> to vector<8x256xf32>
    %66 = math.tanh %65 : vector<8x256xf32>
    %67 = vector.extract_strided_slice %64 {offsets = [0, 256], sizes = [8, 256], strides = [1, 1]} : vector<8x768xf32> to vector<8x256xf32>
    %68 = arith.mulf %67, %49 : vector<8x256xf32>
    %69 = vector.extract_strided_slice %64 {offsets = [0, 0], sizes = [8, 256], strides = [1, 1]} : vector<8x768xf32> to vector<8x256xf32>
    %70 = arith.mulf %69, %66 : vector<8x256xf32>
    %71 = arith.addf %68, %70 : vector<8x256xf32>
    %72 = vector.extract_strided_slice %64 {offsets = [0, 512], sizes = [8, 256], strides = [1, 1]} : vector<8x768xf32> to vector<8x256xf32>
    %73 = math.tanh %71 : vector<8x256xf32>
    %74 = arith.mulf %72, %73 : vector<8x256xf32>
    %c16_30 = arith.constant 16 : index
    %c0_31 = arith.constant 0 : index
    %75 = vector.load %arg15[%c16_30, %c0_31] : memref<64x256xf32, #tpu.memory_space<vmem>>, vector<8x256xf32>
    tpu.vector_store %arg15[%c16_30, %c0_31], %74 {strides = array<i32>} : memref<64x256xf32, #tpu.memory_space<vmem>>, vector<8x256xf32>,
    %76 = arith.truncf %74 : vector<8x256xf32> to vector<8x256xbf16>
    %c24 = arith.constant 24 : index
    %c0_32 = arith.constant 0 : index
    %77 = vector.load %arg14[%c24, %c0_32] : memref<64x1024xf32, #tpu.memory_space<vmem>>, vector<8x1024xf32>
    %c0_33 = arith.constant 0 : index
    %c0_34 = arith.constant 0 : index
    %78 = vector.load %arg4[%c0_33, %c0_34] : memref<256x1024xbf16, #tpu.memory_space<vmem>>, vector<256x1024xbf16>
    %cst_35 = arith.constant dense<0.000000e+00> : vector<8x1024xf32>
    %79 = tpu.matmul %76, %78, %cst_35 {dimension_numbers = #tpu.dot_dimension_numbers<[1], [0], [0], [1], [0, 0, 1, 1], [], []>} : vector<8x256xbf16>, vector<256x1024xbf16>, vector<8x1024xf32> -> vector<8x1024xf32>
    %80 = arith.addf %77, %79 : vector<8x1024xf32>
    %81 = vector.extract_strided_slice %80 {offsets = [0, 0], sizes = [8, 768], strides = [1, 1]} : vector<8x1024xf32> to vector<8x768xf32>
    %82 = arith.negf %81 : vector<8x768xf32>
    %83 = math.exp %82 : vector<8x768xf32>
    %cst_36 = arith.constant 1.000000e+00 : f32
    %84 = vector.broadcast %cst_36 : f32 to vector<8x768xf32>
    %85 = arith.addf %84, %83 : vector<8x768xf32>
    %86 = arith.divf %84, %85 : vector<8x768xf32>
    %87 = vector.extract_strided_slice %80 {offsets = [0, 768], sizes = [8, 256], strides = [1, 1]} : vector<8x1024xf32> to vector<8x256xf32>
    %88 = math.tanh %87 : vector<8x256xf32>
    %89 = vector.extract_strided_slice %86 {offsets = [0, 256], sizes = [8, 256], strides = [1, 1]} : vector<8x768xf32> to vector<8x256xf32>
    %90 = arith.mulf %89, %71 : vector<8x256xf32>
    %91 = vector.extract_strided_slice %86 {offsets = [0, 0], sizes = [8, 256], strides = [1, 1]} : vector<8x768xf32> to vector<8x256xf32>
    %92 = arith.mulf %91, %88 : vector<8x256xf32>
    %93 = arith.addf %90, %92 : vector<8x256xf32>
    %94 = vector.extract_strided_slice %86 {offsets = [0, 512], sizes = [8, 256], strides = [1, 1]} : vector<8x768xf32> to vector<8x256xf32>
    %95 = math.tanh %93 : vector<8x256xf32>
    %96 = arith.mulf %94, %95 : vector<8x256xf32>
    %c24_37 = arith.constant 24 : index
    %c0_38 = arith.constant 0 : index
    %97 = vector.load %arg15[%c24_37, %c0_38] : memref<64x256xf32, #tpu.memory_space<vmem>>, vector<8x256xf32>
    tpu.vector_store %arg15[%c24_37, %c0_38], %96 {strides = array<i32>} : memref<64x256xf32, #tpu.memory_space<vmem>>, vector<8x256xf32>,
    %98 = arith.truncf %96 : vector<8x256xf32> to vector<8x256xbf16>
    %c32 = arith.constant 32 : index
    %c0_39 = arith.constant 0 : index
    %99 = vector.load %arg14[%c32, %c0_39] : memref<64x1024xf32, #tpu.memory_space<vmem>>, vector<8x1024xf32>
    %c0_40 = arith.constant 0 : index
    %c0_41 = arith.constant 0 : index
    %100 = vector.load %arg4[%c0_40, %c0_41] : memref<256x1024xbf16, #tpu.memory_space<vmem>>, vector<256x1024xbf16>
    %cst_42 = arith.constant dense<0.000000e+00> : vector<8x1024xf32>
    %101 = tpu.matmul %98, %100, %cst_42 {dimension_numbers = #tpu.dot_dimension_numbers<[1], [0], [0], [1], [0, 0, 1, 1], [], []>} : vector<8x256xbf16>, vector<256x1024xbf16>, vector<8x1024xf32> -> vector<8x1024xf32>
    %102 = arith.addf %99, %101 : vector<8x1024xf32>
    %103 = vector.extract_strided_slice %102 {offsets = [0, 0], sizes = [8, 768], strides = [1, 1]} : vector<8x1024xf32> to vector<8x768xf32>
    %104 = arith.negf %103 : vector<8x768xf32>
    %105 = math.exp %104 : vector<8x768xf32>
    %cst_43 = arith.constant 1.000000e+00 : f32
    %106 = vector.broadcast %cst_43 : f32 to vector<8x768xf32>
    %107 = arith.addf %106, %105 : vector<8x768xf32>
    %108 = arith.divf %106, %107 : vector<8x768xf32>
    %109 = vector.extract_strided_slice %102 {offsets = [0, 768], sizes = [8, 256], strides = [1, 1]} : vector<8x1024xf32> to vector<8x256xf32>
    %110 = math.tanh %109 : vector<8x256xf32>
    %111 = vector.extract_strided_slice %108 {offsets = [0, 256], sizes = [8, 256], strides = [1, 1]} : vector<8x768xf32> to vector<8x256xf32>
    %112 = arith.mulf %111, %93 : vector<8x256xf32>
    %113 = vector.extract_strided_slice %108 {offsets = [0, 0], sizes = [8, 256], strides = [1, 1]} : vector<8x768xf32> to vector<8x256xf32>
    %114 = arith.mulf %113, %110 : vector<8x256xf32>
    %115 = arith.addf %112, %114 : vector<8x256xf32>
    %116 = vector.extract_strided_slice %108 {offsets = [0, 512], sizes = [8, 256], strides = [1, 1]} : vector<8x768xf32> to vector<8x256xf32>
    %117 = math.tanh %115 : vector<8x256xf32>
    %118 = arith.mulf %116, %117 : vector<8x256xf32>
    %c32_44 = arith.constant 32 : index
    %c0_45 = arith.constant 0 : index
    %119 = vector.load %arg15[%c32_44, %c0_45] : memref<64x256xf32, #tpu.memory_space<vmem>>, vector<8x256xf32>
    tpu.vector_store %arg15[%c32_44, %c0_45], %118 {strides = array<i32>} : memref<64x256xf32, #tpu.memory_space<vmem>>, vector<8x256xf32>,
    %120 = arith.truncf %118 : vector<8x256xf32> to vector<8x256xbf16>
    %c40 = arith.constant 40 : index
    %c0_46 = arith.constant 0 : index
    %121 = vector.load %arg14[%c40, %c0_46] : memref<64x1024xf32, #tpu.memory_space<vmem>>, vector<8x1024xf32>
    %c0_47 = arith.constant 0 : index
    %c0_48 = arith.constant 0 : index
    %122 = vector.load %arg4[%c0_47, %c0_48] : memref<256x1024xbf16, #tpu.memory_space<vmem>>, vector<256x1024xbf16>
    %cst_49 = arith.constant dense<0.000000e+00> : vector<8x1024xf32>
    %123 = tpu.matmul %120, %122, %cst_49 {dimension_numbers = #tpu.dot_dimension_numbers<[1], [0], [0], [1], [0, 0, 1, 1], [], []>} : vector<8x256xbf16>, vector<256x1024xbf16>, vector<8x1024xf32> -> vector<8x1024xf32>
    %124 = arith.addf %121, %123 : vector<8x1024xf32>
    %125 = vector.extract_strided_slice %124 {offsets = [0, 0], sizes = [8, 768], strides = [1, 1]} : vector<8x1024xf32> to vector<8x768xf32>
    %126 = arith.negf %125 : vector<8x768xf32>
    %127 = math.exp %126 : vector<8x768xf32>
    %cst_50 = arith.constant 1.000000e+00 : f32
    %128 = vector.broadcast %cst_50 : f32 to vector<8x768xf32>
    %129 = arith.addf %128, %127 : vector<8x768xf32>
    %130 = arith.divf %128, %129 : vector<8x768xf32>
    %131 = vector.extract_strided_slice %124 {offsets = [0, 768], sizes = [8, 256], strides = [1, 1]} : vector<8x1024xf32> to vector<8x256xf32>
    %132 = math.tanh %131 : vector<8x256xf32>
    %133 = vector.extract_strided_slice %130 {offsets = [0, 256], sizes = [8, 256], strides = [1, 1]} : vector<8x768xf32> to vector<8x256xf32>
    %134 = arith.mulf %133, %115 : vector<8x256xf32>
    %135 = vector.extract_strided_slice %130 {offsets = [0, 0], sizes = [8, 256], strides = [1, 1]} : vector<8x768xf32> to vector<8x256xf32>
    %136 = arith.mulf %135, %132 : vector<8x256xf32>
    %137 = arith.addf %134, %136 : vector<8x256xf32>
    %138 = vector.extract_strided_slice %130 {offsets = [0, 512], sizes = [8, 256], strides = [1, 1]} : vector<8x768xf32> to vector<8x256xf32>
    %139 = math.tanh %137 : vector<8x256xf32>
    %140 = arith.mulf %138, %139 : vector<8x256xf32>
    %c40_51 = arith.constant 40 : index
    %c0_52 = arith.constant 0 : index
    %141 = vector.load %arg15[%c40_51, %c0_52] : memref<64x256xf32, #tpu.memory_space<vmem>>, vector<8x256xf32>
    tpu.vector_store %arg15[%c40_51, %c0_52], %140 {strides = array<i32>} : memref<64x256xf32, #tpu.memory_space<vmem>>, vector<8x256xf32>,
    %142 = arith.truncf %140 : vector<8x256xf32> to vector<8x256xbf16>
    %c48 = arith.constant 48 : index
    %c0_53 = arith.constant 0 : index
    %143 = vector.load %arg14[%c48, %c0_53] : memref<64x1024xf32, #tpu.memory_space<vmem>>, vector<8x1024xf32>
    %c0_54 = arith.constant 0 : index
    %c0_55 = arith.constant 0 : index
    %144 = vector.load %arg4[%c0_54, %c0_55] : memref<256x1024xbf16, #tpu.memory_space<vmem>>, vector<256x1024xbf16>
    %cst_56 = arith.constant dense<0.000000e+00> : vector<8x1024xf32>
    %145 = tpu.matmul %142, %144, %cst_56 {dimension_numbers = #tpu.dot_dimension_numbers<[1], [0], [0], [1], [0, 0, 1, 1], [], []>} : vector<8x256xbf16>, vector<256x1024xbf16>, vector<8x1024xf32> -> vector<8x1024xf32>
    %146 = arith.addf %143, %145 : vector<8x1024xf32>
    %147 = vector.extract_strided_slice %146 {offsets = [0, 0], sizes = [8, 768], strides = [1, 1]} : vector<8x1024xf32> to vector<8x768xf32>
    %148 = arith.negf %147 : vector<8x768xf32>
    %149 = math.exp %148 : vector<8x768xf32>
    %cst_57 = arith.constant 1.000000e+00 : f32
    %150 = vector.broadcast %cst_57 : f32 to vector<8x768xf32>
    %151 = arith.addf %150, %149 : vector<8x768xf32>
    %152 = arith.divf %150, %151 : vector<8x768xf32>
    %153 = vector.extract_strided_slice %146 {offsets = [0, 768], sizes = [8, 256], strides = [1, 1]} : vector<8x1024xf32> to vector<8x256xf32>
    %154 = math.tanh %153 : vector<8x256xf32>
    %155 = vector.extract_strided_slice %152 {offsets = [0, 256], sizes = [8, 256], strides = [1, 1]} : vector<8x768xf32> to vector<8x256xf32>
    %156 = arith.mulf %155, %137 : vector<8x256xf32>
    %157 = vector.extract_strided_slice %152 {offsets = [0, 0], sizes = [8, 256], strides = [1, 1]} : vector<8x768xf32> to vector<8x256xf32>
    %158 = arith.mulf %157, %154 : vector<8x256xf32>
    %159 = arith.addf %156, %158 : vector<8x256xf32>
    %160 = vector.extract_strided_slice %152 {offsets = [0, 512], sizes = [8, 256], strides = [1, 1]} : vector<8x768xf32> to vector<8x256xf32>
    %161 = math.tanh %159 : vector<8x256xf32>
    %162 = arith.mulf %160, %161 : vector<8x256xf32>
    %c48_58 = arith.constant 48 : index
    %c0_59 = arith.constant 0 : index
    %163 = vector.load %arg15[%c48_58, %c0_59] : memref<64x256xf32, #tpu.memory_space<vmem>>, vector<8x256xf32>
    tpu.vector_store %arg15[%c48_58, %c0_59], %162 {strides = array<i32>} : memref<64x256xf32, #tpu.memory_space<vmem>>, vector<8x256xf32>,
    %164 = arith.truncf %162 : vector<8x256xf32> to vector<8x256xbf16>
    %c56 = arith.constant 56 : index
    %c0_60 = arith.constant 0 : index
    %165 = vector.load %arg14[%c56, %c0_60] : memref<64x1024xf32, #tpu.memory_space<vmem>>, vector<8x1024xf32>
    %c0_61 = arith.constant 0 : index
    %c0_62 = arith.constant 0 : index
    %166 = vector.load %arg4[%c0_61, %c0_62] : memref<256x1024xbf16, #tpu.memory_space<vmem>>, vector<256x1024xbf16>
    %cst_63 = arith.constant dense<0.000000e+00> : vector<8x1024xf32>
    %167 = tpu.matmul %164, %166, %cst_63 {dimension_numbers = #tpu.dot_dimension_numbers<[1], [0], [0], [1], [0, 0, 1, 1], [], []>} : vector<8x256xbf16>, vector<256x1024xbf16>, vector<8x1024xf32> -> vector<8x1024xf32>
    %168 = arith.addf %165, %167 : vector<8x1024xf32>
    %169 = vector.extract_strided_slice %168 {offsets = [0, 0], sizes = [8, 768], strides = [1, 1]} : vector<8x1024xf32> to vector<8x768xf32>
    %170 = arith.negf %169 : vector<8x768xf32>
    %171 = math.exp %170 : vector<8x768xf32>
    %cst_64 = arith.constant 1.000000e+00 : f32
    %172 = vector.broadcast %cst_64 : f32 to vector<8x768xf32>
    %173 = arith.addf %172, %171 : vector<8x768xf32>
    %174 = arith.divf %172, %173 : vector<8x768xf32>
    %175 = vector.extract_strided_slice %168 {offsets = [0, 768], sizes = [8, 256], strides = [1, 1]} : vector<8x1024xf32> to vector<8x256xf32>
    %176 = math.tanh %175 : vector<8x256xf32>
    %177 = vector.extract_strided_slice %174 {offsets = [0, 256], sizes = [8, 256], strides = [1, 1]} : vector<8x768xf32> to vector<8x256xf32>
    %178 = arith.mulf %177, %159 : vector<8x256xf32>
    %179 = vector.extract_strided_slice %174 {offsets = [0, 0], sizes = [8, 256], strides = [1, 1]} : vector<8x768xf32> to vector<8x256xf32>
    %180 = arith.mulf %179, %176 : vector<8x256xf32>
    %181 = arith.addf %178, %180 : vector<8x256xf32>
    %182 = vector.extract_strided_slice %174 {offsets = [0, 512], sizes = [8, 256], strides = [1, 1]} : vector<8x768xf32> to vector<8x256xf32>
    %183 = math.tanh %181 : vector<8x256xf32>
    %184 = arith.mulf %182, %183 : vector<8x256xf32>
    %c56_65 = arith.constant 56 : index
    %c0_66 = arith.constant 0 : index
    %185 = vector.load %arg15[%c56_65, %c0_66] : memref<64x256xf32, #tpu.memory_space<vmem>>, vector<8x256xf32>
    tpu.vector_store %arg15[%c56_65, %c0_66], %184 {strides = array<i32>} : memref<64x256xf32, #tpu.memory_space<vmem>>, vector<8x256xf32>,
    %c0_67 = arith.constant 0 : index
    %c0_68 = arith.constant 0 : index
    %186 = vector.load %arg15[%c0_67, %c0_68] : memref<64x256xf32, #tpu.memory_space<vmem>>, vector<64x256xf32>
    %187 = arith.truncf %186 : vector<64x256xf32> to vector<64x256xbf16>
    %c0_69 = arith.constant 0 : index
    %c0_70 = arith.constant 0 : index
    %188 = vector.load %arg5[%c0_69, %c0_70] : memref<256x512xbf16, #tpu.memory_space<vmem>>, vector<256x512xbf16>
    %cst_71 = arith.constant dense<0.000000e+00> : vector<64x512xf32>
    %189 = tpu.matmul %187, %188, %cst_71 {dimension_numbers = #tpu.dot_dimension_numbers<[1], [0], [0], [1], [0, 0, 1, 1], [], []>} : vector<64x256xbf16>, vector<256x512xbf16>, vector<64x512xf32> -> vector<64x512xf32>
    %c0_72 = arith.constant 0 : index
    %c0_73 = arith.constant 0 : index
    %190 = vector.load %arg6[%c0_72, %c0_73] : memref<1x512xf32, #tpu.memory_space<vmem>>, vector<1x512xf32>
    %191 = vector.broadcast %190 : vector<1x512xf32> to vector<64x512xf32>
    %192 = arith.addf %189, %191 : vector<64x512xf32>
    %c0_74 = arith.constant 0 : index
    %c0_75 = arith.constant 0 : index
    %193 = vector.load %arg16[%c0_74, %c0_75] : memref<64x512xf32, #tpu.memory_space<vmem>>, vector<64x512xf32>
    tpu.vector_store %arg16[%c0_74, %c0_75], %192 {strides = array<i32>} : memref<64x512xf32, #tpu.memory_space<vmem>>, vector<64x512xf32>,
    %cst_76 = arith.constant 0.000000e+00 : bf16
    %194 = vector.broadcast %cst_76 : bf16 to vector<8x128xbf16>
    %cst_77 = arith.constant 0.000000e+00 : f32
    %195 = vector.broadcast %cst_77 : f32 to vector<8x128xf32>
    %c0_78 = arith.constant 0 : index
    %c0_79 = arith.constant 0 : index
    %196 = vector.load %arg16[%c0_78, %c0_79] : memref<64x512xf32, #tpu.memory_space<vmem>>, vector<8x512xf32>
    %c0_80 = arith.constant 0 : index
    %c0_81 = arith.constant 0 : index
    %197 = vector.load %arg7[%c0_80, %c0_81] : memref<128x512xbf16, #tpu.memory_space<vmem>>, vector<128x512xbf16>
    %cst_82 = arith.constant dense<0.000000e+00> : vector<8x512xf32>
    %198 = tpu.matmul %194, %197, %cst_82 {dimension_numbers = #tpu.dot_dimension_numbers<[1], [0], [0], [1], [0, 0, 1, 1], [], []>} : vector<8x128xbf16>, vector<128x512xbf16>, vector<8x512xf32> -> vector<8x512xf32>
    %199 = arith.addf %196, %198 : vector<8x512xf32>
    %200 = vector.extract_strided_slice %199 {offsets = [0, 0], sizes = [8, 384], strides = [1, 1]} : vector<8x512xf32> to vector<8x384xf32>
    %201 = arith.negf %200 : vector<8x384xf32>
    %202 = math.exp %201 : vector<8x384xf32>
    %cst_83 = arith.constant 1.000000e+00 : f32
    %203 = vector.broadcast %cst_83 : f32 to vector<8x384xf32>
    %204 = arith.addf %203, %202 : vector<8x384xf32>
    %205 = arith.divf %203, %204 : vector<8x384xf32>
    %206 = vector.extract_strided_slice %199 {offsets = [0, 384], sizes = [8, 128], strides = [1, 1]} : vector<8x512xf32> to vector<8x128xf32>
    %207 = math.tanh %206 : vector<8x128xf32>
    %208 = vector.extract_strided_slice %205 {offsets = [0, 128], sizes = [8, 128], strides = [1, 1]} : vector<8x384xf32> to vector<8x128xf32>
    %209 = arith.mulf %208, %195 : vector<8x128xf32>
    %210 = vector.extract_strided_slice %205 {offsets = [0, 0], sizes = [8, 128], strides = [1, 1]} : vector<8x384xf32> to vector<8x128xf32>
    %211 = arith.mulf %210, %207 : vector<8x128xf32>
    %212 = arith.addf %209, %211 : vector<8x128xf32>
    %213 = vector.extract_strided_slice %205 {offsets = [0, 256], sizes = [8, 128], strides = [1, 1]} : vector<8x384xf32> to vector<8x128xf32>
    %214 = math.tanh %212 : vector<8x128xf32>
    %215 = arith.mulf %213, %214 : vector<8x128xf32>
    %c0_84 = arith.constant 0 : index
    %c0_85 = arith.constant 0 : index
    %216 = vector.load %arg17[%c0_84, %c0_85] : memref<64x128xf32, #tpu.memory_space<vmem>>, vector<8x128xf32>
    tpu.vector_store %arg17[%c0_84, %c0_85], %215 {strides = array<i32>} : memref<64x128xf32, #tpu.memory_space<vmem>>, vector<8x128xf32>,
    %217 = arith.truncf %215 : vector<8x128xf32> to vector<8x128xbf16>
    %c8_86 = arith.constant 8 : index
    %c0_87 = arith.constant 0 : index
    %218 = vector.load %arg16[%c8_86, %c0_87] : memref<64x512xf32, #tpu.memory_space<vmem>>, vector<8x512xf32>
    %c0_88 = arith.constant 0 : index
    %c0_89 = arith.constant 0 : index
    %219 = vector.load %arg7[%c0_88, %c0_89] : memref<128x512xbf16, #tpu.memory_space<vmem>>, vector<128x512xbf16>
    %cst_90 = arith.constant dense<0.000000e+00> : vector<8x512xf32>
    %220 = tpu.matmul %217, %219, %cst_90 {dimension_numbers = #tpu.dot_dimension_numbers<[1], [0], [0], [1], [0, 0, 1, 1], [], []>} : vector<8x128xbf16>, vector<128x512xbf16>, vector<8x512xf32> -> vector<8x512xf32>
    %221 = arith.addf %218, %220 : vector<8x512xf32>
    %222 = vector.extract_strided_slice %221 {offsets = [0, 0], sizes = [8, 384], strides = [1, 1]} : vector<8x512xf32> to vector<8x384xf32>
    %223 = arith.negf %222 : vector<8x384xf32>
    %224 = math.exp %223 : vector<8x384xf32>
    %cst_91 = arith.constant 1.000000e+00 : f32
    %225 = vector.broadcast %cst_91 : f32 to vector<8x384xf32>
    %226 = arith.addf %225, %224 : vector<8x384xf32>
    %227 = arith.divf %225, %226 : vector<8x384xf32>
    %228 = vector.extract_strided_slice %221 {offsets = [0, 384], sizes = [8, 128], strides = [1, 1]} : vector<8x512xf32> to vector<8x128xf32>
    %229 = math.tanh %228 : vector<8x128xf32>
    %230 = vector.extract_strided_slice %227 {offsets = [0, 128], sizes = [8, 128], strides = [1, 1]} : vector<8x384xf32> to vector<8x128xf32>
    %231 = arith.mulf %230, %212 : vector<8x128xf32>
    %232 = vector.extract_strided_slice %227 {offsets = [0, 0], sizes = [8, 128], strides = [1, 1]} : vector<8x384xf32> to vector<8x128xf32>
    %233 = arith.mulf %232, %229 : vector<8x128xf32>
    %234 = arith.addf %231, %233 : vector<8x128xf32>
    %235 = vector.extract_strided_slice %227 {offsets = [0, 256], sizes = [8, 128], strides = [1, 1]} : vector<8x384xf32> to vector<8x128xf32>
    %236 = math.tanh %234 : vector<8x128xf32>
    %237 = arith.mulf %235, %236 : vector<8x128xf32>
    %c8_92 = arith.constant 8 : index
    %c0_93 = arith.constant 0 : index
    %238 = vector.load %arg17[%c8_92, %c0_93] : memref<64x128xf32, #tpu.memory_space<vmem>>, vector<8x128xf32>
    tpu.vector_store %arg17[%c8_92, %c0_93], %237 {strides = array<i32>} : memref<64x128xf32, #tpu.memory_space<vmem>>, vector<8x128xf32>,
    %239 = arith.truncf %237 : vector<8x128xf32> to vector<8x128xbf16>
    %c16_94 = arith.constant 16 : index
    %c0_95 = arith.constant 0 : index
    %240 = vector.load %arg16[%c16_94, %c0_95] : memref<64x512xf32, #tpu.memory_space<vmem>>, vector<8x512xf32>
    %c0_96 = arith.constant 0 : index
    %c0_97 = arith.constant 0 : index
    %241 = vector.load %arg7[%c0_96, %c0_97] : memref<128x512xbf16, #tpu.memory_space<vmem>>, vector<128x512xbf16>
    %cst_98 = arith.constant dense<0.000000e+00> : vector<8x512xf32>
    %242 = tpu.matmul %239, %241, %cst_98 {dimension_numbers = #tpu.dot_dimension_numbers<[1], [0], [0], [1], [0, 0, 1, 1], [], []>} : vector<8x128xbf16>, vector<128x512xbf16>, vector<8x512xf32> -> vector<8x512xf32>
    %243 = arith.addf %240, %242 : vector<8x512xf32>
    %244 = vector.extract_strided_slice %243 {offsets = [0, 0], sizes = [8, 384], strides = [1, 1]} : vector<8x512xf32> to vector<8x384xf32>
    %245 = arith.negf %244 : vector<8x384xf32>
    %246 = math.exp %245 : vector<8x384xf32>
    %cst_99 = arith.constant 1.000000e+00 : f32
    %247 = vector.broadcast %cst_99 : f32 to vector<8x384xf32>
    %248 = arith.addf %247, %246 : vector<8x384xf32>
    %249 = arith.divf %247, %248 : vector<8x384xf32>
    %250 = vector.extract_strided_slice %243 {offsets = [0, 384], sizes = [8, 128], strides = [1, 1]} : vector<8x512xf32> to vector<8x128xf32>
    %251 = math.tanh %250 : vector<8x128xf32>
    %252 = vector.extract_strided_slice %249 {offsets = [0, 128], sizes = [8, 128], strides = [1, 1]} : vector<8x384xf32> to vector<8x128xf32>
    %253 = arith.mulf %252, %234 : vector<8x128xf32>
    %254 = vector.extract_strided_slice %249 {offsets = [0, 0], sizes = [8, 128], strides = [1, 1]} : vector<8x384xf32> to vector<8x128xf32>
    %255 = arith.mulf %254, %251 : vector<8x128xf32>
    %256 = arith.addf %253, %255 : vector<8x128xf32>
    %257 = vector.extract_strided_slice %249 {offsets = [0, 256], sizes = [8, 128], strides = [1, 1]} : vector<8x384xf32> to vector<8x128xf32>
    %258 = math.tanh %256 : vector<8x128xf32>
    %259 = arith.mulf %257, %258 : vector<8x128xf32>
    %c16_100 = arith.constant 16 : index
    %c0_101 = arith.constant 0 : index
    %260 = vector.load %arg17[%c16_100, %c0_101] : memref<64x128xf32, #tpu.memory_space<vmem>>, vector<8x128xf32>
    tpu.vector_store %arg17[%c16_100, %c0_101], %259 {strides = array<i32>} : memref<64x128xf32, #tpu.memory_space<vmem>>, vector<8x128xf32>,
    %261 = arith.truncf %259 : vector<8x128xf32> to vector<8x128xbf16>
    %c24_102 = arith.constant 24 : index
    %c0_103 = arith.constant 0 : index
    %262 = vector.load %arg16[%c24_102, %c0_103] : memref<64x512xf32, #tpu.memory_space<vmem>>, vector<8x512xf32>
    %c0_104 = arith.constant 0 : index
    %c0_105 = arith.constant 0 : index
    %263 = vector.load %arg7[%c0_104, %c0_105] : memref<128x512xbf16, #tpu.memory_space<vmem>>, vector<128x512xbf16>
    %cst_106 = arith.constant dense<0.000000e+00> : vector<8x512xf32>
    %264 = tpu.matmul %261, %263, %cst_106 {dimension_numbers = #tpu.dot_dimension_numbers<[1], [0], [0], [1], [0, 0, 1, 1], [], []>} : vector<8x128xbf16>, vector<128x512xbf16>, vector<8x512xf32> -> vector<8x512xf32>
    %265 = arith.addf %262, %264 : vector<8x512xf32>
    %266 = vector.extract_strided_slice %265 {offsets = [0, 0], sizes = [8, 384], strides = [1, 1]} : vector<8x512xf32> to vector<8x384xf32>
    %267 = arith.negf %266 : vector<8x384xf32>
    %268 = math.exp %267 : vector<8x384xf32>
    %cst_107 = arith.constant 1.000000e+00 : f32
    %269 = vector.broadcast %cst_107 : f32 to vector<8x384xf32>
    %270 = arith.addf %269, %268 : vector<8x384xf32>
    %271 = arith.divf %269, %270 : vector<8x384xf32>
    %272 = vector.extract_strided_slice %265 {offsets = [0, 384], sizes = [8, 128], strides = [1, 1]} : vector<8x512xf32> to vector<8x128xf32>
    %273 = math.tanh %272 : vector<8x128xf32>
    %274 = vector.extract_strided_slice %271 {offsets = [0, 128], sizes = [8, 128], strides = [1, 1]} : vector<8x384xf32> to vector<8x128xf32>
    %275 = arith.mulf %274, %256 : vector<8x128xf32>
    %276 = vector.extract_strided_slice %271 {offsets = [0, 0], sizes = [8, 128], strides = [1, 1]} : vector<8x384xf32> to vector<8x128xf32>
    %277 = arith.mulf %276, %273 : vector<8x128xf32>
    %278 = arith.addf %275, %277 : vector<8x128xf32>
    %279 = vector.extract_strided_slice %271 {offsets = [0, 256], sizes = [8, 128], strides = [1, 1]} : vector<8x384xf32> to vector<8x128xf32>
    %280 = math.tanh %278 : vector<8x128xf32>
    %281 = arith.mulf %279, %280 : vector<8x128xf32>
    %c24_108 = arith.constant 24 : index
    %c0_109 = arith.constant 0 : index
    %282 = vector.load %arg17[%c24_108, %c0_109] : memref<64x128xf32, #tpu.memory_space<vmem>>, vector<8x128xf32>
    tpu.vector_store %arg17[%c24_108, %c0_109], %281 {strides = array<i32>} : memref<64x128xf32, #tpu.memory_space<vmem>>, vector<8x128xf32>,
    %283 = arith.truncf %281 : vector<8x128xf32> to vector<8x128xbf16>
    %c32_110 = arith.constant 32 : index
    %c0_111 = arith.constant 0 : index
    %284 = vector.load %arg16[%c32_110, %c0_111] : memref<64x512xf32, #tpu.memory_space<vmem>>, vector<8x512xf32>
    %c0_112 = arith.constant 0 : index
    %c0_113 = arith.constant 0 : index
    %285 = vector.load %arg7[%c0_112, %c0_113] : memref<128x512xbf16, #tpu.memory_space<vmem>>, vector<128x512xbf16>
    %cst_114 = arith.constant dense<0.000000e+00> : vector<8x512xf32>
    %286 = tpu.matmul %283, %285, %cst_114 {dimension_numbers = #tpu.dot_dimension_numbers<[1], [0], [0], [1], [0, 0, 1, 1], [], []>} : vector<8x128xbf16>, vector<128x512xbf16>, vector<8x512xf32> -> vector<8x512xf32>
    %287 = arith.addf %284, %286 : vector<8x512xf32>
    %288 = vector.extract_strided_slice %287 {offsets = [0, 0], sizes = [8, 384], strides = [1, 1]} : vector<8x512xf32> to vector<8x384xf32>
    %289 = arith.negf %288 : vector<8x384xf32>
    %290 = math.exp %289 : vector<8x384xf32>
    %cst_115 = arith.constant 1.000000e+00 : f32
    %291 = vector.broadcast %cst_115 : f32 to vector<8x384xf32>
    %292 = arith.addf %291, %290 : vector<8x384xf32>
    %293 = arith.divf %291, %292 : vector<8x384xf32>
    %294 = vector.extract_strided_slice %287 {offsets = [0, 384], sizes = [8, 128], strides = [1, 1]} : vector<8x512xf32> to vector<8x128xf32>
    %295 = math.tanh %294 : vector<8x128xf32>
    %296 = vector.extract_strided_slice %293 {offsets = [0, 128], sizes = [8, 128], strides = [1, 1]} : vector<8x384xf32> to vector<8x128xf32>
    %297 = arith.mulf %296, %278 : vector<8x128xf32>
    %298 = vector.extract_strided_slice %293 {offsets = [0, 0], sizes = [8, 128], strides = [1, 1]} : vector<8x384xf32> to vector<8x128xf32>
    %299 = arith.mulf %298, %295 : vector<8x128xf32>
    %300 = arith.addf %297, %299 : vector<8x128xf32>
    %301 = vector.extract_strided_slice %293 {offsets = [0, 256], sizes = [8, 128], strides = [1, 1]} : vector<8x384xf32> to vector<8x128xf32>
    %302 = math.tanh %300 : vector<8x128xf32>
    %303 = arith.mulf %301, %302 : vector<8x128xf32>
    %c32_116 = arith.constant 32 : index
    %c0_117 = arith.constant 0 : index
    %304 = vector.load %arg17[%c32_116, %c0_117] : memref<64x128xf32, #tpu.memory_space<vmem>>, vector<8x128xf32>
    tpu.vector_store %arg17[%c32_116, %c0_117], %303 {strides = array<i32>} : memref<64x128xf32, #tpu.memory_space<vmem>>, vector<8x128xf32>,
    %305 = arith.truncf %303 : vector<8x128xf32> to vector<8x128xbf16>
    %c40_118 = arith.constant 40 : index
    %c0_119 = arith.constant 0 : index
    %306 = vector.load %arg16[%c40_118, %c0_119] : memref<64x512xf32, #tpu.memory_space<vmem>>, vector<8x512xf32>
    %c0_120 = arith.constant 0 : index
    %c0_121 = arith.constant 0 : index
    %307 = vector.load %arg7[%c0_120, %c0_121] : memref<128x512xbf16, #tpu.memory_space<vmem>>, vector<128x512xbf16>
    %cst_122 = arith.constant dense<0.000000e+00> : vector<8x512xf32>
    %308 = tpu.matmul %305, %307, %cst_122 {dimension_numbers = #tpu.dot_dimension_numbers<[1], [0], [0], [1], [0, 0, 1, 1], [], []>} : vector<8x128xbf16>, vector<128x512xbf16>, vector<8x512xf32> -> vector<8x512xf32>
    %309 = arith.addf %306, %308 : vector<8x512xf32>
    %310 = vector.extract_strided_slice %309 {offsets = [0, 0], sizes = [8, 384], strides = [1, 1]} : vector<8x512xf32> to vector<8x384xf32>
    %311 = arith.negf %310 : vector<8x384xf32>
    %312 = math.exp %311 : vector<8x384xf32>
    %cst_123 = arith.constant 1.000000e+00 : f32
    %313 = vector.broadcast %cst_123 : f32 to vector<8x384xf32>
    %314 = arith.addf %313, %312 : vector<8x384xf32>
    %315 = arith.divf %313, %314 : vector<8x384xf32>
    %316 = vector.extract_strided_slice %309 {offsets = [0, 384], sizes = [8, 128], strides = [1, 1]} : vector<8x512xf32> to vector<8x128xf32>
    %317 = math.tanh %316 : vector<8x128xf32>
    %318 = vector.extract_strided_slice %315 {offsets = [0, 128], sizes = [8, 128], strides = [1, 1]} : vector<8x384xf32> to vector<8x128xf32>
    %319 = arith.mulf %318, %300 : vector<8x128xf32>
    %320 = vector.extract_strided_slice %315 {offsets = [0, 0], sizes = [8, 128], strides = [1, 1]} : vector<8x384xf32> to vector<8x128xf32>
    %321 = arith.mulf %320, %317 : vector<8x128xf32>
    %322 = arith.addf %319, %321 : vector<8x128xf32>
    %323 = vector.extract_strided_slice %315 {offsets = [0, 256], sizes = [8, 128], strides = [1, 1]} : vector<8x384xf32> to vector<8x128xf32>
    %324 = math.tanh %322 : vector<8x128xf32>
    %325 = arith.mulf %323, %324 : vector<8x128xf32>
    %c40_124 = arith.constant 40 : index
    %c0_125 = arith.constant 0 : index
    %326 = vector.load %arg17[%c40_124, %c0_125] : memref<64x128xf32, #tpu.memory_space<vmem>>, vector<8x128xf32>
    tpu.vector_store %arg17[%c40_124, %c0_125], %325 {strides = array<i32>} : memref<64x128xf32, #tpu.memory_space<vmem>>, vector<8x128xf32>,
    %327 = arith.truncf %325 : vector<8x128xf32> to vector<8x128xbf16>
    %c48_126 = arith.constant 48 : index
    %c0_127 = arith.constant 0 : index
    %328 = vector.load %arg16[%c48_126, %c0_127] : memref<64x512xf32, #tpu.memory_space<vmem>>, vector<8x512xf32>
    %c0_128 = arith.constant 0 : index
    %c0_129 = arith.constant 0 : index
    %329 = vector.load %arg7[%c0_128, %c0_129] : memref<128x512xbf16, #tpu.memory_space<vmem>>, vector<128x512xbf16>
    %cst_130 = arith.constant dense<0.000000e+00> : vector<8x512xf32>
    %330 = tpu.matmul %327, %329, %cst_130 {dimension_numbers = #tpu.dot_dimension_numbers<[1], [0], [0], [1], [0, 0, 1, 1], [], []>} : vector<8x128xbf16>, vector<128x512xbf16>, vector<8x512xf32> -> vector<8x512xf32>
    %331 = arith.addf %328, %330 : vector<8x512xf32>
    %332 = vector.extract_strided_slice %331 {offsets = [0, 0], sizes = [8, 384], strides = [1, 1]} : vector<8x512xf32> to vector<8x384xf32>
    %333 = arith.negf %332 : vector<8x384xf32>
    %334 = math.exp %333 : vector<8x384xf32>
    %cst_131 = arith.constant 1.000000e+00 : f32
    %335 = vector.broadcast %cst_131 : f32 to vector<8x384xf32>
    %336 = arith.addf %335, %334 : vector<8x384xf32>
    %337 = arith.divf %335, %336 : vector<8x384xf32>
    %338 = vector.extract_strided_slice %331 {offsets = [0, 384], sizes = [8, 128], strides = [1, 1]} : vector<8x512xf32> to vector<8x128xf32>
    %339 = math.tanh %338 : vector<8x128xf32>
    %340 = vector.extract_strided_slice %337 {offsets = [0, 128], sizes = [8, 128], strides = [1, 1]} : vector<8x384xf32> to vector<8x128xf32>
    %341 = arith.mulf %340, %322 : vector<8x128xf32>
    %342 = vector.extract_strided_slice %337 {offsets = [0, 0], sizes = [8, 128], strides = [1, 1]} : vector<8x384xf32> to vector<8x128xf32>
    %343 = arith.mulf %342, %339 : vector<8x128xf32>
    %344 = arith.addf %341, %343 : vector<8x128xf32>
    %345 = vector.extract_strided_slice %337 {offsets = [0, 256], sizes = [8, 128], strides = [1, 1]} : vector<8x384xf32> to vector<8x128xf32>
    %346 = math.tanh %344 : vector<8x128xf32>
    %347 = arith.mulf %345, %346 : vector<8x128xf32>
    %c48_132 = arith.constant 48 : index
    %c0_133 = arith.constant 0 : index
    %348 = vector.load %arg17[%c48_132, %c0_133] : memref<64x128xf32, #tpu.memory_space<vmem>>, vector<8x128xf32>
    tpu.vector_store %arg17[%c48_132, %c0_133], %347 {strides = array<i32>} : memref<64x128xf32, #tpu.memory_space<vmem>>, vector<8x128xf32>,
    %349 = arith.truncf %347 : vector<8x128xf32> to vector<8x128xbf16>
    %c56_134 = arith.constant 56 : index
    %c0_135 = arith.constant 0 : index
    %350 = vector.load %arg16[%c56_134, %c0_135] : memref<64x512xf32, #tpu.memory_space<vmem>>, vector<8x512xf32>
    %c0_136 = arith.constant 0 : index
    %c0_137 = arith.constant 0 : index
    %351 = vector.load %arg7[%c0_136, %c0_137] : memref<128x512xbf16, #tpu.memory_space<vmem>>, vector<128x512xbf16>
    %cst_138 = arith.constant dense<0.000000e+00> : vector<8x512xf32>
    %352 = tpu.matmul %349, %351, %cst_138 {dimension_numbers = #tpu.dot_dimension_numbers<[1], [0], [0], [1], [0, 0, 1, 1], [], []>} : vector<8x128xbf16>, vector<128x512xbf16>, vector<8x512xf32> -> vector<8x512xf32>
    %353 = arith.addf %350, %352 : vector<8x512xf32>
    %354 = vector.extract_strided_slice %353 {offsets = [0, 0], sizes = [8, 384], strides = [1, 1]} : vector<8x512xf32> to vector<8x384xf32>
    %355 = arith.negf %354 : vector<8x384xf32>
    %356 = math.exp %355 : vector<8x384xf32>
    %cst_139 = arith.constant 1.000000e+00 : f32
    %357 = vector.broadcast %cst_139 : f32 to vector<8x384xf32>
    %358 = arith.addf %357, %356 : vector<8x384xf32>
    %359 = arith.divf %357, %358 : vector<8x384xf32>
    %360 = vector.extract_strided_slice %353 {offsets = [0, 384], sizes = [8, 128], strides = [1, 1]} : vector<8x512xf32> to vector<8x128xf32>
    %361 = math.tanh %360 : vector<8x128xf32>
    %362 = vector.extract_strided_slice %359 {offsets = [0, 128], sizes = [8, 128], strides = [1, 1]} : vector<8x384xf32> to vector<8x128xf32>
    %363 = arith.mulf %362, %344 : vector<8x128xf32>
    %364 = vector.extract_strided_slice %359 {offsets = [0, 0], sizes = [8, 128], strides = [1, 1]} : vector<8x384xf32> to vector<8x128xf32>
    %365 = arith.mulf %364, %361 : vector<8x128xf32>
    %366 = arith.addf %363, %365 : vector<8x128xf32>
    %367 = vector.extract_strided_slice %359 {offsets = [0, 256], sizes = [8, 128], strides = [1, 1]} : vector<8x384xf32> to vector<8x128xf32>
    %368 = math.tanh %366 : vector<8x128xf32>
    %369 = arith.mulf %367, %368 : vector<8x128xf32>
    %c56_140 = arith.constant 56 : index
    %c0_141 = arith.constant 0 : index
    %370 = vector.load %arg17[%c56_140, %c0_141] : memref<64x128xf32, #tpu.memory_space<vmem>>, vector<8x128xf32>
    tpu.vector_store %arg17[%c56_140, %c0_141], %369 {strides = array<i32>} : memref<64x128xf32, #tpu.memory_space<vmem>>, vector<8x128xf32>,
    %c0_142 = arith.constant 0 : index
    %c0_143 = arith.constant 0 : index
    %371 = vector.load %arg17[%c0_142, %c0_143] : memref<64x128xf32, #tpu.memory_space<vmem>>, vector<64x128xf32>
    %372 = arith.truncf %371 : vector<64x128xf32> to vector<64x128xbf16>
    %c0_144 = arith.constant 0 : index
    %c0_145 = arith.constant 0 : index
    %373 = vector.load %arg8[%c0_144, %c0_145] : memref<128x512xbf16, #tpu.memory_space<vmem>>, vector<128x512xbf16>
    %cst_146 = arith.constant dense<0.000000e+00> : vector<64x512xf32>
    %374 = tpu.matmul %372, %373, %cst_146 {dimension_numbers = #tpu.dot_dimension_numbers<[1], [0], [0], [1], [0, 0, 1, 1], [], []>} : vector<64x128xbf16>, vector<128x512xbf16>, vector<64x512xf32> -> vector<64x512xf32>
    %c0_147 = arith.constant 0 : index
    %c0_148 = arith.constant 0 : index
    %375 = vector.load %arg9[%c0_147, %c0_148] : memref<1x512xf32, #tpu.memory_space<vmem>>, vector<1x512xf32>
    %376 = vector.broadcast %375 : vector<1x512xf32> to vector<64x512xf32>
    %377 = arith.addf %374, %376 : vector<64x512xf32>
    %c0_149 = arith.constant 0 : index
    %c0_150 = arith.constant 0 : index
    %378 = vector.load %arg18[%c0_149, %c0_150] : memref<64x512xf32, #tpu.memory_space<vmem>>, vector<64x512xf32>
    tpu.vector_store %arg18[%c0_149, %c0_150], %377 {strides = array<i32>} : memref<64x512xf32, #tpu.memory_space<vmem>>, vector<64x512xf32>,
    %cst_151 = arith.constant 0.000000e+00 : bf16
    %379 = vector.broadcast %cst_151 : bf16 to vector<8x128xbf16>
    %cst_152 = arith.constant 0.000000e+00 : f32
    %380 = vector.broadcast %cst_152 : f32 to vector<8x128xf32>
    %c0_153 = arith.constant 0 : index
    %c0_154 = arith.constant 0 : index
    %381 = vector.load %arg18[%c0_153, %c0_154] : memref<64x512xf32, #tpu.memory_space<vmem>>, vector<8x512xf32>
    %c0_155 = arith.constant 0 : index
    %c0_156 = arith.constant 0 : index
    %382 = vector.load %arg10[%c0_155, %c0_156] : memref<128x512xbf16, #tpu.memory_space<vmem>>, vector<128x512xbf16>
    %cst_157 = arith.constant dense<0.000000e+00> : vector<8x512xf32>
    %383 = tpu.matmul %379, %382, %cst_157 {dimension_numbers = #tpu.dot_dimension_numbers<[1], [0], [0], [1], [0, 0, 1, 1], [], []>} : vector<8x128xbf16>, vector<128x512xbf16>, vector<8x512xf32> -> vector<8x512xf32>
    %384 = arith.addf %381, %383 : vector<8x512xf32>
    %385 = vector.extract_strided_slice %384 {offsets = [0, 0], sizes = [8, 384], strides = [1, 1]} : vector<8x512xf32> to vector<8x384xf32>
    %386 = arith.negf %385 : vector<8x384xf32>
    %387 = math.exp %386 : vector<8x384xf32>
    %cst_158 = arith.constant 1.000000e+00 : f32
    %388 = vector.broadcast %cst_158 : f32 to vector<8x384xf32>
    %389 = arith.addf %388, %387 : vector<8x384xf32>
    %390 = arith.divf %388, %389 : vector<8x384xf32>
    %391 = vector.extract_strided_slice %384 {offsets = [0, 384], sizes = [8, 128], strides = [1, 1]} : vector<8x512xf32> to vector<8x128xf32>
    %392 = math.tanh %391 : vector<8x128xf32>
    %393 = vector.extract_strided_slice %390 {offsets = [0, 128], sizes = [8, 128], strides = [1, 1]} : vector<8x384xf32> to vector<8x128xf32>
    %394 = arith.mulf %393, %380 : vector<8x128xf32>
    %395 = vector.extract_strided_slice %390 {offsets = [0, 0], sizes = [8, 128], strides = [1, 1]} : vector<8x384xf32> to vector<8x128xf32>
    %396 = arith.mulf %395, %392 : vector<8x128xf32>
    %397 = arith.addf %394, %396 : vector<8x128xf32>
    %398 = vector.extract_strided_slice %390 {offsets = [0, 256], sizes = [8, 128], strides = [1, 1]} : vector<8x384xf32> to vector<8x128xf32>
    %399 = math.tanh %397 : vector<8x128xf32>
    %400 = arith.mulf %398, %399 : vector<8x128xf32>
    %401 = arith.truncf %400 : vector<8x128xf32> to vector<8x128xbf16>
    %c8_159 = arith.constant 8 : index
    %c0_160 = arith.constant 0 : index
    %402 = vector.load %arg18[%c8_159, %c0_160] : memref<64x512xf32, #tpu.memory_space<vmem>>, vector<8x512xf32>
    %c0_161 = arith.constant 0 : index
    %c0_162 = arith.constant 0 : index
    %403 = vector.load %arg10[%c0_161, %c0_162] : memref<128x512xbf16, #tpu.memory_space<vmem>>, vector<128x512xbf16>
    %cst_163 = arith.constant dense<0.000000e+00> : vector<8x512xf32>
    %404 = tpu.matmul %401, %403, %cst_163 {dimension_numbers = #tpu.dot_dimension_numbers<[1], [0], [0], [1], [0, 0, 1, 1], [], []>} : vector<8x128xbf16>, vector<128x512xbf16>, vector<8x512xf32> -> vector<8x512xf32>
    %405 = arith.addf %402, %404 : vector<8x512xf32>
    %406 = vector.extract_strided_slice %405 {offsets = [0, 0], sizes = [8, 384], strides = [1, 1]} : vector<8x512xf32> to vector<8x384xf32>
    %407 = arith.negf %406 : vector<8x384xf32>
    %408 = math.exp %407 : vector<8x384xf32>
    %cst_164 = arith.constant 1.000000e+00 : f32
    %409 = vector.broadcast %cst_164 : f32 to vector<8x384xf32>
    %410 = arith.addf %409, %408 : vector<8x384xf32>
    %411 = arith.divf %409, %410 : vector<8x384xf32>
    %412 = vector.extract_strided_slice %405 {offsets = [0, 384], sizes = [8, 128], strides = [1, 1]} : vector<8x512xf32> to vector<8x128xf32>
    %413 = math.tanh %412 : vector<8x128xf32>
    %414 = vector.extract_strided_slice %411 {offsets = [0, 128], sizes = [8, 128], strides = [1, 1]} : vector<8x384xf32> to vector<8x128xf32>
    %415 = arith.mulf %414, %397 : vector<8x128xf32>
    %416 = vector.extract_strided_slice %411 {offsets = [0, 0], sizes = [8, 128], strides = [1, 1]} : vector<8x384xf32> to vector<8x128xf32>
    %417 = arith.mulf %416, %413 : vector<8x128xf32>
    %418 = arith.addf %415, %417 : vector<8x128xf32>
    %419 = vector.extract_strided_slice %411 {offsets = [0, 256], sizes = [8, 128], strides = [1, 1]} : vector<8x384xf32> to vector<8x128xf32>
    %420 = math.tanh %418 : vector<8x128xf32>
    %421 = arith.mulf %419, %420 : vector<8x128xf32>
    %422 = arith.truncf %421 : vector<8x128xf32> to vector<8x128xbf16>
    %c16_165 = arith.constant 16 : index
    %c0_166 = arith.constant 0 : index
    %423 = vector.load %arg18[%c16_165, %c0_166] : memref<64x512xf32, #tpu.memory_space<vmem>>, vector<8x512xf32>
    %c0_167 = arith.constant 0 : index
    %c0_168 = arith.constant 0 : index
    %424 = vector.load %arg10[%c0_167, %c0_168] : memref<128x512xbf16, #tpu.memory_space<vmem>>, vector<128x512xbf16>
    %cst_169 = arith.constant dense<0.000000e+00> : vector<8x512xf32>
    %425 = tpu.matmul %422, %424, %cst_169 {dimension_numbers = #tpu.dot_dimension_numbers<[1], [0], [0], [1], [0, 0, 1, 1], [], []>} : vector<8x128xbf16>, vector<128x512xbf16>, vector<8x512xf32> -> vector<8x512xf32>
    %426 = arith.addf %423, %425 : vector<8x512xf32>
    %427 = vector.extract_strided_slice %426 {offsets = [0, 0], sizes = [8, 384], strides = [1, 1]} : vector<8x512xf32> to vector<8x384xf32>
    %428 = arith.negf %427 : vector<8x384xf32>
    %429 = math.exp %428 : vector<8x384xf32>
    %cst_170 = arith.constant 1.000000e+00 : f32
    %430 = vector.broadcast %cst_170 : f32 to vector<8x384xf32>
    %431 = arith.addf %430, %429 : vector<8x384xf32>
    %432 = arith.divf %430, %431 : vector<8x384xf32>
    %433 = vector.extract_strided_slice %426 {offsets = [0, 384], sizes = [8, 128], strides = [1, 1]} : vector<8x512xf32> to vector<8x128xf32>
    %434 = math.tanh %433 : vector<8x128xf32>
    %435 = vector.extract_strided_slice %432 {offsets = [0, 128], sizes = [8, 128], strides = [1, 1]} : vector<8x384xf32> to vector<8x128xf32>
    %436 = arith.mulf %435, %418 : vector<8x128xf32>
    %437 = vector.extract_strided_slice %432 {offsets = [0, 0], sizes = [8, 128], strides = [1, 1]} : vector<8x384xf32> to vector<8x128xf32>
    %438 = arith.mulf %437, %434 : vector<8x128xf32>
    %439 = arith.addf %436, %438 : vector<8x128xf32>
    %440 = vector.extract_strided_slice %432 {offsets = [0, 256], sizes = [8, 128], strides = [1, 1]} : vector<8x384xf32> to vector<8x128xf32>
    %441 = math.tanh %439 : vector<8x128xf32>
    %442 = arith.mulf %440, %441 : vector<8x128xf32>
    %443 = arith.truncf %442 : vector<8x128xf32> to vector<8x128xbf16>
    %c24_171 = arith.constant 24 : index
    %c0_172 = arith.constant 0 : index
    %444 = vector.load %arg18[%c24_171, %c0_172] : memref<64x512xf32, #tpu.memory_space<vmem>>, vector<8x512xf32>
    %c0_173 = arith.constant 0 : index
    %c0_174 = arith.constant 0 : index
    %445 = vector.load %arg10[%c0_173, %c0_174] : memref<128x512xbf16, #tpu.memory_space<vmem>>, vector<128x512xbf16>
    %cst_175 = arith.constant dense<0.000000e+00> : vector<8x512xf32>
    %446 = tpu.matmul %443, %445, %cst_175 {dimension_numbers = #tpu.dot_dimension_numbers<[1], [0], [0], [1], [0, 0, 1, 1], [], []>} : vector<8x128xbf16>, vector<128x512xbf16>, vector<8x512xf32> -> vector<8x512xf32>
    %447 = arith.addf %444, %446 : vector<8x512xf32>
    %448 = vector.extract_strided_slice %447 {offsets = [0, 0], sizes = [8, 384], strides = [1, 1]} : vector<8x512xf32> to vector<8x384xf32>
    %449 = arith.negf %448 : vector<8x384xf32>
    %450 = math.exp %449 : vector<8x384xf32>
    %cst_176 = arith.constant 1.000000e+00 : f32
    %451 = vector.broadcast %cst_176 : f32 to vector<8x384xf32>
    %452 = arith.addf %451, %450 : vector<8x384xf32>
    %453 = arith.divf %451, %452 : vector<8x384xf32>
    %454 = vector.extract_strided_slice %447 {offsets = [0, 384], sizes = [8, 128], strides = [1, 1]} : vector<8x512xf32> to vector<8x128xf32>
    %455 = math.tanh %454 : vector<8x128xf32>
    %456 = vector.extract_strided_slice %453 {offsets = [0, 128], sizes = [8, 128], strides = [1, 1]} : vector<8x384xf32> to vector<8x128xf32>
    %457 = arith.mulf %456, %439 : vector<8x128xf32>
    %458 = vector.extract_strided_slice %453 {offsets = [0, 0], sizes = [8, 128], strides = [1, 1]} : vector<8x384xf32> to vector<8x128xf32>
    %459 = arith.mulf %458, %455 : vector<8x128xf32>
    %460 = arith.addf %457, %459 : vector<8x128xf32>
    %461 = vector.extract_strided_slice %453 {offsets = [0, 256], sizes = [8, 128], strides = [1, 1]} : vector<8x384xf32> to vector<8x128xf32>
    %462 = math.tanh %460 : vector<8x128xf32>
    %463 = arith.mulf %461, %462 : vector<8x128xf32>
    %464 = arith.truncf %463 : vector<8x128xf32> to vector<8x128xbf16>
    %c32_177 = arith.constant 32 : index
    %c0_178 = arith.constant 0 : index
    %465 = vector.load %arg18[%c32_177, %c0_178] : memref<64x512xf32, #tpu.memory_space<vmem>>, vector<8x512xf32>
    %c0_179 = arith.constant 0 : index
    %c0_180 = arith.constant 0 : index
    %466 = vector.load %arg10[%c0_179, %c0_180] : memref<128x512xbf16, #tpu.memory_space<vmem>>, vector<128x512xbf16>
    %cst_181 = arith.constant dense<0.000000e+00> : vector<8x512xf32>
    %467 = tpu.matmul %464, %466, %cst_181 {dimension_numbers = #tpu.dot_dimension_numbers<[1], [0], [0], [1], [0, 0, 1, 1], [], []>} : vector<8x128xbf16>, vector<128x512xbf16>, vector<8x512xf32> -> vector<8x512xf32>
    %468 = arith.addf %465, %467 : vector<8x512xf32>
    %469 = vector.extract_strided_slice %468 {offsets = [0, 0], sizes = [8, 384], strides = [1, 1]} : vector<8x512xf32> to vector<8x384xf32>
    %470 = arith.negf %469 : vector<8x384xf32>
    %471 = math.exp %470 : vector<8x384xf32>
    %cst_182 = arith.constant 1.000000e+00 : f32
    %472 = vector.broadcast %cst_182 : f32 to vector<8x384xf32>
    %473 = arith.addf %472, %471 : vector<8x384xf32>
    %474 = arith.divf %472, %473 : vector<8x384xf32>
    %475 = vector.extract_strided_slice %468 {offsets = [0, 384], sizes = [8, 128], strides = [1, 1]} : vector<8x512xf32> to vector<8x128xf32>
    %476 = math.tanh %475 : vector<8x128xf32>
    %477 = vector.extract_strided_slice %474 {offsets = [0, 128], sizes = [8, 128], strides = [1, 1]} : vector<8x384xf32> to vector<8x128xf32>
    %478 = arith.mulf %477, %460 : vector<8x128xf32>
    %479 = vector.extract_strided_slice %474 {offsets = [0, 0], sizes = [8, 128], strides = [1, 1]} : vector<8x384xf32> to vector<8x128xf32>
    %480 = arith.mulf %479, %476 : vector<8x128xf32>
    %481 = arith.addf %478, %480 : vector<8x128xf32>
    %482 = vector.extract_strided_slice %474 {offsets = [0, 256], sizes = [8, 128], strides = [1, 1]} : vector<8x384xf32> to vector<8x128xf32>
    %483 = math.tanh %481 : vector<8x128xf32>
    %484 = arith.mulf %482, %483 : vector<8x128xf32>
    %485 = arith.truncf %484 : vector<8x128xf32> to vector<8x128xbf16>
    %c40_183 = arith.constant 40 : index
    %c0_184 = arith.constant 0 : index
    %486 = vector.load %arg18[%c40_183, %c0_184] : memref<64x512xf32, #tpu.memory_space<vmem>>, vector<8x512xf32>
    %c0_185 = arith.constant 0 : index
    %c0_186 = arith.constant 0 : index
    %487 = vector.load %arg10[%c0_185, %c0_186] : memref<128x512xbf16, #tpu.memory_space<vmem>>, vector<128x512xbf16>
    %cst_187 = arith.constant dense<0.000000e+00> : vector<8x512xf32>
    %488 = tpu.matmul %485, %487, %cst_187 {dimension_numbers = #tpu.dot_dimension_numbers<[1], [0], [0], [1], [0, 0, 1, 1], [], []>} : vector<8x128xbf16>, vector<128x512xbf16>, vector<8x512xf32> -> vector<8x512xf32>
    %489 = arith.addf %486, %488 : vector<8x512xf32>
    %490 = vector.extract_strided_slice %489 {offsets = [0, 0], sizes = [8, 384], strides = [1, 1]} : vector<8x512xf32> to vector<8x384xf32>
    %491 = arith.negf %490 : vector<8x384xf32>
    %492 = math.exp %491 : vector<8x384xf32>
    %cst_188 = arith.constant 1.000000e+00 : f32
    %493 = vector.broadcast %cst_188 : f32 to vector<8x384xf32>
    %494 = arith.addf %493, %492 : vector<8x384xf32>
    %495 = arith.divf %493, %494 : vector<8x384xf32>
    %496 = vector.extract_strided_slice %489 {offsets = [0, 384], sizes = [8, 128], strides = [1, 1]} : vector<8x512xf32> to vector<8x128xf32>
    %497 = math.tanh %496 : vector<8x128xf32>
    %498 = vector.extract_strided_slice %495 {offsets = [0, 128], sizes = [8, 128], strides = [1, 1]} : vector<8x384xf32> to vector<8x128xf32>
    %499 = arith.mulf %498, %481 : vector<8x128xf32>
    %500 = vector.extract_strided_slice %495 {offsets = [0, 0], sizes = [8, 128], strides = [1, 1]} : vector<8x384xf32> to vector<8x128xf32>
    %501 = arith.mulf %500, %497 : vector<8x128xf32>
    %502 = arith.addf %499, %501 : vector<8x128xf32>
    %503 = vector.extract_strided_slice %495 {offsets = [0, 256], sizes = [8, 128], strides = [1, 1]} : vector<8x384xf32> to vector<8x128xf32>
    %504 = math.tanh %502 : vector<8x128xf32>
    %505 = arith.mulf %503, %504 : vector<8x128xf32>
    %506 = arith.truncf %505 : vector<8x128xf32> to vector<8x128xbf16>
    %c48_189 = arith.constant 48 : index
    %c0_190 = arith.constant 0 : index
    %507 = vector.load %arg18[%c48_189, %c0_190] : memref<64x512xf32, #tpu.memory_space<vmem>>, vector<8x512xf32>
    %c0_191 = arith.constant 0 : index
    %c0_192 = arith.constant 0 : index
    %508 = vector.load %arg10[%c0_191, %c0_192] : memref<128x512xbf16, #tpu.memory_space<vmem>>, vector<128x512xbf16>
    %cst_193 = arith.constant dense<0.000000e+00> : vector<8x512xf32>
    %509 = tpu.matmul %506, %508, %cst_193 {dimension_numbers = #tpu.dot_dimension_numbers<[1], [0], [0], [1], [0, 0, 1, 1], [], []>} : vector<8x128xbf16>, vector<128x512xbf16>, vector<8x512xf32> -> vector<8x512xf32>
    %510 = arith.addf %507, %509 : vector<8x512xf32>
    %511 = vector.extract_strided_slice %510 {offsets = [0, 0], sizes = [8, 384], strides = [1, 1]} : vector<8x512xf32> to vector<8x384xf32>
    %512 = arith.negf %511 : vector<8x384xf32>
    %513 = math.exp %512 : vector<8x384xf32>
    %cst_194 = arith.constant 1.000000e+00 : f32
    %514 = vector.broadcast %cst_194 : f32 to vector<8x384xf32>
    %515 = arith.addf %514, %513 : vector<8x384xf32>
    %516 = arith.divf %514, %515 : vector<8x384xf32>
    %517 = vector.extract_strided_slice %510 {offsets = [0, 384], sizes = [8, 128], strides = [1, 1]} : vector<8x512xf32> to vector<8x128xf32>
    %518 = math.tanh %517 : vector<8x128xf32>
    %519 = vector.extract_strided_slice %516 {offsets = [0, 128], sizes = [8, 128], strides = [1, 1]} : vector<8x384xf32> to vector<8x128xf32>
    %520 = arith.mulf %519, %502 : vector<8x128xf32>
    %521 = vector.extract_strided_slice %516 {offsets = [0, 0], sizes = [8, 128], strides = [1, 1]} : vector<8x384xf32> to vector<8x128xf32>
    %522 = arith.mulf %521, %518 : vector<8x128xf32>
    %523 = arith.addf %520, %522 : vector<8x128xf32>
    %524 = vector.extract_strided_slice %516 {offsets = [0, 256], sizes = [8, 128], strides = [1, 1]} : vector<8x384xf32> to vector<8x128xf32>
    %525 = math.tanh %523 : vector<8x128xf32>
    %526 = arith.mulf %524, %525 : vector<8x128xf32>
    %527 = arith.truncf %526 : vector<8x128xf32> to vector<8x128xbf16>
    %c56_195 = arith.constant 56 : index
    %c0_196 = arith.constant 0 : index
    %528 = vector.load %arg18[%c56_195, %c0_196] : memref<64x512xf32, #tpu.memory_space<vmem>>, vector<8x512xf32>
    %c0_197 = arith.constant 0 : index
    %c0_198 = arith.constant 0 : index
    %529 = vector.load %arg10[%c0_197, %c0_198] : memref<128x512xbf16, #tpu.memory_space<vmem>>, vector<128x512xbf16>
    %cst_199 = arith.constant dense<0.000000e+00> : vector<8x512xf32>
    %530 = tpu.matmul %527, %529, %cst_199 {dimension_numbers = #tpu.dot_dimension_numbers<[1], [0], [0], [1], [0, 0, 1, 1], [], []>} : vector<8x128xbf16>, vector<128x512xbf16>, vector<8x512xf32> -> vector<8x512xf32>
    %531 = arith.addf %528, %530 : vector<8x512xf32>
    %532 = vector.extract_strided_slice %531 {offsets = [0, 0], sizes = [8, 384], strides = [1, 1]} : vector<8x512xf32> to vector<8x384xf32>
    %533 = arith.negf %532 : vector<8x384xf32>
    %534 = math.exp %533 : vector<8x384xf32>
    %cst_200 = arith.constant 1.000000e+00 : f32
    %535 = vector.broadcast %cst_200 : f32 to vector<8x384xf32>
    %536 = arith.addf %535, %534 : vector<8x384xf32>
    %537 = arith.divf %535, %536 : vector<8x384xf32>
    %538 = vector.extract_strided_slice %531 {offsets = [0, 384], sizes = [8, 128], strides = [1, 1]} : vector<8x512xf32> to vector<8x128xf32>
    %539 = math.tanh %538 : vector<8x128xf32>
    %540 = vector.extract_strided_slice %537 {offsets = [0, 128], sizes = [8, 128], strides = [1, 1]} : vector<8x384xf32> to vector<8x128xf32>
    %541 = arith.mulf %540, %523 : vector<8x128xf32>
    %542 = vector.extract_strided_slice %537 {offsets = [0, 0], sizes = [8, 128], strides = [1, 1]} : vector<8x384xf32> to vector<8x128xf32>
    %543 = arith.mulf %542, %539 : vector<8x128xf32>
    %544 = arith.addf %541, %543 : vector<8x128xf32>
    %545 = vector.extract_strided_slice %537 {offsets = [0, 256], sizes = [8, 128], strides = [1, 1]} : vector<8x384xf32> to vector<8x128xf32>
    %546 = math.tanh %544 : vector<8x128xf32>
    %547 = arith.mulf %545, %546 : vector<8x128xf32>
    %548 = arith.truncf %547 : vector<8x128xf32> to vector<8x128xbf16>
    %c0_201 = arith.constant 0 : index
    %c0_202 = arith.constant 0 : index
    %549 = vector.load %arg11[%c0_201, %c0_202] : memref<128x128xbf16, #tpu.memory_space<vmem>>, vector<128x128xbf16>
    %cst_203 = arith.constant dense<0.000000e+00> : vector<8x128xf32>
    %550 = tpu.matmul %548, %549, %cst_203 {dimension_numbers = #tpu.dot_dimension_numbers<[1], [0], [0], [1], [0, 0, 1, 1], [], []>} : vector<8x128xbf16>, vector<128x128xbf16>, vector<8x128xf32> -> vector<8x128xf32>
    %c0_204 = arith.constant 0 : index
    %c0_205 = arith.constant 0 : index
    %551 = vector.load %arg12[%c0_204, %c0_205] : memref<1x128xf32, #tpu.memory_space<vmem>>, vector<1x128xf32>
    %552 = vector.broadcast %551 : vector<1x128xf32> to vector<8x128xf32>
    %553 = arith.addf %550, %552 : vector<8x128xf32>
    %c0_206 = arith.constant 0 : index
    %c0_207 = arith.constant 0 : index
    %c0_208 = arith.constant 0 : index
    %554 = vector.load %arg13[%c0_206, %c0_207, %c0_208] : memref<1x8x128xf32, #tpu.memory_space<vmem>>, vector<1x8x128xf32>
    %555 = vector.shape_cast %554 : vector<1x8x128xf32> to vector<8x128xf32>
    %556 = vector.shape_cast %553 : vector<8x128xf32> to vector<1x8x128xf32>
    tpu.vector_store %arg13[%c0_206, %c0_207, %c0_208], %556 {strides = array<i32>} : memref<1x8x128xf32, #tpu.memory_space<vmem>>, vector<1x8x128xf32>,
    return
  }
  func.func @transform_0(%arg0: i32) -> (i32, i32, i32) {
    %c0_i32 = arith.constant 0 : i32
    %c0_i32_0 = arith.constant 0 : i32
    %c0_i32_1 = arith.constant 0 : i32
    return %arg0, %c0_i32, %c0_i32_0 : i32, i32, i32
  }
  func.func @transform_1(%arg0: i32) -> (i32, i32) {
    %c0_i32 = arith.constant 0 : i32
    %c0_i32_0 = arith.constant 0 : i32
    %c0_i32_1 = arith.constant 0 : i32
    return %c0_i32, %c0_i32_0 : i32, i32
  }
  func.func @transform_2(%arg0: i32) -> (i32, i32) {
    %c0_i32 = arith.constant 0 : i32
    %c0_i32_0 = arith.constant 0 : i32
    %c0_i32_1 = arith.constant 0 : i32
    return %c0_i32, %c0_i32_0 : i32, i32
  }
  func.func @transform_3(%arg0: i32) -> (i32, i32) {
    %c0_i32 = arith.constant 0 : i32
    %c0_i32_0 = arith.constant 0 : i32
    %c0_i32_1 = arith.constant 0 : i32
    return %c0_i32, %c0_i32_0 : i32, i32
  }
  func.func @transform_4(%arg0: i32) -> (i32, i32) {
    %c0_i32 = arith.constant 0 : i32
    %c0_i32_0 = arith.constant 0 : i32
    %c0_i32_1 = arith.constant 0 : i32
    return %c0_i32, %c0_i32_0 : i32, i32
  }
  func.func @transform_5(%arg0: i32) -> (i32, i32) {
    %c0_i32 = arith.constant 0 : i32
    %c0_i32_0 = arith.constant 0 : i32
    %c0_i32_1 = arith.constant 0 : i32
    return %c0_i32, %c0_i32_0 : i32, i32
  }
  func.func @transform_6(%arg0: i32) -> (i32, i32) {
    %c0_i32 = arith.constant 0 : i32
    %c0_i32_0 = arith.constant 0 : i32
    %c0_i32_1 = arith.constant 0 : i32
    return %c0_i32, %c0_i32_0 : i32, i32
  }
  func.func @transform_7(%arg0: i32) -> (i32, i32) {
    %c0_i32 = arith.constant 0 : i32
    %c0_i32_0 = arith.constant 0 : i32
    %c0_i32_1 = arith.constant 0 : i32
    return %c0_i32, %c0_i32_0 : i32, i32
  }
  func.func @transform_8(%arg0: i32) -> (i32, i32) {
    %c0_i32 = arith.constant 0 : i32
    %c0_i32_0 = arith.constant 0 : i32
    %c0_i32_1 = arith.constant 0 : i32
    return %c0_i32, %c0_i32_0 : i32, i32
  }
  func.func @transform_9(%arg0: i32) -> (i32, i32) {
    %c0_i32 = arith.constant 0 : i32
    %c0_i32_0 = arith.constant 0 : i32
    %c0_i32_1 = arith.constant 0 : i32
    return %c0_i32, %c0_i32_0 : i32, i32
  }
  func.func @transform_10(%arg0: i32) -> (i32, i32) {
    %c0_i32 = arith.constant 0 : i32
    %c0_i32_0 = arith.constant 0 : i32
    %c0_i32_1 = arith.constant 0 : i32
    return %c0_i32, %c0_i32_0 : i32, i32
  }
  func.func @transform_11(%arg0: i32) -> (i32, i32) {
    %c0_i32 = arith.constant 0 : i32
    %c0_i32_0 = arith.constant 0 : i32
    %c0_i32_1 = arith.constant 0 : i32
    return %c0_i32, %c0_i32_0 : i32, i32
  }
  func.func @transform_12(%arg0: i32) -> (i32, i32, i32) {
    %c0_i32 = arith.constant 0 : i32
    %c0_i32_0 = arith.constant 0 : i32
    %c0_i32_1 = arith.constant 0 : i32
    return %arg0, %c0_i32, %c0_i32_0 : i32, i32, i32
  }
}

</mosaic_0001>

<bundles_post_ra>
// kernel: lstm_feature_extractor.1
= control target key start
LH: loop header
LB: loop body
LE: loop exit
PB: predicated region body
PF: predicated region fallthrough
CT: control target
= control target key end

     0   :  { %s20356_s0 = inlined_call_operand.vmem [shape: f32[2,64,16], index: 0, kind: input, shape index: {}]   ;;  %s20357_s1 = inlined_call_operand.vmem [shape: bf16[16,1024], index: 1, kind: input, shape index: {}]   ;;  %s20358_s2 = inlined_call_operand.vmem [shape: f32[1,1024], index: 2, kind: input, shape index: {}]   ;;  %s20359_s3 = inlined_call_operand.hbm [shape: bf16[256,1024], index: 3, kind: input, shape index: {}]   ;;  %s20360_s4 = inlined_call_operand.vmem [shape: bf16[256,512], index: 4, kind: input, shape index: {}]   ;;  %s20361_s5 = inlined_call_operand.vmem [shape: f32[1,512], index: 5, kind: input, shape index: {}]   ;;  %s20362_s6 = inlined_call_operand.hbm [shape: bf16[128,512], index: 6, kind: input, shape index: {}]   ;;  %s20363_s7 = inlined_call_operand.hbm [shape: bf16[128,512], index: 7, kind: input, shape index: {}]   ;;  %s20364_s8 = inlined_call_operand.vmem [shape: f32[1,512], index: 8, kind: input, shape index: {}]   ;;  %s20365_s9 = inlined_call_operand.hbm [shape: bf16[128,512], index: 9, kind: input, shape index: {}]   ;;  %s20366_s10 = inlined_call_operand.hbm [shape: bf16[128,128], index: 10, kind: input, shape index: {}]   ;;  %s20367_s11 = inlined_call_operand.vmem [shape: f32[1,128], index: 11, kind: input, shape index: {}]   ;;  %s20368_s12 = inlined_call_operand.hbm [shape: f32[2,8,128], index: 12, kind: output, shape index: {}]  }
   0x1   :  { %20628 = sst [smem:[#allocation165_spill]] %s20362_s6 }
   0x2   :  { %20629 = sst [smem:[#allocation166_spill]] %s20365_s9 }
   0x3   :  { %20630 = sst [smem:[#allocation167_spill]] %s20368_s12 }
   0x4   :  { %17 = vsyncpa [#allocation8], 0 }
   0x5   :  { %18 = vsyncpa [#allocation11], 0 }
   0x6   :  { %19 = vsyncpa [#allocation14], 0 }
   0x7   :  { %20 = vsyncpa [#allocation9], 0 }
   0x8   :  { %22 = vsyncpa [#allocation9 + $0x1], 0  ;;  %s16602_s21 = smov 0   ;;  %s16604_s22 = smov 0  }
   0x9   :  { %s16606_s23 = smov 0   ;;  %s16608_s24 = smov 0  }
   0xa LB: > { %20631 = sst [smem:[#allocation21_spill]] %s16508_s21  ;;  %s16623_s25 = sadd.s32 4294967295, %s16520_s24   ;;  %s16520_s24 = sphi %s16608_s24, %s21348_s24   ;;  %s16516_s23 = sphi %s16606_s23, %s21350_s23   ;;  %s16512_s22 = sphi %s16604_s22, %s21352_s22   ;;  %s16508_s21 = sphi %s16602_s21, %s21351_s21  }
   0xb   : > { %20632 = sst [smem:[#allocation22_spill]] %s16516_s23  ;;  %s13777_s26 = sadd.s32 4294967294, %s16520_s24  }
   0xc   : > { %20633 = sst [smem:[#allocation23_spill]] %s16520_s24  ;;  %s16627_s27 = sadd.s32 1, %s16520_s24  }
   0xd   : > { %20634 = sst [smem:[#allocation24_spill]] %s16627_s27  ;;  %s292_s28 = sadd.s32 1, %s16516_s23 }
   0xe   : > { %s289_s29 = ssub.s32 %s16520_s24, %s16627_s27  ;;  %p302_p0 = scmp.ne.s32.totalorder %s16516_s23, %s16512_s22 }
   0xf   : > { %p290_p1 = scmp.eq.s32.totalorder %s289_s29, 0  ;;  %p303_p2 = scmp.eq.s32.totalorder %s16623_s25, 1 }
  0x10   : > { %p308_p3 = scmp.ne.s32.totalorder %s16512_s22, %s16508_s21  ;;  %p309_p4 = scmp.eq.s32.totalorder %s13777_s26, 1 }
  0x11   : > { %s16638_s30 = scalar_select %p290_p1, %s16516_s23, %s292_s28  }
  0x12   : > { %p16640_p5 = por %p303_p2, %p302_p0  ;;  %p16644_p6 = por %p309_p4, %p308_p3 }
  0x13   : > { %20635 = sst [smem:[#allocation25_spill]] %s16638_s30  ;;  %p13778_p7 = scmp.ge.s32.totalorder %s16520_s24, 1 }
  0x14   : > { %s20636_s13 = scalar_select %p16640_p5, 1, 0 }
  0x15   : > { %s20638_s14 = scalar_select %p16644_p6, 1, 0 }
  0x16   : > { %20637 = sst [smem:[#allocation26_spill]] %s20636_s13  ;;  %p316_p8 = scmp.lt.s32.totalorder %s16520_s24, 3 }
  0x17   : > { %20639 = sst [smem:[#allocation27_spill]] %s20638_s14  ;;  %p20373_p9 = scmp.eq.s32.totalorder %s16623_s25, 0 }
  0x18   : > { %p16651_p10 = pnand %p13778_p7, %p316_p8  ;;  %s16522_s16 = smov [#allocation10]  }
  0x19   : > { %s353_s17 = sshll.u32 %s16522_s16, 4  ;;  %s16523_s19 = smov [#allocation13]   ;;  %s16657_s17 = int_to_ptr.vmem [resolvable:$true] %s353_s17 }
  0x1a   : > { %s20640_s15 = scalar_select %p16651_p10, 1, 0 }
  0x1b   : > { %p15389_p11 = pneg %p16651_p10  ;;  %s382_s20 = sshll.u32 %s16523_s19, 4  ;;  %s16665_s20 = int_to_ptr.vmem [resolvable:$true] %s382_s20 }
  0x1c   : > { %s16524_s26 = smov [#allocation7]   ;;  %s20642_s6 = sld [smem:[#allocation165_spill]] }
  0x1d   : > { %p16661_p12 = pnand %p20373_p9, %p15389_p11  ;;  %s16667_s28 = sshll.u32 %s16524_s26, 4  ;;  %s335_s28 = int_to_ptr.vmem [resolvable:$true] %s16667_s28 }
  0x1f   : > { %p16677_p0 = pneg %p16661_p12 }
  0x22   : > { %s16306_s16 = scalar_lea.hbm %s20642_s6, 4096 }
  0x23   : > { %p16307_p13 = scmp.ne.s32.totalorder %s20642_s6, %s16306_s16  ;;  %p16313_p3 = scmp.lt.u32.totalorder %s16306_s16, %s20642_s6 }
  0x25   : > { %p16309_p1 = pnand %p16677_p0, %p16307_p13 }
  0x27   : > { %p16310_p2 = pneg %p16309_p1 }
  0x29   : > { %p16315_p4 = pnand %p16313_p3, %p16310_p2 }
  0x2b   : > { %16318 = shalt.err (!%p16315_p4)
}
  0x2c   : > { %s16319_s23 = scalar_lea.vmem %s16657_s17, 4096  ;;  %p16327_p9 = scmp.lt.s32.totalorder %s16657_s17, %s16657_s17 }
  0x2d   : > { %p16320_p7 = scmp.ne.s32.totalorder %s16657_s17, %s16319_s23  ;;  %p16328_p6 = scmp.lt.s32.totalorder %s16319_s23, %s16319_s23 }
  0x2f   : > { %p16322_p8 = pnand %p16320_p7, %p16677_p0  ;;  %p16329_p13 = por %p16328_p6, %p16327_p9 }
  0x31   : > { %p16323_p11 = pneg %p16322_p8 }
  0x33   : > { %p16330_p1 = pnand %p16329_p13, %p16323_p11 }
  0x35   : > { %16333 = shalt.err (!%p16330_p1)
}
  0x36   : > { %s20381_s27 = smov 256   ;;  %s20382_s30 = smov 16  }
  0x37   : > { %15395 = dma.hbm_to_vmem [thread:$0]  (!%p16661_p12), %s20642_s6, 4096, %s16657_s17, [#allocation11], %s20381_s27, %s20381_s27, %s20382_s30  }
  0x38   : > { %s20644_s9 = sld [smem:[#allocation166_spill]] }
  0x3e   : > { %s16334_s23 = scalar_lea.hbm %s20644_s9, 4096 }
  0x3f   : > { %p16335_p6 = scmp.ne.s32.totalorder %s20644_s9, %s16334_s23  ;;  %p16341_p3 = scmp.lt.u32.totalorder %s16334_s23, %s20644_s9 }
  0x41   : > { %p16337_p9 = pnand %p16335_p6, %p16677_p0 }
  0x43   : > { %p16338_p2 = pneg %p16337_p9 }
  0x45   : > { %p16343_p4 = pnand %p16341_p3, %p16338_p2 }
  0x47   : > { %16346 = shalt.err (!%p16343_p4)
}
  0x48   : > { %s16347_s17 = scalar_lea.vmem %s16665_s20, 4096  ;;  %p16355_p13 = scmp.lt.s32.totalorder %s16665_s20, %s16665_s20 }
  0x49   : > { %p16348_p7 = scmp.ne.s32.totalorder %s16665_s20, %s16347_s17  ;;  %p16356_p1 = scmp.lt.s32.totalorder %s16347_s17, %s16347_s17 }
  0x4b   : > { %p16350_p8 = pnand %p16348_p7, %p16677_p0  ;;  %p16357_p6 = por %p16356_p1, %p16355_p13 }
  0x4d   : > { %p16351_p11 = pneg %p16350_p8 }
  0x4f   : > { %p16358_p9 = pnand %p16357_p6, %p16351_p11 }
  0x51   : > { %16361 = shalt.err (!%p16358_p9)
}
  0x52   : > { %15401 = dma.hbm_to_vmem [thread:$0]  (!%p16661_p12), %s20644_s9, 4096, %s16665_s20, [#allocation14], %s20381_s27, %s20381_s27, %s20382_s30  }
  0x53   : > { %s16362_s29 = scalar_lea.hbm %s20359_s3, 16384 }
  0x54   : > { %p16363_p2 = scmp.ne.s32.totalorder %s20359_s3, %s16362_s29  ;;  %p16369_p7 = scmp.lt.u32.totalorder %s16362_s29, %s20359_s3 }
  0x56   : > { %p16365_p3 = pnand %p16363_p2, %p16677_p0 }
  0x58   : > { %p16366_p4 = pneg %p16365_p3 }
  0x5a   : > { %p16371_p8 = pnand %p16369_p7, %p16366_p4 }
  0x5c   : > { %16374 = shalt.err (!%p16371_p8)
}
  0x5d   : > { %s16375_s17 = scalar_lea.vmem %s335_s28, 16384  ;;  %p16383_p6 = scmp.lt.s32.totalorder %s335_s28, %s335_s28 }
  0x5e   : > { %p16376_p11 = scmp.ne.s32.totalorder %s335_s28, %s16375_s17  ;;  %p16384_p9 = scmp.lt.s32.totalorder %s16375_s17, %s16375_s17 }
  0x60   : > { %p16378_p13 = pnand %p16376_p11, %p16677_p0  ;;  %p16385_p5 = por %p16384_p9, %p16383_p6 }
  0x62   : > { %p16379_p1 = pneg %p16378_p13 }
  0x64   : > { %p16386_p10 = pnand %p16385_p5, %p16379_p1 }
  0x66   : > { %16389 = shalt.err (!%p16386_p10)
}
  0x67   : > { %s16527_s20 = smov 512   ;;  %s16528_s12 = smov 32  }
  0x68   : > { %15392 = dma.hbm_to_vmem [thread:$0]  (!%p16661_p12), %s20359_s3, 16384, %s335_s28, [#allocation8], %s16527_s20, %s16527_s20, %s16528_s12  }
  0x69   : > { %s16529_s13 = smov [#allocation12]   ;;  %s16530_s16 = smov [#allocation15]  }
  0x6a   : > { %s366_s29 = sshll.u32 %s16529_s13, 4  ;;  %s395_s19 = sshll.u32 %s16530_s16, 4  ;;  %s367_s29 = int_to_ptr.vmem [resolvable:$true] %s366_s29  ;;  %s396_s19 = int_to_ptr.vmem [resolvable:$true] %s395_s19 }
  0x6b   : > { %s16390_s17 = scalar_lea.hbm %s20363_s7, 4096 }
  0x6c   : > { %p16391_p5 = scmp.ne.s32.totalorder %s20363_s7, %s16390_s17  ;;  %p16397_p3 = scmp.lt.u32.totalorder %s16390_s17, %s20363_s7 }
  0x6e   : > { %p16393_p10 = pnand %p16391_p5, %p16677_p0 }
  0x70   : > { %p16394_p2 = pneg %p16393_p10 }
  0x72   : > { %p16399_p4 = pnand %p16397_p3, %p16394_p2 }
  0x74   : > { %16402 = shalt.err (!%p16399_p4)
}
  0x75   : > { %s16403_s28 = scalar_lea.vmem %s367_s29, 4096  ;;  %p16411_p13 = scmp.lt.s32.totalorder %s367_s29, %s367_s29 }
  0x76   : > { %p16404_p7 = scmp.ne.s32.totalorder %s367_s29, %s16403_s28  ;;  %p16412_p1 = scmp.lt.s32.totalorder %s16403_s28, %s16403_s28 }
  0x78   : > { %p16406_p8 = pnand %p16404_p7, %p16677_p0  ;;  %p16413_p6 = por %p16412_p1, %p16411_p13 }
  0x7a   : > { %p16407_p11 = pneg %p16406_p8 }
  0x7c   : > { %p16414_p9 = pnand %p16413_p6, %p16407_p11 }
  0x7e   : > { %16417 = shalt.err (!%p16414_p9)
}
  0x7f   : > { %s20645_s27 = smov 16   ;;  %s20646_s30 = smov 256  }
  0x80   : > { %15398 = dma.hbm_to_vmem [thread:$0]  (!%p16661_p12), %s20363_s7, 4096, %s367_s29, [#allocation11], %s20646_s30, %s20646_s30, %s20645_s27  }
  0x81   : > { %s16418_s21 = scalar_lea.hbm %s20366_s10, 1024 }
  0x82   : > { %p16419_p5 = scmp.ne.s32.totalorder %s20366_s10, %s16418_s21  ;;  %p16425_p3 = scmp.lt.u32.totalorder %s16418_s21, %s20366_s10 }
  0x84   : > { %p16421_p10 = pnand %p16419_p5, %p16677_p0 }
  0x86   : > { %p16422_p2 = pneg %p16421_p10 }
  0x88   : > { %p16427_p4 = pnand %p16425_p3, %p16422_p2 }
  0x8a   : > { %16430 = shalt.err (!%p16427_p4)
}
  0x8b   : > { %s16431_s23 = scalar_lea.vmem %s396_s19, 1024  ;;  %p16439_p13 = scmp.lt.s32.totalorder %s396_s19, %s396_s19 }
  0x8c   : > { %p16432_p7 = scmp.ne.s32.totalorder %s396_s19, %s16431_s23  ;;  %p16440_p1 = scmp.lt.s32.totalorder %s16431_s23, %s16431_s23 }
  0x8e   : > { %p16434_p8 = pnand %p16432_p7, %p16677_p0  ;;  %p16441_p6 = por %p16440_p1, %p16439_p13 }
  0x90   : > { %p16435_p11 = pneg %p16434_p8 }
  0x92   : > { %p16442_p9 = pnand %p16441_p6, %p16435_p11 }
  0x94   : > { %16445 = shalt.err (!%p16442_p9)
}
  0x95   : > { %s16531_s29 = smov 64   ;;  %s16532_s17 = smov 4  }
  0x96   : > { %15404 = dma.hbm_to_vmem [thread:$0]  (!%p16661_p12), %s20366_s10, 1024, %s396_s19, [#allocation14], %s16531_s29, %s16531_s29, %s16532_s17  }
  0x97   : > { %p20647_p5 = scmp.ne.s32.totalorder %s20640_s15, 0 }
  0x99   : > { %422 = sbr.rel (%p20647_p5) target bundleno = 7190 (0x1c16), region = 68 }
  0xa0   : > { %p20648_p10 = scmp.eq.s32.totalorder %s16623_s25, 0 }
  0xa2   : > { %16491 = dma.done.wait (%p20648_p10), [#allocation8], 16384   ;;  %p20649_p0 = pmov %p20648_p10 }
  0xa4   : > { %16493 = vsyncadd (%p20649_p0), [#allocation8], 4294950912  ;;  %p20650_p2 = pmov %p20649_p0 }
  0xa5   : > { %p20651_p3 = pmov %p20649_p0 }
  0xa6   : > { %16495 = dma.done.wait (%p20650_p2), [#allocation11], 8192  }
  0xa7   : > { %16497 = vsyncadd (%p20651_p3), [#allocation11], 4294959104  ;;  %p20652_p4 = pmov %p20649_p0 }
  0xa8   : > { %p20653_p12 = pmov %p20649_p0 }
  0xa9   : > { %16499 = dma.done.wait (%p20652_p4), [#allocation14], 5120  }
  0xaa   : > { %16501 = vsyncadd (%p20653_p12), [#allocation14], 4294962176  ;;  %p480_p7 = scmp.lt.s32.totalorder %s16623_s25, 1  ;;  %v20383_v0 = vmov 0   ;;  %v498_v1 = vld [vmem:[%s20357_s1] sm:$0xff]  ;;  %v499_v9 = vld [vmem:[%s20357_s1 + $0x8] sm:$0xff] }
  0xab   : > { %633 = vmatprep.mubr.bf16.mxu0 %v20383_v0  ;;  %653 = vmatprep.mubr.bf16.mxu1 %v20383_v0  ;;  %v502_v2 = vld [vmem:[%s20357_s1 + $0x20] sm:$0xff]  ;;  %v503_v10 = vld [vmem:[%s20357_s1 + $0x28] sm:$0xff]  ;;  %vm588_vm0 = vcmask 130048   ;;  %v500_v15 = vld [vmem:[%s20357_s1 + $0x10] sm:$0xff]  ;;  %vm16535_vm1 = vmmov 0   ;;  %s477_s19 = sand.u32 1, %s16512_s22  }
  0xac   : > { %s481_s14 = scalar_select %p480_p7, %s16623_s25, 1  ;;  %v13795_v4 = vcombine.high %v498_v1, %v502_v2  ;;  %v13794_v5 = vcombine.low %v498_v1, %v502_v2  ;;  %v13797_v13 = vcombine.high %v499_v9, %v503_v10  ;;  %v13796_v14 = vcombine.low %v499_v9, %v503_v10  ;;  %v504_v16 = vld [vmem:[%s20357_s1 + $0x30] sm:$0xff]  ;;  %v965_v17 = vld [vmem:[#allocation7] sm:$0xff]  ;;  %v501_v20 = vld [vmem:[%s20357_s1 + $0x18] sm:$0xff] }
  0xad   : > { %v13799_v18 = vcombine.high %v500_v15, %v504_v16  ;;  %v969_v19 = vld [vmem:[#allocation7 + $0x20] sm:$0xff]  ;;  %v505_v21 = vld [vmem:[%s20357_s1 + $0x38] sm:$0xff]  ;;  %v13798_v22 = vcombine.low %v500_v15, %v504_v16  ;;  %v16860_v33 = vld [vmem:[#allocation7 + $0x8] sm:$0xff]  ;;  %s21341_s20 = sld [smem:[#allocation26_spill]]  ;;  %s15332_s12 = sshll.u32 %s16623_s25, 7 }
  0xae   : > { %s15335_s15 = sshll.u32 %s481_s14, 6  ;;  %601 = vmatprep.subr.bf16.mxu0 %v13795_v4  ;;  %15365 = vmatprep.subr.bf16.mxu1 %v13795_v4  ;;  %v13801_v23 = vcombine.high %v501_v20, %v505_v21  ;;  %v13819_v25 = vcombine.high %v965_v17, %v969_v19  ;;  %v973_v31 = vld [vmem:[#allocation7 + $0x40] sm:$0xff]  ;;  %v16862_v34 = vld [vmem:[#allocation7 + $0x28] sm:$0xff]  ;;  %v13818_v35 = vcombine.low %v965_v17, %v969_v19  ;;  %s21342_s26 = sld [smem:[#allocation167_spill]] }
  0xaf   : > { %s16806_s30 = scalar_lea.vmem %s20356_s0, %s15335_s15  ;;  %602 = vmatpush1.bf16.msra.mxu0 %v13794_v5  ;;  %15366 = vmatpush1.bf16.msra.mxu1 %v13794_v5  ;;  %v977_v32 = vld [vmem:[#allocation7 + $0x60] sm:$0xff]  ;;  %v13800_v36 = vcombine.low %v501_v20, %v505_v21  ;;  %v13821_v40 = vcombine.high %v16860_v33, %v16862_v34  ;;  %v974_v5 = vld [vmem:[#allocation7 + $0x48] sm:$0xff]  ;;  %v13820_v9 = vcombine.low %v16860_v33, %v16862_v34  ;;  %s13655_s29 = scalar_lea.sflag [#allocation9], %s477_s19 }
  0xb0   : > { %v486_v3 = vld [vmem:[%s16806_s30] sm:$0xff]  ;;  %v487_v6 = vld [vmem:[%s16806_s30 + $0x8] sm:$0xff]  ;;  %674 = vmatprep.subr.bf16.mxu1 %v13797_v13  ;;  %v488_v24 = vld [vmem:[%s16806_s30 + $0x10] sm:$0xff]  ;;  %747 = vmatprep.subr.bf16.mxu0 %v13799_v18  ;;  %v13827_v37 = vcombine.high %v973_v31, %v977_v32  ;;  %v13826_v41 = vcombine.low %v973_v31, %v977_v32  ;;  %s16536_s17 = smov [#allocation16]  }
  0xb1   : > { %v490_v7 = vld [vmem:[%s16806_s30 + $0x20] sm:$0xff]  ;;  %v491_v8 = vld [vmem:[%s16806_s30 + $0x28] sm:$0xff]  ;;  %v16824_v11 = vpack.c.bf16 %v487_v6, %v486_v3  ;;  %v489_v26 = vld [vmem:[%s16806_s30 + $0x18] sm:$0xff]  ;;  %s16450_s28 = sshll.u32 %s16536_s17, 4  ;;  %s16451_s28 = int_to_ptr.vmem [resolvable:$false] %s16450_s28 }
  0xb2   : > { %v16826_v12 = vpack.c.bf16 %v491_v8, %v490_v7  ;;  %v492_v27 = vld [vmem:[%s16806_s30 + $0x30] sm:$0xff]  ;;  %v493_v28 = vld [vmem:[%s16806_s30 + $0x38] sm:$0xff]  ;;  %v16850_v29 = vpack.c.bf16 %v489_v26, %v488_v24  ;;  %v981_v38 = vld [vmem:[#allocation7 + $0x80] sm:$0xff]  ;;  %s13791_s30 = sshll.u32 %s477_s19, 3  ;;  %s16452_s27 = scalar_lea.vmem %s16451_s28, 256 }
  0xb3   : > { %13802 = vmatmul.mubr.msk.bf16.vlgmr.msra.gmra.mrb[0].mxu0 %vm588_vm0, %v16824_v11  ;;  %v16852_v30 = vpack.c.bf16 %v493_v28, %v492_v27  ;;  %v985_v39 = vld [vmem:[#allocation7 + $0xa0] sm:$0xff]  ;;  %v978_v6 = vld [vmem:[#allocation7 + $0x68] sm:$0xff]  ;;  %s479_s21 = scalar_lea.vmem [#allocation16], %s13791_s30  ;;  %p21343_p11 = scmp.ne.s32.totalorder %s21341_s20, 0 }
  0xb4   : > { %13804 = vmatmul.mubr.msk.bf16.vlgmr.msra.gmra.mrb[0].mxu1 %vm588_vm0, %v16826_v12  ;;  %643 = vmatprep.mubr.bf16.mxu0 %v20383_v0  ;;  %v13835_v42 = vcombine.high %v981_v38, %v985_v39  ;;  %v989_v43 = vld [vmem:[#allocation7 + $0xc0] sm:$0xff]  ;;  %v13834_v45 = vcombine.low %v981_v38, %v985_v39  ;;  %v986_v15 = vld [vmem:[#allocation7 + $0xa8] sm:$0xff]  ;;  %v13829_v17 = vcombine.high %v974_v5, %v978_v6  ;;  %s13668_s24 = sshll.u32 %s479_s21, 4  ;;  %s20314_s23 = scalar_lea.hbm %s21342_s26, %s15332_s12  ;;  %s20316_s24 = int_to_ptr.vmem [resolvable:$true] %s13668_s24 }
  0xb5   : > { %675 = vmatpush1.bf16.msra.mxu1 %v13796_v14  ;;  %663 = vmatprep.mubr.bf16.mxu1 %v20383_v0  ;;  %v993_v44 = vld [vmem:[#allocation7 + $0xe0] sm:$0xff]  ;;  %v982_v14 = vld [vmem:[#allocation7 + $0x88] sm:$0xff]  ;;  %v13828_v19 = vcombine.low %v974_v5, %v978_v6  ;;  %v975_v6 = vld [vmem:[#allocation7 + $0x50] sm:$0xff]  ;;  %s16446_s25 = scalar_lea.vmem %s20316_s24, 128  ;;  %p16453_p6 = scmp.lt.s32.totalorder %s20316_s24, %s16451_s28 }
  0xb6   : > { %748 = vmatpush1.bf16.msra.mxu0 %v13798_v22  ;;  %820 = vmatprep.subr.bf16.mxu1 %v13801_v23  ;;  %v13843_v46 = vcombine.high %v989_v43, %v993_v44  ;;  %v997_v47 = vld [vmem:[#allocation7 + $0x100] sm:$0xff]  ;;  %v13842_v49 = vcombine.low %v989_v43, %v993_v44  ;;  %v990_v22 = vld [vmem:[#allocation7 + $0xc8] sm:$0xff]  ;;  %v13836_v27 = vcombine.low %v982_v14, %v986_v15  ;;  %p16447_p8 = scmp.ne.s32.totalorder %s20316_s24, %s16446_s25  ;;  %p16454_p9 = scmp.lt.s32.totalorder %s16452_s27, %s16446_s25 }
  0xb7   : > { %1733 = vmatprep.subr.bf16.mxu0 %v13819_v25  ;;  %v1001_v48 = vld [vmem:[#allocation7 + $0x120] sm:$0xff]  ;;  %v994_v23 = vld [vmem:[#allocation7 + $0xe8] sm:$0xff]  ;;  %v13837_v25 = vcombine.high %v982_v14, %v986_v15  ;;  %v983_v15 = vld [vmem:[#allocation7 + $0x90] sm:$0xff] }
  0xb8   : > { %v13851_v50 = vcombine.high %v997_v47, %v1001_v48  ;;  %v1005_v51 = vld [vmem:[#allocation7 + $0x140] sm:$0xff]  ;;  %v13850_v53 = vcombine.low %v997_v47, %v1001_v48  ;;  %v998_v31 = vld [vmem:[#allocation7 + $0x108] sm:$0xff]  ;;  %v13845_v34 = vcombine.high %v990_v22, %v994_v23  ;;  %p16448_p13 = pnand %p16447_p8, %p21343_p11  ;;  %p16455_p5 = por %p16454_p9, %p16453_p6 }
  0xb9   : > { %v1009_v52 = vld [vmem:[#allocation7 + $0x160] sm:$0xff]  ;;  %v1002_v32 = vld [vmem:[#allocation7 + $0x128] sm:$0xff] }
  0xba   : > { %v13859_v54 = vcombine.high %v1005_v51, %v1009_v52  ;;  %v1013_v55 = vld [vmem:[#allocation7 + $0x180] sm:$0xff]  ;;  %v13858_v57 = vcombine.low %v1005_v51, %v1009_v52  ;;  %v1006_v39 = vld [vmem:[#allocation7 + $0x148] sm:$0xff]  ;;  %v13852_v44 = vcombine.low %v998_v31, %v1002_v32  ;;  %p16449_p1 = pneg %p16448_p13 }
  0xbb   : > { %13803 = vmatmul.mubr.msk.bf16.gmra.mrb[4].mxu0 %vm588_vm0, %v16850_v29  ;;  %v1017_v56 = vld [vmem:[#allocation7 + $0x1a0] sm:$0xff]  ;;  %v1018_v47 = vld [vmem:[#allocation7 + $0x1a8] sm:$0xff] }
  0xbc   : > { %13805 = vmatmul.mubr.msk.bf16.gmra.mrb[4].mxu1 %vm588_vm0, %v16852_v30  ;;  %779 = vmatprep.mubr.bf16.mxu0 %v20383_v0  ;;  %v13867_v58 = vcombine.high %v1013_v55, %v1017_v56  ;;  %v1021_v59 = vld [vmem:[#allocation7 + $0x1c0] sm:$0xff]  ;;  %v13866_v61 = vcombine.low %v1013_v55, %v1017_v56  ;;  %v1026_v55 = vld [vmem:[#allocation7 + $0x1e8] sm:$0xff]  ;;  %p16456_p10 = pnand %p16455_p5, %p16449_p1 }
  0xbd   : > { %706 = vmatprep.mubr.bf16.mxu1 %v20383_v0  ;;  %v1025_v60 = vld [vmem:[#allocation7 + $0x1e0] sm:$0xff]  ;;  %v1042_v5 = vld [vmem:[#allocation7 + $0x268] sm:$0xff] }
  0xbe   : > { %v13875_v62 = vcombine.high %v1021_v59, %v1025_v60  ;;  %v1029_v63 = vld [vmem:[#allocation7 + $0x200] sm:$0xff]  ;;  %v13874_v2 = vcombine.low %v1021_v59, %v1025_v60  ;;  %v1030_v60 = vld [vmem:[#allocation7 + $0x208] sm:$0xff] }
  0xbf   : > { %v1033_v1 = vld [vmem:[#allocation7 + $0x220] sm:$0xff]  ;;  %v1046_v14 = vld [vmem:[#allocation7 + $0x288] sm:$0xff] }
  0xc0   : > { %v1037_v3 = vld [vmem:[#allocation7 + $0x240] sm:$0xff]  ;;  %v13883_v7 = vcombine.high %v1029_v63, %v1033_v1  ;;  %v13882_v8 = vcombine.low %v1029_v63, %v1033_v1 }
  0xc1   : > { %v1041_v4 = vld [vmem:[#allocation7 + $0x260] sm:$0xff] }
  0xc2   : > { %v1045_v10 = vld [vmem:[#allocation7 + $0x280] sm:$0xff]  ;;  %v13891_v16 = vcombine.high %v1037_v3, %v1041_v4  ;;  %v13890_v18 = vcombine.low %v1037_v3, %v1041_v4  ;;  %v1038_v4 = vld [vmem:[#allocation7 + $0x248] sm:$0xff] }
  0xc3   : > { %13810 = vmatmul.mubr.msk.bf16.vlgmr.msra.gmra.mrb[8].mxu0 %vm588_vm0, %v16824_v11  ;;  %v1049_v13 = vld [vmem:[#allocation7 + $0x2a0] sm:$0xff] }
  0xc4   : > { %13806 = vmatmul.mubr.msk.bf16.vlgmr.msra.gmra.mrb[8].mxu1 %vm588_vm0, %v16824_v11  ;;  %1734 = vmatpush1.bf16.msra.mxu0 %v13818_v35  ;;  %v1053_v20 = vld [vmem:[#allocation7 + $0x2c0] sm:$0xff]  ;;  %v13899_v24 = vcombine.high %v1045_v10, %v1049_v13  ;;  %v13898_v26 = vcombine.low %v1045_v10, %v1049_v13 }
  0xc5   : > { %821 = vmatpush1.bf16.msra.mxu1 %v13800_v36  ;;  %1735 = vmatprep.subr.bf16.mxu0 %v13827_v37  ;;  %v1057_v21 = vld [vmem:[#allocation7 + $0x2e0] sm:$0xff]  ;;  %v13844_v36 = vcombine.low %v990_v22, %v994_v23  ;;  %v1058_v22 = vld [vmem:[#allocation7 + $0x2e8] sm:$0xff]  ;;  %v991_v23 = vld [vmem:[#allocation7 + $0xd0] sm:$0xff] }
  0xc6   : > { %716 = vmatprep.mubr.bf16.mxu1 %v20383_v0  ;;  %1774 = vmatprep.subr.bf16.mxu1 %v13821_v40  ;;  %v1061_v28 = vld [vmem:[#allocation7 + $0x300] sm:$0xff]  ;;  %v13907_v33 = vcombine.high %v1053_v20, %v1057_v21  ;;  %v13906_v35 = vcombine.low %v1053_v20, %v1057_v21  ;;  %v1010_v40 = vld [vmem:[#allocation7 + $0x168] sm:$0xff] }
  0xc7   : > { %789 = vmatprep.mubr.bf16.mxu0 %v20383_v0  ;;  %v1069_v37 = vld [vmem:[#allocation7 + $0x340] sm:$0xff]  ;;  %v13860_v51 = vcombine.low %v1006_v39, %v1010_v40  ;;  %v1054_v21 = vld [vmem:[#allocation7 + $0x2c8] sm:$0xff] }
  0xc8   : > { %1736 = vmatpush1.bf16.msra.mxu0 %v13826_v41  ;;  %v1073_v38 = vld [vmem:[#allocation7 + $0x360] sm:$0xff] }
  0xc9   : > { %1737 = vmatprep.subr.bf16.mxu0 %v13835_v42  ;;  %v13853_v42 = vcombine.high %v998_v31, %v1002_v32  ;;  %v13923_v48 = vcombine.high %v1069_v37, %v1073_v38  ;;  %v1085_v52 = vld [vmem:[#allocation7 + $0x3c0] sm:$0xff]  ;;  %v1066_v31 = vld [vmem:[#allocation7 + $0x328] sm:$0xff]  ;;  %v999_v32 = vld [vmem:[#allocation7 + $0x110] sm:$0xff] }
  0xcb   : > { %13811 = vmatmul.mubr.msk.bf16.gmra.mrb[12].mxu0 %vm588_vm0, %v16850_v29 }
  0xcc   : > { %13807 = vmatmul.mubr.msk.bf16.gmra.mrb[12].mxu1 %vm588_vm0, %v16850_v29  ;;  %1738 = vmatpush1.bf16.msra.mxu0 %v13834_v45  ;;  %v1077_v45 = vld [vmem:[#allocation7 + $0x380] sm:$0xff] }
  0xcd   : > { %726 = vmatprep.mubr.bf16.mxu1 %v20383_v0  ;;  %1739 = vmatprep.subr.bf16.mxu0 %v13843_v46  ;;  %v1014_v46 = vld [vmem:[#allocation7 + $0x188] sm:$0xff] }
  0xce   : > { %799 = vmatprep.mubr.bf16.mxu0 %v20383_v0  ;;  %v13868_v59 = vcombine.low %v1014_v46, %v1018_v47 }
  0xd0   : > { %1740 = vmatpush1.bf16.msra.mxu0 %v13842_v49  ;;  %v13861_v49 = vcombine.high %v1006_v39, %v1010_v40  ;;  %v1074_v39 = vld [vmem:[#allocation7 + $0x368] sm:$0xff]  ;;  %v1007_v40 = vld [vmem:[#allocation7 + $0x150] sm:$0xff] }
  0xd1   : > { %1741 = vmatprep.subr.bf16.mxu0 %v13851_v50  ;;  %v13922_v50 = vcombine.low %v1069_v37, %v1073_v38  ;;  %v1070_v38 = vld [vmem:[#allocation7 + $0x348] sm:$0xff] }
  0xd3   : > { %13812 = vmatmul.mubr.msk.bf16.gmra.mrb[16].mxu0 %vm588_vm0, %v16826_v12 }
  0xd4   : > { %13808 = vmatmul.mubr.msk.bf16.gmra.mrb[16].mxu1 %vm588_vm0, %v16826_v12  ;;  %1742 = vmatpush1.bf16.msra.mxu0 %v13850_v53  ;;  %v1089_v53 = vld [vmem:[#allocation7 + $0x3e0] sm:$0xff] }
  0xd5   : > { %736 = vmatprep.mubr.bf16.mxu1 %v20383_v0  ;;  %1743 = vmatprep.subr.bf16.mxu0 %v13859_v54  ;;  %v1022_v54 = vld [vmem:[#allocation7 + $0x1c8] sm:$0xff]  ;;  %v13939_v63 = vcombine.high %v1085_v52, %v1089_v53 }
  0xd6   : > { %809 = vmatprep.mubr.bf16.mxu0 %v20383_v0  ;;  %v13877_v1 = vcombine.high %v1022_v54, %v1026_v55  ;;  %v13876_v3 = vcombine.low %v1022_v54, %v1026_v55  ;;  %v1090_v54 = vld [vmem:[#allocation7 + $0x3e8] sm:$0xff]  ;;  %v1023_v55 = vld [vmem:[#allocation7 + $0x1d0] sm:$0xff] }
  0xd8   : > { %1744 = vmatpush1.bf16.msra.mxu0 %v13858_v57  ;;  %v13869_v57 = vcombine.high %v1014_v46, %v1018_v47  ;;  %v1082_v46 = vld [vmem:[#allocation7 + $0x3a8] sm:$0xff]  ;;  %v1015_v47 = vld [vmem:[#allocation7 + $0x190] sm:$0xff] }
  0xd9   : > { %1745 = vmatprep.subr.bf16.mxu0 %v13867_v58 }
  0xdb   : > { %13813 = vmatmul.mubr.msk.bf16.gmra.mrb[20].mxu0 %vm588_vm0, %v16852_v30 }
  0xdc   : > { %13809 = vmatmul.mubr.msk.bf16.gmra.mrb[20].mxu1 %vm588_vm0, %v16852_v30  ;;  %1746 = vmatpush1.bf16.msra.mxu0 %v13866_v61  ;;  %v967_v61 = vld [vmem:[#allocation7 + $0x10] sm:$0xff] }
  0xdd   : > { %852 = vmatprep.mubr.bf16.mxu1 %v20383_v0  ;;  %1747 = vmatprep.subr.bf16.mxu0 %v13875_v62  ;;  %v971_v62 = vld [vmem:[#allocation7 + $0x30] sm:$0xff] }
  0xde   : > { %1765 = vmatprep.mubr.bf16.mxu0 %v20383_v0  ;;  %v13822_v13 = vcombine.low %v967_v61, %v971_v62 }
  0xe0   : > { %1748 = vmatpush1.bf16.msra.mxu0 %v13874_v2  ;;  %v13938_v2 = vcombine.low %v1085_v52, %v1089_v53  ;;  %v1086_v53 = vld [vmem:[#allocation7 + $0x3c8] sm:$0xff] }
  0xe1   : > { %1749 = vmatprep.subr.bf16.mxu0 %v13883_v7  ;;  %v979_v7 = vld [vmem:[#allocation7 + $0x70] sm:$0xff] }
  0xe2   : > { %v13830_v20 = vcombine.low %v975_v6, %v979_v7 }
  0xe4   : > { %13814 = vmatmul.mubr.msk.bf16.vlgmr.msra.gmra.mrb[24].mxu1 %vm588_vm0, %v16824_v11  ;;  %1750 = vmatpush1.bf16.msra.mxu0 %v13882_v8  ;;  %v1065_v11 = vld [vmem:[#allocation7 + $0x320] sm:$0xff] }
  0xe5   : > { %1775 = vmatpush1.bf16.msra.mxu1 %v13820_v9  ;;  %1751 = vmatprep.subr.bf16.mxu0 %v13891_v16  ;;  %v13915_v41 = vcombine.high %v1061_v28, %v1065_v11  ;;  %v13914_v43 = vcombine.low %v1061_v28, %v1065_v11  ;;  %v13823_v9 = vcombine.high %v967_v61, %v971_v62  ;;  %v987_v16 = vld [vmem:[#allocation7 + $0xb0] sm:$0xff]  ;;  %v1062_v11 = vld [vmem:[#allocation7 + $0x308] sm:$0xff]  ;;  %v968_v62 = vld [vmem:[#allocation7 + $0x18] sm:$0xff] }
  0xe6   : > { %1776 = vmatprep.subr.bf16.mxu1 %v13829_v17  ;;  %862 = vmatprep.mubr.bf16.mxu1 %v20383_v0  ;;  %v13893_v17 = vcombine.high %v1038_v4, %v1042_v5  ;;  %v13838_v28 = vcombine.low %v983_v15, %v987_v16  ;;  %v1035_v61 = vld [vmem:[#allocation7 + $0x230] sm:$0xff] }
  0xe8   : > { %1752 = vmatpush1.bf16.msra.mxu0 %v13890_v18  ;;  %v13831_v18 = vcombine.high %v975_v6, %v979_v7  ;;  %v1043_v6 = vld [vmem:[#allocation7 + $0x270] sm:$0xff]  ;;  %v976_v7 = vld [vmem:[#allocation7 + $0x58] sm:$0xff] }
  0xe9   : > { %1777 = vmatpush1.bf16.msra.mxu1 %v13828_v19  ;;  %1753 = vmatprep.subr.bf16.mxu0 %v13899_v24  ;;  %v13892_v19 = vcombine.low %v1038_v4, %v1042_v5  ;;  %v995_v24 = vld [vmem:[#allocation7 + $0xf0] sm:$0xff] }
  0xea   : > { %1778 = vmatprep.subr.bf16.mxu1 %v13837_v25  ;;  %v13846_v37 = vcombine.low %v991_v23, %v995_v24  ;;  %v1039_v5 = vld [vmem:[#allocation7 + $0x250] sm:$0xff] }
  0xec   : > { %13815 = vmatmul.mubr.msk.bf16.gmra.mrb[28].mxu1 %vm588_vm0, %v16850_v29  ;;  %1754 = vmatpush1.bf16.msra.mxu0 %v13898_v26  ;;  %v1081_v29 = vld [vmem:[#allocation7 + $0x3a0] sm:$0xff]  ;;  %v13839_v26 = vcombine.high %v983_v15, %v987_v16  ;;  %v1047_v16 = vld [vmem:[#allocation7 + $0x290] sm:$0xff] }
  0xed   : > { %1779 = vmatpush1.bf16.msra.mxu1 %v13836_v27  ;;  %1755 = vmatprep.subr.bf16.mxu0 %v13907_v33  ;;  %v13931_v56 = vcombine.high %v1077_v45, %v1081_v29  ;;  %v13930_v58 = vcombine.low %v1077_v45, %v1081_v29  ;;  %v1003_v33 = vld [vmem:[#allocation7 + $0x130] sm:$0xff]  ;;  %v1078_v29 = vld [vmem:[#allocation7 + $0x388] sm:$0xff] }
  0xee   : > { %1780 = vmatprep.subr.bf16.mxu1 %v13845_v34  ;;  %872 = vmatprep.mubr.bf16.mxu1 %v20383_v0  ;;  %v13909_v34 = vcombine.high %v1054_v21, %v1058_v22  ;;  %v13854_v45 = vcombine.low %v999_v32, %v1003_v33 }
  0xf0   : > { %1756 = vmatpush1.bf16.msra.mxu0 %v13906_v35  ;;  %v13847_v35 = vcombine.high %v991_v23, %v995_v24  ;;  %v1055_v24 = vld [vmem:[#allocation7 + $0x2d0] sm:$0xff] }
  0xf1   : > { %1781 = vmatpush1.bf16.msra.mxu1 %v13844_v36  ;;  %1757 = vmatprep.subr.bf16.mxu0 %v13915_v41  ;;  %v13908_v36 = vcombine.low %v1054_v21, %v1058_v22  ;;  %v1011_v41 = vld [vmem:[#allocation7 + $0x170] sm:$0xff] }
  0xf2   : > { %1782 = vmatprep.subr.bf16.mxu1 %v13853_v42  ;;  %v13917_v42 = vcombine.high %v1062_v11, %v1066_v31  ;;  %v13862_v52 = vcombine.low %v1007_v40, %v1011_v41 }
  0xf4   : > { %13816 = vmatmul.mubr.msk.bf16.gmra.mrb[32].mxu1 %vm588_vm0, %v16826_v12  ;;  %1758 = vmatpush1.bf16.msra.mxu0 %v13914_v43  ;;  %v1034_v12 = vld [vmem:[#allocation7 + $0x228] sm:$0xff]  ;;  %v13855_v43 = vcombine.high %v999_v32, %v1003_v33  ;;  %v1063_v33 = vld [vmem:[#allocation7 + $0x310] sm:$0xff] }
  0xf5   : > { %1783 = vmatpush1.bf16.msra.mxu1 %v13852_v44  ;;  %1759 = vmatprep.subr.bf16.mxu0 %v13923_v48  ;;  %v13885_v8 = vcombine.high %v1030_v60, %v1034_v12  ;;  %v13884_v10 = vcombine.low %v1030_v60, %v1034_v12  ;;  %v13916_v44 = vcombine.low %v1062_v11, %v1066_v31  ;;  %v1019_v48 = vld [vmem:[#allocation7 + $0x1b0] sm:$0xff] }
  0xf6   : > { %1784 = vmatprep.subr.bf16.mxu1 %v13861_v49  ;;  %882 = vmatprep.mubr.bf16.mxu1 %v20383_v0  ;;  %v13925_v49 = vcombine.high %v1070_v38, %v1074_v39  ;;  %v13870_v60 = vcombine.low %v1015_v47, %v1019_v48  ;;  %v1031_v12 = vld [vmem:[#allocation7 + $0x210] sm:$0xff] }
  0xf8   : > { %1760 = vmatpush1.bf16.msra.mxu0 %v13922_v50  ;;  %v13863_v50 = vcombine.high %v1007_v40, %v1011_v41  ;;  %v1071_v41 = vld [vmem:[#allocation7 + $0x350] sm:$0xff] }
  0xf9   : > { %1785 = vmatpush1.bf16.msra.mxu1 %v13860_v51  ;;  %1761 = vmatprep.subr.bf16.mxu0 %v13931_v56  ;;  %v13924_v51 = vcombine.low %v1070_v38, %v1074_v39  ;;  %v1027_v56 = vld [vmem:[#allocation7 + $0x1f0] sm:$0xff] }
  0xfa   : > { %1786 = vmatprep.subr.bf16.mxu1 %v13869_v57  ;;  %v13933_v57 = vcombine.high %v1078_v29, %v1082_v46  ;;  %v13878_v4 = vcombine.low %v1023_v55, %v1027_v56 }
  0xfc   : > { %13817 = vmatmul.mubr.msk.bf16.gmra.mrb[36].mxu1 %vm588_vm0, %v16852_v30  ;;  %1762 = vmatpush1.bf16.msra.mxu0 %v13930_v58  ;;  %v1050_v30 = vld [vmem:[#allocation7 + $0x2a8] sm:$0xff]  ;;  %v13871_v58 = vcombine.high %v1015_v47, %v1019_v48  ;;  %v1079_v48 = vld [vmem:[#allocation7 + $0x390] sm:$0xff] }
  0xfd   : > { %1787 = vmatpush1.bf16.msra.mxu1 %v13868_v59  ;;  %1763 = vmatprep.subr.bf16.mxu0 %v13939_v63  ;;  %v13901_v25 = vcombine.high %v1046_v14, %v1050_v30  ;;  %v13900_v27 = vcombine.low %v1046_v14, %v1050_v30  ;;  %v13932_v59 = vcombine.low %v1078_v29, %v1082_v46  ;;  %v972_v63 = vld [vmem:[#allocation7 + $0x38] sm:$0xff] }
  0xfe   : > { %1788 = vmatprep.subr.bf16.mxu1 %v13877_v1  ;;  %1806 = vmatprep.mubr.bf16.mxu1 %v20383_v0  ;;  %v13941_v1 = vcombine.high %v1086_v53, %v1090_v54  ;;  %v13824_v14 = vcombine.low %v968_v62, %v972_v63  ;;  %v13895_v30 = vcombine.high %v1039_v5, %v1043_v6 }
 0x100   : > { %1764 = vmatpush1.bf16.msra.mxu0 %v13938_v2  ;;  %v13879_v2 = vcombine.high %v1023_v55, %v1027_v56  ;;  %v1087_v56 = vld [vmem:[#allocation7 + $0x3d0] sm:$0xff] }
 0x101   : > { %1789 = vmatpush1.bf16.msra.mxu1 %v13876_v3  ;;  %1815 = vmatprep.subr.bf16.mxu0 %v13823_v9  ;;  %v13940_v3 = vcombine.low %v1086_v53, %v1090_v54  ;;  %v13887_v9 = vcombine.high %v1031_v12, %v1035_v61 }
 0x102   : > { %1790 = vmatprep.subr.bf16.mxu1 %v13885_v8  ;;  %v980_v8 = vld [vmem:[#allocation7 + $0x78] sm:$0xff] }
 0x103   : > { %1766 = vmatmul.mubr.bf16.vlgmr.msra.gmra.mrb[24].mxu0 %v20383_v0  ;;  %v13833_v15 = vcombine.high %v976_v7, %v980_v8  ;;  %v13832_v21 = vcombine.low %v976_v7, %v980_v8 }
 0x104   : > { %1816 = vmatpush1.bf16.msra.mxu0 %v13822_v13  ;;  %1847 = vmatprep.mubr.bf16.mxu0 %v20383_v0  ;;  %v13886_v13 = vcombine.low %v1031_v12, %v1035_v61 }
 0x105   : > { %1791 = vmatpush1.bf16.msra.mxu1 %v13884_v10  ;;  %1817 = vmatprep.subr.bf16.mxu0 %v13831_v18  ;;  %v13825_v10 = vcombine.high %v968_v62, %v972_v63  ;;  %v984_v18 = vld [vmem:[#allocation7 + $0x98] sm:$0xff] }
 0x106   : > { %1792 = vmatprep.subr.bf16.mxu1 %v13893_v17  ;;  %v1051_v17 = vld [vmem:[#allocation7 + $0x2b0] sm:$0xff]  ;;  %v1032_v63 = vld [vmem:[#allocation7 + $0x218] sm:$0xff] }
 0x107   : > { %v13903_v22 = vcombine.high %v1047_v16, %v1051_v17 }
 0x108   : > { %1818 = vmatpush1.bf16.msra.mxu0 %v13830_v20  ;;  %v13894_v20 = vcombine.low %v1039_v5, %v1043_v6  ;;  %v1040_v5 = vld [vmem:[#allocation7 + $0x258] sm:$0xff] }
 0x109   : > { %1793 = vmatpush1.bf16.msra.mxu1 %v13892_v19  ;;  %1819 = vmatprep.subr.bf16.mxu0 %v13839_v26  ;;  %v988_v19 = vld [vmem:[#allocation7 + $0xb8] sm:$0xff] }
 0x10a   : > { %1794 = vmatprep.subr.bf16.mxu1 %v13901_v25  ;;  %v13841_v23 = vcombine.high %v984_v18, %v988_v19  ;;  %v1059_v25 = vld [vmem:[#allocation7 + $0x2f0] sm:$0xff]  ;;  %v992_v26 = vld [vmem:[#allocation7 + $0xd8] sm:$0xff]  ;;  %v13840_v11 = vcombine.low %v984_v18, %v988_v19 }
 0x10b   : > { %v13911_v31 = vcombine.high %v1055_v24, %v1059_v25  ;;  %v1044_v6 = vld [vmem:[#allocation7 + $0x278] sm:$0xff] }
 0x10c   : > { %1820 = vmatpush1.bf16.msra.mxu0 %v13838_v28  ;;  %v13902_v28 = vcombine.low %v1047_v16, %v1051_v17  ;;  %v13897_v8 = vcombine.high %v1040_v5, %v1044_v6  ;;  %v1064_v18 = vld [vmem:[#allocation7 + $0x318] sm:$0xff] }
 0x10d   : > { %1795 = vmatpush1.bf16.msra.mxu1 %v13900_v27  ;;  %1821 = vmatprep.subr.bf16.mxu0 %v13847_v35  ;;  %v996_v27 = vld [vmem:[#allocation7 + $0xf8] sm:$0xff] }
 0x10e   : > { %1796 = vmatprep.subr.bf16.mxu1 %v13909_v34  ;;  %v13849_v32 = vcombine.high %v992_v26, %v996_v27  ;;  %v1067_v34 = vld [vmem:[#allocation7 + $0x330] sm:$0xff]  ;;  %v1000_v35 = vld [vmem:[#allocation7 + $0x118] sm:$0xff]  ;;  %v13848_v38 = vcombine.low %v992_v26, %v996_v27 }
 0x10f   : > { %v13919_v39 = vcombine.high %v1063_v33, %v1067_v34  ;;  %v1068_v19 = vld [vmem:[#allocation7 + $0x338] sm:$0xff] }
 0x110   : > { %1822 = vmatpush1.bf16.msra.mxu0 %v13846_v37  ;;  %v13910_v37 = vcombine.low %v1055_v24, %v1059_v25  ;;  %v13920_v24 = vcombine.low %v1064_v18, %v1068_v19  ;;  %v1080_v26 = vld [vmem:[#allocation7 + $0x398] sm:$0xff] }
 0x111   : > { %1797 = vmatpush1.bf16.msra.mxu1 %v13908_v36  ;;  %1823 = vmatprep.subr.bf16.mxu0 %v13855_v43  ;;  %v1004_v36 = vld [vmem:[#allocation7 + $0x138] sm:$0xff] }
 0x112   : > { %1798 = vmatprep.subr.bf16.mxu1 %v13917_v42  ;;  %v13857_v40 = vcombine.high %v1000_v35, %v1004_v36  ;;  %v1075_v42 = vld [vmem:[#allocation7 + $0x370] sm:$0xff]  ;;  %v1008_v43 = vld [vmem:[#allocation7 + $0x158] sm:$0xff]  ;;  %v13856_v29 = vcombine.low %v1000_v35, %v1004_v36  ;;  %v508_v36 = vlaneseq }
 0x113   : > { %v13927_v46 = vcombine.high %v1071_v41, %v1075_v42  ;;  %v1084_v27 = vld [vmem:[#allocation7 + $0x3b8] sm:$0xff] }
 0x114   : > { %1824 = vmatpush1.bf16.msra.mxu0 %v13854_v45  ;;  %v13918_v45 = vcombine.low %v1063_v33, %v1067_v34  ;;  %v13936_v33 = vcombine.low %v1080_v26, %v1084_v27 }
 0x115   : > { %1799 = vmatpush1.bf16.msra.mxu1 %v13916_v44  ;;  %1825 = vmatprep.subr.bf16.mxu0 %v13863_v50  ;;  %v1012_v44 = vld [vmem:[#allocation7 + $0x178] sm:$0xff] }
 0x116   : > { %1800 = vmatprep.subr.bf16.mxu1 %v13925_v49  ;;  %v13865_v47 = vcombine.high %v1008_v43, %v1012_v44  ;;  %v1083_v49 = vld [vmem:[#allocation7 + $0x3b0] sm:$0xff]  ;;  %v1016_v50 = vld [vmem:[#allocation7 + $0x198] sm:$0xff]  ;;  %v13864_v53 = vcombine.low %v1008_v43, %v1012_v44 }
 0x117   : > { %v13935_v54 = vcombine.high %v1079_v48, %v1083_v49 }
 0x118   : > { %1826 = vmatpush1.bf16.msra.mxu0 %v13862_v52  ;;  %v13926_v52 = vcombine.low %v1071_v41, %v1075_v42 }
 0x119   : > { %1801 = vmatpush1.bf16.msra.mxu1 %v13924_v51  ;;  %1827 = vmatprep.subr.bf16.mxu0 %v13871_v58  ;;  %v1020_v51 = vld [vmem:[#allocation7 + $0x1b8] sm:$0xff] }
 0x11a   : > { %1802 = vmatprep.subr.bf16.mxu1 %v13933_v57  ;;  %v13873_v55 = vcombine.high %v1016_v50, %v1020_v51  ;;  %v1091_v57 = vld [vmem:[#allocation7 + $0x3f0] sm:$0xff]  ;;  %v1024_v58 = vld [vmem:[#allocation7 + $0x1d8] sm:$0xff]  ;;  %v13872_v12 = vcombine.low %v1016_v50, %v1020_v51 }
 0x11b   : > { %v13943_v61 = vcombine.high %v1087_v56, %v1091_v57 }
 0x11c   : > { %1828 = vmatpush1.bf16.msra.mxu0 %v13870_v60  ;;  %v13934_v60 = vcombine.low %v1079_v48, %v1083_v49 }
 0x11d   : > { %1803 = vmatpush1.bf16.msra.mxu1 %v13932_v59  ;;  %1829 = vmatprep.subr.bf16.mxu0 %v13879_v2  ;;  %v1028_v59 = vld [vmem:[#allocation7 + $0x1f8] sm:$0xff]  ;;  %v13942_v2 = vcombine.low %v1087_v56, %v1091_v57 }
 0x11e   : > { %1804 = vmatprep.subr.bf16.mxu1 %v13941_v1  ;;  %v13881_v62 = vcombine.high %v1024_v58, %v1028_v59  ;;  %v1036_v1 = vld [vmem:[#allocation7 + $0x238] sm:$0xff] }
 0x11f   : > { %v13888_v7 = vcombine.low %v1032_v63, %v1036_v1 }
 0x120   : > { %1830 = vmatpush1.bf16.msra.mxu0 %v13878_v4  ;;  %v13889_v4 = vcombine.high %v1032_v63, %v1036_v1 }
 0x121   : > { %1805 = vmatpush1.bf16.msra.mxu1 %v13940_v3  ;;  %1831 = vmatprep.subr.bf16.mxu0 %v13887_v9  ;;  %v13880_v3 = vcombine.low %v1024_v58, %v1028_v59  ;;  %v1048_v9 = vld [vmem:[#allocation7 + $0x298] sm:$0xff] }
 0x122   : > { %1856 = vmatprep.subr.bf16.mxu1 %v13825_v10  ;;  %v1052_v10 = vld [vmem:[#allocation7 + $0x2b8] sm:$0xff] }
 0x123   : > { %v13904_v16 = vcombine.low %v1048_v9, %v1052_v10 }
 0x124   : > { %1807 = vmatmul.mubr.bf16.vlgmr.msra.gmra.mrb[40].mxu1 %v20383_v0  ;;  %1832 = vmatpush1.bf16.msra.mxu0 %v13886_v13  ;;  %v13896_v13 = vcombine.low %v1040_v5, %v1044_v6 }
 0x125   : > { %1857 = vmatpush1.bf16.msra.mxu1 %v13824_v14  ;;  %1833 = vmatprep.subr.bf16.mxu0 %v13895_v30  ;;  %v13905_v14 = vcombine.high %v1048_v9, %v1052_v10  ;;  %v1056_v30 = vld [vmem:[#allocation7 + $0x2d8] sm:$0xff] }
 0x126   : > { %1858 = vmatprep.subr.bf16.mxu1 %v13833_v15  ;;  %1888 = vmatprep.mubr.bf16.mxu1 %v20383_v0  ;;  %v1060_v15 = vld [vmem:[#allocation7 + $0x2f8] sm:$0xff] }
 0x127   : > { %v13913_v17 = vcombine.high %v1056_v30, %v1060_v15 }
 0x128   : > { %1834 = vmatpush1.bf16.msra.mxu0 %v13894_v20  ;;  %v13912_v20 = vcombine.low %v1056_v30, %v1060_v15  ;;  %v1965_v30 = vld [vmem:[#allocation7] sm:$0xff] }
 0x129   : > { %1859 = vmatpush1.bf16.msra.mxu1 %v13832_v21  ;;  %1835 = vmatprep.subr.bf16.mxu0 %v13903_v22  ;;  %v13921_v21 = vcombine.high %v1064_v18, %v1068_v19  ;;  %v1072_v22 = vld [vmem:[#allocation7 + $0x358] sm:$0xff]  ;;  %v1969_v15 = vld [vmem:[#allocation7 + $0x20] sm:$0xff] }
 0x12a   : > { %1860 = vmatprep.subr.bf16.mxu1 %v13841_v23  ;;  %v1076_v23 = vld [vmem:[#allocation7 + $0x378] sm:$0xff] }
 0x12b   : > { %v13929_v25 = vcombine.high %v1072_v22, %v1076_v23 }
 0x12c   : > { %1836 = vmatpush1.bf16.msra.mxu0 %v13902_v28  ;;  %v13928_v28 = vcombine.low %v1072_v22, %v1076_v23 }
 0x12d   : > { %1861 = vmatpush1.bf16.msra.mxu1 %v13840_v11  ;;  %1837 = vmatprep.subr.bf16.mxu0 %v13911_v31  ;;  %v13937_v11 = vcombine.high %v1080_v26, %v1084_v27  ;;  %v1088_v31 = vld [vmem:[#allocation7 + $0x3d8] sm:$0xff] }
 0x12e   : > { %1862 = vmatprep.subr.bf16.mxu1 %v13849_v32  ;;  %v1092_v32 = vld [vmem:[#allocation7 + $0x3f8] sm:$0xff] }
 0x12f   : > { %v13945_v34 = vcombine.high %v1088_v31, %v1092_v32  ;;  %v13944_v35 = vcombine.low %v1088_v31, %v1092_v32 }
 0x130   : > { %1838 = vmatpush1.bf16.msra.mxu0 %v13910_v37  ;;  %v16910_v37 = vshrl.u32 %v508_v36, 7  ;;  %v1973_v36 = vld [vmem:[#allocation7 + $0x40] sm:$0xff] }
 0x131   : > { %1863 = vmatpush1.bf16.msra.mxu1 %v13848_v38  ;;  %1839 = vmatprep.subr.bf16.mxu0 %v13919_v39  ;;  %v16918_v39 = vld [vmem:[%s20358_s2] sm:$0xff] }
 0x132   : > { %1864 = vmatprep.subr.bf16.mxu1 %v13857_v40  ;;  %v16913_v38 = vsub.s32 0, %v16910_v37  ;;  %v16921_v40 = vsub.s32 1, %v16910_v37  ;;  %v526_v6 = vsub.s32 4, %v16910_v37  ;;  %v530_v9 = vsub.s32 5, %v16910_v37 }
 0x133   : > { %v16980_v10 = vsub.s32 2, %v16910_v37 }
 0x134   : > { %1840 = vmatpush1.bf16.msra.mxu0 %v13918_v45  ;;  %20654 = vst [vmem:[#allocation28_spill] sm:$0xff] %v16913_v38  ;;  %20655 = vst [vmem:[#allocation29_spill] sm:$0xff] %v16921_v40  ;;  %v16925_v41 = vrot.slane %v16918_v39, %v16913_v38  ;;  %v16929_v42 = vrot.slane %v16918_v39, %v16921_v40  ;;  %v16993_v19 = vrot.slane %v16918_v39, %v530_v9  ;;  %v1986_v9 = vld [vmem:[#allocation7 + $0xa8] sm:$0xff] }
 0x135   : > { %1865 = vmatpush1.bf16.msra.mxu1 %v13856_v29  ;;  %1841 = vmatprep.subr.bf16.mxu0 %v13927_v46  ;;  %20670 = vst [vmem:[#allocation44_spill] sm:$0xff] %v16980_v10  ;;  %v16999_v22 = vrot.slane %v16918_v39, %v16980_v10  ;;  %v1998_v10 = vld [vmem:[#allocation7 + $0x108] sm:$0xff] }
 0x136   : > { %1866 = vmatprep.subr.bf16.mxu1 %v13865_v47 }
 0x138   : > { %1842 = vmatpush1.bf16.msra.mxu0 %v13926_v52 }
 0x139   : > { %1867 = vmatpush1.bf16.msra.mxu1 %v13864_v53  ;;  %1843 = vmatprep.subr.bf16.mxu0 %v13935_v54 }
 0x13a   : > { %1868 = vmatprep.subr.bf16.mxu1 %v13873_v55 }
 0x13c   : > { %1844 = vmatpush1.bf16.msra.mxu0 %v13934_v60 }
 0x13d   : > { %1869 = vmatpush1.bf16.msra.mxu1 %v13872_v12  ;;  %1845 = vmatprep.subr.bf16.mxu0 %v13943_v61 }
 0x13e   : > { %1870 = vmatprep.subr.bf16.mxu1 %v13881_v62 }
 0x140   : > { %1846 = vmatpush1.bf16.msra.mxu0 %v13942_v2 }
 0x141   : > { %1871 = vmatpush1.bf16.msra.mxu1 %v13880_v3 }
 0x142   : > { %1872 = vmatprep.subr.bf16.mxu1 %v13889_v4 }
 0x143   : > { %1848 = vmatmul.mubr.bf16.vlgmr.msra.gmra.mrb[28].mxu0 %v20383_v0 }
 0x145   : > { %1873 = vmatpush1.bf16.msra.mxu1 %v13888_v7 }
 0x146   : > { %1874 = vmatprep.subr.bf16.mxu1 %v13897_v8 }
 0x149   : > { %1875 = vmatpush1.bf16.msra.mxu1 %v13896_v13  ;;  %v16983_v13 = vsub.s32 3, %v16910_v37 }
 0x14a   : > { %1876 = vmatprep.subr.bf16.mxu1 %v13905_v14  ;;  %v16986_v14 = vrot.slane %v16918_v39, %v526_v6 }
 0x14b   : > { %20671 = vst [vmem:[#allocation45_spill] sm:$0xff] %v16983_v13  ;;  %v17011_v27 = vrot.slane %v16918_v39, %v16983_v13 }
 0x14d   : > { %1877 = vmatpush1.bf16.msra.mxu1 %v13904_v16  ;;  %v1966_v16 = vld [vmem:[#allocation7 + $0x8] sm:$0xff] }
 0x14e   : > { %1878 = vmatprep.subr.bf16.mxu1 %v13913_v17 }
 0x151   : > { %1879 = vmatpush1.bf16.msra.mxu1 %v13912_v20  ;;  %v16995_v20 = vcombine.high %v1965_v30, %v1969_v15 }
 0x152   : > { %1880 = vmatprep.subr.bf16.mxu1 %v13921_v21  ;;  %v1970_v21 = vld [vmem:[#allocation7 + $0x28] sm:$0xff] }
 0x153   : > { %v17007_v26 = vcombine.low %v1966_v16, %v1970_v21  ;;  %2733 = vmatprep.subr.bf16.mxu0 %v16995_v20  ;;  %v17014_v31 = vcombine.high %v1966_v16, %v1970_v21 }
 0x155   : > { %1881 = vmatpush1.bf16.msra.mxu1 %v13920_v24 }
 0x156   : > { %1882 = vmatprep.subr.bf16.mxu1 %v13929_v25  ;;  %v17005_v25 = vcombine.low %v1965_v30, %v1969_v15 }
 0x158   : > { %2734 = vmatpush1.bf16.msra.mxu0 %v17005_v25 }
 0x159   : > { %1883 = vmatpush1.bf16.msra.mxu1 %v13928_v28 }
 0x15a   : > { %1884 = vmatprep.subr.bf16.mxu1 %v13937_v11 }
 0x15d   : > { %1885 = vmatpush1.bf16.msra.mxu1 %v13936_v33 }
 0x15e   : > { %1886 = vmatprep.subr.bf16.mxu1 %v13945_v34 }
 0x161   : > { %1887 = vmatpush1.bf16.msra.mxu1 %v13944_v35 }
 0x162   : > { %2774 = vmatprep.subr.bf16.mxu1 %v17014_v31 }
 0x164   : > { %1889 = vmatmul.mubr.bf16.vlgmr.msra.gmra.mrb[44].mxu1 %v20383_v0  ;;  %v1990_v0 = vld [vmem:[#allocation7 + $0xc8] sm:$0xff] }
 0x165   : > { %2775 = vmatpush1.bf16.msra.mxu1 %v17007_v26 }
 0x186   : > { %v16931_v44 = vpop.f32.mrb[0].mxu0 }
 0x187   : > { %v655_v43 = vpop.f32.mrb[0].mxu1  ;;  %v16936_v46 = vpop.f32.mrb[1].mxu0 }
 0x188   : > { %v16934_v45 = vadd.f32 %v655_v43, %v16925_v41  ;;  %v657_v29 = vpop.f32.mrb[1].mxu1  ;;  %v639_v49 = vpop.f32.mrb[2].mxu0  ;;  %v1977_v43 = vld [vmem:[#allocation7 + $0x60] sm:$0xff] }
 0x189   : > { %v16939_v47 = vadd.f32 %v657_v29, %v16929_v42  ;;  %v659_v48 = vpop.f32.mrb[2].mxu1  ;;  %v16945_v52 = vadd.f32 %v639_v49, %v16925_v41  ;;  %v641_v53 = vpop.f32.mrb[3].mxu0  ;;  %v1974_v29 = vld [vmem:[#allocation7 + $0x48] sm:$0xff] }
 0x18a   : > { %20656 = vst [vmem:[#allocation30_spill] sm:$0xff] %v16934_v45  ;;  %v16942_v50 = vadd.f32 %v659_v48, %v16925_v41  ;;  %v661_v51 = vpop.f32.mrb[3].mxu1  ;;  %v16951_v55 = vadd.f32 %v641_v53, %v16929_v42  ;;  %v1978_v53 = vld [vmem:[#allocation7 + $0x68] sm:$0xff] }
 0x18b   : > { %20657 = vst [vmem:[#allocation31_spill] sm:$0xff] %v16939_v47  ;;  %20659 = vst [vmem:[#allocation33_spill] sm:$0xff] %v16945_v52  ;;  %v16948_v54 = vadd.f32 %v661_v51, %v16929_v42  ;;  %v17030_v51 = vcombine.high %v1973_v36, %v1977_v43 }
 0x18c   : > { %20658 = vst [vmem:[#allocation32_spill] sm:$0xff] %v16942_v50  ;;  %20661 = vst [vmem:[#allocation35_spill] sm:$0xff] %v16951_v55  ;;  %v2038_v55 = vld [vmem:[#allocation7 + $0x248] sm:$0xff] }
 0x18d   : > { %20660 = vst [vmem:[#allocation34_spill] sm:$0xff] %v16948_v54  ;;  %2735 = vmatprep.subr.bf16.mxu0 %v17030_v51 }
 0x18e   : > { %v645_v57 = vpop.f32.mrb[4].mxu0 }
 0x18f   : > { %v665_v56 = vpop.f32.mrb[4].mxu1  ;;  %v16957_v60 = vadd.f32 %v645_v57, %v16925_v41  ;;  %v647_v12 = vpop.f32.mrb[5].mxu0  ;;  %v17035_v57 = vcombine.low %v1974_v29, %v1978_v53 }
 0x190   : > { %v16954_v58 = vadd.f32 %v665_v56, %v16925_v41  ;;  %v667_v59 = vpop.f32.mrb[5].mxu1  ;;  %v16963_v63 = vadd.f32 %v647_v12, %v16929_v42  ;;  %v649_v1 = vpop.f32.mrb[6].mxu0  ;;  %v17033_v56 = vcombine.low %v1973_v36, %v1977_v43  ;;  %v1981_v12 = vld [vmem:[#allocation7 + $0x80] sm:$0xff] }
 0x191   : > { %20663 = vst [vmem:[#allocation37_spill] sm:$0xff] %v16957_v60  ;;  %v16960_v61 = vadd.f32 %v667_v59, %v16929_v42  ;;  %v669_v62 = vpop.f32.mrb[6].mxu1  ;;  %v16969_v4 = vadd.f32 %v649_v1, %v16925_v41  ;;  %v651_v5 = vpop.f32.mrb[7].mxu0  ;;  %v17037_v59 = vcombine.high %v1974_v29, %v1978_v53  ;;  %v1982_v1 = vld [vmem:[#allocation7 + $0x88] sm:$0xff] }
 0x192   : > { %20662 = vst [vmem:[#allocation36_spill] sm:$0xff] %v16954_v58  ;;  %20665 = vst [vmem:[#allocation39_spill] sm:$0xff] %v16963_v63  ;;  %v16966_v2 = vadd.f32 %v669_v62, %v16925_v41  ;;  %v671_v3 = vpop.f32.mrb[7].mxu1  ;;  %v16976_v8 = vadd.f32 %v651_v5, %v16929_v42  ;;  %2736 = vmatpush1.bf16.msra.mxu0 %v17033_v56  ;;  %v1985_v62 = vld [vmem:[#allocation7 + $0xa0] sm:$0xff]  ;;  %v17062_v29 = vcombine.high %v1982_v1, %v1986_v9 }
 0x193   : > { %20664 = vst [vmem:[#allocation38_spill] sm:$0xff] %v16960_v61  ;;  %20667 = vst [vmem:[#allocation41_spill] sm:$0xff] %v16969_v4  ;;  %v16973_v7 = vadd.f32 %v671_v3, %v16929_v42  ;;  %2776 = vmatprep.subr.bf16.mxu1 %v17037_v59  ;;  %v17042_v6 = vcombine.high %v1981_v12, %v1985_v62  ;;  %v2002_v61 = vld [vmem:[#allocation7 + $0x128] sm:$0xff] }
 0x194   : > { %20666 = vst [vmem:[#allocation40_spill] sm:$0xff] %v16966_v2  ;;  %20669 = vst [vmem:[#allocation43_spill] sm:$0xff] %v16976_v8  ;;  %2777 = vmatpush1.bf16.msra.mxu1 %v17035_v57  ;;  %v17101_v54 = vcombine.low %v1998_v10, %v2002_v61  ;;  %v2022_v8 = vld [vmem:[#allocation7 + $0x1c8] sm:$0xff] }
 0x195   : > { %20668 = vst [vmem:[#allocation42_spill] sm:$0xff] %v16973_v7  ;;  %2737 = vmatprep.subr.bf16.mxu0 %v17042_v6  ;;  %2778 = vmatprep.subr.bf16.mxu1 %v17062_v29 }
 0x196   : > { %v16990_v18 = vpop.f32.mrb[8].mxu0 }
 0x197   : > { %v16988_v17 = vpop.f32.mrb[8].mxu1  ;;  %v17003_v24 = vpop.f32.mrb[9].mxu0 }
 0x198   : > { %v17001_v23 = vpop.f32.mrb[9].mxu1  ;;  %v785_v11 = vpop.f32.mrb[10].mxu0 }
 0x199   : > { %v712_v28 = vpop.f32.mrb[10].mxu1  ;;  %v17020_v34 = vadd.f32 %v785_v11, %v16986_v14  ;;  %v787_v35 = vpop.f32.mrb[11].mxu0  ;;  %v17053_v11 = vcombine.low %v1982_v1, %v1986_v9  ;;  %v1994_v9 = vld [vmem:[#allocation7 + $0xe8] sm:$0xff] }
 0x19a   : > { %v17017_v32 = vadd.f32 %v712_v28, %v16999_v22  ;;  %v714_v33 = vpop.f32.mrb[11].mxu1  ;;  %v17027_v49 = vadd.f32 %v787_v35, %v16993_v19  ;;  %v17051_v28 = vcombine.low %v1981_v12, %v1985_v62  ;;  %v17085_v40 = vcombine.high %v1990_v0, %v1994_v9 }
 0x19b   : > { %20673 = vst [vmem:[#allocation47_spill] sm:$0xff] %v17020_v34  ;;  %v17024_v48 = vadd.f32 %v714_v33, %v17011_v27  ;;  %2779 = vmatpush1.bf16.msra.mxu1 %v17053_v11 }
 0x19c   : > { %20672 = vst [vmem:[#allocation46_spill] sm:$0xff] %v17017_v32  ;;  %20675 = vst [vmem:[#allocation49_spill] sm:$0xff] %v17027_v49  ;;  %2738 = vmatpush1.bf16.msra.mxu0 %v17051_v28  ;;  %2780 = vmatprep.subr.bf16.mxu1 %v17085_v40  ;;  %v2045_v32 = vld [vmem:[#allocation7 + $0x280] sm:$0xff] }
 0x19d   : > { %20674 = vst [vmem:[#allocation48_spill] sm:$0xff] %v17024_v48 }
 0x19e   : > { %v791_v5 = vpop.f32.mrb[12].mxu0 }
 0x19f   : > { %v718_v3 = vpop.f32.mrb[12].mxu1  ;;  %v17048_v16 = vadd.f32 %v791_v5, %v16986_v14  ;;  %v793_v21 = vpop.f32.mrb[13].mxu0  ;;  %v1989_v5 = vld [vmem:[#allocation7 + $0xc0] sm:$0xff] }
 0x1a0   : > { %v17045_v30 = vadd.f32 %v718_v3, %v16999_v22  ;;  %v720_v15 = vpop.f32.mrb[13].mxu1  ;;  %v17059_v36 = vadd.f32 %v793_v21, %v16993_v19  ;;  %v795_v43 = vpop.f32.mrb[14].mxu0 }
 0x1a1   : > { %20677 = vst [vmem:[#allocation51_spill] sm:$0xff] %v17048_v16  ;;  %v17056_v33 = vadd.f32 %v720_v15, %v17011_v27  ;;  %v722_v35 = vpop.f32.mrb[14].mxu1  ;;  %v17068_v12 = vadd.f32 %v795_v43, %v16986_v14  ;;  %v797_v62 = vpop.f32.mrb[15].mxu0  ;;  %v1993_v15 = vld [vmem:[#allocation7 + $0xe0] sm:$0xff]  ;;  %v17083_v43 = vcombine.low %v1990_v0, %v1994_v9 }
 0x1a2   : > { %20676 = vst [vmem:[#allocation50_spill] sm:$0xff] %v17045_v30  ;;  %20679 = vst [vmem:[#allocation53_spill] sm:$0xff] %v17059_v36  ;;  %v17065_v53 = vadd.f32 %v722_v35, %v16999_v22  ;;  %v724_v3 = vpop.f32.mrb[15].mxu1  ;;  %v17075_v13 = vadd.f32 %v797_v62, %v16993_v19  ;;  %v17078_v1 = vcombine.high %v1989_v5, %v1993_v15  ;;  %v2001_v62 = vld [vmem:[#allocation7 + $0x120] sm:$0xff] }
 0x1a3   : > { %20678 = vst [vmem:[#allocation52_spill] sm:$0xff] %v17056_v33  ;;  %20681 = vst [vmem:[#allocation55_spill] sm:$0xff] %v17068_v12  ;;  %v17072_v21 = vadd.f32 %v724_v3, %v17011_v27  ;;  %v17081_v35 = vcombine.low %v1989_v5, %v1993_v15  ;;  %v1997_v3 = vld [vmem:[#allocation7 + $0x100] sm:$0xff]  ;;  %2781 = vmatpush1.bf16.msra.mxu1 %v17083_v43 }
 0x1a4   : > { %20680 = vst [vmem:[#allocation54_spill] sm:$0xff] %v17065_v53  ;;  %20683 = vst [vmem:[#allocation57_spill] sm:$0xff] %v17075_v13  ;;  %2739 = vmatprep.subr.bf16.mxu0 %v17078_v1  ;;  %v17090_v2 = vcombine.high %v1997_v3, %v2001_v62  ;;  %v17099_v58 = vcombine.low %v1997_v3, %v2001_v62  ;;  %v2006_v13 = vld [vmem:[#allocation7 + $0x148] sm:$0xff] }
 0x1a5   : > { %20682 = vst [vmem:[#allocation56_spill] sm:$0xff] %v17072_v21  ;;  %2740 = vmatpush1.bf16.msra.mxu0 %v17081_v35  ;;  %v2026_v53 = vld [vmem:[#allocation7 + $0x1e8] sm:$0xff] }
 0x1a6   : > { %v801_v7 = vpop.f32.mrb[16].mxu0  ;;  %2741 = vmatprep.subr.bf16.mxu0 %v17090_v2 }
 0x1a7   : > { %v728_v38 = vpop.f32.mrb[16].mxu1  ;;  %v17096_v0 = vadd.f32 %v801_v7, %v16986_v14  ;;  %v803_v9 = vpop.f32.mrb[17].mxu0 }
 0x1a8   : > { %v17093_v5 = vadd.f32 %v728_v38, %v16999_v22  ;;  %v730_v15 = vpop.f32.mrb[17].mxu1  ;;  %v17107_v45 = vadd.f32 %v803_v9, %v16993_v19  ;;  %v805_v38 = vpop.f32.mrb[18].mxu0 }
 0x1a9   : > { %20685 = vst [vmem:[#allocation59_spill] sm:$0xff] %v17096_v0  ;;  %v17104_v50 = vadd.f32 %v730_v15, %v17011_v27  ;;  %v732_v47 = vpop.f32.mrb[18].mxu1  ;;  %v17116_v3 = vadd.f32 %v805_v38, %v16986_v14  ;;  %v807_v62 = vpop.f32.mrb[19].mxu0  ;;  %2742 = vmatpush1.bf16.msra.mxu0 %v17099_v58  ;;  %v2005_v15 = vld [vmem:[#allocation7 + $0x140] sm:$0xff] }
 0x1aa   : > { %20684 = vst [vmem:[#allocation58_spill] sm:$0xff] %v17093_v5  ;;  %20687 = vst [vmem:[#allocation61_spill] sm:$0xff] %v17107_v45  ;;  %v17110_v5 = vcombine.high %v1998_v10, %v2002_v61  ;;  %v17113_v7 = vadd.f32 %v732_v47, %v16999_v22  ;;  %v734_v0 = vpop.f32.mrb[19].mxu1  ;;  %v17123_v45 = vadd.f32 %v807_v62, %v16993_v19  ;;  %v2010_v10 = vld [vmem:[#allocation7 + $0x168] sm:$0xff]  ;;  %v2013_v38 = vld [vmem:[#allocation7 + $0x180] sm:$0xff] }
 0x1ab   : > { %20686 = vst [vmem:[#allocation60_spill] sm:$0xff] %v17104_v50  ;;  %20689 = vst [vmem:[#allocation63_spill] sm:$0xff] %v17116_v3  ;;  %v2009_v50 = vld [vmem:[#allocation7 + $0x160] sm:$0xff]  ;;  %v17120_v9 = vadd.f32 %v734_v0, %v17011_v27  ;;  %v17133_v12 = vcombine.high %v2006_v13, %v2010_v10  ;;  %v2018_v62 = vld [vmem:[#allocation7 + $0x1a8] sm:$0xff] }
 0x1ac   : > { %20688 = vst [vmem:[#allocation62_spill] sm:$0xff] %v17113_v7  ;;  %20691 = vst [vmem:[#allocation65_spill] sm:$0xff] %v17123_v45  ;;  %2782 = vmatprep.subr.bf16.mxu1 %v17110_v5  ;;  %v17126_v47 = vcombine.low %v2005_v15, %v2009_v50  ;;  %v17128_v61 = vcombine.high %v2005_v15, %v2009_v50  ;;  %v2017_v3 = vld [vmem:[#allocation7 + $0x1a0] sm:$0xff]  ;;  %v17131_v7 = vcombine.low %v2006_v13, %v2010_v10 }
 0x1ad   : > { %20690 = vst [vmem:[#allocation64_spill] sm:$0xff] %v17120_v9  ;;  %2783 = vmatpush1.bf16.msra.mxu1 %v17101_v54  ;;  %v17135_v0 = vcombine.high %v2013_v38, %v2017_v3  ;;  %v2014_v9 = vld [vmem:[#allocation7 + $0x188] sm:$0xff]  ;;  %v2021_v45 = vld [vmem:[#allocation7 + $0x1c0] sm:$0xff]  ;;  %v17142_v15 = vcombine.low %v2013_v38, %v2017_v3 }
 0x1ae   : > { %2743 = vmatprep.subr.bf16.mxu0 %v17128_v61  ;;  %v17138_v21 = vcombine.high %v2014_v9, %v2018_v62  ;;  %v2025_v50 = vld [vmem:[#allocation7 + $0x1e0] sm:$0xff]  ;;  %2784 = vmatprep.subr.bf16.mxu1 %v17133_v12  ;;  %v811_v10 = vpop.f32.mrb[20].mxu0  ;;  %v17154_v3 = vcombine.low %v2014_v9, %v2018_v62 }
 0x1af   : > { %2744 = vmatpush1.bf16.msra.mxu0 %v17126_v47  ;;  %v738_v13 = vpop.f32.mrb[20].mxu1  ;;  %v17145_v4 = vcombine.high %v2021_v45, %v2025_v50  ;;  %v17151_v33 = vadd.f32 %v811_v10, %v16986_v14  ;;  %v813_v63 = vpop.f32.mrb[21].mxu0 }
 0x1b0   : > { %2745 = vmatprep.subr.bf16.mxu0 %v17135_v0  ;;  %v17148_v36 = vadd.f32 %v738_v13, %v16999_v22  ;;  %v740_v16 = vpop.f32.mrb[21].mxu1  ;;  %v17160_v60 = vadd.f32 %v813_v63, %v16993_v19  ;;  %v815_v49 = vpop.f32.mrb[22].mxu0  ;;  %v17163_v13 = vcombine.high %v2022_v8, %v2026_v53 }
 0x1b1   : > { %20693 = vst [vmem:[#allocation67_spill] sm:$0xff] %v17151_v33  ;;  %2785 = vmatpush1.bf16.msra.mxu1 %v17131_v7  ;;  %v17157_v38 = vadd.f32 %v740_v16, %v17011_v27  ;;  %v742_v30 = vpop.f32.mrb[22].mxu1  ;;  %v817_v9 = vpop.f32.mrb[23].mxu0  ;;  %v17172_v16 = vcombine.low %v2021_v45, %v2025_v50  ;;  %v2029_v45 = vld [vmem:[#allocation7 + $0x200] sm:$0xff]  ;;  %v2030_v50 = vld [vmem:[#allocation7 + $0x208] sm:$0xff] }
 0x1b2   : > { %20692 = vst [vmem:[#allocation66_spill] sm:$0xff] %v17148_v36  ;;  %20695 = vst [vmem:[#allocation69_spill] sm:$0xff] %v17160_v60  ;;  %2786 = vmatprep.subr.bf16.mxu1 %v17138_v21  ;;  %v17166_v10 = vadd.f32 %v742_v30, %v16999_v22  ;;  %v744_v33 = vpop.f32.mrb[23].mxu1  ;;  %v17169_v36 = vadd.f32 %v815_v49, %v16986_v14  ;;  %v17178_v62 = vadd.f32 %v817_v9, %v16993_v19 }
 0x1b3   : > { %20694 = vst [vmem:[#allocation68_spill] sm:$0xff] %v17157_v38  ;;  %20696 = vst [vmem:[#allocation70_spill] sm:$0xff] %v17163_v13  ;;  %2746 = vmatpush1.bf16.msra.mxu0 %v17142_v15  ;;  %v17175_v63 = vadd.f32 %v744_v33, %v17011_v27  ;;  %v534_v30 = vsub.s32 6, %v16910_v37  ;;  %v538_v49 = vsub.s32 7, %v16910_v37  ;;  %v2033_v33 = vld [vmem:[#allocation7 + $0x220] sm:$0xff] }
 0x1b4   : > { %20697 = vst [vmem:[#allocation71_spill] sm:$0xff] %v17166_v10  ;;  %20698 = vst [vmem:[#allocation72_spill] sm:$0xff] %v17169_v36  ;;  %2747 = vmatprep.subr.bf16.mxu0 %v17145_v4  ;;  %v17183_v10 = vcombine.low %v2022_v8, %v2026_v53  ;;  %v17190_v9 = vcombine.high %v2029_v45, %v2033_v33  ;;  %v17198_v37 = vcombine.low %v2029_v45, %v2033_v33  ;;  %v2037_v45 = vld [vmem:[#allocation7 + $0x240] sm:$0xff] }
 0x1b5   : > { %20699 = vst [vmem:[#allocation73_spill] sm:$0xff] %v17172_v16  ;;  %20700 = vst [vmem:[#allocation74_spill] sm:$0xff] %v17175_v63  ;;  %2787 = vmatpush1.bf16.msra.mxu1 %v17154_v3  ;;  %v17193_v63 = vrot.slane %v16918_v39, %v534_v30  ;;  %v17205_v38 = vrot.slane %v16918_v39, %v538_v49  ;;  %v2041_v33 = vld [vmem:[#allocation7 + $0x260] sm:$0xff]  ;;  %v2042_v39 = vld [vmem:[#allocation7 + $0x268] sm:$0xff] }
 0x1b6   : > { %20701 = vst [vmem:[#allocation75_spill] sm:$0xff] %v17178_v62  ;;  %20702 = vst [vmem:[#allocation76_spill] sm:$0xff] %v17183_v10  ;;  %2788 = vmatprep.subr.bf16.mxu1 %v17163_v13  ;;  %v2034_v62 = vld [vmem:[#allocation7 + $0x228] sm:$0xff]  ;;  %v17219_v49 = vcombine.low %v2037_v45, %v2041_v33 }
 0x1b7   : > { %2748 = vmatpush1.bf16.msra.mxu0 %v17172_v16  ;;  %v17188_v36 = vpop.f32.mrb[24].mxu1  ;;  %20703 = vst [vmem:[#allocation77_spill] sm:$0xff] %v17190_v9  ;;  %20704 = vst [vmem:[#allocation78_spill] sm:$0xff] %v17198_v37  ;;  %v17200_v8 = vcombine.low %v2030_v50, %v2034_v62  ;;  %v17202_v53 = vcombine.high %v2030_v50, %v2034_v62  ;;  %v17216_v50 = vcombine.high %v2037_v45, %v2041_v33 }
 0x1b8   : > { %v17195_v60 = vpop.f32.mrb[25].mxu1  ;;  %2749 = vmatprep.subr.bf16.mxu0 %v17190_v9  ;;  %20710 = vst [vmem:[#allocation84_spill] sm:$0xff] %v17219_v49  ;;  %v2082_v9 = vld [vmem:[#allocation7 + $0x3a8] sm:$0xff] }
 0x1b9   : > { %2789 = vmatpush1.bf16.msra.mxu1 %v17183_v10  ;;  %20705 = vst [vmem:[#allocation79_spill] sm:$0xff] %v17200_v8  ;;  %20706 = vst [vmem:[#allocation80_spill] sm:$0xff] %v17202_v53  ;;  %v858_v34 = vpop.f32.mrb[26].mxu1  ;;  %v2085_v10 = vld [vmem:[#allocation7 + $0x3c0] sm:$0xff] }
 0x1ba   : > { %v17209_v48 = vadd.f32 %v858_v34, %v17193_v63  ;;  %v860_v30 = vpop.f32.mrb[27].mxu1  ;;  %2790 = vmatprep.subr.bf16.mxu1 %v17202_v53  ;;  %20709 = vst [vmem:[#allocation83_spill] sm:$0xff] %v17216_v50  ;;  %v17221_v34 = vcombine.low %v2038_v55, %v2042_v39  ;;  %v2050_v53 = vld [vmem:[#allocation7 + $0x2a8] sm:$0xff] }
 0x1bb   : > { %2750 = vmatpush1.bf16.msra.mxu0 %v17198_v37  ;;  %v17214_v62 = vadd.f32 %v860_v30, %v17205_v38  ;;  %v2049_v30 = vld [vmem:[#allocation7 + $0x2a0] sm:$0xff] }
 0x1bc   : > { %20707 = vst [vmem:[#allocation81_spill] sm:$0xff] %v17209_v48  ;;  %20711 = vst [vmem:[#allocation85_spill] sm:$0xff] %v17221_v34  ;;  %v17223_v48 = vcombine.high %v2038_v55, %v2042_v39  ;;  %2751 = vmatprep.subr.bf16.mxu0 %v17216_v50  ;;  %v17228_v37 = vcombine.high %v2045_v32, %v2049_v30  ;;  %v17234_v55 = vcombine.low %v2045_v32, %v2049_v30  ;;  %v2053_v32 = vld [vmem:[#allocation7 + $0x2c0] sm:$0xff] }
 0x1bd   : > { %20708 = vst [vmem:[#allocation82_spill] sm:$0xff] %v17214_v62  ;;  %2791 = vmatpush1.bf16.msra.mxu1 %v17200_v8  ;;  %v2046_v62 = vld [vmem:[#allocation7 + $0x288] sm:$0xff]  ;;  %v2057_v30 = vld [vmem:[#allocation7 + $0x2e0] sm:$0xff] }
 0x1be   : > { %20712 = vst [vmem:[#allocation86_spill] sm:$0xff] %v17223_v48  ;;  %2792 = vmatprep.subr.bf16.mxu1 %v17223_v48  ;;  %20713 = vst [vmem:[#allocation87_spill] sm:$0xff] %v17228_v37  ;;  %v17236_v39 = vcombine.low %v2046_v62, %v2050_v53  ;;  %v17238_v48 = vcombine.high %v2046_v62, %v2050_v53  ;;  %v17252_v62 = vcombine.high %v2053_v32, %v2057_v30 }
 0x1bf   : > { %2752 = vmatpush1.bf16.msra.mxu0 %v17219_v49  ;;  %v864_v52 = vpop.f32.mrb[28].mxu1  ;;  %20715 = vst [vmem:[#allocation89_spill] sm:$0xff] %v17234_v55 }
 0x1c0   : > { %v17231_v45 = vadd.f32 %v864_v52, %v17193_v63  ;;  %v866_v33 = vpop.f32.mrb[29].mxu1  ;;  %20716 = vst [vmem:[#allocation90_spill] sm:$0xff] %v17236_v39  ;;  %20717 = vst [vmem:[#allocation91_spill] sm:$0xff] %v17238_v48  ;;  %2753 = vmatprep.subr.bf16.mxu0 %v17228_v37 }
 0x1c1   : > { %2793 = vmatpush1.bf16.msra.mxu1 %v17221_v34  ;;  %v17241_v49 = vadd.f32 %v866_v33, %v17205_v38  ;;  %v868_v50 = vpop.f32.mrb[30].mxu1  ;;  %20721 = vst [vmem:[#allocation95_spill] sm:$0xff] %v17252_v62  ;;  %v2058_v33 = vld [vmem:[#allocation7 + $0x2e8] sm:$0xff] }
 0x1c2   : > { %20714 = vst [vmem:[#allocation88_spill] sm:$0xff] %v17231_v45  ;;  %v17245_v8 = vadd.f32 %v868_v50, %v17193_v63  ;;  %v870_v52 = vpop.f32.mrb[31].mxu1  ;;  %2794 = vmatprep.subr.bf16.mxu1 %v17238_v48  ;;  %v2054_v45 = vld [vmem:[#allocation7 + $0x2c8] sm:$0xff] }
 0x1c3   : > { %20718 = vst [vmem:[#allocation92_spill] sm:$0xff] %v17241_v49  ;;  %2754 = vmatpush1.bf16.msra.mxu0 %v17234_v55  ;;  %v17250_v53 = vadd.f32 %v870_v52, %v17205_v38  ;;  %v17255_v49 = vcombine.low %v2053_v32, %v2057_v30  ;;  %v17257_v50 = vcombine.low %v2054_v45, %v2058_v33  ;;  %v2061_v55 = vld [vmem:[#allocation7 + $0x300] sm:$0xff]  ;;  %v2066_v34 = vld [vmem:[#allocation7 + $0x328] sm:$0xff] }
 0x1c4   : > { %20719 = vst [vmem:[#allocation93_spill] sm:$0xff] %v17245_v8  ;;  %v17259_v8 = vcombine.high %v2054_v45, %v2058_v33  ;;  %2755 = vmatprep.subr.bf16.mxu0 %v17252_v62  ;;  %v2065_v52 = vld [vmem:[#allocation7 + $0x320] sm:$0xff] }
 0x1c5   : > { %20720 = vst [vmem:[#allocation94_spill] sm:$0xff] %v17250_v53  ;;  %2795 = vmatpush1.bf16.msra.mxu1 %v17236_v39  ;;  %20722 = vst [vmem:[#allocation96_spill] sm:$0xff] %v17255_v49  ;;  %v2062_v53 = vld [vmem:[#allocation7 + $0x308] sm:$0xff]  ;;  %v17264_v37 = vcombine.high %v2061_v55, %v2065_v52  ;;  %v17270_v45 = vcombine.low %v2061_v55, %v2065_v52  ;;  %v2069_v55 = vld [vmem:[#allocation7 + $0x340] sm:$0xff] }
 0x1c6   : > { %20723 = vst [vmem:[#allocation97_spill] sm:$0xff] %v17257_v50  ;;  %20724 = vst [vmem:[#allocation98_spill] sm:$0xff] %v17259_v8  ;;  %2796 = vmatprep.subr.bf16.mxu1 %v17259_v8  ;;  %v17272_v33 = vcombine.low %v2062_v53, %v2066_v34  ;;  %v17274_v8 = vcombine.high %v2062_v53, %v2066_v34  ;;  %v2073_v52 = vld [vmem:[#allocation7 + $0x360] sm:$0xff] }
 0x1c7   : > { %2756 = vmatpush1.bf16.msra.mxu0 %v17255_v49  ;;  %v874_v48 = vpop.f32.mrb[32].mxu1  ;;  %20725 = vst [vmem:[#allocation99_spill] sm:$0xff] %v17264_v37  ;;  %20727 = vst [vmem:[#allocation101_spill] sm:$0xff] %v17270_v45  ;;  %v17288_v53 = vcombine.low %v2069_v55, %v2073_v52 }
 0x1c8   : > { %v17267_v32 = vadd.f32 %v874_v48, %v17193_v63  ;;  %v876_v30 = vpop.f32.mrb[33].mxu1  ;;  %20728 = vst [vmem:[#allocation102_spill] sm:$0xff] %v17272_v33  ;;  %20729 = vst [vmem:[#allocation103_spill] sm:$0xff] %v17274_v8  ;;  %2757 = vmatprep.subr.bf16.mxu0 %v17264_v37  ;;  %v2077_v37 = vld [vmem:[#allocation7 + $0x380] sm:$0xff] }
 0x1c9   : > { %2797 = vmatpush1.bf16.msra.mxu1 %v17257_v50  ;;  %v17277_v49 = vadd.f32 %v876_v30, %v17205_v38  ;;  %v878_v62 = vpop.f32.mrb[34].mxu1  ;;  %20733 = vst [vmem:[#allocation107_spill] sm:$0xff] %v17288_v53  ;;  %v17290_v30 = vcombine.high %v2069_v55, %v2073_v52  ;;  %v2081_v50 = vld [vmem:[#allocation7 + $0x3a0] sm:$0xff] }
 0x1ca   : > { %20726 = vst [vmem:[#allocation100_spill] sm:$0xff] %v17267_v32  ;;  %v17281_v39 = vadd.f32 %v878_v62, %v17193_v63  ;;  %v880_v48 = vpop.f32.mrb[35].mxu1  ;;  %2798 = vmatprep.subr.bf16.mxu1 %v17274_v8  ;;  %v2070_v32 = vld [vmem:[#allocation7 + $0x348] sm:$0xff]  ;;  %v2089_v55 = vld [vmem:[#allocation7 + $0x3e0] sm:$0xff]  ;;  %v17304_v52 = vcombine.low %v2077_v37, %v2081_v50 }
 0x1cb   : > { %20730 = vst [vmem:[#allocation104_spill] sm:$0xff] %v17277_v49  ;;  %2758 = vmatpush1.bf16.msra.mxu0 %v17270_v45  ;;  %v17286_v34 = vadd.f32 %v880_v48, %v17205_v38  ;;  %20734 = vst [vmem:[#allocation108_spill] sm:$0xff] %v17290_v30  ;;  %v2074_v49 = vld [vmem:[#allocation7 + $0x368] sm:$0xff]  ;;  %v17297_v45 = vcombine.high %v2077_v37, %v2081_v50 }
 0x1cc   : > { %20731 = vst [vmem:[#allocation105_spill] sm:$0xff] %v17281_v39  ;;  %v17293_v62 = vcombine.low %v2070_v32, %v2074_v49  ;;  %v17295_v39 = vcombine.high %v2070_v32, %v2074_v49  ;;  %v2078_v8 = vld [vmem:[#allocation7 + $0x388] sm:$0xff]  ;;  %2759 = vmatprep.subr.bf16.mxu0 %v17290_v30  ;;  %v17307_v32 = vcombine.high %v2085_v10, %v2089_v55 }
 0x1cd   : > { %20732 = vst [vmem:[#allocation106_spill] sm:$0xff] %v17286_v34  ;;  %2799 = vmatpush1.bf16.msra.mxu1 %v17272_v33  ;;  %20736 = vst [vmem:[#allocation110_spill] sm:$0xff] %v17297_v45  ;;  %v17300_v48 = vcombine.high %v2078_v8, %v2082_v9  ;;  %v2086_v34 = vld [vmem:[#allocation7 + $0x3c8] sm:$0xff]  ;;  %v17313_v13 = vcombine.low %v2078_v8, %v2082_v9  ;;  %v636_v8 = vadd.f32 %v16931_v44, %v16925_v41 }
 0x1ce   : > { %20735 = vst [vmem:[#allocation109_spill] sm:$0xff] %v17295_v39  ;;  %2800 = vmatprep.subr.bf16.mxu1 %v17295_v39  ;;  %v2090_v33 = vld [vmem:[#allocation7 + $0x3e8] sm:$0xff]  ;;  %20737 = vst [vmem:[#allocation111_spill] sm:$0xff] %v17307_v32 }
 0x1cf   : > { %2760 = vmatpush1.bf16.msra.mxu0 %v17288_v53  ;;  %v884_v49 = vpop.f32.mrb[36].mxu1  ;;  %v17319_v50 = vcombine.high %v2086_v34, %v2090_v33  ;;  %v17332_v9 = vcombine.low %v2086_v34, %v2090_v33 }
 0x1d0   : > { %2761 = vmatprep.subr.bf16.mxu0 %v17297_v45  ;;  %v17310_v16 = vadd.f32 %v884_v49, %v17193_v63  ;;  %v886_v30 = vpop.f32.mrb[37].mxu1  ;;  %v17325_v49 = vcombine.low %v2085_v10, %v2089_v55  ;;  %v1968_v10 = vld [vmem:[#allocation7 + $0x18] sm:$0xff] }
 0x1d1   : > { %2801 = vmatpush1.bf16.msra.mxu1 %v17293_v62  ;;  %v17316_v39 = vadd.f32 %v886_v30, %v17205_v38  ;;  %v888_v37 = vpop.f32.mrb[38].mxu1  ;;  %20740 = vst [vmem:[#allocation114_spill] sm:$0xff] %v17319_v50  ;;  %20744 = vst [vmem:[#allocation118_spill] sm:$0xff] %v17332_v9  ;;  %v1967_v30 = vld [vmem:[#allocation7 + $0x10] sm:$0xff] }
 0x1d2   : > { %20738 = vst [vmem:[#allocation112_spill] sm:$0xff] %v17310_v16  ;;  %2802 = vmatprep.subr.bf16.mxu1 %v17300_v48  ;;  %v17322_v45 = vadd.f32 %v888_v37, %v17193_v63  ;;  %v890_v53 = vpop.f32.mrb[39].mxu1  ;;  %20742 = vst [vmem:[#allocation116_spill] sm:$0xff] %v17325_v49  ;;  %v1971_v37 = vld [vmem:[#allocation7 + $0x30] sm:$0xff] }
 0x1d3   : > { %20739 = vst [vmem:[#allocation113_spill] sm:$0xff] %v17316_v39  ;;  %2762 = vmatpush1.bf16.msra.mxu0 %v17304_v52  ;;  %v17328_v16 = vadd.f32 %v890_v53, %v17205_v38  ;;  %v638_v53 = vadd.f32 %v16936_v46, %v16929_v42  ;;  %v17343_v34 = vcombine.low %v1967_v30, %v1971_v37 }
 0x1d4   : > { %20741 = vst [vmem:[#allocation115_spill] sm:$0xff] %v17322_v45  ;;  %2763 = vmatprep.subr.bf16.mxu0 %v17307_v32  ;;  %v1972_v45 = vld [vmem:[#allocation7 + $0x38] sm:$0xff]  ;;  %v709_v42 = vadd.f32 %v16988_v17, %v16999_v22  ;;  %v711_v46 = vadd.f32 %v17001_v23, %v17011_v27 }
 0x1d5   : > { %20743 = vst [vmem:[#allocation117_spill] sm:$0xff] %v17328_v16  ;;  %2803 = vmatpush1.bf16.msra.mxu1 %v17313_v13  ;;  %v17340_v16 = vcombine.high %v1967_v30, %v1971_v37  ;;  %v17347_v41 = vcombine.high %v1968_v10, %v1972_v45 }
 0x1d6   : > { %2804 = vmatprep.subr.bf16.mxu1 %v17319_v50  ;;  %v1767_v55 = vpop.f32.mrb[24].mxu0  ;;  %v17345_v50 = vcombine.low %v1968_v10, %v1972_v45 }
 0x1d7   : > { %2764 = vmatpush1.bf16.msra.mxu0 %v17325_v49  ;;  %20745 = vst [vmem:[#allocation119_spill] sm:$0xff] %v17340_v16  ;;  %v1897_v39 = vadd.f32 %v1767_v55, %v636_v8  ;;  %v1769_v33 = vpop.f32.mrb[25].mxu0  ;;  %20746 = vst [vmem:[#allocation120_spill] sm:$0xff] %v17347_v41 }
 0x1d8   : > { %v1898_v44 = vadd.f32 %v1769_v33, %v638_v53  ;;  %v1771_v49 = vpop.f32.mrb[26].mxu0  ;;  %2815 = vmatprep.subr.bf16.mxu0 %v17340_v16 }
 0x1d9   : > { %2805 = vmatpush1.bf16.msra.mxu1 %v17332_v9  ;;  %v1772_v32 = vpop.f32.mrb[27].mxu0  ;;  %v782_v49 = vadd.f32 %v16990_v18, %v16986_v14  ;;  %v13946_v16 = vmul.f32 -1.442695, %v1897_v39  ;;  %v857_v39 = vadd.f32 %v17195_v60, %v17205_v38 }
 0x1da   : > { %2856 = vmatprep.subr.bf16.mxu1 %v17347_v41  ;;  %v784_v32 = vadd.f32 %v17003_v24, %v16993_v19  ;;  %v13947_v23 = vmul.f32 -1.442695, %v1898_v44 }
 0x1db   : > { %15762 = vpow2.f32 %v13946_v16  ;;  %v855_v16 = vadd.f32 %v17188_v36, %v17193_v63 }
 0x1dc   : > { %15764 = vpow2.f32 %v13947_v23 }
 0x1f7   : > { %v1808_v8 = vpop.f32.mrb[40].mxu1 }
 0x1f8   : > { %v1899_v30 = vadd.f32 %v1808_v8, %v709_v42  ;;  %v1810_v37 = vpop.f32.mrb[41].mxu1 }
 0x1f9   : > { %v1900_v55 = vadd.f32 %v1810_v37, %v711_v46  ;;  %v1812_v9 = vpop.f32.mrb[42].mxu1 }
 0x1fa   : > { %v1813_v45 = vpop.f32.mrb[43].mxu1  ;;  %v13948_v27 = vmul.f32 -1.442695, %v1899_v30  ;;  %v15763_v9 = vpop.eup %15762 }
 0x1fb   : > { %v13949_v42 = vmul.f32 -1.442695, %v1900_v55  ;;  %v15765_v46 = vpop.eup %15764  ;;  %v1923_v14 = vadd.f32 1.0, %v15763_v9 }
 0x1fc   : > { %15766 = vpow2.f32 %v13948_v27  ;;  %v1924_v8 = vadd.f32 1.0, %v15765_v46 }
 0x1fd   : > { %15768 = vpow2.f32 %v13949_v42 }
 0x1fe   : > { %15770 = vrcp.f32 %v1923_v14 }
 0x1ff   : > { %15772 = vrcp.f32 %v1924_v8 }
 0x206   : > { %v15767_v18 = vpop.eup %15766 }
 0x207   : > { %v15769_v19 = vpop.eup %15768  ;;  %v1925_v45 = vadd.f32 1.0, %v15767_v18 }
 0x216   : > { %v1849_v10 = vpop.f32.mrb[28].mxu0 }
 0x217   : > { %v1901_v53 = vadd.f32 %v1849_v10, %v782_v49  ;;  %v1851_v33 = vpop.f32.mrb[29].mxu0  ;;  %v1926_v49 = vadd.f32 1.0, %v15769_v19 }
 0x218   : > { %v1902_v41 = vadd.f32 %v1851_v33, %v784_v32  ;;  %v1853_v17 = vpop.f32.mrb[30].mxu0 }
 0x219   : > { %v1854_v22 = vpop.f32.mrb[31].mxu0  ;;  %v13950_v24 = vmul.f32 -1.442695, %v1901_v53  ;;  %v15771_v53 = vpop.eup %15770 }
 0x21a   : > { %v13951_v37 = vmul.f32 -1.442695, %v1902_v41  ;;  %v15773_v33 = vpop.eup %15772 }
 0x21b   : > { %15774 = vpow2.f32 %v13950_v24 }
 0x21c   : > { %15776 = vpow2.f32 %v13951_v37 }
 0x21d   : > { %15778 = vrcp.f32 %v1925_v45 }
 0x21e   : > { %15780 = vrcp.f32 %v1926_v49 }
 0x225   : > { %v15775_v17 = vpop.eup %15774 }
 0x226   : > { %v15777_v22 = vpop.eup %15776  ;;  %v1927_v23 = vadd.f32 1.0, %v15775_v17  ;;  %v1987_v17 = vld [vmem:[#allocation7 + $0xb0] sm:$0xff] }
 0x227   : > { %v15779_v36 = vpop.eup %15778  ;;  %v1928_v60 = vadd.f32 1.0, %v15777_v22  ;;  %v1984_v22 = vld [vmem:[#allocation7 + $0x98] sm:$0xff] }
 0x228   : > { %v15781_v63 = vpop.eup %15780  ;;  %v1943_v42 = vmul.f32 0.0, %v15779_v36  ;;  %v1988_v36 = vld [vmem:[#allocation7 + $0xb8] sm:$0xff] }
 0x229   : > { %v1944_v46 = vmul.f32 0.0, %v15781_v63 }
 0x237   : > { %v1890_v44 = vpop.f32.mrb[44].mxu1 }
 0x238   : > { %v1903_v30 = vadd.f32 %v1890_v44, %v855_v16  ;;  %v1892_v55 = vpop.f32.mrb[45].mxu1  ;;  %v1979_v44 = vld [vmem:[#allocation7 + $0x70] sm:$0xff] }
 0x239   : > { %v1904_v32 = vadd.f32 %v1892_v55, %v857_v39  ;;  %v1894_v10 = vpop.f32.mrb[46].mxu1  ;;  %v1975_v39 = vld [vmem:[#allocation7 + $0x50] sm:$0xff]  ;;  %v1980_v55 = vld [vmem:[#allocation7 + $0x78] sm:$0xff] }
 0x23a   : > { %15782 = vtanh.f32 %v1903_v30  ;;  %v1895_v41 = vpop.f32.mrb[47].mxu1  ;;  %v1976_v30 = vld [vmem:[#allocation7 + $0x58] sm:$0xff]  ;;  %v17387_v63 = vcombine.low %v1975_v39, %v1979_v44 }
 0x23b   : > { %15784 = vtanh.f32 %v1904_v32  ;;  %v1983_v41 = vld [vmem:[#allocation7 + $0x90] sm:$0xff] }
 0x23c   : > { %15786 = vrcp.f32 %v1927_v23  ;;  %v17389_v23 = vcombine.low %v1976_v30, %v1980_v55 }
 0x23d   : > { %15788 = vrcp.f32 %v1928_v60  ;;  %v17393_v60 = vcombine.high %v1984_v22, %v1988_v36 }
 0x244   : > { %v15783_v27 = vpop.eup %15782 }
 0x245   : > { %v15785_v38 = vpop.eup %15784  ;;  %v1945_v9 = vmul.f32 %v15783_v27, %v15771_v53  ;;  %v17379_v53 = vcombine.high %v1975_v39, %v1979_v44  ;;  %v17391_v27 = vcombine.high %v1983_v41, %v1987_v17  ;;  %v2003_v39 = vld [vmem:[#allocation7 + $0x130] sm:$0xff]  ;;  %v2000_v44 = vld [vmem:[#allocation7 + $0x118] sm:$0xff] }
 0x246   : > { %v1946_v14 = vmul.f32 %v15785_v38, %v15773_v33  ;;  %v15787_v19 = vpop.eup %15786  ;;  %v17381_v33 = vcombine.high %v1976_v30, %v1980_v55  ;;  %v1991_v38 = vld [vmem:[#allocation7 + $0xd0] sm:$0xff]  ;;  %v2004_v30 = vld [vmem:[#allocation7 + $0x138] sm:$0xff] }
 0x247   : > { %v17363_v18 = vadd.f32 %v1945_v9, %v1943_v42  ;;  %v15789_v24 = vpop.eup %15788  ;;  %v1995_v42 = vld [vmem:[#allocation7 + $0xf0] sm:$0xff]  ;;  %v1992_v9 = vld [vmem:[#allocation7 + $0xd8] sm:$0xff] }
 0x248   : > { %v17365_v8 = vadd.f32 %v1946_v14, %v1944_v46  ;;  %v1996_v46 = vld [vmem:[#allocation7 + $0xf8] sm:$0xff]  ;;  %v17399_v14 = vcombine.low %v1983_v41, %v1987_v17  ;;  %v17411_v55 = vcombine.low %v1991_v38, %v1995_v42  ;;  %v17419_v17 = vcombine.high %v2000_v44, %v2004_v30 }
 0x249   : > { %15790 = vtanh.f32 %v17363_v18 }
 0x24a   : > { %15792 = vtanh.f32 %v17365_v8  ;;  %20749 = vst [vmem:[#allocation123_spill] sm:$0xff] %v17399_v14  ;;  %20753 = vst [vmem:[#allocation127_spill] sm:$0xff] %v17411_v55 }
 0x24b   : > { %20756 = vst [vmem:[#allocation130_spill] sm:$0xff] %v17419_v17 }
 0x253   : > { %v15791_v37 = vpop.eup %15790 }
 0x254   : > { %v15793_v45 = vpop.eup %15792  ;;  %v17369_v49 = vmul.f32 %v15791_v37, %v15787_v19  ;;  %v17401_v19 = vcombine.low %v1984_v22, %v1988_v36  ;;  %v17407_v37 = vcombine.high %v1992_v9, %v1996_v46  ;;  %v2007_v22 = vld [vmem:[#allocation7 + $0x150] sm:$0xff] }
 0x255   : > { %v17371_v16 = vmul.f32 %v15793_v45, %v15789_v24  ;;  %v17405_v24 = vcombine.high %v1991_v38, %v1995_v42  ;;  %v1999_v45 = vld [vmem:[#allocation7 + $0x110] sm:$0xff]  ;;  %v17425_v42 = vcombine.low %v2000_v44, %v2004_v30 }
 0x256   : > { %20747 = vst [vmem:[#allocation121_spill] sm:$0xff] %v17369_v49  ;;  %v17377_v10 = vpack.c.bf16 %v17369_v49, %v17369_v49  ;;  %20750 = vst [vmem:[#allocation124_spill] sm:$0xff] %v17401_v19  ;;  %v17417_v41 = vcombine.high %v1999_v45, %v2003_v39  ;;  %v2011_v36 = vld [vmem:[#allocation7 + $0x170] sm:$0xff]  ;;  %v2008_v49 = vld [vmem:[#allocation7 + $0x158] sm:$0xff]  ;;  %v17423_v38 = vcombine.low %v1999_v45, %v2003_v39 }
 0x257   : > { %20748 = vst [vmem:[#allocation122_spill] sm:$0xff] %v17371_v16  ;;  %v1956_v32 = vpack.c.bf16 %v17371_v16, %v17371_v16  ;;  %20751 = vst [vmem:[#allocation125_spill] sm:$0xff] %v17405_v24  ;;  %v2012_v16 = vld [vmem:[#allocation7 + $0x178] sm:$0xff]  ;;  %v17435_v45 = vcombine.low %v2007_v22, %v2011_v36 }
 0x258   : > { %20752 = vst [vmem:[#allocation126_spill] sm:$0xff] %v17407_v37  ;;  %20755 = vst [vmem:[#allocation129_spill] sm:$0xff] %v17417_v41  ;;  %v17437_v39 = vcombine.low %v2008_v49, %v2012_v16 }
 0x259   : > { %2765 = vmatprep.mubr.bf16.mxu0 %v1956_v32  ;;  %2806 = vmatprep.mubr.bf16.mxu1 %v1956_v32  ;;  %20757 = vst [vmem:[#allocation131_spill] sm:$0xff] %v17423_v38  ;;  %20758 = vst [vmem:[#allocation132_spill] sm:$0xff] %v17425_v42 }
 0x25a   : > { %2766 = vmatmul.mubr.bf16.vlgmr.msra.gmra.mrb[32].mxu0 %v17377_v10  ;;  %2807 = vmatmul.mubr.bf16.vlgmr.msra.gmra.mrb[48].mxu1 %v17377_v10  ;;  %20761 = vst [vmem:[#allocation135_spill] sm:$0xff] %v17435_v45  ;;  %20762 = vst [vmem:[#allocation136_spill] sm:$0xff] %v17437_v39 }
 0x25b   : > { %2816 = vmatpush1.bf16.msra.mxu0 %v17343_v34  ;;  %2857 = vmatpush1.bf16.msra.mxu1 %v17345_v50 }
 0x25c   : > { %2847 = vmatprep.mubr.bf16.mxu0 %v1956_v32  ;;  %2888 = vmatprep.mubr.bf16.mxu1 %v1956_v32  ;;  %v17413_v32 = vcombine.low %v1992_v9, %v1996_v46  ;;  %v17429_v9 = vcombine.high %v2007_v22, %v2011_v36  ;;  %v17431_v46 = vcombine.high %v2008_v49, %v2012_v16 }
 0x25d   : > { %2817 = vmatprep.subr.bf16.mxu0 %v17379_v53  ;;  %2858 = vmatprep.subr.bf16.mxu1 %v17381_v33 }
 0x25e   : > { %20754 = vst [vmem:[#allocation128_spill] sm:$0xff] %v17413_v32  ;;  %20759 = vst [vmem:[#allocation133_spill] sm:$0xff] %v17429_v9 }
 0x25f   : > { %2818 = vmatpush1.bf16.msra.mxu0 %v17387_v63  ;;  %2859 = vmatpush1.bf16.msra.mxu1 %v17389_v23  ;;  %20760 = vst [vmem:[#allocation134_spill] sm:$0xff] %v17431_v46 }
 0x260   : > { %2819 = vmatprep.subr.bf16.mxu0 %v17391_v27  ;;  %2860 = vmatprep.subr.bf16.mxu1 %v17393_v60 }
 0x263   : > { %2820 = vmatpush1.bf16.msra.mxu0 %v17399_v14  ;;  %2861 = vmatpush1.bf16.msra.mxu1 %v17401_v19  ;;  %v2016_v19 = vld [vmem:[#allocation7 + $0x198] sm:$0xff] }
 0x264   : > { %2821 = vmatprep.subr.bf16.mxu0 %v17405_v24  ;;  %2862 = vmatprep.subr.bf16.mxu1 %v17407_v37  ;;  %v2015_v37 = vld [vmem:[#allocation7 + $0x190] sm:$0xff]  ;;  %v2020_v14 = vld [vmem:[#allocation7 + $0x1b8] sm:$0xff] }
 0x265   : > { %v2019_v24 = vld [vmem:[#allocation7 + $0x1b0] sm:$0xff]  ;;  %v17443_v30 = vcombine.high %v2016_v19, %v2020_v14  ;;  %v17449_v49 = vcombine.low %v2016_v19, %v2020_v14 }
 0x266   : > { %v17441_v44 = vcombine.high %v2015_v37, %v2019_v24  ;;  %v17447_v22 = vcombine.low %v2015_v37, %v2019_v24 }
 0x267   : > { %2822 = vmatpush1.bf16.msra.mxu0 %v17411_v55  ;;  %2863 = vmatpush1.bf16.msra.mxu1 %v17413_v32  ;;  %20764 = vst [vmem:[#allocation138_spill] sm:$0xff] %v17443_v30  ;;  %v2024_v32 = vld [vmem:[#allocation7 + $0x1d8] sm:$0xff]  ;;  %20766 = vst [vmem:[#allocation140_spill] sm:$0xff] %v17449_v49 }
 0x268   : > { %2823 = vmatprep.subr.bf16.mxu0 %v17417_v41  ;;  %2864 = vmatprep.subr.bf16.mxu1 %v17419_v17  ;;  %20763 = vst [vmem:[#allocation137_spill] sm:$0xff] %v17441_v44  ;;  %v2023_v17 = vld [vmem:[#allocation7 + $0x1d0] sm:$0xff]  ;;  %v2028_v55 = vld [vmem:[#allocation7 + $0x1f8] sm:$0xff]  ;;  %20765 = vst [vmem:[#allocation139_spill] sm:$0xff] %v17447_v22 }
 0x269   : > { %v2027_v41 = vld [vmem:[#allocation7 + $0x1f0] sm:$0xff]  ;;  %v17455_v36 = vcombine.high %v2024_v32, %v2028_v55  ;;  %v17461_v14 = vcombine.low %v2024_v32, %v2028_v55 }
 0x26a   : > { %v17453_v16 = vcombine.high %v2023_v17, %v2027_v41  ;;  %v17459_v24 = vcombine.low %v2023_v17, %v2027_v41 }
 0x26b   : > { %2824 = vmatpush1.bf16.msra.mxu0 %v17423_v38  ;;  %2865 = vmatpush1.bf16.msra.mxu1 %v17425_v42  ;;  %20768 = vst [vmem:[#allocation142_spill] sm:$0xff] %v17455_v36  ;;  %v2032_v42 = vld [vmem:[#allocation7 + $0x218] sm:$0xff]  ;;  %20770 = vst [vmem:[#allocation144_spill] sm:$0xff] %v17461_v14 }
 0x26c   : > { %2825 = vmatprep.subr.bf16.mxu0 %v17429_v9  ;;  %2866 = vmatprep.subr.bf16.mxu1 %v17431_v46  ;;  %20767 = vst [vmem:[#allocation141_spill] sm:$0xff] %v17453_v16  ;;  %v2031_v46 = vld [vmem:[#allocation7 + $0x210] sm:$0xff]  ;;  %v2036_v38 = vld [vmem:[#allocation7 + $0x238] sm:$0xff]  ;;  %20769 = vst [vmem:[#allocation143_spill] sm:$0xff] %v17459_v24 }
 0x26d   : > { %v2035_v9 = vld [vmem:[#allocation7 + $0x230] sm:$0xff]  ;;  %v17467_v37 = vcombine.high %v2032_v42, %v2036_v38  ;;  %v17473_v55 = vcombine.low %v2032_v42, %v2036_v38 }
 0x26e   : > { %v17465_v19 = vcombine.high %v2031_v46, %v2035_v9  ;;  %v17471_v41 = vcombine.low %v2031_v46, %v2035_v9 }
 0x26f   : > { %2826 = vmatpush1.bf16.msra.mxu0 %v17435_v45  ;;  %2867 = vmatpush1.bf16.msra.mxu1 %v17437_v39  ;;  %20772 = vst [vmem:[#allocation146_spill] sm:$0xff] %v17467_v37  ;;  %v2040_v39 = vld [vmem:[#allocation7 + $0x258] sm:$0xff]  ;;  %20774 = vst [vmem:[#allocation148_spill] sm:$0xff] %v17473_v55 }
 0x270   : > { %2827 = vmatprep.subr.bf16.mxu0 %v17441_v44  ;;  %2868 = vmatprep.subr.bf16.mxu1 %v17443_v30  ;;  %20771 = vst [vmem:[#allocation145_spill] sm:$0xff] %v17465_v19  ;;  %v2039_v30 = vld [vmem:[#allocation7 + $0x250] sm:$0xff]  ;;  %v2044_v45 = vld [vmem:[#allocation7 + $0x278] sm:$0xff]  ;;  %20773 = vst [vmem:[#allocation147_spill] sm:$0xff] %v17471_v41 }
 0x271   : > { %v2043_v44 = vld [vmem:[#allocation7 + $0x270] sm:$0xff]  ;;  %v17479_v17 = vcombine.high %v2040_v39, %v2044_v45  ;;  %v17485_v38 = vcombine.low %v2040_v39, %v2044_v45 }
 0x272   : > { %v17477_v32 = vcombine.high %v2039_v30, %v2043_v44  ;;  %v17483_v9 = vcombine.low %v2039_v30, %v2043_v44 }
 0x273   : > { %2828 = vmatpush1.bf16.msra.mxu0 %v17447_v22  ;;  %2869 = vmatpush1.bf16.msra.mxu1 %v17449_v49  ;;  %20776 = vst [vmem:[#allocation150_spill] sm:$0xff] %v17479_v17  ;;  %v2048_v49 = vld [vmem:[#allocation7 + $0x298] sm:$0xff]  ;;  %20778 = vst [vmem:[#allocation152_spill] sm:$0xff] %v17485_v38 }
 0x274   : > { %2829 = vmatprep.subr.bf16.mxu0 %v17453_v16  ;;  %2870 = vmatprep.subr.bf16.mxu1 %v17455_v36  ;;  %20775 = vst [vmem:[#allocation149_spill] sm:$0xff] %v17477_v32  ;;  %v2047_v36 = vld [vmem:[#allocation7 + $0x290] sm:$0xff]  ;;  %v2052_v22 = vld [vmem:[#allocation7 + $0x2b8] sm:$0xff]  ;;  %20777 = vst [vmem:[#allocation151_spill] sm:$0xff] %v17483_v9 }
 0x275   : > { %v2051_v16 = vld [vmem:[#allocation7 + $0x2b0] sm:$0xff]  ;;  %v17491_v46 = vcombine.high %v2048_v49, %v2052_v22  ;;  %v17497_v45 = vcombine.low %v2048_v49, %v2052_v22 }
 0x276   : > { %v17489_v42 = vcombine.high %v2047_v36, %v2051_v16  ;;  %v17495_v44 = vcombine.low %v2047_v36, %v2051_v16 }
 0x277   : > { %2830 = vmatpush1.bf16.msra.mxu0 %v17459_v24  ;;  %2871 = vmatpush1.bf16.msra.mxu1 %v17461_v14  ;;  %20780 = vst [vmem:[#allocation154_spill] sm:$0xff] %v17491_v46  ;;  %v2056_v14 = vld [vmem:[#allocation7 + $0x2d8] sm:$0xff]  ;;  %20782 = vst [vmem:[#allocation156_spill] sm:$0xff] %v17497_v45 }
 0x278   : > { %2831 = vmatprep.subr.bf16.mxu0 %v17465_v19  ;;  %2872 = vmatprep.subr.bf16.mxu1 %v17467_v37  ;;  %20779 = vst [vmem:[#allocation153_spill] sm:$0xff] %v17489_v42  ;;  %v2055_v37 = vld [vmem:[#allocation7 + $0x2d0] sm:$0xff]  ;;  %v2060_v24 = vld [vmem:[#allocation7 + $0x2f8] sm:$0xff]  ;;  %20781 = vst [vmem:[#allocation155_spill] sm:$0xff] %v17495_v44 }
 0x279   : > { %v2059_v19 = vld [vmem:[#allocation7 + $0x2f0] sm:$0xff]  ;;  %v17503_v30 = vcombine.high %v2056_v14, %v2060_v24  ;;  %v17509_v22 = vcombine.low %v2056_v14, %v2060_v24 }
 0x27a   : > { %v17501_v39 = vcombine.high %v2055_v37, %v2059_v19  ;;  %v17507_v16 = vcombine.low %v2055_v37, %v2059_v19 }
 0x27b   : > { %2832 = vmatpush1.bf16.msra.mxu0 %v17471_v41  ;;  %2873 = vmatpush1.bf16.msra.mxu1 %v17473_v55  ;;  %20784 = vst [vmem:[#allocation158_spill] sm:$0xff] %v17503_v30  ;;  %v2064_v55 = vld [vmem:[#allocation7 + $0x318] sm:$0xff]  ;;  %20786 = vst [vmem:[#allocation160_spill] sm:$0xff] %v17509_v22 }
 0x27c   : > { %2833 = vmatprep.subr.bf16.mxu0 %v17477_v32  ;;  %2874 = vmatprep.subr.bf16.mxu1 %v17479_v17  ;;  %20783 = vst [vmem:[#allocation157_spill] sm:$0xff] %v17501_v39  ;;  %v2063_v17 = vld [vmem:[#allocation7 + $0x310] sm:$0xff]  ;;  %v2068_v41 = vld [vmem:[#allocation7 + $0x338] sm:$0xff]  ;;  %20785 = vst [vmem:[#allocation159_spill] sm:$0xff] %v17507_v16 }
 0x27d   : > { %v2067_v32 = vld [vmem:[#allocation7 + $0x330] sm:$0xff]  ;;  %v17515_v36 = vcombine.high %v2064_v55, %v2068_v41  ;;  %v17521_v24 = vcombine.low %v2064_v55, %v2068_v41 }
 0x27e   : > { %v17513_v49 = vcombine.high %v2063_v17, %v2067_v32  ;;  %v17519_v19 = vcombine.low %v2063_v17, %v2067_v32 }
 0x27f   : > { %2834 = vmatpush1.bf16.msra.mxu0 %v17483_v9  ;;  %2875 = vmatpush1.bf16.msra.mxu1 %v17485_v38  ;;  %20788 = vst [vmem:[#allocation162_spill] sm:$0xff] %v17515_v36  ;;  %v2072_v38 = vld [vmem:[#allocation7 + $0x358] sm:$0xff] }
 0x280   : > { %2835 = vmatprep.subr.bf16.mxu0 %v17489_v42  ;;  %2876 = vmatprep.subr.bf16.mxu1 %v17491_v46  ;;  %20787 = vst [vmem:[#allocation161_spill] sm:$0xff] %v17513_v49  ;;  %v2071_v46 = vld [vmem:[#allocation7 + $0x350] sm:$0xff]  ;;  %v2076_v9 = vld [vmem:[#allocation7 + $0x378] sm:$0xff] }
 0x281   : > { %v2075_v42 = vld [vmem:[#allocation7 + $0x370] sm:$0xff]  ;;  %v17527_v37 = vcombine.high %v2072_v38, %v2076_v9  ;;  %v17533_v41 = vcombine.low %v2072_v38, %v2076_v9 }
 0x282   : > { %v17525_v14 = vcombine.high %v2071_v46, %v2075_v42  ;;  %v17531_v32 = vcombine.low %v2071_v46, %v2075_v42 }
 0x283   : > { %2836 = vmatpush1.bf16.msra.mxu0 %v17495_v44  ;;  %2877 = vmatpush1.bf16.msra.mxu1 %v17497_v45  ;;  %20789 = vst [vmem:[#allocation163_spill] sm:$0xff] %v17527_v37  ;;  %v2080_v45 = vld [vmem:[#allocation7 + $0x398] sm:$0xff] }
 0x284   : > { %2837 = vmatprep.subr.bf16.mxu0 %v17501_v39  ;;  %2878 = vmatprep.subr.bf16.mxu1 %v17503_v30  ;;  %v2079_v30 = vld [vmem:[#allocation7 + $0x390] sm:$0xff]  ;;  %v2084_v44 = vld [vmem:[#allocation7 + $0x3b8] sm:$0xff]  ;;  %20790 = vst [vmem:[#allocation164_spill] sm:$0xff] %v17531_v32 }
 0x285   : > { %v2083_v39 = vld [vmem:[#allocation7 + $0x3b0] sm:$0xff]  ;;  %v17539_v17 = vcombine.high %v2080_v45, %v2084_v44  ;;  %v17545_v9 = vcombine.low %v2080_v45, %v2084_v44  ;;  %v20821_v44 = vld [vmem:[#allocation118_spill] sm:$0xff]  ;;  %v20822_v45 = vld [vmem:[#allocation119_spill] sm:$0xff] }
 0x286   : > { %v17537_v55 = vcombine.high %v2079_v30, %v2083_v39  ;;  %v17543_v42 = vcombine.low %v2079_v30, %v2083_v39  ;;  %v20823_v39 = vld [vmem:[#allocation120_spill] sm:$0xff] }
 0x287   : > { %2838 = vmatpush1.bf16.msra.mxu0 %v17507_v16  ;;  %2879 = vmatpush1.bf16.msra.mxu1 %v17509_v22  ;;  %v2088_v22 = vld [vmem:[#allocation7 + $0x3d8] sm:$0xff] }
 0x288   : > { %2839 = vmatprep.subr.bf16.mxu0 %v17513_v49  ;;  %2880 = vmatprep.subr.bf16.mxu1 %v17515_v36  ;;  %v2087_v36 = vld [vmem:[#allocation7 + $0x3d0] sm:$0xff]  ;;  %v2092_v16 = vld [vmem:[#allocation7 + $0x3f8] sm:$0xff] }
 0x289   : > { %v2091_v49 = vld [vmem:[#allocation7 + $0x3f0] sm:$0xff]  ;;  %v17551_v46 = vcombine.high %v2088_v22, %v2092_v16 }
 0x28a   : > { %v17549_v38 = vcombine.high %v2087_v36, %v2091_v49 }
 0x28b   : > { %2840 = vmatpush1.bf16.msra.mxu0 %v17519_v19  ;;  %2881 = vmatpush1.bf16.msra.mxu1 %v17521_v24 }
 0x28c   : > { %2841 = vmatprep.subr.bf16.mxu0 %v17525_v14  ;;  %2882 = vmatprep.subr.bf16.mxu1 %v17527_v37  ;;  %v17555_v37 = vcombine.low %v2087_v36, %v2091_v49  ;;  %v20826_v36 = vld [vmem:[#allocation35_spill] sm:$0xff] }
 0x28f   : > { %2842 = vmatpush1.bf16.msra.mxu0 %v17531_v32  ;;  %2883 = vmatpush1.bf16.msra.mxu1 %v17533_v41  ;;  %v17557_v32 = vcombine.low %v2088_v22, %v2092_v16  ;;  %v20824_v16 = vld [vmem:[#allocation33_spill] sm:$0xff]  ;;  %v20825_v22 = vld [vmem:[#allocation46_spill] sm:$0xff] }
 0x290   : > { %2843 = vmatprep.subr.bf16.mxu0 %v17537_v55  ;;  %2884 = vmatprep.subr.bf16.mxu1 %v17539_v17 }
 0x293   : > { %2844 = vmatpush1.bf16.msra.mxu0 %v17543_v42  ;;  %2885 = vmatpush1.bf16.msra.mxu1 %v17545_v9 }
 0x294   : > { %2845 = vmatprep.subr.bf16.mxu0 %v17549_v38  ;;  %2886 = vmatprep.subr.bf16.mxu1 %v17551_v46 }
 0x297   : > { %2846 = vmatpush1.bf16.msra.mxu0 %v17555_v37  ;;  %2887 = vmatpush1.bf16.msra.mxu1 %v17557_v32 }
 0x298   : > { %3733 = vmatprep.subr.bf16.mxu0 %v16995_v20  ;;  %3774 = vmatprep.subr.bf16.mxu1 %v17014_v31  ;;  %v20795_v20 = vld [vmem:[#allocation80_spill] sm:$0xff]  ;;  %v20798_v31 = vld [vmem:[#allocation83_spill] sm:$0xff] }
 0x29a   : > { %2848 = vmatmul.mubr.bf16.vlgmr.msra.gmra.mrb[36].mxu0 %v17377_v10  ;;  %2889 = vmatmul.mubr.bf16.vlgmr.msra.gmra.mrb[52].mxu1 %v17377_v10  ;;  %v20820_v10 = vld [vmem:[#allocation116_spill] sm:$0xff] }
 0x29b   : > { %3734 = vmatpush1.bf16.msra.mxu0 %v17005_v25  ;;  %3775 = vmatpush1.bf16.msra.mxu1 %v17007_v26  ;;  %v20796_v25 = vld [vmem:[#allocation78_spill] sm:$0xff]  ;;  %v20797_v26 = vld [vmem:[#allocation79_spill] sm:$0xff] }
 0x29c   : > { %3735 = vmatprep.subr.bf16.mxu0 %v17030_v51  ;;  %3776 = vmatprep.subr.bf16.mxu1 %v17037_v59  ;;  %v20799_v51 = vld [vmem:[#allocation86_spill] sm:$0xff]  ;;  %v20803_v59 = vld [vmem:[#allocation91_spill] sm:$0xff] }
 0x29f   : > { %3736 = vmatpush1.bf16.msra.mxu0 %v17033_v56  ;;  %3777 = vmatpush1.bf16.msra.mxu1 %v17035_v57  ;;  %v20800_v56 = vld [vmem:[#allocation84_spill] sm:$0xff]  ;;  %v20802_v57 = vld [vmem:[#allocation87_spill] sm:$0xff] }
 0x2a0   : > { %3737 = vmatprep.subr.bf16.mxu0 %v17042_v6  ;;  %3778 = vmatprep.subr.bf16.mxu1 %v17062_v29  ;;  %v20804_v6 = vld [vmem:[#allocation89_spill] sm:$0xff]  ;;  %v20807_v29 = vld [vmem:[#allocation98_spill] sm:$0xff] }
 0x2a3   : > { %3738 = vmatpush1.bf16.msra.mxu0 %v17051_v28  ;;  %3779 = vmatpush1.bf16.msra.mxu1 %v17053_v11  ;;  %v20805_v28 = vld [vmem:[#allocation90_spill] sm:$0xff]  ;;  %v20806_v11 = vld [vmem:[#allocation95_spill] sm:$0xff] }
 0x2a4   : > { %3739 = vmatprep.subr.bf16.mxu0 %v17078_v1  ;;  %3780 = vmatprep.subr.bf16.mxu1 %v17085_v40  ;;  %v20791_v40 = vld [vmem:[#allocation70_spill] sm:$0xff]  ;;  %v20810_v1 = vld [vmem:[#allocation99_spill] sm:$0xff] }
 0x2a7   : > { %3740 = vmatpush1.bf16.msra.mxu0 %v17081_v35  ;;  %3781 = vmatpush1.bf16.msra.mxu1 %v17083_v43  ;;  %v20811_v35 = vld [vmem:[#allocation103_spill] sm:$0xff]  ;;  %v20812_v43 = vld [vmem:[#allocation101_spill] sm:$0xff] }
 0x2a8   : > { %3741 = vmatprep.subr.bf16.mxu0 %v17090_v2  ;;  %3782 = vmatprep.subr.bf16.mxu1 %v17110_v5  ;;  %v20794_v2 = vld [vmem:[#allocation77_spill] sm:$0xff]  ;;  %v20813_v5 = vld [vmem:[#allocation102_spill] sm:$0xff] }
 0x2ab   : > { %3742 = vmatpush1.bf16.msra.mxu0 %v17099_v58  ;;  %3783 = vmatpush1.bf16.msra.mxu1 %v17101_v54  ;;  %v20792_v54 = vld [vmem:[#allocation73_spill] sm:$0xff]  ;;  %v20793_v58 = vld [vmem:[#allocation76_spill] sm:$0xff] }
 0x2ac   : > { %3743 = vmatprep.subr.bf16.mxu0 %v17128_v61  ;;  %3784 = vmatprep.subr.bf16.mxu1 %v17133_v12  ;;  %v20808_v12 = vld [vmem:[#allocation96_spill] sm:$0xff]  ;;  %v20816_v61 = vld [vmem:[#allocation107_spill] sm:$0xff] }
 0x2af   : > { %3744 = vmatpush1.bf16.msra.mxu0 %v17126_v47  ;;  %3785 = vmatpush1.bf16.msra.mxu1 %v17131_v7  ;;  %v20814_v7 = vld [vmem:[#allocation108_spill] sm:$0xff]  ;;  %v20815_v47 = vld [vmem:[#allocation109_spill] sm:$0xff] }
 0x2b0   : > { %3745 = vmatprep.subr.bf16.mxu0 %v17135_v0  ;;  %3786 = vmatprep.subr.bf16.mxu1 %v17138_v21  ;;  %v20809_v21 = vld [vmem:[#allocation97_spill] sm:$0xff]  ;;  %v20817_v0 = vld [vmem:[#allocation110_spill] sm:$0xff] }
 0x2b3   : > { %3746 = vmatpush1.bf16.msra.mxu0 %v17142_v15  ;;  %3787 = vmatpush1.bf16.msra.mxu1 %v17154_v3  ;;  %v20818_v15 = vld [vmem:[#allocation111_spill] sm:$0xff]  ;;  %v20819_v3 = vld [vmem:[#allocation114_spill] sm:$0xff] }
 0x2b4   : > { %3747 = vmatprep.subr.bf16.mxu0 %v17145_v4  ;;  %3788 = vmatprep.subr.bf16.mxu1 %v20791_v40  ;;  %v20801_v4 = vld [vmem:[#allocation85_spill] sm:$0xff] }
 0x2b7   : > { %3748 = vmatpush1.bf16.msra.mxu0 %v20792_v54  ;;  %3789 = vmatpush1.bf16.msra.mxu1 %v20793_v58  ;;  %v20827_v54 = vld [vmem:[#allocation48_spill] sm:$0xff] }
 0x2b8   : > { %3749 = vmatprep.subr.bf16.mxu0 %v20794_v2  ;;  %3790 = vmatprep.subr.bf16.mxu1 %v20795_v20 }
 0x2bb   : > { %3750 = vmatpush1.bf16.msra.mxu0 %v20796_v25  ;;  %3791 = vmatpush1.bf16.msra.mxu1 %v20797_v26 }
 0x2bc   : > { %3751 = vmatprep.subr.bf16.mxu0 %v20798_v31  ;;  %3792 = vmatprep.subr.bf16.mxu1 %v20799_v51 }
 0x2bf   : > { %3752 = vmatpush1.bf16.msra.mxu0 %v20800_v56  ;;  %3793 = vmatpush1.bf16.msra.mxu1 %v20801_v4 }
 0x2c0   : > { %3753 = vmatprep.subr.bf16.mxu0 %v20802_v57  ;;  %3794 = vmatprep.subr.bf16.mxu1 %v20803_v59 }
 0x2c3   : > { %3754 = vmatpush1.bf16.msra.mxu0 %v20804_v6  ;;  %3795 = vmatpush1.bf16.msra.mxu1 %v20805_v28 }
 0x2c4   : > { %3755 = vmatprep.subr.bf16.mxu0 %v20806_v11  ;;  %3796 = vmatprep.subr.bf16.mxu1 %v20807_v29 }
 0x2c7   : > { %3756 = vmatpush1.bf16.msra.mxu0 %v20808_v12  ;;  %3797 = vmatpush1.bf16.msra.mxu1 %v20809_v21 }
 0x2c8   : > { %3757 = vmatprep.subr.bf16.mxu0 %v20810_v1  ;;  %3798 = vmatprep.subr.bf16.mxu1 %v20811_v35 }
 0x2cb   : > { %3758 = vmatpush1.bf16.msra.mxu0 %v20812_v43  ;;  %3799 = vmatpush1.bf16.msra.mxu1 %v20813_v5  ;;  %v20828_v43 = vld [vmem:[#allocation47_spill] sm:$0xff] }
 0x2cc   : > { %3759 = vmatprep.subr.bf16.mxu0 %v20814_v7  ;;  %3800 = vmatprep.subr.bf16.mxu1 %v20815_v47  ;;  %v20829_v7 = vld [vmem:[#allocation81_spill] sm:$0xff] }
 0x2cf   : > { %3760 = vmatpush1.bf16.msra.mxu0 %v20816_v61  ;;  %3801 = vmatpush1.bf16.msra.mxu1 %v17293_v62 }
 0x2d0   : > { %3761 = vmatprep.subr.bf16.mxu0 %v20817_v0  ;;  %3802 = vmatprep.subr.bf16.mxu1 %v17300_v48 }
 0x2d3   : > { %3762 = vmatpush1.bf16.msra.mxu0 %v17304_v52  ;;  %3803 = vmatpush1.bf16.msra.mxu1 %v17313_v13 }
 0x2d4   : > { %3763 = vmatprep.subr.bf16.mxu0 %v20818_v15  ;;  %3804 = vmatprep.subr.bf16.mxu1 %v20819_v3  ;;  %v20830_v15 = vld [vmem:[#allocation49_spill] sm:$0xff] }
 0x2d7   : > { %3764 = vmatpush1.bf16.msra.mxu0 %v20820_v10  ;;  %3805 = vmatpush1.bf16.msra.mxu1 %v20821_v44  ;;  %v20831_v10 = vld [vmem:[#allocation82_spill] sm:$0xff] }
 0x2d8   : > { %3815 = vmatprep.subr.bf16.mxu0 %v20822_v45  ;;  %3856 = vmatprep.subr.bf16.mxu1 %v20823_v39 }
 0x32d   : > { %v2767_v62 = vpop.f32.mrb[32].mxu0  ;;  %v2808_v30 = vpop.f32.mrb[48].mxu1 }
 0x32e   : > { %v2897_v48 = vadd.f32 %v2767_v62, %v20824_v16  ;;  %v2899_v52 = vadd.f32 %v2808_v30, %v20825_v22  ;;  %v2769_v49 = vpop.f32.mrb[33].mxu0  ;;  %v2810_v13 = vpop.f32.mrb[49].mxu1 }
 0x32f   : > { %v2898_v40 = vadd.f32 %v2769_v49, %v20826_v36  ;;  %v2900_v58 = vadd.f32 %v2810_v13, %v20827_v54  ;;  %v2771_v2 = vpop.f32.mrb[34].mxu0  ;;  %v2812_v20 = vpop.f32.mrb[50].mxu1 }
 0x330   : > { %v2772_v25 = vpop.f32.mrb[35].mxu0  ;;  %v2813_v26 = vpop.f32.mrb[51].mxu1  ;;  %v14080_v31 = vmul.f32 -1.442695, %v2897_v48  ;;  %v14082_v51 = vmul.f32 -1.442695, %v2899_v52 }
 0x331   : > { %v14081_v56 = vmul.f32 -1.442695, %v2898_v40  ;;  %v14083_v4 = vmul.f32 -1.442695, %v2900_v58 }
 0x332   : > { %15794 = vpow2.f32 %v14080_v31 }
 0x333   : > { %15796 = vpow2.f32 %v14082_v51 }
 0x334   : > { %15798 = vpow2.f32 %v14081_v56 }
 0x335   : > { %15800 = vpow2.f32 %v14083_v4 }
 0x33c   : > { %v15795_v57 = vpop.eup %15794 }
 0x33d   : > { %v15797_v59 = vpop.eup %15796  ;;  %v2923_v11 = vadd.f32 1.0, %v15795_v57 }
 0x33e   : > { %v15799_v6 = vpop.eup %15798  ;;  %v2925_v29 = vadd.f32 1.0, %v15797_v59 }
 0x33f   : > { %v15801_v28 = vpop.eup %15800  ;;  %v2924_v12 = vadd.f32 1.0, %v15799_v6  ;;  %15802 = vrcp.f32 %v2923_v11 }
 0x340   : > { %v2926_v21 = vadd.f32 1.0, %v15801_v28  ;;  %15804 = vrcp.f32 %v2925_v29 }
 0x341   : > { %15806 = vrcp.f32 %v2924_v12  ;;  %v20834_v12 = vld [vmem:[#allocation123_spill] sm:$0xff] }
 0x342   : > { %15808 = vrcp.f32 %v2926_v21  ;;  %v20835_v21 = vld [vmem:[#allocation124_spill] sm:$0xff] }
 0x349   : > { %v15803_v22 = vpop.eup %15802 }
 0x34a   : > { %v15805_v52 = vpop.eup %15804 }
 0x34b   : > { %v15807_v49 = vpop.eup %15806  ;;  %v2943_v54 = vmul.f32 %v15805_v52, %v17363_v18  ;;  %v20863_v52 = vld [vmem:[#allocation152_spill] sm:$0xff] }
 0x34c   : > { %v15809_v13 = vpop.eup %15808 }
 0x34d   : > { %v2944_v20 = vmul.f32 %v15809_v13, %v17365_v8  ;;  %v20865_v13 = vld [vmem:[#allocation154_spill] sm:$0xff] }
 0x36d   : > { %v2849_v1 = vpop.f32.mrb[36].mxu0  ;;  %v2890_v35 = vpop.f32.mrb[52].mxu1 }
 0x36e   : > { %v2901_v5 = vadd.f32 %v2849_v1, %v20828_v43  ;;  %v2903_v47 = vadd.f32 %v2890_v35, %v20829_v7  ;;  %v2851_v61 = vpop.f32.mrb[37].mxu0  ;;  %v2892_v0 = vpop.f32.mrb[53].mxu1  ;;  %v20838_v1 = vld [vmem:[#allocation127_spill] sm:$0xff]  ;;  %v20845_v35 = vld [vmem:[#allocation134_spill] sm:$0xff]  ;;  %v20848_v7 = vld [vmem:[#allocation137_spill] sm:$0xff] }
 0x36f   : > { %v2902_v3 = vadd.f32 %v2851_v61, %v20830_v15  ;;  %v2904_v44 = vadd.f32 %v2892_v0, %v20831_v10  ;;  %v2853_v45 = vpop.f32.mrb[38].mxu0  ;;  %v2894_v39 = vpop.f32.mrb[54].mxu1  ;;  %v20846_v43 = vld [vmem:[#allocation135_spill] sm:$0xff]  ;;  %v20851_v0 = vld [vmem:[#allocation140_spill] sm:$0xff]  ;;  %v20852_v15 = vld [vmem:[#allocation141_spill] sm:$0xff] }
 0x370   : > { %v14084_v62 = vmul.f32 -1.442695, %v2901_v5  ;;  %15810 = vtanh.f32 %v2903_v47  ;;  %v2854_v30 = vpop.f32.mrb[39].mxu0  ;;  %v2895_v16 = vpop.f32.mrb[55].mxu1  ;;  %v20847_v5 = vld [vmem:[#allocation136_spill] sm:$0xff]  ;;  %v20849_v47 = vld [vmem:[#allocation138_spill] sm:$0xff] }
 0x371   : > { %v14085_v48 = vmul.f32 -1.442695, %v2902_v3  ;;  %15812 = vtanh.f32 %v2904_v44  ;;  %v20850_v61 = vld [vmem:[#allocation139_spill] sm:$0xff]  ;;  %v20853_v3 = vld [vmem:[#allocation142_spill] sm:$0xff]  ;;  %v20855_v44 = vld [vmem:[#allocation144_spill] sm:$0xff] }
 0x372   : > { %15814 = vpow2.f32 %v14084_v62  ;;  %v20854_v10 = vld [vmem:[#allocation143_spill] sm:$0xff]  ;;  %v20856_v45 = vld [vmem:[#allocation145_spill] sm:$0xff]  ;;  %v20857_v39 = vld [vmem:[#allocation146_spill] sm:$0xff] }
 0x373   : > { %15816 = vpow2.f32 %v14085_v48  ;;  %v20858_v62 = vld [vmem:[#allocation147_spill] sm:$0xff]  ;;  %v20859_v30 = vld [vmem:[#allocation148_spill] sm:$0xff]  ;;  %v20860_v16 = vld [vmem:[#allocation149_spill] sm:$0xff] }
 0x374   : > { %v20861_v48 = vld [vmem:[#allocation150_spill] sm:$0xff] }
 0x37a   : > { %v15811_v36 = vpop.eup %15810 }
 0x37b   : > { %v15813_v40 = vpop.eup %15812  ;;  %v2945_v58 = vmul.f32 %v15811_v36, %v15803_v22  ;;  %v20862_v22 = vld [vmem:[#allocation151_spill] sm:$0xff] }
 0x37c   : > { %v15815_v2 = vpop.eup %15814  ;;  %v2946_v25 = vmul.f32 %v15813_v40, %v15807_v49  ;;  %v20864_v49 = vld [vmem:[#allocation153_spill] sm:$0xff]  ;;  %v20866_v36 = vld [vmem:[#allocation155_spill] sm:$0xff]  ;;  %v20867_v40 = vld [vmem:[#allocation156_spill] sm:$0xff] }
 0x37d   : > { %v15817_v26 = vpop.eup %15816  ;;  %v2927_v31 = vadd.f32 1.0, %v15815_v2  ;;  %v17641_v51 = vadd.f32 %v2945_v58, %v2943_v54  ;;  %v20868_v54 = vld [vmem:[#allocation157_spill] sm:$0xff]  ;;  %v20869_v58 = vld [vmem:[#allocation158_spill] sm:$0xff]  ;;  %v20870_v2 = vld [vmem:[#allocation159_spill] sm:$0xff] }
 0x37e   : > { %v2928_v56 = vadd.f32 1.0, %v15817_v26  ;;  %v17643_v4 = vadd.f32 %v2946_v25, %v2944_v20  ;;  %v20871_v20 = vld [vmem:[#allocation160_spill] sm:$0xff]  ;;  %v20872_v25 = vld [vmem:[#allocation161_spill] sm:$0xff]  ;;  %v20873_v26 = vld [vmem:[#allocation162_spill] sm:$0xff] }
 0x37f   : > { %15818 = vrcp.f32 %v2927_v31  ;;  %v20874_v31 = vld [vmem:[#allocation163_spill] sm:$0xff] }
 0x380   : > { %15820 = vtanh.f32 %v17641_v51 }
 0x381   : > { %15822 = vrcp.f32 %v2928_v56  ;;  %v20875_v56 = vld [vmem:[#allocation164_spill] sm:$0xff] }
 0x382   : > { %15824 = vtanh.f32 %v17643_v4 }
 0x389   : > { %v15819_v57 = vpop.eup %15818 }
 0x38a   : > { %v15821_v18 = vpop.eup %15820 }
 0x38b   : > { %v15823_v59 = vpop.eup %15822  ;;  %v17647_v28 = vmul.f32 %v15821_v18, %v15819_v57  ;;  %v3978_v57 = vld [vmem:[#allocation7 + $0x68] sm:$0xff]  ;;  %v3981_v18 = vld [vmem:[#allocation7 + $0x80] sm:$0xff] }
 0x38c   : > { %v15825_v6 = vpop.eup %15824 }
 0x38d   : > { %20832 = vst [vmem:[#allocation70_spill] sm:$0xff] %v17647_v28  ;;  %v17649_v8 = vmul.f32 %v15825_v6, %v15823_v59  ;;  %v17655_v29 = vpack.c.bf16 %v17647_v28, %v17647_v28  ;;  %v3985_v6 = vld [vmem:[#allocation7 + $0xa0] sm:$0xff] }
 0x38f   : > { %20833 = vst [vmem:[#allocation73_spill] sm:$0xff] %v17649_v8  ;;  %v2956_v11 = vpack.c.bf16 %v17649_v8, %v17649_v8  ;;  %v4081_v8 = vld [vmem:[#allocation7 + $0x3a0] sm:$0xff] }
 0x391   : > { %3765 = vmatprep.mubr.bf16.mxu0 %v2956_v11  ;;  %3806 = vmatprep.mubr.bf16.mxu1 %v2956_v11 }
 0x392   : > { %3766 = vmatmul.mubr.bf16.vlgmr.msra.gmra.mrb[40].mxu0 %v17655_v29  ;;  %3807 = vmatmul.mubr.bf16.vlgmr.msra.gmra.mrb[56].mxu1 %v17655_v29 }
 0x393   : > { %3816 = vmatpush1.bf16.msra.mxu0 %v17343_v34  ;;  %3857 = vmatpush1.bf16.msra.mxu1 %v17345_v50  ;;  %v20836_v34 = vld [vmem:[#allocation125_spill] sm:$0xff]  ;;  %v20837_v50 = vld [vmem:[#allocation126_spill] sm:$0xff] }
 0x394   : > { %3847 = vmatprep.mubr.bf16.mxu0 %v2956_v11  ;;  %3888 = vmatprep.mubr.bf16.mxu1 %v2956_v11  ;;  %v3982_v11 = vld [vmem:[#allocation7 + $0x88] sm:$0xff] }
 0x395   : > { %3817 = vmatprep.subr.bf16.mxu0 %v17379_v53  ;;  %3858 = vmatprep.subr.bf16.mxu1 %v17381_v33  ;;  %v20839_v53 = vld [vmem:[#allocation128_spill] sm:$0xff]  ;;  %v20840_v33 = vld [vmem:[#allocation129_spill] sm:$0xff] }
 0x397   : > { %3818 = vmatpush1.bf16.msra.mxu0 %v17387_v63  ;;  %3859 = vmatpush1.bf16.msra.mxu1 %v17389_v23  ;;  %v20841_v63 = vld [vmem:[#allocation130_spill] sm:$0xff]  ;;  %v20842_v23 = vld [vmem:[#allocation131_spill] sm:$0xff] }
 0x398   : > { %3819 = vmatprep.subr.bf16.mxu0 %v17391_v27  ;;  %3860 = vmatprep.subr.bf16.mxu1 %v17393_v60  ;;  %v20843_v27 = vld [vmem:[#allocation132_spill] sm:$0xff]  ;;  %v20844_v60 = vld [vmem:[#allocation133_spill] sm:$0xff] }
 0x39b   : > { %3820 = vmatpush1.bf16.msra.mxu0 %v20834_v12  ;;  %3861 = vmatpush1.bf16.msra.mxu1 %v20835_v21 }
 0x39c   : > { %3821 = vmatprep.subr.bf16.mxu0 %v20836_v34  ;;  %3862 = vmatprep.subr.bf16.mxu1 %v20837_v50  ;;  %v17744_v34 = vcombine.high %v3981_v18, %v3985_v6 }
 0x39f   : > { %3822 = vmatpush1.bf16.msra.mxu0 %v20838_v1  ;;  %3863 = vmatpush1.bf16.msra.mxu1 %v20839_v53  ;;  %v3989_v1 = vld [vmem:[#allocation7 + $0xc0] sm:$0xff] }
 0x3a0   : > { %3823 = vmatprep.subr.bf16.mxu0 %v20840_v33  ;;  %3864 = vmatprep.subr.bf16.mxu1 %v20841_v63  ;;  %v3993_v53 = vld [vmem:[#allocation7 + $0xe0] sm:$0xff]  ;;  %v3990_v33 = vld [vmem:[#allocation7 + $0xc8] sm:$0xff] }
 0x3a1   : > { %v3994_v63 = vld [vmem:[#allocation7 + $0xe8] sm:$0xff] }
 0x3a3   : > { %3824 = vmatpush1.bf16.msra.mxu0 %v20842_v23  ;;  %3865 = vmatpush1.bf16.msra.mxu1 %v20843_v27  ;;  %v17750_v23 = vcombine.low %v3981_v18, %v3985_v6  ;;  %v4034_v18 = vld [vmem:[#allocation7 + $0x228] sm:$0xff] }
 0x3a4   : > { %3825 = vmatprep.subr.bf16.mxu0 %v20844_v60  ;;  %3866 = vmatprep.subr.bf16.mxu1 %v20845_v35  ;;  %v17756_v60 = vcombine.high %v3989_v1, %v3993_v53  ;;  %v17759_v35 = vcombine.high %v3990_v33, %v3994_v63 }
 0x3a7   : > { %3826 = vmatpush1.bf16.msra.mxu0 %v20846_v43  ;;  %3867 = vmatpush1.bf16.msra.mxu1 %v20847_v5  ;;  %v3997_v43 = vld [vmem:[#allocation7 + $0x100] sm:$0xff] }
 0x3a8   : > { %3827 = vmatprep.subr.bf16.mxu0 %v20848_v7  ;;  %3868 = vmatprep.subr.bf16.mxu1 %v20849_v47  ;;  %v4001_v5 = vld [vmem:[#allocation7 + $0x120] sm:$0xff]  ;;  %v3998_v7 = vld [vmem:[#allocation7 + $0x108] sm:$0xff] }
 0x3a9   : > { %v4002_v47 = vld [vmem:[#allocation7 + $0x128] sm:$0xff] }
 0x3ab   : > { %3828 = vmatpush1.bf16.msra.mxu0 %v20850_v61  ;;  %3869 = vmatpush1.bf16.msra.mxu1 %v20851_v0  ;;  %v17762_v61 = vcombine.low %v3989_v1, %v3993_v53  ;;  %v17766_v0 = vcombine.low %v3990_v33, %v3994_v63  ;;  %v4037_v1 = vld [vmem:[#allocation7 + $0x240] sm:$0xff]  ;;  %v4038_v33 = vld [vmem:[#allocation7 + $0x248] sm:$0xff] }
 0x3ac   : > { %3829 = vmatprep.subr.bf16.mxu0 %v20852_v15  ;;  %3870 = vmatprep.subr.bf16.mxu1 %v20853_v3  ;;  %v17768_v15 = vcombine.high %v3997_v43, %v4001_v5  ;;  %v17771_v3 = vcombine.high %v3998_v7, %v4002_v47  ;;  %v4041_v53 = vld [vmem:[#allocation7 + $0x260] sm:$0xff] }
 0x3ad   : > { %v17831_v63 = vcombine.high %v4037_v1, %v4041_v53 }
 0x3af   : > { %3830 = vmatpush1.bf16.msra.mxu0 %v20854_v10  ;;  %3871 = vmatpush1.bf16.msra.mxu1 %v20855_v44  ;;  %v4005_v10 = vld [vmem:[#allocation7 + $0x140] sm:$0xff] }
 0x3b0   : > { %3831 = vmatprep.subr.bf16.mxu0 %v20856_v45  ;;  %3872 = vmatprep.subr.bf16.mxu1 %v20857_v39  ;;  %v4009_v44 = vld [vmem:[#allocation7 + $0x160] sm:$0xff]  ;;  %v4006_v45 = vld [vmem:[#allocation7 + $0x148] sm:$0xff] }
 0x3b1   : > { %v4010_v39 = vld [vmem:[#allocation7 + $0x168] sm:$0xff] }
 0x3b3   : > { %3832 = vmatpush1.bf16.msra.mxu0 %v20858_v62  ;;  %3873 = vmatpush1.bf16.msra.mxu1 %v20859_v30  ;;  %v17774_v62 = vcombine.low %v3997_v43, %v4001_v5  ;;  %v17778_v30 = vcombine.low %v3998_v7, %v4002_v47  ;;  %v4042_v43 = vld [vmem:[#allocation7 + $0x268] sm:$0xff]  ;;  %v17833_v5 = vcombine.low %v4037_v1, %v4041_v53  ;;  %v4061_v1 = vld [vmem:[#allocation7 + $0x300] sm:$0xff] }
 0x3b4   : > { %3833 = vmatprep.subr.bf16.mxu0 %v20860_v16  ;;  %3874 = vmatprep.subr.bf16.mxu1 %v20861_v48  ;;  %v17780_v16 = vcombine.high %v4005_v10, %v4009_v44  ;;  %v17783_v48 = vcombine.high %v4006_v45, %v4010_v39  ;;  %v17835_v7 = vcombine.low %v4038_v33, %v4042_v43  ;;  %v4065_v53 = vld [vmem:[#allocation7 + $0x320] sm:$0xff] }
 0x3b5   : > { %v17837_v47 = vcombine.high %v4038_v33, %v4042_v43  ;;  %v4062_v33 = vld [vmem:[#allocation7 + $0x308] sm:$0xff]  ;;  %v17867_v43 = vcombine.high %v4061_v1, %v4065_v53 }
 0x3b6   : > { %20876 = vst [vmem:[#allocation76_spill] sm:$0xff] %v17835_v7 }
 0x3b7   : > { %3834 = vmatpush1.bf16.msra.mxu0 %v20862_v22  ;;  %3875 = vmatpush1.bf16.msra.mxu1 %v20863_v52  ;;  %v4013_v22 = vld [vmem:[#allocation7 + $0x180] sm:$0xff]  ;;  %20885 = vst [vmem:[#allocation87_spill] sm:$0xff] %v17867_v43 }
 0x3b8   : > { %3835 = vmatprep.subr.bf16.mxu0 %v20864_v49  ;;  %3876 = vmatprep.subr.bf16.mxu1 %v20865_v13  ;;  %v4017_v52 = vld [vmem:[#allocation7 + $0x1a0] sm:$0xff]  ;;  %v4014_v49 = vld [vmem:[#allocation7 + $0x188] sm:$0xff] }
 0x3b9   : > { %v4018_v13 = vld [vmem:[#allocation7 + $0x1a8] sm:$0xff] }
 0x3bb   : > { %3836 = vmatpush1.bf16.msra.mxu0 %v20866_v36  ;;  %3877 = vmatpush1.bf16.msra.mxu1 %v20867_v40  ;;  %v17786_v36 = vcombine.low %v4005_v10, %v4009_v44  ;;  %v17790_v40 = vcombine.low %v4006_v45, %v4010_v39  ;;  %v4045_v10 = vld [vmem:[#allocation7 + $0x280] sm:$0xff]  ;;  %v4046_v45 = vld [vmem:[#allocation7 + $0x288] sm:$0xff] }
 0x3bc   : > { %3837 = vmatprep.subr.bf16.mxu0 %v20868_v54  ;;  %3878 = vmatprep.subr.bf16.mxu1 %v20869_v58  ;;  %v17792_v54 = vcombine.high %v4013_v22, %v4017_v52  ;;  %v17795_v58 = vcombine.high %v4014_v49, %v4018_v13  ;;  %v4049_v44 = vld [vmem:[#allocation7 + $0x2a0] sm:$0xff] }
 0x3bd   : > { %v17843_v39 = vcombine.high %v4045_v10, %v4049_v44 }
 0x3bf   : > { %3838 = vmatpush1.bf16.msra.mxu0 %v20870_v2  ;;  %3879 = vmatpush1.bf16.msra.mxu1 %v20871_v20  ;;  %v4021_v2 = vld [vmem:[#allocation7 + $0x1c0] sm:$0xff]  ;;  %20877 = vst [vmem:[#allocation77_spill] sm:$0xff] %v17843_v39 }
 0x3c0   : > { %3839 = vmatprep.subr.bf16.mxu0 %v20872_v25  ;;  %3880 = vmatprep.subr.bf16.mxu1 %v20873_v26  ;;  %v4025_v20 = vld [vmem:[#allocation7 + $0x1e0] sm:$0xff]  ;;  %v4022_v25 = vld [vmem:[#allocation7 + $0x1c8] sm:$0xff] }
 0x3c1   : > { %v4026_v26 = vld [vmem:[#allocation7 + $0x1e8] sm:$0xff] }
 0x3c3   : > { %3840 = vmatpush1.bf16.msra.mxu0 %v17519_v19  ;;  %3881 = vmatpush1.bf16.msra.mxu1 %v17521_v24  ;;  %v3965_v19 = vld [vmem:[#allocation7] sm:$0xff] }
 0x3c4   : > { %3841 = vmatprep.subr.bf16.mxu0 %v17525_v14  ;;  %3882 = vmatprep.subr.bf16.mxu1 %v20874_v31  ;;  %v3969_v24 = vld [vmem:[#allocation7 + $0x20] sm:$0xff]  ;;  %v3966_v14 = vld [vmem:[#allocation7 + $0x8] sm:$0xff]  ;;  %v17798_v31 = vcombine.low %v4013_v22, %v4017_v52  ;;  %v17845_v52 = vcombine.low %v4045_v10, %v4049_v44  ;;  %v17869_v44 = vcombine.low %v4061_v1, %v4065_v53 }
 0x3c5   : > { %v4050_v22 = vld [vmem:[#allocation7 + $0x2a8] sm:$0xff]  ;;  %v4077_v53 = vld [vmem:[#allocation7 + $0x380] sm:$0xff] }
 0x3c6   : > { %20878 = vst [vmem:[#allocation80_spill] sm:$0xff] %v17845_v52  ;;  %v4066_v10 = vld [vmem:[#allocation7 + $0x328] sm:$0xff]  ;;  %20886 = vst [vmem:[#allocation91_spill] sm:$0xff] %v17869_v44 }
 0x3c7   : > { %3842 = vmatpush1.bf16.msra.mxu0 %v20875_v56  ;;  %3883 = vmatpush1.bf16.msra.mxu1 %v17533_v41  ;;  %v17723_v41 = vcombine.low %v3965_v19, %v3969_v24  ;;  %v17802_v56 = vcombine.low %v4014_v49, %v4018_v13  ;;  %v17847_v49 = vcombine.low %v4046_v45, %v4050_v22  ;;  %v4074_v1 = vld [vmem:[#allocation7 + $0x368] sm:$0xff] }
 0x3c8   : > { %3843 = vmatprep.subr.bf16.mxu0 %v17537_v55  ;;  %3884 = vmatprep.subr.bf16.mxu1 %v17539_v17  ;;  %v17725_v55 = vcombine.high %v3965_v19, %v3969_v24  ;;  %v3970_v17 = vld [vmem:[#allocation7 + $0x28] sm:$0xff]  ;;  %v17804_v19 = vcombine.high %v4021_v2, %v4025_v20  ;;  %v17807_v24 = vcombine.high %v4022_v25, %v4026_v26 }
 0x3c9   : > { %20879 = vst [vmem:[#allocation78_spill] sm:$0xff] %v17847_v49  ;;  %v17849_v13 = vcombine.high %v4046_v45, %v4050_v22  ;;  %v17871_v45 = vcombine.low %v4062_v33, %v4066_v10  ;;  %v17873_v22 = vcombine.high %v4062_v33, %v4066_v10 }
 0x3cb   : > { %3844 = vmatpush1.bf16.msra.mxu0 %v17543_v42  ;;  %3885 = vmatpush1.bf16.msra.mxu1 %v17545_v9  ;;  %v3973_v42 = vld [vmem:[#allocation7 + $0x40] sm:$0xff]  ;;  %20880 = vst [vmem:[#allocation79_spill] sm:$0xff] %v17849_v13  ;;  %20887 = vst [vmem:[#allocation89_spill] sm:$0xff] %v17871_v45 }
 0x3cc   : > { %3845 = vmatprep.subr.bf16.mxu0 %v17549_v38  ;;  %3886 = vmatprep.subr.bf16.mxu1 %v17551_v46  ;;  %v3977_v9 = vld [vmem:[#allocation7 + $0x60] sm:$0xff]  ;;  %v17727_v38 = vcombine.low %v3966_v14, %v3970_v17  ;;  %v17729_v46 = vcombine.high %v3966_v14, %v3970_v17  ;;  %v17810_v14 = vcombine.low %v4021_v2, %v4025_v20 }
 0x3cd   : > { %v17738_v12 = vcombine.low %v3973_v42, %v3977_v9  ;;  %v17814_v17 = vcombine.low %v4022_v25, %v4026_v26  ;;  %v4053_v2 = vld [vmem:[#allocation7 + $0x2c0] sm:$0xff]  ;;  %v4054_v25 = vld [vmem:[#allocation7 + $0x2c8] sm:$0xff]  ;;  %20888 = vst [vmem:[#allocation90_spill] sm:$0xff] %v17873_v22 }
 0x3ce   : > { %v4057_v20 = vld [vmem:[#allocation7 + $0x2e0] sm:$0xff] }
 0x3cf   : > { %3846 = vmatpush1.bf16.msra.mxu0 %v17555_v37  ;;  %3887 = vmatpush1.bf16.msra.mxu1 %v17557_v32  ;;  %v17731_v37 = vcombine.high %v3973_v42, %v3977_v9  ;;  %v3974_v32 = vld [vmem:[#allocation7 + $0x48] sm:$0xff]  ;;  %v4029_v42 = vld [vmem:[#allocation7 + $0x200] sm:$0xff]  ;;  %v17855_v26 = vcombine.high %v4053_v2, %v4057_v20 }
 0x3d0   : > { %4733 = vmatprep.subr.bf16.mxu0 %v17725_v55  ;;  %v17734_v59 = vcombine.high %v3974_v32, %v3978_v57  ;;  %4774 = vmatprep.subr.bf16.mxu1 %v17729_v46  ;;  %v17742_v21 = vcombine.low %v3974_v32, %v3978_v57  ;;  %v4033_v9 = vld [vmem:[#allocation7 + $0x220] sm:$0xff]  ;;  %v4030_v32 = vld [vmem:[#allocation7 + $0x208] sm:$0xff] }
 0x3d1   : > { %v17819_v57 = vcombine.high %v4029_v42, %v4033_v9  ;;  %v17821_v6 = vcombine.low %v4029_v42, %v4033_v9  ;;  %20881 = vst [vmem:[#allocation83_spill] sm:$0xff] %v17855_v26  ;;  %v4058_v42 = vld [vmem:[#allocation7 + $0x2e8] sm:$0xff]  ;;  %v17857_v9 = vcombine.low %v4053_v2, %v4057_v20  ;;  %v4069_v2 = vld [vmem:[#allocation7 + $0x340] sm:$0xff] }
 0x3d2   : > { %3848 = vmatmul.mubr.bf16.vlgmr.msra.gmra.mrb[44].mxu0 %v17655_v29  ;;  %3889 = vmatmul.mubr.bf16.vlgmr.msra.gmra.mrb[60].mxu1 %v17655_v29  ;;  %v3986_v29 = vld [vmem:[#allocation7 + $0xa8] sm:$0xff]  ;;  %v4073_v20 = vld [vmem:[#allocation7 + $0x360] sm:$0xff] }
 0x3d3   : > { %4734 = vmatpush1.bf16.msra.mxu0 %v17723_v41  ;;  %4775 = vmatpush1.bf16.msra.mxu1 %v17727_v38  ;;  %v17747_v50 = vcombine.high %v3982_v11, %v3986_v29  ;;  %v17754_v27 = vcombine.low %v3982_v11, %v3986_v29  ;;  %v17823_v11 = vcombine.low %v4030_v32, %v4034_v18 }
 0x3d4   : > { %4735 = vmatprep.subr.bf16.mxu0 %v17731_v37  ;;  %4776 = vmatprep.subr.bf16.mxu1 %v17734_v59  ;;  %v17825_v29 = vcombine.high %v4030_v32, %v4034_v18  ;;  %20882 = vst [vmem:[#allocation86_spill] sm:$0xff] %v17857_v9  ;;  %v17859_v32 = vcombine.low %v4054_v25, %v4058_v42 }
 0x3d5   : > { %v17861_v18 = vcombine.high %v4054_v25, %v4058_v42  ;;  %v4070_v25 = vld [vmem:[#allocation7 + $0x348] sm:$0xff]  ;;  %v17879_v42 = vcombine.low %v4069_v2, %v4073_v20  ;;  %v17881_v28 = vcombine.high %v4069_v2, %v4073_v20  ;;  %v17894_v20 = vcombine.low %v4077_v53, %v4081_v8 }
 0x3d6   : > { %20883 = vst [vmem:[#allocation84_spill] sm:$0xff] %v17859_v32  ;;  %v17883_v33 = vcombine.low %v4070_v25, %v4074_v1  ;;  %v17885_v10 = vcombine.high %v4070_v25, %v4074_v1  ;;  %v4090_v2 = vld [vmem:[#allocation7 + $0x3e8] sm:$0xff] }
 0x3d7   : > { %4736 = vmatpush1.bf16.msra.mxu0 %v17738_v12  ;;  %4777 = vmatpush1.bf16.msra.mxu1 %v17742_v21  ;;  %20884 = vst [vmem:[#allocation85_spill] sm:$0xff] %v17861_v18  ;;  %20889 = vst [vmem:[#allocation95_spill] sm:$0xff] %v17879_v42 }
 0x3d8   : > { %4737 = vmatprep.subr.bf16.mxu0 %v17744_v34  ;;  %4778 = vmatprep.subr.bf16.mxu1 %v17747_v50  ;;  %20890 = vst [vmem:[#allocation98_spill] sm:$0xff] %v17881_v28  ;;  %20891 = vst [vmem:[#allocation96_spill] sm:$0xff] %v17883_v33 }
 0x3d9   : > { %20892 = vst [vmem:[#allocation97_spill] sm:$0xff] %v17885_v10  ;;  %20895 = vst [vmem:[#allocation101_spill] sm:$0xff] %v17894_v20 }
 0x3db   : > { %4738 = vmatpush1.bf16.msra.mxu0 %v17750_v23  ;;  %4779 = vmatpush1.bf16.msra.mxu1 %v17754_v27 }
 0x3dc   : > { %4739 = vmatprep.subr.bf16.mxu0 %v17756_v60  ;;  %4780 = vmatprep.subr.bf16.mxu1 %v17759_v35 }
 0x3df   : > { %4740 = vmatpush1.bf16.msra.mxu0 %v17762_v61  ;;  %4781 = vmatpush1.bf16.msra.mxu1 %v17766_v0 }
 0x3e0   : > { %4741 = vmatprep.subr.bf16.mxu0 %v17768_v15  ;;  %4782 = vmatprep.subr.bf16.mxu1 %v17771_v3 }
 0x3e3   : > { %4742 = vmatpush1.bf16.msra.mxu0 %v17774_v62  ;;  %4783 = vmatpush1.bf16.msra.mxu1 %v17778_v30 }
 0x3e4   : > { %4743 = vmatprep.subr.bf16.mxu0 %v17780_v16  ;;  %4784 = vmatprep.subr.bf16.mxu1 %v17783_v48 }
 0x3e7   : > { %4744 = vmatpush1.bf16.msra.mxu0 %v17786_v36  ;;  %4785 = vmatpush1.bf16.msra.mxu1 %v17790_v40 }
 0x3e8   : > { %4745 = vmatprep.subr.bf16.mxu0 %v17792_v54  ;;  %4786 = vmatprep.subr.bf16.mxu1 %v17795_v58 }
 0x3eb   : > { %4746 = vmatpush1.bf16.msra.mxu0 %v17798_v31  ;;  %4787 = vmatpush1.bf16.msra.mxu1 %v17802_v56 }
 0x3ec   : > { %4747 = vmatprep.subr.bf16.mxu0 %v17804_v19  ;;  %4788 = vmatprep.subr.bf16.mxu1 %v17807_v24 }
 0x3ef   : > { %4748 = vmatpush1.bf16.msra.mxu0 %v17810_v14  ;;  %4789 = vmatpush1.bf16.msra.mxu1 %v17814_v17 }
 0x3f0   : > { %4749 = vmatprep.subr.bf16.mxu0 %v17819_v57  ;;  %4790 = vmatprep.subr.bf16.mxu1 %v17825_v29 }
 0x3f3   : > { %4750 = vmatpush1.bf16.msra.mxu0 %v17821_v6  ;;  %4791 = vmatpush1.bf16.msra.mxu1 %v17823_v11 }
 0x3f4   : > { %4751 = vmatprep.subr.bf16.mxu0 %v17831_v63  ;;  %4792 = vmatprep.subr.bf16.mxu1 %v17837_v47 }
 0x3f7   : > { %4752 = vmatpush1.bf16.msra.mxu0 %v17833_v5  ;;  %4793 = vmatpush1.bf16.msra.mxu1 %v17835_v7 }
 0x3f8   : > { %4753 = vmatprep.subr.bf16.mxu0 %v17843_v39  ;;  %4794 = vmatprep.subr.bf16.mxu1 %v17849_v13 }
 0x3fb   : > { %4754 = vmatpush1.bf16.msra.mxu0 %v17845_v52  ;;  %4795 = vmatpush1.bf16.msra.mxu1 %v17847_v49 }
 0x3fc   : > { %4755 = vmatprep.subr.bf16.mxu0 %v17855_v26  ;;  %4796 = vmatprep.subr.bf16.mxu1 %v17861_v18  ;;  %v4086_v18 = vld [vmem:[#allocation7 + $0x3c8] sm:$0xff] }
 0x3ff   : > { %4756 = vmatpush1.bf16.msra.mxu0 %v17857_v9  ;;  %4797 = vmatpush1.bf16.msra.mxu1 %v17859_v32  ;;  %v4085_v32 = vld [vmem:[#allocation7 + $0x3c0] sm:$0xff] }
 0x400   : > { %4757 = vmatprep.subr.bf16.mxu0 %v17867_v43  ;;  %4798 = vmatprep.subr.bf16.mxu1 %v17873_v22  ;;  %v17887_v43 = vcombine.high %v4077_v53, %v4081_v8  ;;  %v4078_v22 = vld [vmem:[#allocation7 + $0x388] sm:$0xff]  ;;  %v17910_v8 = vcombine.low %v4086_v18, %v4090_v2  ;;  %v3968_v53 = vld [vmem:[#allocation7 + $0x18] sm:$0xff] }
 0x402   : > { %20893 = vst [vmem:[#allocation99_spill] sm:$0xff] %v17887_v43  ;;  %20900 = vst [vmem:[#allocation110_spill] sm:$0xff] %v17910_v8 }
 0x403   : > { %4758 = vmatpush1.bf16.msra.mxu0 %v17869_v44  ;;  %4799 = vmatpush1.bf16.msra.mxu1 %v17871_v45  ;;  %v4082_v44 = vld [vmem:[#allocation7 + $0x3a8] sm:$0xff]  ;;  %v4089_v45 = vld [vmem:[#allocation7 + $0x3e0] sm:$0xff] }
 0x404   : > { %4759 = vmatprep.subr.bf16.mxu0 %v17881_v28  ;;  %v17890_v9 = vcombine.high %v4078_v22, %v4082_v44  ;;  %4800 = vmatprep.subr.bf16.mxu1 %v17885_v10  ;;  %v17898_v25 = vcombine.low %v4078_v22, %v4082_v44  ;;  %v17900_v1 = vcombine.high %v4085_v32, %v4089_v45  ;;  %v3967_v44 = vld [vmem:[#allocation7 + $0x10] sm:$0xff] }
 0x405   : > { %v17903_v28 = vcombine.high %v4086_v18, %v4090_v2  ;;  %v17906_v26 = vcombine.low %v4085_v32, %v4089_v45  ;;  %v3971_v22 = vld [vmem:[#allocation7 + $0x30] sm:$0xff] }
 0x406   : > { %20894 = vst [vmem:[#allocation103_spill] sm:$0xff] %v17890_v9  ;;  %20896 = vst [vmem:[#allocation102_spill] sm:$0xff] %v17898_v25  ;;  %v17917_v32 = vcombine.low %v3967_v44, %v3971_v22 }
 0x407   : > { %4760 = vmatpush1.bf16.msra.mxu0 %v17879_v42  ;;  %4801 = vmatpush1.bf16.msra.mxu1 %v17883_v33  ;;  %20897 = vst [vmem:[#allocation108_spill] sm:$0xff] %v17900_v1  ;;  %20898 = vst [vmem:[#allocation109_spill] sm:$0xff] %v17903_v28  ;;  %v20905_v42 = vld [vmem:[#allocation39_spill] sm:$0xff] }
 0x408   : > { %4761 = vmatprep.subr.bf16.mxu0 %v17887_v43  ;;  %4802 = vmatprep.subr.bf16.mxu1 %v17890_v9  ;;  %20899 = vst [vmem:[#allocation107_spill] sm:$0xff] %v17906_v26  ;;  %v17915_v9 = vcombine.high %v3967_v44, %v3971_v22  ;;  %v20906_v44 = vld [vmem:[#allocation52_spill] sm:$0xff] }
 0x40a   : > { %20901 = vst [vmem:[#allocation111_spill] sm:$0xff] %v17915_v9 }
 0x40b   : > { %4762 = vmatpush1.bf16.msra.mxu0 %v17894_v20  ;;  %4803 = vmatpush1.bf16.msra.mxu1 %v17898_v25  ;;  %v3972_v20 = vld [vmem:[#allocation7 + $0x38] sm:$0xff] }
 0x40c   : > { %4763 = vmatprep.subr.bf16.mxu0 %v17900_v1  ;;  %4804 = vmatprep.subr.bf16.mxu1 %v17903_v28  ;;  %v17919_v45 = vcombine.low %v3968_v53, %v3972_v20  ;;  %v17921_v25 = vcombine.high %v3968_v53, %v3972_v20  ;;  %v20904_v1 = vld [vmem:[#allocation50_spill] sm:$0xff] }
 0x40e   : > { %20902 = vst [vmem:[#allocation114_spill] sm:$0xff] %v17921_v25 }
 0x40f   : > { %4764 = vmatpush1.bf16.msra.mxu0 %v17906_v26  ;;  %4805 = vmatpush1.bf16.msra.mxu1 %v17910_v8  ;;  %v20903_v26 = vld [vmem:[#allocation37_spill] sm:$0xff] }
 0x410   : > { %4815 = vmatprep.subr.bf16.mxu0 %v17915_v9  ;;  %4856 = vmatprep.subr.bf16.mxu1 %v17921_v25 }
 0x465   : > { %v3767_v18 = vpop.f32.mrb[40].mxu0  ;;  %v3808_v2 = vpop.f32.mrb[56].mxu1 }
 0x466   : > { %v3897_v28 = vadd.f32 %v3767_v18, %v20903_v26  ;;  %v3899_v43 = vadd.f32 %v3808_v2, %v20904_v1  ;;  %v3769_v8 = vpop.f32.mrb[41].mxu0  ;;  %v3810_v33 = vpop.f32.mrb[57].mxu1 }
 0x467   : > { %v3898_v10 = vadd.f32 %v3769_v8, %v20905_v42  ;;  %v3900_v22 = vadd.f32 %v3810_v33, %v20906_v44  ;;  %v3771_v49 = vpop.f32.mrb[42].mxu0  ;;  %v3812_v52 = vpop.f32.mrb[58].mxu1 }
 0x468   : > { %v3772_v20 = vpop.f32.mrb[43].mxu0  ;;  %v3813_v53 = vpop.f32.mrb[59].mxu1  ;;  %v14214_v13 = vmul.f32 -1.442695, %v3897_v28  ;;  %v14216_v9 = vmul.f32 -1.442695, %v3899_v43 }
 0x469   : > { %v14215_v39 = vmul.f32 -1.442695, %v3898_v10  ;;  %v14217_v25 = vmul.f32 -1.442695, %v3900_v22  ;;  %v20907_v28 = vld [vmem:[#allocation51_spill] sm:$0xff]  ;;  %v20908_v10 = vld [vmem:[#allocation88_spill] sm:$0xff] }
 0x46a   : > { %15826 = vpow2.f32 %v14214_v13  ;;  %v20910_v22 = vld [vmem:[#allocation92_spill] sm:$0xff] }
 0x46b   : > { %15828 = vpow2.f32 %v14216_v9 }
 0x46c   : > { %15830 = vpow2.f32 %v14215_v39 }
 0x46d   : > { %15832 = vpow2.f32 %v14217_v25  ;;  %v20909_v25 = vld [vmem:[#allocation53_spill] sm:$0xff] }
 0x474   : > { %v15827_v26 = vpop.eup %15826 }
 0x475   : > { %v15829_v1 = vpop.eup %15828  ;;  %v3923_v7 = vadd.f32 1.0, %v15827_v26 }
 0x476   : > { %v15831_v18 = vpop.eup %15830  ;;  %v3925_v42 = vadd.f32 1.0, %v15829_v1 }
 0x477   : > { %v15833_v2 = vpop.eup %15832  ;;  %v3924_v8 = vadd.f32 1.0, %v15831_v18  ;;  %15834 = vrcp.f32 %v3923_v7 }
 0x478   : > { %v3926_v33 = vadd.f32 1.0, %v15833_v2  ;;  %15836 = vrcp.f32 %v3925_v42 }
 0x479   : > { %15838 = vrcp.f32 %v3924_v8 }
 0x47a   : > { %15840 = vrcp.f32 %v3926_v33 }
 0x481   : > { %v15835_v42 = vpop.eup %15834 }
 0x482   : > { %v15837_v8 = vpop.eup %15836 }
 0x4a5   : > { %v3849_v52 = vpop.f32.mrb[44].mxu0  ;;  %v3890_v49 = vpop.f32.mrb[60].mxu1 }
 0x4a6   : > { %v3901_v43 = vadd.f32 %v3849_v52, %v20907_v28  ;;  %v3903_v13 = vadd.f32 %v3890_v49, %v20908_v10  ;;  %v3851_v9 = vpop.f32.mrb[45].mxu0  ;;  %v3892_v39 = vpop.f32.mrb[61].mxu1  ;;  %v3943_v10 = vmul.f32 %v15837_v8, %v17641_v51  ;;  %v3976_v8 = vld [vmem:[#allocation7 + $0x58] sm:$0xff] }
 0x4a7   : > { %v3902_v44 = vadd.f32 %v3851_v9, %v20909_v25  ;;  %v3904_v20 = vadd.f32 %v3892_v39, %v20910_v22  ;;  %v3853_v53 = vpop.f32.mrb[46].mxu0  ;;  %v3894_v26 = vpop.f32.mrb[62].mxu1 }
 0x4a8   : > { %v14218_v1 = vmul.f32 -1.442695, %v3901_v43  ;;  %15842 = vtanh.f32 %v3903_v13  ;;  %v3854_v7 = vpop.f32.mrb[47].mxu0  ;;  %v3895_v18 = vpop.f32.mrb[63].mxu1 }
 0x4a9   : > { %v14219_v2 = vmul.f32 -1.442695, %v3902_v44  ;;  %15844 = vtanh.f32 %v3904_v20  ;;  %v15839_v52 = vpop.eup %15838 }
 0x4aa   : > { %15846 = vpow2.f32 %v14218_v1  ;;  %v15841_v49 = vpop.eup %15840 }
 0x4ab   : > { %15848 = vpow2.f32 %v14219_v2  ;;  %v3944_v25 = vmul.f32 %v15841_v49, %v17643_v4  ;;  %v3975_v2 = vld [vmem:[#allocation7 + $0x50] sm:$0xff] }
 0x4b2   : > { %v15843_v28 = vpop.eup %15842 }
 0x4b3   : > { %v15845_v33 = vpop.eup %15844  ;;  %v3945_v9 = vmul.f32 %v15843_v28, %v15835_v42  ;;  %v3979_v42 = vld [vmem:[#allocation7 + $0x70] sm:$0xff] }
 0x4b4   : > { %v15847_v39 = vpop.eup %15846  ;;  %v3946_v43 = vmul.f32 %v15845_v33, %v15839_v52  ;;  %v3980_v52 = vld [vmem:[#allocation7 + $0x78] sm:$0xff]  ;;  %v3983_v33 = vld [vmem:[#allocation7 + $0x90] sm:$0xff] }
 0x4b5   : > { %v15849_v13 = vpop.eup %15848  ;;  %v3927_v22 = vadd.f32 1.0, %v15847_v39  ;;  %v17935_v53 = vadd.f32 %v3945_v9, %v3943_v10  ;;  %v17951_v10 = vcombine.high %v3975_v2, %v3979_v42  ;;  %v17953_v9 = vcombine.high %v3976_v8, %v3980_v52  ;;  %v3987_v39 = vld [vmem:[#allocation7 + $0xb0] sm:$0xff] }
 0x4b6   : > { %v3928_v44 = vadd.f32 1.0, %v15849_v13  ;;  %v17937_v20 = vadd.f32 %v3946_v43, %v3944_v25  ;;  %v3984_v25 = vld [vmem:[#allocation7 + $0x98] sm:$0xff]  ;;  %v17959_v13 = vcombine.low %v3975_v2, %v3979_v42  ;;  %v17971_v2 = vcombine.low %v3983_v33, %v3987_v39 }
 0x4b7   : > { %15850 = vrcp.f32 %v3927_v22  ;;  %20913 = vst [vmem:[#allocation119_spill] sm:$0xff] %v17951_v10  ;;  %20914 = vst [vmem:[#allocation120_spill] sm:$0xff] %v17953_v9  ;;  %v3988_v43 = vld [vmem:[#allocation7 + $0xb8] sm:$0xff]  ;;  %v17961_v22 = vcombine.low %v3976_v8, %v3980_v52 }
 0x4b8   : > { %15852 = vtanh.f32 %v17935_v53  ;;  %20915 = vst [vmem:[#allocation33_spill] sm:$0xff] %v17959_v13  ;;  %20919 = vst [vmem:[#allocation47_spill] sm:$0xff] %v17971_v2  ;;  %v17973_v42 = vcombine.low %v3984_v25, %v3988_v43 }
 0x4b9   : > { %15854 = vrcp.f32 %v3928_v44  ;;  %20916 = vst [vmem:[#allocation46_spill] sm:$0xff] %v17961_v22  ;;  %v17963_v44 = vcombine.high %v3983_v33, %v3987_v39 }
 0x4ba   : > { %15856 = vtanh.f32 %v17937_v20  ;;  %20920 = vst [vmem:[#allocation81_spill] sm:$0xff] %v17973_v42 }
 0x4bb   : > { %20917 = vst [vmem:[#allocation35_spill] sm:$0xff] %v17963_v44 }
 0x4c1   : > { %v15851_v26 = vpop.eup %15850 }
 0x4c2   : > { %v15853_v51 = vpop.eup %15852 }
 0x4c3   : > { %v15855_v1 = vpop.eup %15854  ;;  %v17941_v18 = vmul.f32 %v15853_v51, %v15851_v26  ;;  %v17965_v26 = vcombine.high %v3984_v25, %v3988_v43  ;;  %v3991_v51 = vld [vmem:[#allocation7 + $0xd0] sm:$0xff] }
 0x4c4   : > { %v15857_v7 = vpop.eup %15856 }
 0x4c5   : > { %20911 = vst [vmem:[#allocation116_spill] sm:$0xff] %v17941_v18  ;;  %v17943_v4 = vmul.f32 %v15857_v7, %v15855_v1  ;;  %v17949_v28 = vpack.c.bf16 %v17941_v18, %v17941_v18  ;;  %20918 = vst [vmem:[#allocation48_spill] sm:$0xff] %v17965_v26  ;;  %v3995_v1 = vld [vmem:[#allocation7 + $0xf0] sm:$0xff]  ;;  %v3992_v7 = vld [vmem:[#allocation7 + $0xd8] sm:$0xff] }
 0x4c6   : > { %v3996_v18 = vld [vmem:[#allocation7 + $0xf8] sm:$0xff]  ;;  %v17977_v8 = vcombine.high %v3991_v51, %v3995_v1  ;;  %v17983_v33 = vcombine.low %v3991_v51, %v3995_v1 }
 0x4c7   : > { %20912 = vst [vmem:[#allocation118_spill] sm:$0xff] %v17943_v4  ;;  %v3956_v49 = vpack.c.bf16 %v17943_v4, %v17943_v4  ;;  %v17979_v52 = vcombine.high %v3992_v7, %v3996_v18  ;;  %v4003_v4 = vld [vmem:[#allocation7 + $0x130] sm:$0xff]  ;;  %v17985_v39 = vcombine.low %v3992_v7, %v3996_v18 }
 0x4c8   : > { %20921 = vst [vmem:[#allocation49_spill] sm:$0xff] %v17977_v8  ;;  %20923 = vst [vmem:[#allocation123_spill] sm:$0xff] %v17983_v33 }
 0x4c9   : > { %4765 = vmatprep.mubr.bf16.mxu0 %v3956_v49  ;;  %4806 = vmatprep.mubr.bf16.mxu1 %v3956_v49  ;;  %20922 = vst [vmem:[#allocation82_spill] sm:$0xff] %v17979_v52  ;;  %20924 = vst [vmem:[#allocation124_spill] sm:$0xff] %v17985_v39 }
 0x4ca   : > { %4766 = vmatmul.mubr.bf16.vlgmr.msra.gmra.mrb[48].mxu0 %v17949_v28  ;;  %4807 = vmatmul.mubr.bf16.vlgmr.msra.gmra.mrb[64].mxu1 %v17949_v28 }
 0x4cb   : > { %4816 = vmatpush1.bf16.msra.mxu0 %v17917_v32  ;;  %4857 = vmatpush1.bf16.msra.mxu1 %v17919_v45 }
 0x4cc   : > { %4847 = vmatprep.mubr.bf16.mxu0 %v3956_v49  ;;  %4888 = vmatprep.mubr.bf16.mxu1 %v3956_v49  ;;  %v3999_v49 = vld [vmem:[#allocation7 + $0x110] sm:$0xff] }
 0x4cd   : > { %4817 = vmatprep.subr.bf16.mxu0 %v17951_v10  ;;  %4858 = vmatprep.subr.bf16.mxu1 %v17953_v9  ;;  %v4000_v9 = vld [vmem:[#allocation7 + $0x118] sm:$0xff]  ;;  %v17989_v25 = vcombine.high %v3999_v49, %v4003_v4  ;;  %v17995_v51 = vcombine.low %v3999_v49, %v4003_v4 }
 0x4ce   : > { %v4004_v10 = vld [vmem:[#allocation7 + $0x138] sm:$0xff] }
 0x4cf   : > { %4818 = vmatpush1.bf16.msra.mxu0 %v17959_v13  ;;  %4859 = vmatpush1.bf16.msra.mxu1 %v17961_v22  ;;  %20925 = vst [vmem:[#allocation125_spill] sm:$0xff] %v17989_v25  ;;  %v17991_v43 = vcombine.high %v4000_v9, %v4004_v10  ;;  %v4008_v22 = vld [vmem:[#allocation7 + $0x158] sm:$0xff]  ;;  %20927 = vst [vmem:[#allocation127_spill] sm:$0xff] %v17995_v51  ;;  %v17997_v18 = vcombine.low %v4000_v9, %v4004_v10 }
 0x4d0   : > { %4819 = vmatprep.subr.bf16.mxu0 %v17963_v44  ;;  %4860 = vmatprep.subr.bf16.mxu1 %v17965_v26  ;;  %v4007_v26 = vld [vmem:[#allocation7 + $0x150] sm:$0xff]  ;;  %v4012_v13 = vld [vmem:[#allocation7 + $0x178] sm:$0xff] }
 0x4d1   : > { %20926 = vst [vmem:[#allocation126_spill] sm:$0xff] %v17991_v43  ;;  %v4011_v44 = vld [vmem:[#allocation7 + $0x170] sm:$0xff]  ;;  %20928 = vst [vmem:[#allocation128_spill] sm:$0xff] %v17997_v18  ;;  %v18003_v7 = vcombine.high %v4008_v22, %v4012_v13  ;;  %v18009_v10 = vcombine.low %v4008_v22, %v4012_v13 }
 0x4d2   : > { %v18001_v1 = vcombine.high %v4007_v26, %v4011_v44  ;;  %v18007_v4 = vcombine.low %v4007_v26, %v4011_v44 }
 0x4d3   : > { %4820 = vmatpush1.bf16.msra.mxu0 %v17971_v2  ;;  %4861 = vmatpush1.bf16.msra.mxu1 %v17973_v42  ;;  %20930 = vst [vmem:[#allocation130_spill] sm:$0xff] %v18003_v7  ;;  %v4016_v42 = vld [vmem:[#allocation7 + $0x198] sm:$0xff]  ;;  %20932 = vst [vmem:[#allocation132_spill] sm:$0xff] %v18009_v10 }
 0x4d4   : > { %4821 = vmatprep.subr.bf16.mxu0 %v17977_v8  ;;  %4862 = vmatprep.subr.bf16.mxu1 %v17979_v52  ;;  %20929 = vst [vmem:[#allocation129_spill] sm:$0xff] %v18001_v1  ;;  %v4015_v52 = vld [vmem:[#allocation7 + $0x190] sm:$0xff]  ;;  %v4020_v2 = vld [vmem:[#allocation7 + $0x1b8] sm:$0xff]  ;;  %20931 = vst [vmem:[#allocation131_spill] sm:$0xff] %v18007_v4 }
 0x4d5   : > { %v4019_v8 = vld [vmem:[#allocation7 + $0x1b0] sm:$0xff]  ;;  %v18015_v49 = vcombine.high %v4016_v42, %v4020_v2  ;;  %v18021_v13 = vcombine.low %v4016_v42, %v4020_v2 }
 0x4d6   : > { %v18013_v9 = vcombine.high %v4015_v52, %v4019_v8  ;;  %v18019_v44 = vcombine.low %v4015_v52, %v4019_v8 }
 0x4d7   : > { %4822 = vmatpush1.bf16.msra.mxu0 %v17983_v33  ;;  %4863 = vmatpush1.bf16.msra.mxu1 %v17985_v39  ;;  %20934 = vst [vmem:[#allocation134_spill] sm:$0xff] %v18015_v49  ;;  %v4024_v39 = vld [vmem:[#allocation7 + $0x1d8] sm:$0xff]  ;;  %20936 = vst [vmem:[#allocation136_spill] sm:$0xff] %v18021_v13 }
 0x4d8   : > { %4823 = vmatprep.subr.bf16.mxu0 %v17989_v25  ;;  %4864 = vmatprep.subr.bf16.mxu1 %v17991_v43  ;;  %20933 = vst [vmem:[#allocation133_spill] sm:$0xff] %v18013_v9  ;;  %v4023_v43 = vld [vmem:[#allocation7 + $0x1d0] sm:$0xff]  ;;  %v4028_v33 = vld [vmem:[#allocation7 + $0x1f8] sm:$0xff]  ;;  %20935 = vst [vmem:[#allocation135_spill] sm:$0xff] %v18019_v44 }
 0x4d9   : > { %v4027_v25 = vld [vmem:[#allocation7 + $0x1f0] sm:$0xff]  ;;  %v18027_v26 = vcombine.high %v4024_v39, %v4028_v33  ;;  %v18033_v2 = vcombine.low %v4024_v39, %v4028_v33 }
 0x4da   : > { %v18025_v22 = vcombine.high %v4023_v43, %v4027_v25  ;;  %v18031_v8 = vcombine.low %v4023_v43, %v4027_v25 }
 0x4db   : > { %4824 = vmatpush1.bf16.msra.mxu0 %v17995_v51  ;;  %4865 = vmatpush1.bf16.msra.mxu1 %v17997_v18  ;;  %20938 = vst [vmem:[#allocation138_spill] sm:$0xff] %v18027_v26  ;;  %v4032_v18 = vld [vmem:[#allocation7 + $0x218] sm:$0xff]  ;;  %20940 = vst [vmem:[#allocation140_spill] sm:$0xff] %v18033_v2 }
 0x4dc   : > { %4825 = vmatprep.subr.bf16.mxu0 %v18001_v1  ;;  %4866 = vmatprep.subr.bf16.mxu1 %v18003_v7  ;;  %20937 = vst [vmem:[#allocation137_spill] sm:$0xff] %v18025_v22  ;;  %v4031_v7 = vld [vmem:[#allocation7 + $0x210] sm:$0xff]  ;;  %v4036_v51 = vld [vmem:[#allocation7 + $0x238] sm:$0xff]  ;;  %20939 = vst [vmem:[#allocation139_spill] sm:$0xff] %v18031_v8 }
 0x4dd   : > { %v4035_v1 = vld [vmem:[#allocation7 + $0x230] sm:$0xff]  ;;  %v18039_v52 = vcombine.high %v4032_v18, %v4036_v51  ;;  %v18045_v33 = vcombine.low %v4032_v18, %v4036_v51 }
 0x4de   : > { %v18037_v42 = vcombine.high %v4031_v7, %v4035_v1  ;;  %v18043_v25 = vcombine.low %v4031_v7, %v4035_v1 }
 0x4df   : > { %4826 = vmatpush1.bf16.msra.mxu0 %v18007_v4  ;;  %4867 = vmatpush1.bf16.msra.mxu1 %v18009_v10  ;;  %20942 = vst [vmem:[#allocation142_spill] sm:$0xff] %v18039_v52  ;;  %v4040_v10 = vld [vmem:[#allocation7 + $0x258] sm:$0xff]  ;;  %20944 = vst [vmem:[#allocation144_spill] sm:$0xff] %v18045_v33 }
 0x4e0   : > { %4827 = vmatprep.subr.bf16.mxu0 %v18013_v9  ;;  %4868 = vmatprep.subr.bf16.mxu1 %v18015_v49  ;;  %20941 = vst [vmem:[#allocation141_spill] sm:$0xff] %v18037_v42  ;;  %v4039_v49 = vld [vmem:[#allocation7 + $0x250] sm:$0xff]  ;;  %v4044_v4 = vld [vmem:[#allocation7 + $0x278] sm:$0xff]  ;;  %20943 = vst [vmem:[#allocation143_spill] sm:$0xff] %v18043_v25 }
 0x4e1   : > { %v4043_v9 = vld [vmem:[#allocation7 + $0x270] sm:$0xff]  ;;  %v18051_v43 = vcombine.high %v4040_v10, %v4044_v4  ;;  %v18057_v51 = vcombine.low %v4040_v10, %v4044_v4 }
 0x4e2   : > { %v18049_v39 = vcombine.high %v4039_v49, %v4043_v9  ;;  %v18055_v1 = vcombine.low %v4039_v49, %v4043_v9 }
 0x4e3   : > { %4828 = vmatpush1.bf16.msra.mxu0 %v18019_v44  ;;  %4869 = vmatpush1.bf16.msra.mxu1 %v18021_v13  ;;  %20946 = vst [vmem:[#allocation146_spill] sm:$0xff] %v18051_v43  ;;  %v4048_v13 = vld [vmem:[#allocation7 + $0x298] sm:$0xff]  ;;  %20948 = vst [vmem:[#allocation148_spill] sm:$0xff] %v18057_v51 }
 0x4e4   : > { %4829 = vmatprep.subr.bf16.mxu0 %v18025_v22  ;;  %4870 = vmatprep.subr.bf16.mxu1 %v18027_v26  ;;  %20945 = vst [vmem:[#allocation145_spill] sm:$0xff] %v18049_v39  ;;  %v4047_v26 = vld [vmem:[#allocation7 + $0x290] sm:$0xff]  ;;  %v4052_v44 = vld [vmem:[#allocation7 + $0x2b8] sm:$0xff]  ;;  %20947 = vst [vmem:[#allocation147_spill] sm:$0xff] %v18055_v1 }
 0x4e5   : > { %v4051_v22 = vld [vmem:[#allocation7 + $0x2b0] sm:$0xff]  ;;  %v18063_v7 = vcombine.high %v4048_v13, %v4052_v44  ;;  %v18069_v4 = vcombine.low %v4048_v13, %v4052_v44 }
 0x4e6   : > { %v18061_v18 = vcombine.high %v4047_v26, %v4051_v22  ;;  %v18067_v9 = vcombine.low %v4047_v26, %v4051_v22 }
 0x4e7   : > { %4830 = vmatpush1.bf16.msra.mxu0 %v18031_v8  ;;  %4871 = vmatpush1.bf16.msra.mxu1 %v18033_v2  ;;  %20950 = vst [vmem:[#allocation150_spill] sm:$0xff] %v18063_v7  ;;  %v4056_v2 = vld [vmem:[#allocation7 + $0x2d8] sm:$0xff]  ;;  %20952 = vst [vmem:[#allocation152_spill] sm:$0xff] %v18069_v4 }
 0x4e8   : > { %4831 = vmatprep.subr.bf16.mxu0 %v18037_v42  ;;  %4872 = vmatprep.subr.bf16.mxu1 %v18039_v52  ;;  %20949 = vst [vmem:[#allocation149_spill] sm:$0xff] %v18061_v18  ;;  %v4055_v52 = vld [vmem:[#allocation7 + $0x2d0] sm:$0xff]  ;;  %v4060_v8 = vld [vmem:[#allocation7 + $0x2f8] sm:$0xff]  ;;  %20951 = vst [vmem:[#allocation151_spill] sm:$0xff] %v18067_v9 }
 0x4e9   : > { %v4059_v42 = vld [vmem:[#allocation7 + $0x2f0] sm:$0xff]  ;;  %v18075_v49 = vcombine.high %v4056_v2, %v4060_v8  ;;  %v18081_v44 = vcombine.low %v4056_v2, %v4060_v8 }
 0x4ea   : > { %v18073_v10 = vcombine.high %v4055_v52, %v4059_v42  ;;  %v18079_v22 = vcombine.low %v4055_v52, %v4059_v42 }
 0x4eb   : > { %4832 = vmatpush1.bf16.msra.mxu0 %v18043_v25  ;;  %4873 = vmatpush1.bf16.msra.mxu1 %v18045_v33  ;;  %20954 = vst [vmem:[#allocation154_spill] sm:$0xff] %v18075_v49  ;;  %v4064_v33 = vld [vmem:[#allocation7 + $0x318] sm:$0xff]  ;;  %20956 = vst [vmem:[#allocation156_spill] sm:$0xff] %v18081_v44 }
 0x4ec   : > { %4833 = vmatprep.subr.bf16.mxu0 %v18049_v39  ;;  %4874 = vmatprep.subr.bf16.mxu1 %v18051_v43  ;;  %20953 = vst [vmem:[#allocation153_spill] sm:$0xff] %v18073_v10  ;;  %v4063_v43 = vld [vmem:[#allocation7 + $0x310] sm:$0xff]  ;;  %v4068_v25 = vld [vmem:[#allocation7 + $0x338] sm:$0xff]  ;;  %20955 = vst [vmem:[#allocation155_spill] sm:$0xff] %v18079_v22 }
 0x4ed   : > { %v4067_v39 = vld [vmem:[#allocation7 + $0x330] sm:$0xff]  ;;  %v18087_v26 = vcombine.high %v4064_v33, %v4068_v25  ;;  %v18093_v8 = vcombine.low %v4064_v33, %v4068_v25 }
 0x4ee   : > { %v18085_v13 = vcombine.high %v4063_v43, %v4067_v39  ;;  %v18091_v42 = vcombine.low %v4063_v43, %v4067_v39 }
 0x4ef   : > { %4834 = vmatpush1.bf16.msra.mxu0 %v18055_v1  ;;  %4875 = vmatpush1.bf16.msra.mxu1 %v18057_v51  ;;  %20958 = vst [vmem:[#allocation158_spill] sm:$0xff] %v18087_v26  ;;  %v4072_v51 = vld [vmem:[#allocation7 + $0x358] sm:$0xff] }
 0x4f0   : > { %4835 = vmatprep.subr.bf16.mxu0 %v18061_v18  ;;  %4876 = vmatprep.subr.bf16.mxu1 %v18063_v7  ;;  %20957 = vst [vmem:[#allocation157_spill] sm:$0xff] %v18085_v13  ;;  %v4071_v7 = vld [vmem:[#allocation7 + $0x350] sm:$0xff]  ;;  %v4076_v1 = vld [vmem:[#allocation7 + $0x378] sm:$0xff] }
 0x4f1   : > { %v4075_v18 = vld [vmem:[#allocation7 + $0x370] sm:$0xff]  ;;  %v18099_v52 = vcombine.high %v4072_v51, %v4076_v1  ;;  %v18105_v25 = vcombine.low %v4072_v51, %v4076_v1 }
 0x4f2   : > { %v18097_v2 = vcombine.high %v4071_v7, %v4075_v18  ;;  %v18103_v39 = vcombine.low %v4071_v7, %v4075_v18 }
 0x4f3   : > { %4836 = vmatpush1.bf16.msra.mxu0 %v18067_v9  ;;  %4877 = vmatpush1.bf16.msra.mxu1 %v18069_v4  ;;  %20959 = vst [vmem:[#allocation159_spill] sm:$0xff] %v18099_v52  ;;  %v4080_v4 = vld [vmem:[#allocation7 + $0x398] sm:$0xff] }
 0x4f4   : > { %4837 = vmatprep.subr.bf16.mxu0 %v18073_v10  ;;  %4878 = vmatprep.subr.bf16.mxu1 %v18075_v49  ;;  %v4079_v49 = vld [vmem:[#allocation7 + $0x390] sm:$0xff]  ;;  %v4084_v9 = vld [vmem:[#allocation7 + $0x3b8] sm:$0xff]  ;;  %20960 = vst [vmem:[#allocation160_spill] sm:$0xff] %v18103_v39 }
 0x4f5   : > { %v4083_v10 = vld [vmem:[#allocation7 + $0x3b0] sm:$0xff]  ;;  %v18111_v43 = vcombine.high %v4080_v4, %v4084_v9  ;;  %v18117_v1 = vcombine.low %v4080_v4, %v4084_v9 }
 0x4f6   : > { %v18109_v33 = vcombine.high %v4079_v49, %v4083_v10  ;;  %v18115_v18 = vcombine.low %v4079_v49, %v4083_v10 }
 0x4f7   : > { %4838 = vmatpush1.bf16.msra.mxu0 %v18079_v22  ;;  %4879 = vmatpush1.bf16.msra.mxu1 %v18081_v44  ;;  %v4088_v44 = vld [vmem:[#allocation7 + $0x3d8] sm:$0xff] }
 0x4f8   : > { %4839 = vmatprep.subr.bf16.mxu0 %v18085_v13  ;;  %4880 = vmatprep.subr.bf16.mxu1 %v18087_v26  ;;  %v4087_v26 = vld [vmem:[#allocation7 + $0x3d0] sm:$0xff]  ;;  %v4092_v22 = vld [vmem:[#allocation7 + $0x3f8] sm:$0xff] }
 0x4f9   : > { %v4091_v13 = vld [vmem:[#allocation7 + $0x3f0] sm:$0xff]  ;;  %v18123_v7 = vcombine.high %v4088_v44, %v4092_v22 }
 0x4fa   : > { %v18121_v51 = vcombine.high %v4087_v26, %v4091_v13 }
 0x4fb   : > { %4840 = vmatpush1.bf16.msra.mxu0 %v18091_v42  ;;  %4881 = vmatpush1.bf16.msra.mxu1 %v18093_v8 }
 0x4fc   : > { %4841 = vmatprep.subr.bf16.mxu0 %v18097_v2  ;;  %4882 = vmatprep.subr.bf16.mxu1 %v18099_v52  ;;  %v18127_v52 = vcombine.low %v4087_v26, %v4091_v13 }
 0x4ff   : > { %4842 = vmatpush1.bf16.msra.mxu0 %v18103_v39  ;;  %4883 = vmatpush1.bf16.msra.mxu1 %v18105_v25  ;;  %v18129_v39 = vcombine.low %v4088_v44, %v4092_v22 }
 0x500   : > { %4843 = vmatprep.subr.bf16.mxu0 %v18109_v33  ;;  %4884 = vmatprep.subr.bf16.mxu1 %v18111_v43 }
 0x503   : > { %4844 = vmatpush1.bf16.msra.mxu0 %v18115_v18  ;;  %4885 = vmatpush1.bf16.msra.mxu1 %v18117_v1 }
 0x504   : > { %4845 = vmatprep.subr.bf16.mxu0 %v18121_v51  ;;  %4886 = vmatprep.subr.bf16.mxu1 %v18123_v7 }
 0x507   : > { %4846 = vmatpush1.bf16.msra.mxu0 %v18127_v52  ;;  %4887 = vmatpush1.bf16.msra.mxu1 %v18129_v39 }
 0x508   : > { %5733 = vmatprep.subr.bf16.mxu0 %v17725_v55  ;;  %5774 = vmatprep.subr.bf16.mxu1 %v17729_v46  ;;  %v20962_v55 = vld [vmem:[#allocation77_spill] sm:$0xff]  ;;  %v20964_v46 = vld [vmem:[#allocation80_spill] sm:$0xff] }
 0x50a   : > { %4848 = vmatmul.mubr.bf16.vlgmr.msra.gmra.mrb[52].mxu0 %v17949_v28  ;;  %4889 = vmatmul.mubr.bf16.vlgmr.msra.gmra.mrb[68].mxu1 %v17949_v28 }
 0x50b   : > { %5734 = vmatpush1.bf16.msra.mxu0 %v17723_v41  ;;  %5775 = vmatpush1.bf16.msra.mxu1 %v17727_v38  ;;  %v20961_v41 = vld [vmem:[#allocation76_spill] sm:$0xff]  ;;  %v20963_v38 = vld [vmem:[#allocation79_spill] sm:$0xff] }
 0x50c   : > { %5735 = vmatprep.subr.bf16.mxu0 %v17731_v37  ;;  %5776 = vmatprep.subr.bf16.mxu1 %v17734_v59  ;;  %v20965_v37 = vld [vmem:[#allocation78_spill] sm:$0xff]  ;;  %v20966_v59 = vld [vmem:[#allocation83_spill] sm:$0xff] }
 0x50f   : > { %5736 = vmatpush1.bf16.msra.mxu0 %v17738_v12  ;;  %5777 = vmatpush1.bf16.msra.mxu1 %v17742_v21  ;;  %v20967_v12 = vld [vmem:[#allocation85_spill] sm:$0xff]  ;;  %v20968_v21 = vld [vmem:[#allocation86_spill] sm:$0xff] }
 0x510   : > { %5737 = vmatprep.subr.bf16.mxu0 %v17744_v34  ;;  %5778 = vmatprep.subr.bf16.mxu1 %v17747_v50  ;;  %v20969_v34 = vld [vmem:[#allocation84_spill] sm:$0xff]  ;;  %v20970_v50 = vld [vmem:[#allocation87_spill] sm:$0xff] }
 0x513   : > { %5738 = vmatpush1.bf16.msra.mxu0 %v17750_v23  ;;  %5779 = vmatpush1.bf16.msra.mxu1 %v17754_v27  ;;  %v20971_v23 = vld [vmem:[#allocation90_spill] sm:$0xff]  ;;  %v20972_v27 = vld [vmem:[#allocation91_spill] sm:$0xff] }
 0x514   : > { %5739 = vmatprep.subr.bf16.mxu0 %v17756_v60  ;;  %5780 = vmatprep.subr.bf16.mxu1 %v17759_v35  ;;  %v20973_v60 = vld [vmem:[#allocation89_spill] sm:$0xff]  ;;  %v20974_v35 = vld [vmem:[#allocation98_spill] sm:$0xff] }
 0x517   : > { %5740 = vmatpush1.bf16.msra.mxu0 %v17762_v61  ;;  %5781 = vmatpush1.bf16.msra.mxu1 %v17766_v0  ;;  %v20975_v61 = vld [vmem:[#allocation97_spill] sm:$0xff]  ;;  %v20976_v0 = vld [vmem:[#allocation95_spill] sm:$0xff] }
 0x518   : > { %5741 = vmatprep.subr.bf16.mxu0 %v17768_v15  ;;  %5782 = vmatprep.subr.bf16.mxu1 %v17771_v3  ;;  %v20977_v15 = vld [vmem:[#allocation96_spill] sm:$0xff]  ;;  %v20978_v3 = vld [vmem:[#allocation99_spill] sm:$0xff] }
 0x51b   : > { %5742 = vmatpush1.bf16.msra.mxu0 %v17774_v62  ;;  %5783 = vmatpush1.bf16.msra.mxu1 %v17778_v30  ;;  %v20979_v62 = vld [vmem:[#allocation103_spill] sm:$0xff]  ;;  %v20980_v30 = vld [vmem:[#allocation101_spill] sm:$0xff] }
 0x51c   : > { %5743 = vmatprep.subr.bf16.mxu0 %v17780_v16  ;;  %5784 = vmatprep.subr.bf16.mxu1 %v17783_v48  ;;  %v20981_v16 = vld [vmem:[#allocation102_spill] sm:$0xff]  ;;  %v20982_v48 = vld [vmem:[#allocation108_spill] sm:$0xff] }
 0x51f   : > { %5744 = vmatpush1.bf16.msra.mxu0 %v17786_v36  ;;  %5785 = vmatpush1.bf16.msra.mxu1 %v17790_v40  ;;  %v20983_v36 = vld [vmem:[#allocation109_spill] sm:$0xff]  ;;  %v20984_v40 = vld [vmem:[#allocation107_spill] sm:$0xff] }
 0x520   : > { %5745 = vmatprep.subr.bf16.mxu0 %v17792_v54  ;;  %5786 = vmatprep.subr.bf16.mxu1 %v17795_v58  ;;  %v20985_v54 = vld [vmem:[#allocation110_spill] sm:$0xff]  ;;  %v20986_v58 = vld [vmem:[#allocation111_spill] sm:$0xff] }
 0x523   : > { %5746 = vmatpush1.bf16.msra.mxu0 %v17798_v31  ;;  %5787 = vmatpush1.bf16.msra.mxu1 %v17802_v56  ;;  %v20987_v31 = vld [vmem:[#allocation114_spill] sm:$0xff] }
 0x524   : > { %5747 = vmatprep.subr.bf16.mxu0 %v17804_v19  ;;  %5788 = vmatprep.subr.bf16.mxu1 %v17807_v24  ;;  %v20988_v24 = vld [vmem:[#allocation41_spill] sm:$0xff] }
 0x527   : > { %5748 = vmatpush1.bf16.msra.mxu0 %v17810_v14  ;;  %5789 = vmatpush1.bf16.msra.mxu1 %v17814_v17  ;;  %v20989_v17 = vld [vmem:[#allocation54_spill] sm:$0xff] }
 0x528   : > { %5749 = vmatprep.subr.bf16.mxu0 %v17819_v57  ;;  %5790 = vmatprep.subr.bf16.mxu1 %v17825_v29  ;;  %v20990_v29 = vld [vmem:[#allocation43_spill] sm:$0xff] }
 0x52b   : > { %5750 = vmatpush1.bf16.msra.mxu0 %v17821_v6  ;;  %5791 = vmatpush1.bf16.msra.mxu1 %v17823_v11 }
 0x52c   : > { %5751 = vmatprep.subr.bf16.mxu0 %v17831_v63  ;;  %5792 = vmatprep.subr.bf16.mxu1 %v17837_v47 }
 0x52f   : > { %5752 = vmatpush1.bf16.msra.mxu0 %v17833_v5  ;;  %5793 = vmatpush1.bf16.msra.mxu1 %v20961_v41  ;;  %v20991_v5 = vld [vmem:[#allocation56_spill] sm:$0xff] }
 0x530   : > { %5753 = vmatprep.subr.bf16.mxu0 %v20962_v55  ;;  %5794 = vmatprep.subr.bf16.mxu1 %v20963_v38 }
 0x533   : > { %5754 = vmatpush1.bf16.msra.mxu0 %v20964_v46  ;;  %5795 = vmatpush1.bf16.msra.mxu1 %v20965_v37 }
 0x534   : > { %5755 = vmatprep.subr.bf16.mxu0 %v20966_v59  ;;  %5796 = vmatprep.subr.bf16.mxu1 %v20967_v12 }
 0x537   : > { %5756 = vmatpush1.bf16.msra.mxu0 %v20968_v21  ;;  %5797 = vmatpush1.bf16.msra.mxu1 %v20969_v34 }
 0x538   : > { %5757 = vmatprep.subr.bf16.mxu0 %v20970_v50  ;;  %5798 = vmatprep.subr.bf16.mxu1 %v20971_v23  ;;  %v20992_v50 = vld [vmem:[#allocation55_spill] sm:$0xff] }
 0x53b   : > { %5758 = vmatpush1.bf16.msra.mxu0 %v20972_v27  ;;  %5799 = vmatpush1.bf16.msra.mxu1 %v20973_v60  ;;  %v20993_v27 = vld [vmem:[#allocation93_spill] sm:$0xff] }
 0x53c   : > { %5759 = vmatprep.subr.bf16.mxu0 %v20974_v35  ;;  %5800 = vmatprep.subr.bf16.mxu1 %v20975_v61 }
 0x53f   : > { %5760 = vmatpush1.bf16.msra.mxu0 %v20976_v0  ;;  %5801 = vmatpush1.bf16.msra.mxu1 %v20977_v15  ;;  %v20994_v0 = vld [vmem:[#allocation57_spill] sm:$0xff] }
 0x540   : > { %5761 = vmatprep.subr.bf16.mxu0 %v20978_v3  ;;  %5802 = vmatprep.subr.bf16.mxu1 %v20979_v62  ;;  %v20995_v3 = vld [vmem:[#allocation94_spill] sm:$0xff] }
 0x543   : > { %5762 = vmatpush1.bf16.msra.mxu0 %v20980_v30  ;;  %5803 = vmatpush1.bf16.msra.mxu1 %v20981_v16 }
 0x544   : > { %5763 = vmatprep.subr.bf16.mxu0 %v20982_v48  ;;  %5804 = vmatprep.subr.bf16.mxu1 %v20983_v36 }
 0x547   : > { %5764 = vmatpush1.bf16.msra.mxu0 %v20984_v40  ;;  %5805 = vmatpush1.bf16.msra.mxu1 %v20985_v54 }
 0x548   : > { %5815 = vmatprep.subr.bf16.mxu0 %v20986_v58  ;;  %5856 = vmatprep.subr.bf16.mxu1 %v20987_v31 }
 0x59d   : > { %v4767_v56 = vpop.f32.mrb[48].mxu0  ;;  %v4808_v19 = vpop.f32.mrb[64].mxu1 }
 0x59e   : > { %v4897_v14 = vadd.f32 %v4767_v56, %v20988_v24  ;;  %v4899_v57 = vadd.f32 %v4808_v19, %v20989_v17  ;;  %v4769_v6 = vpop.f32.mrb[49].mxu0  ;;  %v4810_v11 = vpop.f32.mrb[65].mxu1 }
 0x59f   : > { %v4898_v63 = vadd.f32 %v4769_v6, %v20990_v29  ;;  %v4900_v47 = vadd.f32 %v4810_v11, %v20991_v5  ;;  %v4771_v28 = vpop.f32.mrb[50].mxu0  ;;  %v4812_v9 = vpop.f32.mrb[66].mxu1 }
 0x5a0   : > { %v4772_v4 = vpop.f32.mrb[51].mxu0  ;;  %v4813_v10 = vpop.f32.mrb[67].mxu1  ;;  %v14348_v49 = vmul.f32 -1.442695, %v4897_v14  ;;  %v14350_v22 = vmul.f32 -1.442695, %v4899_v57 }
 0x5a1   : > { %v14349_v44 = vmul.f32 -1.442695, %v4898_v63  ;;  %v14351_v13 = vmul.f32 -1.442695, %v4900_v47 }
 0x5a2   : > { %15858 = vpow2.f32 %v14348_v49 }
 0x5a3   : > { %15860 = vpow2.f32 %v14350_v22 }
 0x5a4   : > { %15862 = vpow2.f32 %v14349_v44 }
 0x5a5   : > { %15864 = vpow2.f32 %v14351_v13 }
 0x5ac   : > { %v15859_v26 = vpop.eup %15858 }
 0x5ad   : > { %v15861_v41 = vpop.eup %15860  ;;  %v4923_v46 = vadd.f32 1.0, %v15859_v26  ;;  %v20998_v26 = vld [vmem:[#allocation119_spill] sm:$0xff] }
 0x5ae   : > { %v15863_v55 = vpop.eup %15862  ;;  %v4925_v37 = vadd.f32 1.0, %v15861_v41  ;;  %v20999_v41 = vld [vmem:[#allocation120_spill] sm:$0xff] }
 0x5af   : > { %v15865_v38 = vpop.eup %15864  ;;  %v4924_v59 = vadd.f32 1.0, %v15863_v55  ;;  %15866 = vrcp.f32 %v4923_v46  ;;  %v21000_v55 = vld [vmem:[#allocation33_spill] sm:$0xff]  ;;  %v21002_v46 = vld [vmem:[#allocation35_spill] sm:$0xff] }
 0x5b0   : > { %v4926_v12 = vadd.f32 1.0, %v15865_v38  ;;  %15868 = vrcp.f32 %v4925_v37  ;;  %v21001_v38 = vld [vmem:[#allocation46_spill] sm:$0xff]  ;;  %v21003_v37 = vld [vmem:[#allocation48_spill] sm:$0xff] }
 0x5b1   : > { %15870 = vrcp.f32 %v4924_v59  ;;  %v21004_v59 = vld [vmem:[#allocation47_spill] sm:$0xff] }
 0x5b2   : > { %15872 = vrcp.f32 %v4926_v12  ;;  %v21005_v12 = vld [vmem:[#allocation81_spill] sm:$0xff] }
 0x5b9   : > { %v15867_v58 = vpop.eup %15866 }
 0x5ba   : > { %v15869_v31 = vpop.eup %15868 }
 0x5bb   : > { %v15871_v56 = vpop.eup %15870  ;;  %v4943_v17 = vmul.f32 %v15869_v31, %v17935_v53  ;;  %v21027_v31 = vld [vmem:[#allocation142_spill] sm:$0xff] }
 0x5bc   : > { %v15873_v19 = vpop.eup %15872 }
 0x5bd   : > { %v4944_v11 = vmul.f32 %v15873_v19, %v17937_v20  ;;  %v21029_v19 = vld [vmem:[#allocation144_spill] sm:$0xff] }
 0x5dd   : > { %v4849_v21 = vpop.f32.mrb[52].mxu0  ;;  %v4890_v34 = vpop.f32.mrb[68].mxu1 }
 0x5de   : > { %v4901_v23 = vadd.f32 %v4849_v21, %v20992_v50  ;;  %v4903_v60 = vadd.f32 %v4890_v34, %v20993_v27  ;;  %v4851_v35 = vpop.f32.mrb[53].mxu0  ;;  %v4892_v61 = vpop.f32.mrb[69].mxu1  ;;  %v21008_v21 = vld [vmem:[#allocation123_spill] sm:$0xff]  ;;  %v21009_v34 = vld [vmem:[#allocation124_spill] sm:$0xff]  ;;  %v21010_v50 = vld [vmem:[#allocation125_spill] sm:$0xff] }
 0x5df   : > { %v4902_v15 = vadd.f32 %v4851_v35, %v20994_v0  ;;  %v4904_v62 = vadd.f32 %v4892_v61, %v20995_v3  ;;  %v4853_v30 = vpop.f32.mrb[54].mxu0  ;;  %v4894_v16 = vpop.f32.mrb[70].mxu1  ;;  %v21012_v27 = vld [vmem:[#allocation127_spill] sm:$0xff]  ;;  %v21014_v35 = vld [vmem:[#allocation129_spill] sm:$0xff]  ;;  %v21015_v61 = vld [vmem:[#allocation130_spill] sm:$0xff] }
 0x5e0   : > { %v14352_v48 = vmul.f32 -1.442695, %v4901_v23  ;;  %15874 = vtanh.f32 %v4903_v60  ;;  %v4854_v36 = vpop.f32.mrb[55].mxu0  ;;  %v4895_v40 = vpop.f32.mrb[71].mxu1  ;;  %v21011_v23 = vld [vmem:[#allocation126_spill] sm:$0xff]  ;;  %v21013_v60 = vld [vmem:[#allocation128_spill] sm:$0xff] }
 0x5e1   : > { %v14353_v54 = vmul.f32 -1.442695, %v4902_v15  ;;  %15876 = vtanh.f32 %v4904_v62  ;;  %v21016_v0 = vld [vmem:[#allocation131_spill] sm:$0xff]  ;;  %v21017_v15 = vld [vmem:[#allocation132_spill] sm:$0xff]  ;;  %v21018_v3 = vld [vmem:[#allocation133_spill] sm:$0xff] }
 0x5e2   : > { %15878 = vpow2.f32 %v14352_v48  ;;  %v21019_v62 = vld [vmem:[#allocation134_spill] sm:$0xff]  ;;  %v21020_v30 = vld [vmem:[#allocation135_spill] sm:$0xff]  ;;  %v21021_v16 = vld [vmem:[#allocation136_spill] sm:$0xff] }
 0x5e3   : > { %15880 = vpow2.f32 %v14353_v54  ;;  %v21022_v48 = vld [vmem:[#allocation137_spill] sm:$0xff]  ;;  %v21023_v36 = vld [vmem:[#allocation138_spill] sm:$0xff]  ;;  %v21024_v40 = vld [vmem:[#allocation139_spill] sm:$0xff] }
 0x5e4   : > { %v21025_v54 = vld [vmem:[#allocation140_spill] sm:$0xff] }
 0x5ea   : > { %v15875_v24 = vpop.eup %15874 }
 0x5eb   : > { %v15877_v14 = vpop.eup %15876  ;;  %v4945_v57 = vmul.f32 %v15875_v24, %v15867_v58  ;;  %v21026_v58 = vld [vmem:[#allocation141_spill] sm:$0xff] }
 0x5ec   : > { %v15879_v6 = vpop.eup %15878  ;;  %v4946_v29 = vmul.f32 %v15877_v14, %v15871_v56  ;;  %v21028_v56 = vld [vmem:[#allocation143_spill] sm:$0xff]  ;;  %v21030_v24 = vld [vmem:[#allocation145_spill] sm:$0xff]  ;;  %v21031_v14 = vld [vmem:[#allocation146_spill] sm:$0xff] }
 0x5ed   : > { %v15881_v63 = vpop.eup %15880  ;;  %v4927_v5 = vadd.f32 1.0, %v15879_v6  ;;  %v18213_v47 = vadd.f32 %v4945_v57, %v4943_v17  ;;  %v21032_v17 = vld [vmem:[#allocation147_spill] sm:$0xff]  ;;  %v21033_v57 = vld [vmem:[#allocation148_spill] sm:$0xff]  ;;  %v21034_v6 = vld [vmem:[#allocation149_spill] sm:$0xff] }
 0x5ee   : > { %v4928_v28 = vadd.f32 1.0, %v15881_v63  ;;  %v18215_v9 = vadd.f32 %v4946_v29, %v4944_v11  ;;  %v21035_v11 = vld [vmem:[#allocation150_spill] sm:$0xff]  ;;  %v21036_v29 = vld [vmem:[#allocation151_spill] sm:$0xff]  ;;  %v21037_v63 = vld [vmem:[#allocation152_spill] sm:$0xff] }
 0x5ef   : > { %15882 = vrcp.f32 %v4927_v5  ;;  %v21038_v5 = vld [vmem:[#allocation153_spill] sm:$0xff] }
 0x5f0   : > { %15884 = vtanh.f32 %v18213_v47 }
 0x5f1   : > { %15886 = vrcp.f32 %v4928_v28  ;;  %v21039_v28 = vld [vmem:[#allocation154_spill] sm:$0xff] }
 0x5f2   : > { %15888 = vtanh.f32 %v18215_v9 }
 0x5f9   : > { %v15883_v4 = vpop.eup %15882 }
 0x5fa   : > { %v15885_v53 = vpop.eup %15884 }
 0x5fb   : > { %v15887_v10 = vpop.eup %15886  ;;  %v18219_v22 = vmul.f32 %v15885_v53, %v15883_v4  ;;  %v21040_v4 = vld [vmem:[#allocation155_spill] sm:$0xff]  ;;  %v21041_v53 = vld [vmem:[#allocation156_spill] sm:$0xff] }
 0x5fc   : > { %v15889_v49 = vpop.eup %15888 }
 0x5fd   : > { %20996 = vst [vmem:[#allocation161_spill] sm:$0xff] %v18219_v22  ;;  %v18221_v20 = vmul.f32 %v15889_v49, %v15887_v10  ;;  %v18227_v13 = vpack.c.bf16 %v18219_v22, %v18219_v22  ;;  %v21042_v10 = vld [vmem:[#allocation157_spill] sm:$0xff]  ;;  %v21043_v49 = vld [vmem:[#allocation158_spill] sm:$0xff] }
 0x5ff   : > { %20997 = vst [vmem:[#allocation162_spill] sm:$0xff] %v18221_v20  ;;  %v4956_v44 = vpack.c.bf16 %v18221_v20, %v18221_v20  ;;  %v6081_v20 = vld [vmem:[#allocation7 + $0x3a0] sm:$0xff] }
 0x601   : > { %5765 = vmatprep.mubr.bf16.mxu0 %v4956_v44  ;;  %5806 = vmatprep.mubr.bf16.mxu1 %v4956_v44 }
 0x602   : > { %5766 = vmatmul.mubr.bf16.vlgmr.msra.gmra.mrb[56].mxu0 %v18227_v13  ;;  %5807 = vmatmul.mubr.bf16.vlgmr.msra.gmra.mrb[72].mxu1 %v18227_v13 }
 0x603   : > { %5816 = vmatpush1.bf16.msra.mxu0 %v17917_v32  ;;  %5857 = vmatpush1.bf16.msra.mxu1 %v17919_v45  ;;  %v21006_v32 = vld [vmem:[#allocation49_spill] sm:$0xff]  ;;  %v21007_v45 = vld [vmem:[#allocation82_spill] sm:$0xff] }
 0x604   : > { %5847 = vmatprep.mubr.bf16.mxu0 %v4956_v44  ;;  %5888 = vmatprep.mubr.bf16.mxu1 %v4956_v44  ;;  %v21044_v44 = vld [vmem:[#allocation159_spill] sm:$0xff] }
 0x605   : > { %5817 = vmatprep.subr.bf16.mxu0 %v20998_v26  ;;  %5858 = vmatprep.subr.bf16.mxu1 %v20999_v41  ;;  %v21045_v26 = vld [vmem:[#allocation160_spill] sm:$0xff]  ;;  %v5978_v41 = vld [vmem:[#allocation7 + $0x68] sm:$0xff] }
 0x607   : > { %5818 = vmatpush1.bf16.msra.mxu0 %v21000_v55  ;;  %5859 = vmatpush1.bf16.msra.mxu1 %v21001_v38  ;;  %v5981_v55 = vld [vmem:[#allocation7 + $0x80] sm:$0xff] }
 0x608   : > { %5819 = vmatprep.subr.bf16.mxu0 %v21002_v46  ;;  %5860 = vmatprep.subr.bf16.mxu1 %v21003_v37  ;;  %v5985_v38 = vld [vmem:[#allocation7 + $0xa0] sm:$0xff]  ;;  %v5982_v46 = vld [vmem:[#allocation7 + $0x88] sm:$0xff] }
 0x609   : > { %v5986_v37 = vld [vmem:[#allocation7 + $0xa8] sm:$0xff] }
 0x60b   : > { %5820 = vmatpush1.bf16.msra.mxu0 %v21004_v59  ;;  %5861 = vmatpush1.bf16.msra.mxu1 %v21005_v12 }
 0x60c   : > { %5821 = vmatprep.subr.bf16.mxu0 %v21006_v32  ;;  %5862 = vmatprep.subr.bf16.mxu1 %v21007_v45  ;;  %v18316_v32 = vcombine.high %v5981_v55, %v5985_v38  ;;  %v18319_v45 = vcombine.high %v5982_v46, %v5986_v37 }
 0x60f   : > { %5822 = vmatpush1.bf16.msra.mxu0 %v21008_v21  ;;  %5863 = vmatpush1.bf16.msra.mxu1 %v21009_v34  ;;  %v5989_v21 = vld [vmem:[#allocation7 + $0xc0] sm:$0xff] }
 0x610   : > { %5823 = vmatprep.subr.bf16.mxu0 %v21010_v50  ;;  %5864 = vmatprep.subr.bf16.mxu1 %v21011_v23  ;;  %v5993_v34 = vld [vmem:[#allocation7 + $0xe0] sm:$0xff]  ;;  %v5990_v50 = vld [vmem:[#allocation7 + $0xc8] sm:$0xff] }
 0x611   : > { %v5994_v23 = vld [vmem:[#allocation7 + $0xe8] sm:$0xff] }
 0x613   : > { %5824 = vmatpush1.bf16.msra.mxu0 %v21012_v27  ;;  %5865 = vmatpush1.bf16.msra.mxu1 %v21013_v60  ;;  %v18322_v27 = vcombine.low %v5981_v55, %v5985_v38  ;;  %v18326_v60 = vcombine.low %v5982_v46, %v5986_v37  ;;  %v6034_v55 = vld [vmem:[#allocation7 + $0x228] sm:$0xff] }
 0x614   : > { %5825 = vmatprep.subr.bf16.mxu0 %v21014_v35  ;;  %5866 = vmatprep.subr.bf16.mxu1 %v21015_v61  ;;  %v18328_v35 = vcombine.high %v5989_v21, %v5993_v34  ;;  %v18331_v61 = vcombine.high %v5990_v50, %v5994_v23 }
 0x617   : > { %5826 = vmatpush1.bf16.msra.mxu0 %v21016_v0  ;;  %5867 = vmatpush1.bf16.msra.mxu1 %v21017_v15  ;;  %v5997_v0 = vld [vmem:[#allocation7 + $0x100] sm:$0xff] }
 0x618   : > { %5827 = vmatprep.subr.bf16.mxu0 %v21018_v3  ;;  %5868 = vmatprep.subr.bf16.mxu1 %v21019_v62  ;;  %v6001_v15 = vld [vmem:[#allocation7 + $0x120] sm:$0xff]  ;;  %v5998_v3 = vld [vmem:[#allocation7 + $0x108] sm:$0xff] }
 0x619   : > { %v6002_v62 = vld [vmem:[#allocation7 + $0x128] sm:$0xff] }
 0x61b   : > { %5828 = vmatpush1.bf16.msra.mxu0 %v21020_v30  ;;  %5869 = vmatpush1.bf16.msra.mxu1 %v21021_v16  ;;  %v18334_v30 = vcombine.low %v5989_v21, %v5993_v34  ;;  %v18338_v16 = vcombine.low %v5990_v50, %v5994_v23  ;;  %v6037_v21 = vld [vmem:[#allocation7 + $0x240] sm:$0xff]  ;;  %v6038_v50 = vld [vmem:[#allocation7 + $0x248] sm:$0xff] }
 0x61c   : > { %5829 = vmatprep.subr.bf16.mxu0 %v21022_v48  ;;  %5870 = vmatprep.subr.bf16.mxu1 %v21023_v36  ;;  %v18340_v48 = vcombine.high %v5997_v0, %v6001_v15  ;;  %v18343_v36 = vcombine.high %v5998_v3, %v6002_v62  ;;  %v6041_v34 = vld [vmem:[#allocation7 + $0x260] sm:$0xff] }
 0x61d   : > { %v18403_v23 = vcombine.high %v6037_v21, %v6041_v34 }
 0x61f   : > { %5830 = vmatpush1.bf16.msra.mxu0 %v21024_v40  ;;  %5871 = vmatpush1.bf16.msra.mxu1 %v21025_v54  ;;  %v6005_v40 = vld [vmem:[#allocation7 + $0x140] sm:$0xff] }
 0x620   : > { %5831 = vmatprep.subr.bf16.mxu0 %v21026_v58  ;;  %5872 = vmatprep.subr.bf16.mxu1 %v21027_v31  ;;  %v6009_v54 = vld [vmem:[#allocation7 + $0x160] sm:$0xff]  ;;  %v6006_v58 = vld [vmem:[#allocation7 + $0x148] sm:$0xff] }
 0x621   : > { %v6010_v31 = vld [vmem:[#allocation7 + $0x168] sm:$0xff] }
 0x623   : > { %5832 = vmatpush1.bf16.msra.mxu0 %v21028_v56  ;;  %5873 = vmatpush1.bf16.msra.mxu1 %v21029_v19  ;;  %v18346_v56 = vcombine.low %v5997_v0, %v6001_v15  ;;  %v18350_v19 = vcombine.low %v5998_v3, %v6002_v62  ;;  %v6042_v0 = vld [vmem:[#allocation7 + $0x268] sm:$0xff]  ;;  %v18405_v15 = vcombine.low %v6037_v21, %v6041_v34  ;;  %v6061_v21 = vld [vmem:[#allocation7 + $0x300] sm:$0xff] }
 0x624   : > { %5833 = vmatprep.subr.bf16.mxu0 %v21030_v24  ;;  %5874 = vmatprep.subr.bf16.mxu1 %v21031_v14  ;;  %v18352_v24 = vcombine.high %v6005_v40, %v6009_v54  ;;  %v18355_v14 = vcombine.high %v6006_v58, %v6010_v31  ;;  %v18407_v3 = vcombine.low %v6038_v50, %v6042_v0  ;;  %v6065_v34 = vld [vmem:[#allocation7 + $0x320] sm:$0xff] }
 0x625   : > { %v18409_v62 = vcombine.high %v6038_v50, %v6042_v0  ;;  %v6062_v50 = vld [vmem:[#allocation7 + $0x308] sm:$0xff]  ;;  %v18439_v0 = vcombine.high %v6061_v21, %v6065_v34 }
 0x626   : > { %21046 = vst [vmem:[#allocation163_spill] sm:$0xff] %v18407_v3 }
 0x627   : > { %5834 = vmatpush1.bf16.msra.mxu0 %v21032_v17  ;;  %5875 = vmatpush1.bf16.msra.mxu1 %v21033_v57  ;;  %v6013_v17 = vld [vmem:[#allocation7 + $0x180] sm:$0xff]  ;;  %21055 = vst [vmem:[#allocation92_spill] sm:$0xff] %v18439_v0 }
 0x628   : > { %5835 = vmatprep.subr.bf16.mxu0 %v21034_v6  ;;  %5876 = vmatprep.subr.bf16.mxu1 %v21035_v11  ;;  %v6017_v57 = vld [vmem:[#allocation7 + $0x1a0] sm:$0xff]  ;;  %v6014_v6 = vld [vmem:[#allocation7 + $0x188] sm:$0xff] }
 0x629   : > { %v6018_v11 = vld [vmem:[#allocation7 + $0x1a8] sm:$0xff] }
 0x62b   : > { %5836 = vmatpush1.bf16.msra.mxu0 %v21036_v29  ;;  %5877 = vmatpush1.bf16.msra.mxu1 %v21037_v63  ;;  %v18358_v29 = vcombine.low %v6005_v40, %v6009_v54  ;;  %v18362_v63 = vcombine.low %v6006_v58, %v6010_v31  ;;  %v6045_v40 = vld [vmem:[#allocation7 + $0x280] sm:$0xff]  ;;  %v6046_v58 = vld [vmem:[#allocation7 + $0x288] sm:$0xff] }
 0x62c   : > { %5837 = vmatprep.subr.bf16.mxu0 %v21038_v5  ;;  %5878 = vmatprep.subr.bf16.mxu1 %v21039_v28  ;;  %v18364_v5 = vcombine.high %v6013_v17, %v6017_v57  ;;  %v18367_v28 = vcombine.high %v6014_v6, %v6018_v11  ;;  %v6049_v54 = vld [vmem:[#allocation7 + $0x2a0] sm:$0xff] }
 0x62d   : > { %v18415_v31 = vcombine.high %v6045_v40, %v6049_v54 }
 0x62f   : > { %5838 = vmatpush1.bf16.msra.mxu0 %v21040_v4  ;;  %5879 = vmatpush1.bf16.msra.mxu1 %v21041_v53  ;;  %v6021_v4 = vld [vmem:[#allocation7 + $0x1c0] sm:$0xff]  ;;  %21047 = vst [vmem:[#allocation164_spill] sm:$0xff] %v18415_v31 }
 0x630   : > { %5839 = vmatprep.subr.bf16.mxu0 %v21042_v10  ;;  %5880 = vmatprep.subr.bf16.mxu1 %v21043_v49  ;;  %v6025_v53 = vld [vmem:[#allocation7 + $0x1e0] sm:$0xff]  ;;  %v6022_v10 = vld [vmem:[#allocation7 + $0x1c8] sm:$0xff] }
 0x631   : > { %v6026_v49 = vld [vmem:[#allocation7 + $0x1e8] sm:$0xff] }
 0x633   : > { %5840 = vmatpush1.bf16.msra.mxu0 %v18091_v42  ;;  %5881 = vmatpush1.bf16.msra.mxu1 %v18093_v8  ;;  %v5965_v42 = vld [vmem:[#allocation7] sm:$0xff] }
 0x634   : > { %5841 = vmatprep.subr.bf16.mxu0 %v18097_v2  ;;  %5882 = vmatprep.subr.bf16.mxu1 %v21044_v44  ;;  %v5969_v8 = vld [vmem:[#allocation7 + $0x20] sm:$0xff]  ;;  %v5966_v2 = vld [vmem:[#allocation7 + $0x8] sm:$0xff]  ;;  %v18370_v44 = vcombine.low %v6013_v17, %v6017_v57  ;;  %v18417_v57 = vcombine.low %v6045_v40, %v6049_v54  ;;  %v18441_v54 = vcombine.low %v6061_v21, %v6065_v34 }
 0x635   : > { %v6050_v17 = vld [vmem:[#allocation7 + $0x2a8] sm:$0xff]  ;;  %v6077_v34 = vld [vmem:[#allocation7 + $0x380] sm:$0xff] }
 0x636   : > { %21048 = vst [vmem:[#allocation37_spill] sm:$0xff] %v18417_v57  ;;  %v6066_v40 = vld [vmem:[#allocation7 + $0x328] sm:$0xff]  ;;  %21056 = vst [vmem:[#allocation76_spill] sm:$0xff] %v18441_v54 }
 0x637   : > { %5842 = vmatpush1.bf16.msra.mxu0 %v21045_v26  ;;  %5883 = vmatpush1.bf16.msra.mxu1 %v18105_v25  ;;  %v18295_v25 = vcombine.low %v5965_v42, %v5969_v8  ;;  %v18374_v26 = vcombine.low %v6014_v6, %v6018_v11  ;;  %v18419_v6 = vcombine.low %v6046_v58, %v6050_v17  ;;  %v6074_v21 = vld [vmem:[#allocation7 + $0x368] sm:$0xff] }
 0x638   : > { %5843 = vmatprep.subr.bf16.mxu0 %v18109_v33  ;;  %5884 = vmatprep.subr.bf16.mxu1 %v18111_v43  ;;  %v18297_v33 = vcombine.high %v5965_v42, %v5969_v8  ;;  %v5970_v43 = vld [vmem:[#allocation7 + $0x28] sm:$0xff]  ;;  %v18376_v42 = vcombine.high %v6021_v4, %v6025_v53  ;;  %v18379_v8 = vcombine.high %v6022_v10, %v6026_v49 }
 0x639   : > { %21049 = vst [vmem:[#allocation50_spill] sm:$0xff] %v18419_v6  ;;  %v18421_v11 = vcombine.high %v6046_v58, %v6050_v17  ;;  %v18443_v58 = vcombine.low %v6062_v50, %v6066_v40  ;;  %v18445_v17 = vcombine.high %v6062_v50, %v6066_v40 }
 0x63b   : > { %5844 = vmatpush1.bf16.msra.mxu0 %v18115_v18  ;;  %5885 = vmatpush1.bf16.msra.mxu1 %v18117_v1  ;;  %v5973_v18 = vld [vmem:[#allocation7 + $0x40] sm:$0xff]  ;;  %21050 = vst [vmem:[#allocation39_spill] sm:$0xff] %v18421_v11  ;;  %21057 = vst [vmem:[#allocation77_spill] sm:$0xff] %v18443_v58 }
 0x63c   : > { %5845 = vmatprep.subr.bf16.mxu0 %v18121_v51  ;;  %5886 = vmatprep.subr.bf16.mxu1 %v18123_v7  ;;  %v5977_v1 = vld [vmem:[#allocation7 + $0x60] sm:$0xff]  ;;  %v18299_v51 = vcombine.low %v5966_v2, %v5970_v43  ;;  %v18301_v7 = vcombine.high %v5966_v2, %v5970_v43  ;;  %v18382_v2 = vcombine.low %v6021_v4, %v6025_v53 }
 0x63d   : > { %v18310_v59 = vcombine.low %v5973_v18, %v5977_v1  ;;  %v18386_v43 = vcombine.low %v6022_v10, %v6026_v49  ;;  %v6053_v4 = vld [vmem:[#allocation7 + $0x2c0] sm:$0xff]  ;;  %v6054_v10 = vld [vmem:[#allocation7 + $0x2c8] sm:$0xff]  ;;  %21058 = vst [vmem:[#allocation79_spill] sm:$0xff] %v18445_v17 }
 0x63e   : > { %v6057_v53 = vld [vmem:[#allocation7 + $0x2e0] sm:$0xff] }
 0x63f   : > { %5846 = vmatpush1.bf16.msra.mxu0 %v18127_v52  ;;  %5887 = vmatpush1.bf16.msra.mxu1 %v18129_v39  ;;  %v18303_v52 = vcombine.high %v5973_v18, %v5977_v1  ;;  %v5974_v39 = vld [vmem:[#allocation7 + $0x48] sm:$0xff]  ;;  %v6029_v18 = vld [vmem:[#allocation7 + $0x200] sm:$0xff]  ;;  %v18427_v49 = vcombine.high %v6053_v4, %v6057_v53 }
 0x640   : > { %6733 = vmatprep.subr.bf16.mxu0 %v18297_v33  ;;  %6774 = vmatprep.subr.bf16.mxu1 %v18301_v7  ;;  %v18314_v12 = vcombine.low %v5974_v39, %v5978_v41  ;;  %v6033_v1 = vld [vmem:[#allocation7 + $0x220] sm:$0xff] }
 0x641   : > { %v18393_v38 = vcombine.low %v6029_v18, %v6033_v1  ;;  %21051 = vst [vmem:[#allocation52_spill] sm:$0xff] %v18427_v49 }
 0x642   : > { %5848 = vmatmul.mubr.bf16.vlgmr.msra.gmra.mrb[60].mxu0 %v18227_v13  ;;  %5889 = vmatmul.mubr.bf16.vlgmr.msra.gmra.mrb[76].mxu1 %v18227_v13  ;;  %v18306_v13 = vcombine.high %v5974_v39, %v5978_v41  ;;  %v6030_v39 = vld [vmem:[#allocation7 + $0x208] sm:$0xff]  ;;  %v18391_v41 = vcombine.high %v6029_v18, %v6033_v1  ;;  %v18429_v1 = vcombine.low %v6053_v4, %v6057_v53  ;;  %v6069_v4 = vld [vmem:[#allocation7 + $0x340] sm:$0xff] }
 0x643   : > { %6734 = vmatpush1.bf16.msra.mxu0 %v18295_v25  ;;  %6775 = vmatpush1.bf16.msra.mxu1 %v18299_v51  ;;  %v18395_v46 = vcombine.low %v6030_v39, %v6034_v55  ;;  %v18397_v37 = vcombine.high %v6030_v39, %v6034_v55  ;;  %v6058_v18 = vld [vmem:[#allocation7 + $0x2e8] sm:$0xff]  ;;  %v6073_v53 = vld [vmem:[#allocation7 + $0x360] sm:$0xff] }
 0x644   : > { %6735 = vmatprep.subr.bf16.mxu0 %v18303_v52  ;;  %6776 = vmatprep.subr.bf16.mxu1 %v18306_v13  ;;  %21052 = vst [vmem:[#allocation51_spill] sm:$0xff] %v18429_v1  ;;  %v18431_v39 = vcombine.low %v6054_v10, %v6058_v18  ;;  %v18433_v55 = vcombine.high %v6054_v10, %v6058_v18  ;;  %v6070_v10 = vld [vmem:[#allocation7 + $0x348] sm:$0xff] }
 0x645   : > { %v18451_v18 = vcombine.low %v6069_v4, %v6073_v53  ;;  %v18453_v22 = vcombine.high %v6069_v4, %v6073_v53  ;;  %v18455_v50 = vcombine.low %v6070_v10, %v6074_v21  ;;  %v18457_v40 = vcombine.high %v6070_v10, %v6074_v21  ;;  %v6090_v4 = vld [vmem:[#allocation7 + $0x3e8] sm:$0xff] }
 0x646   : > { %21053 = vst [vmem:[#allocation88_spill] sm:$0xff] %v18431_v39  ;;  %21054 = vst [vmem:[#allocation53_spill] sm:$0xff] %v18433_v55  ;;  %v18466_v53 = vcombine.low %v6077_v34, %v6081_v20 }
 0x647   : > { %6736 = vmatpush1.bf16.msra.mxu0 %v18310_v59  ;;  %6777 = vmatpush1.bf16.msra.mxu1 %v18314_v12  ;;  %21059 = vst [vmem:[#allocation80_spill] sm:$0xff] %v18451_v18  ;;  %21060 = vst [vmem:[#allocation78_spill] sm:$0xff] %v18453_v22 }
 0x648   : > { %6737 = vmatprep.subr.bf16.mxu0 %v18316_v32  ;;  %6778 = vmatprep.subr.bf16.mxu1 %v18319_v45  ;;  %21061 = vst [vmem:[#allocation83_spill] sm:$0xff] %v18455_v50  ;;  %21062 = vst [vmem:[#allocation85_spill] sm:$0xff] %v18457_v40 }
 0x649   : > { %21065 = vst [vmem:[#allocation87_spill] sm:$0xff] %v18466_v53 }
 0x64b   : > { %6738 = vmatpush1.bf16.msra.mxu0 %v18322_v27  ;;  %6779 = vmatpush1.bf16.msra.mxu1 %v18326_v60 }
 0x64c   : > { %6739 = vmatprep.subr.bf16.mxu0 %v18328_v35  ;;  %6780 = vmatprep.subr.bf16.mxu1 %v18331_v61 }
 0x64f   : > { %6740 = vmatpush1.bf16.msra.mxu0 %v18334_v30  ;;  %6781 = vmatpush1.bf16.msra.mxu1 %v18338_v16 }
 0x650   : > { %6741 = vmatprep.subr.bf16.mxu0 %v18340_v48  ;;  %6782 = vmatprep.subr.bf16.mxu1 %v18343_v36 }
 0x653   : > { %6742 = vmatpush1.bf16.msra.mxu0 %v18346_v56  ;;  %6783 = vmatpush1.bf16.msra.mxu1 %v18350_v19 }
 0x654   : > { %6743 = vmatprep.subr.bf16.mxu0 %v18352_v24  ;;  %6784 = vmatprep.subr.bf16.mxu1 %v18355_v14 }
 0x657   : > { %6744 = vmatpush1.bf16.msra.mxu0 %v18358_v29  ;;  %6785 = vmatpush1.bf16.msra.mxu1 %v18362_v63 }
 0x658   : > { %6745 = vmatprep.subr.bf16.mxu0 %v18364_v5  ;;  %6786 = vmatprep.subr.bf16.mxu1 %v18367_v28 }
 0x65b   : > { %6746 = vmatpush1.bf16.msra.mxu0 %v18370_v44  ;;  %6787 = vmatpush1.bf16.msra.mxu1 %v18374_v26 }
 0x65c   : > { %6747 = vmatprep.subr.bf16.mxu0 %v18376_v42  ;;  %6788 = vmatprep.subr.bf16.mxu1 %v18379_v8 }
 0x65f   : > { %6748 = vmatpush1.bf16.msra.mxu0 %v18382_v2  ;;  %6789 = vmatpush1.bf16.msra.mxu1 %v18386_v43 }
 0x660   : > { %6749 = vmatprep.subr.bf16.mxu0 %v18391_v41  ;;  %6790 = vmatprep.subr.bf16.mxu1 %v18397_v37 }
 0x663   : > { %6750 = vmatpush1.bf16.msra.mxu0 %v18393_v38  ;;  %6791 = vmatpush1.bf16.msra.mxu1 %v18395_v46 }
 0x664   : > { %6751 = vmatprep.subr.bf16.mxu0 %v18403_v23  ;;  %6792 = vmatprep.subr.bf16.mxu1 %v18409_v62 }
 0x667   : > { %6752 = vmatpush1.bf16.msra.mxu0 %v18405_v15  ;;  %6793 = vmatpush1.bf16.msra.mxu1 %v18407_v3 }
 0x668   : > { %6753 = vmatprep.subr.bf16.mxu0 %v18415_v31  ;;  %6794 = vmatprep.subr.bf16.mxu1 %v18421_v11 }
 0x66b   : > { %6754 = vmatpush1.bf16.msra.mxu0 %v18417_v57  ;;  %6795 = vmatpush1.bf16.msra.mxu1 %v18419_v6 }
 0x66c   : > { %6755 = vmatprep.subr.bf16.mxu0 %v18427_v49  ;;  %6796 = vmatprep.subr.bf16.mxu1 %v18433_v55  ;;  %v6086_v55 = vld [vmem:[#allocation7 + $0x3c8] sm:$0xff] }
 0x66f   : > { %6756 = vmatpush1.bf16.msra.mxu0 %v18429_v1  ;;  %6797 = vmatpush1.bf16.msra.mxu1 %v18431_v39  ;;  %v6085_v39 = vld [vmem:[#allocation7 + $0x3c0] sm:$0xff] }
 0x670   : > { %6757 = vmatprep.subr.bf16.mxu0 %v18439_v0  ;;  %6798 = vmatprep.subr.bf16.mxu1 %v18445_v17  ;;  %v18459_v0 = vcombine.high %v6077_v34, %v6081_v20  ;;  %v6078_v17 = vld [vmem:[#allocation7 + $0x388] sm:$0xff]  ;;  %v18482_v20 = vcombine.low %v6086_v55, %v6090_v4  ;;  %v5968_v34 = vld [vmem:[#allocation7 + $0x18] sm:$0xff] }
 0x672   : > { %21063 = vst [vmem:[#allocation86_spill] sm:$0xff] %v18459_v0  ;;  %21070 = vst [vmem:[#allocation97_spill] sm:$0xff] %v18482_v20 }
 0x673   : > { %6758 = vmatpush1.bf16.msra.mxu0 %v18441_v54  ;;  %6799 = vmatpush1.bf16.msra.mxu1 %v18443_v58  ;;  %v6082_v54 = vld [vmem:[#allocation7 + $0x3a8] sm:$0xff]  ;;  %v6089_v58 = vld [vmem:[#allocation7 + $0x3e0] sm:$0xff] }
 0x674   : > { %6759 = vmatprep.subr.bf16.mxu0 %v18453_v22  ;;  %v18462_v1 = vcombine.high %v6078_v17, %v6082_v54  ;;  %6800 = vmatprep.subr.bf16.mxu1 %v18457_v40  ;;  %v18470_v10 = vcombine.low %v6078_v17, %v6082_v54  ;;  %v18472_v21 = vcombine.high %v6085_v39, %v6089_v58  ;;  %v5967_v54 = vld [vmem:[#allocation7 + $0x10] sm:$0xff] }
 0x675   : > { %v18475_v22 = vcombine.high %v6086_v55, %v6090_v4  ;;  %v18478_v49 = vcombine.low %v6085_v39, %v6089_v58  ;;  %v5971_v17 = vld [vmem:[#allocation7 + $0x30] sm:$0xff] }
 0x676   : > { %21064 = vst [vmem:[#allocation84_spill] sm:$0xff] %v18462_v1  ;;  %21066 = vst [vmem:[#allocation90_spill] sm:$0xff] %v18470_v10  ;;  %v18489_v39 = vcombine.low %v5967_v54, %v5971_v17 }
 0x677   : > { %6760 = vmatpush1.bf16.msra.mxu0 %v18451_v18  ;;  %6801 = vmatpush1.bf16.msra.mxu1 %v18455_v50  ;;  %21067 = vst [vmem:[#allocation91_spill] sm:$0xff] %v18472_v21  ;;  %21068 = vst [vmem:[#allocation89_spill] sm:$0xff] %v18475_v22  ;;  %v21075_v18 = vld [vmem:[#allocation31_spill] sm:$0xff] }
 0x678   : > { %6761 = vmatprep.subr.bf16.mxu0 %v18459_v0  ;;  %6802 = vmatprep.subr.bf16.mxu1 %v18462_v1  ;;  %21069 = vst [vmem:[#allocation98_spill] sm:$0xff] %v18478_v49  ;;  %v18487_v1 = vcombine.high %v5967_v54, %v5971_v17  ;;  %v21076_v54 = vld [vmem:[#allocation60_spill] sm:$0xff] }
 0x67a   : > { %21071 = vst [vmem:[#allocation95_spill] sm:$0xff] %v18487_v1 }
 0x67b   : > { %6762 = vmatpush1.bf16.msra.mxu0 %v18466_v53  ;;  %6803 = vmatpush1.bf16.msra.mxu1 %v18470_v10  ;;  %v5972_v53 = vld [vmem:[#allocation7 + $0x38] sm:$0xff] }
 0x67c   : > { %6763 = vmatprep.subr.bf16.mxu0 %v18472_v21  ;;  %6804 = vmatprep.subr.bf16.mxu1 %v18475_v22  ;;  %v18491_v58 = vcombine.low %v5968_v34, %v5972_v53  ;;  %v18493_v10 = vcombine.high %v5968_v34, %v5972_v53  ;;  %v21074_v21 = vld [vmem:[#allocation58_spill] sm:$0xff] }
 0x67e   : > { %21072 = vst [vmem:[#allocation96_spill] sm:$0xff] %v18493_v10 }
 0x67f   : > { %6764 = vmatpush1.bf16.msra.mxu0 %v18478_v49  ;;  %6805 = vmatpush1.bf16.msra.mxu1 %v18482_v20  ;;  %v21073_v49 = vld [vmem:[#allocation30_spill] sm:$0xff] }
 0x680   : > { %6815 = vmatprep.subr.bf16.mxu0 %v18487_v1  ;;  %6856 = vmatprep.subr.bf16.mxu1 %v18493_v10 }
 0x6d5   : > { %v5767_v55 = vpop.f32.mrb[56].mxu0  ;;  %v5808_v4 = vpop.f32.mrb[72].mxu1 }
 0x6d6   : > { %v5897_v22 = vadd.f32 %v5767_v55, %v21073_v49  ;;  %v5899_v0 = vadd.f32 %v5808_v4, %v21074_v21  ;;  %v5769_v20 = vpop.f32.mrb[57].mxu0  ;;  %v5810_v50 = vpop.f32.mrb[73].mxu1 }
 0x6d7   : > { %v5898_v40 = vadd.f32 %v5769_v20, %v21075_v18  ;;  %v5900_v17 = vadd.f32 %v5810_v50, %v21076_v54  ;;  %v5771_v6 = vpop.f32.mrb[58].mxu0  ;;  %v5812_v57 = vpop.f32.mrb[74].mxu1 }
 0x6d8   : > { %v5772_v53 = vpop.f32.mrb[59].mxu0  ;;  %v5813_v34 = vpop.f32.mrb[75].mxu1  ;;  %v14482_v11 = vmul.f32 -1.442695, %v5897_v22  ;;  %v14484_v1 = vmul.f32 -1.442695, %v5899_v0 }
 0x6d9   : > { %v14483_v31 = vmul.f32 -1.442695, %v5898_v40  ;;  %v14485_v10 = vmul.f32 -1.442695, %v5900_v17  ;;  %v21077_v22 = vld [vmem:[#allocation59_spill] sm:$0xff]  ;;  %v21078_v40 = vld [vmem:[#allocation100_spill] sm:$0xff] }
 0x6da   : > { %15890 = vpow2.f32 %v14482_v11  ;;  %v21080_v17 = vld [vmem:[#allocation104_spill] sm:$0xff] }
 0x6db   : > { %15892 = vpow2.f32 %v14484_v1 }
 0x6dc   : > { %15894 = vpow2.f32 %v14483_v31 }
 0x6dd   : > { %15896 = vpow2.f32 %v14485_v10  ;;  %v21079_v10 = vld [vmem:[#allocation61_spill] sm:$0xff] }
 0x6e4   : > { %v15891_v49 = vpop.eup %15890 }
 0x6e5   : > { %v15893_v21 = vpop.eup %15892  ;;  %v5923_v3 = vadd.f32 1.0, %v15891_v49 }
 0x6e6   : > { %v15895_v55 = vpop.eup %15894  ;;  %v5925_v18 = vadd.f32 1.0, %v15893_v21 }
 0x6e7   : > { %v15897_v4 = vpop.eup %15896  ;;  %v5924_v20 = vadd.f32 1.0, %v15895_v55  ;;  %15898 = vrcp.f32 %v5923_v3 }
 0x6e8   : > { %v5926_v50 = vadd.f32 1.0, %v15897_v4  ;;  %15900 = vrcp.f32 %v5925_v18 }
 0x6e9   : > { %15902 = vrcp.f32 %v5924_v20 }
 0x6ea   : > { %15904 = vrcp.f32 %v5926_v50 }
 0x6f1   : > { %v15899_v18 = vpop.eup %15898 }
 0x6f2   : > { %v15901_v20 = vpop.eup %15900 }
 0x715   : > { %v5849_v57 = vpop.f32.mrb[60].mxu0  ;;  %v5890_v6 = vpop.f32.mrb[76].mxu1 }
 0x716   : > { %v5901_v0 = vadd.f32 %v5849_v57, %v21077_v22  ;;  %v5903_v11 = vadd.f32 %v5890_v6, %v21078_v40  ;;  %v5851_v1 = vpop.f32.mrb[61].mxu0  ;;  %v5892_v31 = vpop.f32.mrb[77].mxu1  ;;  %v5943_v40 = vmul.f32 %v15901_v20, %v18213_v47  ;;  %v5976_v20 = vld [vmem:[#allocation7 + $0x58] sm:$0xff] }
 0x717   : > { %v5902_v54 = vadd.f32 %v5851_v1, %v21079_v10  ;;  %v5904_v53 = vadd.f32 %v5892_v31, %v21080_v17  ;;  %v5853_v34 = vpop.f32.mrb[62].mxu0  ;;  %v5894_v49 = vpop.f32.mrb[78].mxu1 }
 0x718   : > { %v14486_v21 = vmul.f32 -1.442695, %v5901_v0  ;;  %15906 = vtanh.f32 %v5903_v11  ;;  %v5854_v3 = vpop.f32.mrb[63].mxu0  ;;  %v5895_v55 = vpop.f32.mrb[79].mxu1 }
 0x719   : > { %v14487_v4 = vmul.f32 -1.442695, %v5902_v54  ;;  %15908 = vtanh.f32 %v5904_v53  ;;  %v15903_v57 = vpop.eup %15902 }
 0x71a   : > { %15910 = vpow2.f32 %v14486_v21  ;;  %v15905_v6 = vpop.eup %15904 }
 0x71b   : > { %15912 = vpow2.f32 %v14487_v4  ;;  %v5944_v10 = vmul.f32 %v15905_v6, %v18215_v9  ;;  %v5975_v4 = vld [vmem:[#allocation7 + $0x50] sm:$0xff] }
 0x722   : > { %v15907_v22 = vpop.eup %15906 }
 0x723   : > { %v15909_v50 = vpop.eup %15908  ;;  %v5945_v1 = vmul.f32 %v15907_v22, %v15899_v18  ;;  %v5979_v18 = vld [vmem:[#allocation7 + $0x70] sm:$0xff] }
 0x724   : > { %v15911_v31 = vpop.eup %15910  ;;  %v5946_v0 = vmul.f32 %v15909_v50, %v15903_v57  ;;  %v5980_v57 = vld [vmem:[#allocation7 + $0x78] sm:$0xff]  ;;  %v5983_v50 = vld [vmem:[#allocation7 + $0x90] sm:$0xff] }
 0x725   : > { %v15913_v11 = vpop.eup %15912  ;;  %v5927_v17 = vadd.f32 1.0, %v15911_v31  ;;  %v18507_v34 = vadd.f32 %v5945_v1, %v5943_v40  ;;  %v18523_v40 = vcombine.high %v5975_v4, %v5979_v18  ;;  %v18525_v1 = vcombine.high %v5976_v20, %v5980_v57  ;;  %v5987_v31 = vld [vmem:[#allocation7 + $0xb0] sm:$0xff] }
 0x726   : > { %v5928_v54 = vadd.f32 1.0, %v15913_v11  ;;  %v18509_v53 = vadd.f32 %v5946_v0, %v5944_v10  ;;  %v5984_v10 = vld [vmem:[#allocation7 + $0x98] sm:$0xff]  ;;  %v18531_v11 = vcombine.low %v5975_v4, %v5979_v18  ;;  %v18543_v4 = vcombine.low %v5983_v50, %v5987_v31 }
 0x727   : > { %15914 = vrcp.f32 %v5927_v17  ;;  %21083 = vst [vmem:[#allocation101_spill] sm:$0xff] %v18523_v40  ;;  %21084 = vst [vmem:[#allocation102_spill] sm:$0xff] %v18525_v1  ;;  %v5988_v0 = vld [vmem:[#allocation7 + $0xb8] sm:$0xff]  ;;  %v18533_v17 = vcombine.low %v5976_v20, %v5980_v57 }
 0x728   : > { %15916 = vtanh.f32 %v18507_v34  ;;  %21085 = vst [vmem:[#allocation108_spill] sm:$0xff] %v18531_v11  ;;  %21089 = vst [vmem:[#allocation111_spill] sm:$0xff] %v18543_v4  ;;  %v18545_v18 = vcombine.low %v5984_v10, %v5988_v0 }
 0x729   : > { %15918 = vrcp.f32 %v5928_v54  ;;  %21086 = vst [vmem:[#allocation109_spill] sm:$0xff] %v18533_v17  ;;  %v18535_v54 = vcombine.high %v5983_v50, %v5987_v31 }
 0x72a   : > { %15920 = vtanh.f32 %v18509_v53  ;;  %21090 = vst [vmem:[#allocation114_spill] sm:$0xff] %v18545_v18 }
 0x72b   : > { %21087 = vst [vmem:[#allocation107_spill] sm:$0xff] %v18535_v54 }
 0x731   : > { %v15915_v49 = vpop.eup %15914 }
 0x732   : > { %v15917_v47 = vpop.eup %15916 }
 0x733   : > { %v15919_v21 = vpop.eup %15918  ;;  %v18513_v55 = vmul.f32 %v15917_v47, %v15915_v49  ;;  %v18537_v49 = vcombine.high %v5984_v10, %v5988_v0  ;;  %v5991_v47 = vld [vmem:[#allocation7 + $0xd0] sm:$0xff] }
 0x734   : > { %v15921_v3 = vpop.eup %15920 }
 0x735   : > { %21081 = vst [vmem:[#allocation99_spill] sm:$0xff] %v18513_v55  ;;  %v18515_v9 = vmul.f32 %v15921_v3, %v15919_v21  ;;  %v18521_v22 = vpack.c.bf16 %v18513_v55, %v18513_v55  ;;  %21088 = vst [vmem:[#allocation110_spill] sm:$0xff] %v18537_v49  ;;  %v5995_v21 = vld [vmem:[#allocation7 + $0xf0] sm:$0xff]  ;;  %v5992_v3 = vld [vmem:[#allocation7 + $0xd8] sm:$0xff] }
 0x736   : > { %v5996_v55 = vld [vmem:[#allocation7 + $0xf8] sm:$0xff]  ;;  %v18549_v20 = vcombine.high %v5991_v47, %v5995_v21  ;;  %v18555_v50 = vcombine.low %v5991_v47, %v5995_v21 }
 0x737   : > { %21082 = vst [vmem:[#allocation103_spill] sm:$0xff] %v18515_v9  ;;  %v5956_v6 = vpack.c.bf16 %v18515_v9, %v18515_v9  ;;  %v18551_v57 = vcombine.high %v5992_v3, %v5996_v55  ;;  %v6003_v9 = vld [vmem:[#allocation7 + $0x130] sm:$0xff]  ;;  %v18557_v31 = vcombine.low %v5992_v3, %v5996_v55 }
 0x738   : > { %21091 = vst [vmem:[#allocation41_spill] sm:$0xff] %v18549_v20  ;;  %21093 = vst [vmem:[#allocation43_spill] sm:$0xff] %v18555_v50 }
 0x739   : > { %6765 = vmatprep.mubr.bf16.mxu0 %v5956_v6  ;;  %6806 = vmatprep.mubr.bf16.mxu1 %v5956_v6  ;;  %21092 = vst [vmem:[#allocation54_spill] sm:$0xff] %v18551_v57  ;;  %21094 = vst [vmem:[#allocation56_spill] sm:$0xff] %v18557_v31 }
 0x73a   : > { %6766 = vmatmul.mubr.bf16.vlgmr.msra.gmra.mrb[64].mxu0 %v18521_v22  ;;  %6807 = vmatmul.mubr.bf16.vlgmr.msra.gmra.mrb[80].mxu1 %v18521_v22 }
 0x73b   : > { %6816 = vmatpush1.bf16.msra.mxu0 %v18489_v39  ;;  %6857 = vmatpush1.bf16.msra.mxu1 %v18491_v58 }
 0x73c   : > { %6847 = vmatprep.mubr.bf16.mxu0 %v5956_v6  ;;  %6888 = vmatprep.mubr.bf16.mxu1 %v5956_v6  ;;  %v5999_v6 = vld [vmem:[#allocation7 + $0x110] sm:$0xff] }
 0x73d   : > { %6817 = vmatprep.subr.bf16.mxu0 %v18523_v40  ;;  %6858 = vmatprep.subr.bf16.mxu1 %v18525_v1  ;;  %v6000_v1 = vld [vmem:[#allocation7 + $0x118] sm:$0xff]  ;;  %v18561_v10 = vcombine.high %v5999_v6, %v6003_v9  ;;  %v18567_v47 = vcombine.low %v5999_v6, %v6003_v9 }
 0x73e   : > { %v6004_v40 = vld [vmem:[#allocation7 + $0x138] sm:$0xff] }
 0x73f   : > { %6818 = vmatpush1.bf16.msra.mxu0 %v18531_v11  ;;  %6859 = vmatpush1.bf16.msra.mxu1 %v18533_v17  ;;  %21095 = vst [vmem:[#allocation55_spill] sm:$0xff] %v18561_v10  ;;  %v18563_v0 = vcombine.high %v6000_v1, %v6004_v40  ;;  %v6008_v17 = vld [vmem:[#allocation7 + $0x158] sm:$0xff]  ;;  %21097 = vst [vmem:[#allocation57_spill] sm:$0xff] %v18567_v47  ;;  %v18569_v55 = vcombine.low %v6000_v1, %v6004_v40 }
 0x740   : > { %6819 = vmatprep.subr.bf16.mxu0 %v18535_v54  ;;  %6860 = vmatprep.subr.bf16.mxu1 %v18537_v49  ;;  %v6007_v49 = vld [vmem:[#allocation7 + $0x150] sm:$0xff]  ;;  %v6012_v11 = vld [vmem:[#allocation7 + $0x178] sm:$0xff] }
 0x741   : > { %21096 = vst [vmem:[#allocation93_spill] sm:$0xff] %v18563_v0  ;;  %v6011_v54 = vld [vmem:[#allocation7 + $0x170] sm:$0xff]  ;;  %21098 = vst [vmem:[#allocation94_spill] sm:$0xff] %v18569_v55  ;;  %v18575_v3 = vcombine.high %v6008_v17, %v6012_v11  ;;  %v18581_v40 = vcombine.low %v6008_v17, %v6012_v11 }
 0x742   : > { %v18573_v21 = vcombine.high %v6007_v49, %v6011_v54  ;;  %v18579_v9 = vcombine.low %v6007_v49, %v6011_v54 }
 0x743   : > { %6820 = vmatpush1.bf16.msra.mxu0 %v18543_v4  ;;  %6861 = vmatpush1.bf16.msra.mxu1 %v18545_v18  ;;  %21100 = vst [vmem:[#allocation120_spill] sm:$0xff] %v18575_v3  ;;  %v6016_v18 = vld [vmem:[#allocation7 + $0x198] sm:$0xff]  ;;  %21102 = vst [vmem:[#allocation46_spill] sm:$0xff] %v18581_v40 }
 0x744   : > { %6821 = vmatprep.subr.bf16.mxu0 %v18549_v20  ;;  %6862 = vmatprep.subr.bf16.mxu1 %v18551_v57  ;;  %21099 = vst [vmem:[#allocation119_spill] sm:$0xff] %v18573_v21  ;;  %v6015_v57 = vld [vmem:[#allocation7 + $0x190] sm:$0xff]  ;;  %v6020_v4 = vld [vmem:[#allocation7 + $0x1b8] sm:$0xff]  ;;  %21101 = vst [vmem:[#allocation33_spill] sm:$0xff] %v18579_v9 }
 0x745   : > { %v6019_v20 = vld [vmem:[#allocation7 + $0x1b0] sm:$0xff]  ;;  %v18587_v6 = vcombine.high %v6016_v18, %v6020_v4  ;;  %v18593_v11 = vcombine.low %v6016_v18, %v6020_v4 }
 0x746   : > { %v18585_v1 = vcombine.high %v6015_v57, %v6019_v20  ;;  %v18591_v54 = vcombine.low %v6015_v57, %v6019_v20 }
 0x747   : > { %6822 = vmatpush1.bf16.msra.mxu0 %v18555_v50  ;;  %6863 = vmatpush1.bf16.msra.mxu1 %v18557_v31  ;;  %21104 = vst [vmem:[#allocation48_spill] sm:$0xff] %v18587_v6  ;;  %v6024_v31 = vld [vmem:[#allocation7 + $0x1d8] sm:$0xff]  ;;  %21106 = vst [vmem:[#allocation81_spill] sm:$0xff] %v18593_v11 }
 0x748   : > { %6823 = vmatprep.subr.bf16.mxu0 %v18561_v10  ;;  %6864 = vmatprep.subr.bf16.mxu1 %v18563_v0  ;;  %21103 = vst [vmem:[#allocation35_spill] sm:$0xff] %v18585_v1  ;;  %v6023_v0 = vld [vmem:[#allocation7 + $0x1d0] sm:$0xff]  ;;  %v6028_v50 = vld [vmem:[#allocation7 + $0x1f8] sm:$0xff]  ;;  %21105 = vst [vmem:[#allocation47_spill] sm:$0xff] %v18591_v54 }
 0x749   : > { %v6027_v10 = vld [vmem:[#allocation7 + $0x1f0] sm:$0xff]  ;;  %v18599_v49 = vcombine.high %v6024_v31, %v6028_v50  ;;  %v18605_v4 = vcombine.low %v6024_v31, %v6028_v50 }
 0x74a   : > { %v18597_v17 = vcombine.high %v6023_v0, %v6027_v10  ;;  %v18603_v20 = vcombine.low %v6023_v0, %v6027_v10 }
 0x74b   : > { %6824 = vmatpush1.bf16.msra.mxu0 %v18567_v47  ;;  %6865 = vmatpush1.bf16.msra.mxu1 %v18569_v55  ;;  %21108 = vst [vmem:[#allocation82_spill] sm:$0xff] %v18599_v49  ;;  %v6032_v55 = vld [vmem:[#allocation7 + $0x218] sm:$0xff]  ;;  %21110 = vst [vmem:[#allocation124_spill] sm:$0xff] %v18605_v4 }
 0x74c   : > { %6825 = vmatprep.subr.bf16.mxu0 %v18573_v21  ;;  %6866 = vmatprep.subr.bf16.mxu1 %v18575_v3  ;;  %21107 = vst [vmem:[#allocation49_spill] sm:$0xff] %v18597_v17  ;;  %v6031_v3 = vld [vmem:[#allocation7 + $0x210] sm:$0xff]  ;;  %v6036_v47 = vld [vmem:[#allocation7 + $0x238] sm:$0xff]  ;;  %21109 = vst [vmem:[#allocation123_spill] sm:$0xff] %v18603_v20 }
 0x74d   : > { %v6035_v21 = vld [vmem:[#allocation7 + $0x230] sm:$0xff]  ;;  %v18611_v57 = vcombine.high %v6032_v55, %v6036_v47  ;;  %v18617_v50 = vcombine.low %v6032_v55, %v6036_v47 }
 0x74e   : > { %v18609_v18 = vcombine.high %v6031_v3, %v6035_v21  ;;  %v18615_v10 = vcombine.low %v6031_v3, %v6035_v21 }
 0x74f   : > { %6826 = vmatpush1.bf16.msra.mxu0 %v18579_v9  ;;  %6867 = vmatpush1.bf16.msra.mxu1 %v18581_v40  ;;  %21112 = vst [vmem:[#allocation126_spill] sm:$0xff] %v18611_v57  ;;  %v6040_v40 = vld [vmem:[#allocation7 + $0x258] sm:$0xff]  ;;  %21114 = vst [vmem:[#allocation128_spill] sm:$0xff] %v18617_v50 }
 0x750   : > { %6827 = vmatprep.subr.bf16.mxu0 %v18585_v1  ;;  %6868 = vmatprep.subr.bf16.mxu1 %v18587_v6  ;;  %21111 = vst [vmem:[#allocation125_spill] sm:$0xff] %v18609_v18  ;;  %v6039_v6 = vld [vmem:[#allocation7 + $0x250] sm:$0xff]  ;;  %v6044_v9 = vld [vmem:[#allocation7 + $0x278] sm:$0xff]  ;;  %21113 = vst [vmem:[#allocation127_spill] sm:$0xff] %v18615_v10 }
 0x751   : > { %v6043_v1 = vld [vmem:[#allocation7 + $0x270] sm:$0xff]  ;;  %v18623_v0 = vcombine.high %v6040_v40, %v6044_v9  ;;  %v18629_v47 = vcombine.low %v6040_v40, %v6044_v9 }
 0x752   : > { %v18621_v31 = vcombine.high %v6039_v6, %v6043_v1  ;;  %v18627_v21 = vcombine.low %v6039_v6, %v6043_v1 }
 0x753   : > { %6828 = vmatpush1.bf16.msra.mxu0 %v18591_v54  ;;  %6869 = vmatpush1.bf16.msra.mxu1 %v18593_v11  ;;  %21116 = vst [vmem:[#allocation130_spill] sm:$0xff] %v18623_v0  ;;  %v6048_v11 = vld [vmem:[#allocation7 + $0x298] sm:$0xff]  ;;  %21118 = vst [vmem:[#allocation132_spill] sm:$0xff] %v18629_v47 }
 0x754   : > { %6829 = vmatprep.subr.bf16.mxu0 %v18597_v17  ;;  %6870 = vmatprep.subr.bf16.mxu1 %v18599_v49  ;;  %21115 = vst [vmem:[#allocation129_spill] sm:$0xff] %v18621_v31  ;;  %v6047_v49 = vld [vmem:[#allocation7 + $0x290] sm:$0xff]  ;;  %v6052_v54 = vld [vmem:[#allocation7 + $0x2b8] sm:$0xff]  ;;  %21117 = vst [vmem:[#allocation131_spill] sm:$0xff] %v18627_v21 }
 0x755   : > { %v6051_v17 = vld [vmem:[#allocation7 + $0x2b0] sm:$0xff]  ;;  %v18635_v3 = vcombine.high %v6048_v11, %v6052_v54  ;;  %v18641_v9 = vcombine.low %v6048_v11, %v6052_v54 }
 0x756   : > { %v18633_v55 = vcombine.high %v6047_v49, %v6051_v17  ;;  %v18639_v1 = vcombine.low %v6047_v49, %v6051_v17 }
 0x757   : > { %6830 = vmatpush1.bf16.msra.mxu0 %v18603_v20  ;;  %6871 = vmatpush1.bf16.msra.mxu1 %v18605_v4  ;;  %21120 = vst [vmem:[#allocation134_spill] sm:$0xff] %v18635_v3  ;;  %v6056_v4 = vld [vmem:[#allocation7 + $0x2d8] sm:$0xff]  ;;  %21122 = vst [vmem:[#allocation136_spill] sm:$0xff] %v18641_v9 }
 0x758   : > { %6831 = vmatprep.subr.bf16.mxu0 %v18609_v18  ;;  %6872 = vmatprep.subr.bf16.mxu1 %v18611_v57  ;;  %21119 = vst [vmem:[#allocation133_spill] sm:$0xff] %v18633_v55  ;;  %v6055_v57 = vld [vmem:[#allocation7 + $0x2d0] sm:$0xff]  ;;  %v6060_v20 = vld [vmem:[#allocation7 + $0x2f8] sm:$0xff]  ;;  %21121 = vst [vmem:[#allocation135_spill] sm:$0xff] %v18639_v1 }
 0x759   : > { %v6059_v18 = vld [vmem:[#allocation7 + $0x2f0] sm:$0xff]  ;;  %v18647_v6 = vcombine.high %v6056_v4, %v6060_v20  ;;  %v18653_v54 = vcombine.low %v6056_v4, %v6060_v20 }
 0x75a   : > { %v18645_v40 = vcombine.high %v6055_v57, %v6059_v18  ;;  %v18651_v17 = vcombine.low %v6055_v57, %v6059_v18 }
 0x75b   : > { %6832 = vmatpush1.bf16.msra.mxu0 %v18615_v10  ;;  %6873 = vmatpush1.bf16.msra.mxu1 %v18617_v50  ;;  %21124 = vst [vmem:[#allocation138_spill] sm:$0xff] %v18647_v6  ;;  %v6064_v50 = vld [vmem:[#allocation7 + $0x318] sm:$0xff]  ;;  %21126 = vst [vmem:[#allocation140_spill] sm:$0xff] %v18653_v54 }
 0x75c   : > { %6833 = vmatprep.subr.bf16.mxu0 %v18621_v31  ;;  %6874 = vmatprep.subr.bf16.mxu1 %v18623_v0  ;;  %21123 = vst [vmem:[#allocation137_spill] sm:$0xff] %v18645_v40  ;;  %v6063_v0 = vld [vmem:[#allocation7 + $0x310] sm:$0xff]  ;;  %v6068_v10 = vld [vmem:[#allocation7 + $0x338] sm:$0xff]  ;;  %21125 = vst [vmem:[#allocation139_spill] sm:$0xff] %v18651_v17 }
 0x75d   : > { %v6067_v31 = vld [vmem:[#allocation7 + $0x330] sm:$0xff]  ;;  %v18659_v49 = vcombine.high %v6064_v50, %v6068_v10  ;;  %v18665_v20 = vcombine.low %v6064_v50, %v6068_v10 }
 0x75e   : > { %v18657_v11 = vcombine.high %v6063_v0, %v6067_v31  ;;  %v18663_v18 = vcombine.low %v6063_v0, %v6067_v31 }
 0x75f   : > { %6834 = vmatpush1.bf16.msra.mxu0 %v18627_v21  ;;  %6875 = vmatpush1.bf16.msra.mxu1 %v18629_v47  ;;  %21128 = vst [vmem:[#allocation142_spill] sm:$0xff] %v18659_v49  ;;  %v6072_v47 = vld [vmem:[#allocation7 + $0x358] sm:$0xff] }
 0x760   : > { %6835 = vmatprep.subr.bf16.mxu0 %v18633_v55  ;;  %6876 = vmatprep.subr.bf16.mxu1 %v18635_v3  ;;  %21127 = vst [vmem:[#allocation141_spill] sm:$0xff] %v18657_v11  ;;  %v6071_v3 = vld [vmem:[#allocation7 + $0x350] sm:$0xff]  ;;  %v6076_v21 = vld [vmem:[#allocation7 + $0x378] sm:$0xff] }
 0x761   : > { %v6075_v55 = vld [vmem:[#allocation7 + $0x370] sm:$0xff]  ;;  %v18671_v57 = vcombine.high %v6072_v47, %v6076_v21  ;;  %v18677_v10 = vcombine.low %v6072_v47, %v6076_v21 }
 0x762   : > { %v18669_v4 = vcombine.high %v6071_v3, %v6075_v55  ;;  %v18675_v31 = vcombine.low %v6071_v3, %v6075_v55 }
 0x763   : > { %6836 = vmatpush1.bf16.msra.mxu0 %v18639_v1  ;;  %6877 = vmatpush1.bf16.msra.mxu1 %v18641_v9  ;;  %21129 = vst [vmem:[#allocation143_spill] sm:$0xff] %v18671_v57  ;;  %v6080_v9 = vld [vmem:[#allocation7 + $0x398] sm:$0xff] }
 0x764   : > { %6837 = vmatprep.subr.bf16.mxu0 %v18645_v40  ;;  %6878 = vmatprep.subr.bf16.mxu1 %v18647_v6  ;;  %v6079_v6 = vld [vmem:[#allocation7 + $0x390] sm:$0xff]  ;;  %v6084_v1 = vld [vmem:[#allocation7 + $0x3b8] sm:$0xff]  ;;  %21130 = vst [vmem:[#allocation144_spill] sm:$0xff] %v18675_v31 }
 0x765   : > { %v6083_v40 = vld [vmem:[#allocation7 + $0x3b0] sm:$0xff]  ;;  %v18683_v0 = vcombine.high %v6080_v9, %v6084_v1  ;;  %v18689_v21 = vcombine.low %v6080_v9, %v6084_v1 }
 0x766   : > { %v18681_v50 = vcombine.high %v6079_v6, %v6083_v40  ;;  %v18687_v55 = vcombine.low %v6079_v6, %v6083_v40 }
 0x767   : > { %6838 = vmatpush1.bf16.msra.mxu0 %v18651_v17  ;;  %6879 = vmatpush1.bf16.msra.mxu1 %v18653_v54  ;;  %v6088_v54 = vld [vmem:[#allocation7 + $0x3d8] sm:$0xff] }
 0x768   : > { %6839 = vmatprep.subr.bf16.mxu0 %v18657_v11  ;;  %6880 = vmatprep.subr.bf16.mxu1 %v18659_v49  ;;  %v6087_v49 = vld [vmem:[#allocation7 + $0x3d0] sm:$0xff]  ;;  %v6092_v17 = vld [vmem:[#allocation7 + $0x3f8] sm:$0xff] }
 0x769   : > { %v6091_v11 = vld [vmem:[#allocation7 + $0x3f0] sm:$0xff]  ;;  %v18695_v3 = vcombine.high %v6088_v54, %v6092_v17 }
 0x76a   : > { %v18693_v47 = vcombine.high %v6087_v49, %v6091_v11 }
 0x76b   : > { %6840 = vmatpush1.bf16.msra.mxu0 %v18663_v18  ;;  %6881 = vmatpush1.bf16.msra.mxu1 %v18665_v20 }
 0x76c   : > { %6841 = vmatprep.subr.bf16.mxu0 %v18669_v4  ;;  %6882 = vmatprep.subr.bf16.mxu1 %v18671_v57  ;;  %v18699_v57 = vcombine.low %v6087_v49, %v6091_v11 }
 0x76f   : > { %6842 = vmatpush1.bf16.msra.mxu0 %v18675_v31  ;;  %6883 = vmatpush1.bf16.msra.mxu1 %v18677_v10  ;;  %v18701_v31 = vcombine.low %v6088_v54, %v6092_v17 }
 0x770   : > { %6843 = vmatprep.subr.bf16.mxu0 %v18681_v50  ;;  %6884 = vmatprep.subr.bf16.mxu1 %v18683_v0 }
 0x773   : > { %6844 = vmatpush1.bf16.msra.mxu0 %v18687_v55  ;;  %6885 = vmatpush1.bf16.msra.mxu1 %v18689_v21 }
 0x774   : > { %6845 = vmatprep.subr.bf16.mxu0 %v18693_v47  ;;  %6886 = vmatprep.subr.bf16.mxu1 %v18695_v3 }
 0x777   : > { %6846 = vmatpush1.bf16.msra.mxu0 %v18699_v57  ;;  %6887 = vmatpush1.bf16.msra.mxu1 %v18701_v31 }
 0x778   : > { %7733 = vmatprep.subr.bf16.mxu0 %v18297_v33  ;;  %7774 = vmatprep.subr.bf16.mxu1 %v18301_v7  ;;  %v21132_v33 = vld [vmem:[#allocation164_spill] sm:$0xff]  ;;  %v21134_v7 = vld [vmem:[#allocation37_spill] sm:$0xff] }
 0x77a   : > { %6848 = vmatmul.mubr.bf16.vlgmr.msra.gmra.mrb[68].mxu0 %v18521_v22  ;;  %6889 = vmatmul.mubr.bf16.vlgmr.msra.gmra.mrb[84].mxu1 %v18521_v22 }
 0x77b   : > { %7734 = vmatpush1.bf16.msra.mxu0 %v18295_v25  ;;  %7775 = vmatpush1.bf16.msra.mxu1 %v18299_v51  ;;  %v21131_v25 = vld [vmem:[#allocation163_spill] sm:$0xff] }
 0x77c   : > { %7735 = vmatprep.subr.bf16.mxu0 %v18303_v52  ;;  %7776 = vmatprep.subr.bf16.mxu1 %v18306_v13  ;;  %v21133_v51 = vld [vmem:[#allocation39_spill] sm:$0xff]  ;;  %v21135_v52 = vld [vmem:[#allocation50_spill] sm:$0xff]  ;;  %v21136_v13 = vld [vmem:[#allocation52_spill] sm:$0xff] }
 0x77f   : > { %7736 = vmatpush1.bf16.msra.mxu0 %v18310_v59  ;;  %7777 = vmatpush1.bf16.msra.mxu1 %v18314_v12  ;;  %v21137_v59 = vld [vmem:[#allocation53_spill] sm:$0xff]  ;;  %v21138_v12 = vld [vmem:[#allocation51_spill] sm:$0xff] }
 0x780   : > { %7737 = vmatprep.subr.bf16.mxu0 %v18316_v32  ;;  %7778 = vmatprep.subr.bf16.mxu1 %v18319_v45  ;;  %v21139_v32 = vld [vmem:[#allocation88_spill] sm:$0xff] }
 0x781   : > { %v21140_v45 = vld [vmem:[#allocation92_spill] sm:$0xff] }
 0x783   : > { %7738 = vmatpush1.bf16.msra.mxu0 %v18322_v27  ;;  %7779 = vmatpush1.bf16.msra.mxu1 %v18326_v60  ;;  %v21141_v27 = vld [vmem:[#allocation79_spill] sm:$0xff]  ;;  %v21142_v60 = vld [vmem:[#allocation76_spill] sm:$0xff] }
 0x784   : > { %7739 = vmatprep.subr.bf16.mxu0 %v18328_v35  ;;  %7780 = vmatprep.subr.bf16.mxu1 %v18331_v61  ;;  %v21143_v35 = vld [vmem:[#allocation77_spill] sm:$0xff]  ;;  %v21144_v61 = vld [vmem:[#allocation78_spill] sm:$0xff] }
 0x787   : > { %7740 = vmatpush1.bf16.msra.mxu0 %v18334_v30  ;;  %7781 = vmatpush1.bf16.msra.mxu1 %v18338_v16  ;;  %v21145_v30 = vld [vmem:[#allocation85_spill] sm:$0xff]  ;;  %v21146_v16 = vld [vmem:[#allocation80_spill] sm:$0xff] }
 0x788   : > { %7741 = vmatprep.subr.bf16.mxu0 %v18340_v48  ;;  %7782 = vmatprep.subr.bf16.mxu1 %v18343_v36  ;;  %v21147_v48 = vld [vmem:[#allocation83_spill] sm:$0xff]  ;;  %v21148_v36 = vld [vmem:[#allocation86_spill] sm:$0xff] }
 0x78b   : > { %7742 = vmatpush1.bf16.msra.mxu0 %v18346_v56  ;;  %7783 = vmatpush1.bf16.msra.mxu1 %v18350_v19  ;;  %v21149_v56 = vld [vmem:[#allocation84_spill] sm:$0xff]  ;;  %v21150_v19 = vld [vmem:[#allocation87_spill] sm:$0xff] }
 0x78c   : > { %7743 = vmatprep.subr.bf16.mxu0 %v18352_v24  ;;  %7784 = vmatprep.subr.bf16.mxu1 %v18355_v14  ;;  %v21151_v24 = vld [vmem:[#allocation90_spill] sm:$0xff]  ;;  %v21152_v14 = vld [vmem:[#allocation91_spill] sm:$0xff] }
 0x78f   : > { %7744 = vmatpush1.bf16.msra.mxu0 %v18358_v29  ;;  %7785 = vmatpush1.bf16.msra.mxu1 %v18362_v63  ;;  %v21153_v29 = vld [vmem:[#allocation89_spill] sm:$0xff]  ;;  %v21154_v63 = vld [vmem:[#allocation98_spill] sm:$0xff] }
 0x790   : > { %7745 = vmatprep.subr.bf16.mxu0 %v18364_v5  ;;  %7786 = vmatprep.subr.bf16.mxu1 %v18367_v28  ;;  %v21155_v5 = vld [vmem:[#allocation97_spill] sm:$0xff]  ;;  %v21156_v28 = vld [vmem:[#allocation95_spill] sm:$0xff] }
 0x793   : > { %7746 = vmatpush1.bf16.msra.mxu0 %v18370_v44  ;;  %7787 = vmatpush1.bf16.msra.mxu1 %v18374_v26  ;;  %v21157_v44 = vld [vmem:[#allocation96_spill] sm:$0xff] }
 0x794   : > { %7747 = vmatprep.subr.bf16.mxu0 %v18376_v42  ;;  %7788 = vmatprep.subr.bf16.mxu1 %v18379_v8  ;;  %v21158_v8 = vld [vmem:[#allocation32_spill] sm:$0xff] }
 0x797   : > { %7748 = vmatpush1.bf16.msra.mxu0 %v18382_v2  ;;  %7789 = vmatpush1.bf16.msra.mxu1 %v18386_v43  ;;  %v21159_v43 = vld [vmem:[#allocation62_spill] sm:$0xff] }
 0x798   : > { %7749 = vmatprep.subr.bf16.mxu0 %v18391_v41  ;;  %7790 = vmatprep.subr.bf16.mxu1 %v18397_v37  ;;  %v21160_v37 = vld [vmem:[#allocation34_spill] sm:$0xff] }
 0x79b   : > { %7750 = vmatpush1.bf16.msra.mxu0 %v18393_v38  ;;  %7791 = vmatpush1.bf16.msra.mxu1 %v18395_v46 }
 0x79c   : > { %7751 = vmatprep.subr.bf16.mxu0 %v18403_v23  ;;  %7792 = vmatprep.subr.bf16.mxu1 %v18409_v62 }
 0x79f   : > { %7752 = vmatpush1.bf16.msra.mxu0 %v18405_v15  ;;  %7793 = vmatpush1.bf16.msra.mxu1 %v21131_v25  ;;  %v21161_v15 = vld [vmem:[#allocation64_spill] sm:$0xff] }
 0x7a0   : > { %7753 = vmatprep.subr.bf16.mxu0 %v21132_v33  ;;  %7794 = vmatprep.subr.bf16.mxu1 %v21133_v51 }
 0x7a3   : > { %7754 = vmatpush1.bf16.msra.mxu0 %v21134_v7  ;;  %7795 = vmatpush1.bf16.msra.mxu1 %v21135_v52 }
 0x7a4   : > { %7755 = vmatprep.subr.bf16.mxu0 %v21136_v13  ;;  %7796 = vmatprep.subr.bf16.mxu1 %v21137_v59 }
 0x7a7   : > { %7756 = vmatpush1.bf16.msra.mxu0 %v21138_v12  ;;  %7797 = vmatpush1.bf16.msra.mxu1 %v21139_v32 }
 0x7a8   : > { %7757 = vmatprep.subr.bf16.mxu0 %v21140_v45  ;;  %7798 = vmatprep.subr.bf16.mxu1 %v21141_v27  ;;  %v21162_v45 = vld [vmem:[#allocation63_spill] sm:$0xff] }
 0x7ab   : > { %7758 = vmatpush1.bf16.msra.mxu0 %v21142_v60  ;;  %7799 = vmatpush1.bf16.msra.mxu1 %v21143_v35  ;;  %v21163_v60 = vld [vmem:[#allocation105_spill] sm:$0xff] }
 0x7ac   : > { %7759 = vmatprep.subr.bf16.mxu0 %v21144_v61  ;;  %7800 = vmatprep.subr.bf16.mxu1 %v21145_v30 }
 0x7af   : > { %7760 = vmatpush1.bf16.msra.mxu0 %v21146_v16  ;;  %7801 = vmatpush1.bf16.msra.mxu1 %v21147_v48  ;;  %v21164_v16 = vld [vmem:[#allocation65_spill] sm:$0xff] }
 0x7b0   : > { %7761 = vmatprep.subr.bf16.mxu0 %v21148_v36  ;;  %7802 = vmatprep.subr.bf16.mxu1 %v21149_v56  ;;  %v21165_v36 = vld [vmem:[#allocation106_spill] sm:$0xff] }
 0x7b3   : > { %7762 = vmatpush1.bf16.msra.mxu0 %v21150_v19  ;;  %7803 = vmatpush1.bf16.msra.mxu1 %v21151_v24 }
 0x7b4   : > { %7763 = vmatprep.subr.bf16.mxu0 %v21152_v14  ;;  %7804 = vmatprep.subr.bf16.mxu1 %v21153_v29 }
 0x7b7   : > { %7764 = vmatpush1.bf16.msra.mxu0 %v21154_v63  ;;  %7805 = vmatpush1.bf16.msra.mxu1 %v21155_v5 }
 0x7b8   : > { %7815 = vmatprep.subr.bf16.mxu0 %v21156_v28  ;;  %7856 = vmatprep.subr.bf16.mxu1 %v21157_v44 }
 0x80d   : > { %v6767_v26 = vpop.f32.mrb[64].mxu0  ;;  %v6808_v42 = vpop.f32.mrb[80].mxu1 }
 0x80e   : > { %v6897_v2 = vadd.f32 %v6767_v26, %v21158_v8  ;;  %v6899_v41 = vadd.f32 %v6808_v42, %v21159_v43  ;;  %v6769_v38 = vpop.f32.mrb[65].mxu0  ;;  %v6810_v46 = vpop.f32.mrb[81].mxu1 }
 0x80f   : > { %v6898_v23 = vadd.f32 %v6769_v38, %v21160_v37  ;;  %v6900_v62 = vadd.f32 %v6810_v46, %v21161_v15  ;;  %v6771_v22 = vpop.f32.mrb[66].mxu0  ;;  %v6812_v1 = vpop.f32.mrb[82].mxu1 }
 0x810   : > { %v6772_v9 = vpop.f32.mrb[67].mxu0  ;;  %v6813_v40 = vpop.f32.mrb[83].mxu1  ;;  %v14616_v6 = vmul.f32 -1.442695, %v6897_v2  ;;  %v14618_v17 = vmul.f32 -1.442695, %v6899_v41 }
 0x811   : > { %v14617_v54 = vmul.f32 -1.442695, %v6898_v23  ;;  %v14619_v11 = vmul.f32 -1.442695, %v6900_v62 }
 0x812   : > { %15922 = vpow2.f32 %v14616_v6 }
 0x813   : > { %15924 = vpow2.f32 %v14618_v17 }
 0x814   : > { %15926 = vpow2.f32 %v14617_v54 }
 0x815   : > { %15928 = vpow2.f32 %v14619_v11 }
 0x81c   : > { %v15923_v49 = vpop.eup %15922 }
 0x81d   : > { %v15925_v25 = vpop.eup %15924  ;;  %v6923_v7 = vadd.f32 1.0, %v15923_v49  ;;  %v21166_v49 = vld [vmem:[#allocation101_spill] sm:$0xff] }
 0x81e   : > { %v15927_v33 = vpop.eup %15926  ;;  %v6925_v52 = vadd.f32 1.0, %v15925_v25  ;;  %v21167_v25 = vld [vmem:[#allocation102_spill] sm:$0xff] }
 0x81f   : > { %v15929_v51 = vpop.eup %15928  ;;  %v6924_v13 = vadd.f32 1.0, %v15927_v33  ;;  %15930 = vrcp.f32 %v6923_v7  ;;  %v21168_v33 = vld [vmem:[#allocation108_spill] sm:$0xff]  ;;  %v21170_v7 = vld [vmem:[#allocation107_spill] sm:$0xff] }
 0x820   : > { %v6926_v59 = vadd.f32 1.0, %v15929_v51  ;;  %15932 = vrcp.f32 %v6925_v52  ;;  %v21169_v51 = vld [vmem:[#allocation109_spill] sm:$0xff]  ;;  %v21171_v52 = vld [vmem:[#allocation110_spill] sm:$0xff] }
 0x821   : > { %15934 = vrcp.f32 %v6924_v13  ;;  %v21172_v13 = vld [vmem:[#allocation111_spill] sm:$0xff] }
 0x822   : > { %15936 = vrcp.f32 %v6926_v59  ;;  %v21173_v59 = vld [vmem:[#allocation114_spill] sm:$0xff] }
 0x829   : > { %v15931_v28 = vpop.eup %15930 }
 0x82a   : > { %v15933_v44 = vpop.eup %15932 }
 0x82b   : > { %v15935_v26 = vpop.eup %15934  ;;  %v6943_v43 = vmul.f32 %v15933_v44, %v18507_v34  ;;  %v21195_v44 = vld [vmem:[#allocation126_spill] sm:$0xff] }
 0x82c   : > { %v15937_v42 = vpop.eup %15936 }
 0x82d   : > { %v6944_v46 = vmul.f32 %v15937_v42, %v18509_v53  ;;  %v21197_v42 = vld [vmem:[#allocation128_spill] sm:$0xff] }
 0x84d   : > { %v6849_v12 = vpop.f32.mrb[68].mxu0  ;;  %v6890_v32 = vpop.f32.mrb[84].mxu1 }
 0x84e   : > { %v6901_v27 = vadd.f32 %v6849_v12, %v21162_v45  ;;  %v6903_v35 = vadd.f32 %v6890_v32, %v21163_v60  ;;  %v6851_v61 = vpop.f32.mrb[69].mxu0  ;;  %v6892_v30 = vpop.f32.mrb[85].mxu1  ;;  %v21176_v12 = vld [vmem:[#allocation43_spill] sm:$0xff]  ;;  %v21177_v32 = vld [vmem:[#allocation56_spill] sm:$0xff]  ;;  %v21180_v60 = vld [vmem:[#allocation57_spill] sm:$0xff] }
 0x84f   : > { %v6902_v48 = vadd.f32 %v6851_v61, %v21164_v16  ;;  %v6904_v56 = vadd.f32 %v6892_v30, %v21165_v36  ;;  %v6853_v19 = vpop.f32.mrb[70].mxu0  ;;  %v6894_v24 = vpop.f32.mrb[86].mxu1  ;;  %v21178_v45 = vld [vmem:[#allocation55_spill] sm:$0xff]  ;;  %v21183_v30 = vld [vmem:[#allocation120_spill] sm:$0xff]  ;;  %v21184_v16 = vld [vmem:[#allocation33_spill] sm:$0xff] }
 0x850   : > { %v14620_v14 = vmul.f32 -1.442695, %v6901_v27  ;;  %15938 = vtanh.f32 %v6903_v35  ;;  %v6854_v29 = vpop.f32.mrb[71].mxu0  ;;  %v6895_v63 = vpop.f32.mrb[87].mxu1  ;;  %v21179_v27 = vld [vmem:[#allocation93_spill] sm:$0xff]  ;;  %v21181_v35 = vld [vmem:[#allocation94_spill] sm:$0xff] }
 0x851   : > { %v14621_v5 = vmul.f32 -1.442695, %v6902_v48  ;;  %15940 = vtanh.f32 %v6904_v56  ;;  %v21182_v61 = vld [vmem:[#allocation119_spill] sm:$0xff]  ;;  %v21185_v48 = vld [vmem:[#allocation46_spill] sm:$0xff]  ;;  %v21187_v56 = vld [vmem:[#allocation48_spill] sm:$0xff] }
 0x852   : > { %15942 = vpow2.f32 %v14620_v14  ;;  %v21186_v36 = vld [vmem:[#allocation35_spill] sm:$0xff]  ;;  %v21189_v24 = vld [vmem:[#allocation81_spill] sm:$0xff]  ;;  %v21191_v29 = vld [vmem:[#allocation82_spill] sm:$0xff] }
 0x853   : > { %15944 = vpow2.f32 %v14621_v5  ;;  %v21188_v19 = vld [vmem:[#allocation47_spill] sm:$0xff]  ;;  %v21190_v14 = vld [vmem:[#allocation49_spill] sm:$0xff]  ;;  %v21193_v5 = vld [vmem:[#allocation124_spill] sm:$0xff] }
 0x854   : > { %v21192_v63 = vld [vmem:[#allocation123_spill] sm:$0xff] }
 0x85a   : > { %v15939_v8 = vpop.eup %15938 }
 0x85b   : > { %v15941_v2 = vpop.eup %15940  ;;  %v6945_v41 = vmul.f32 %v15939_v8, %v15931_v28  ;;  %v21194_v28 = vld [vmem:[#allocation125_spill] sm:$0xff] }
 0x85c   : > { %v15943_v38 = vpop.eup %15942  ;;  %v6946_v37 = vmul.f32 %v15941_v2, %v15935_v26  ;;  %v21196_v26 = vld [vmem:[#allocation127_spill] sm:$0xff]  ;;  %v21198_v8 = vld [vmem:[#allocation129_spill] sm:$0xff]  ;;  %v21199_v2 = vld [vmem:[#allocation130_spill] sm:$0xff] }
 0x85d   : > { %v15945_v23 = vpop.eup %15944  ;;  %v6927_v15 = vadd.f32 1.0, %v15943_v38  ;;  %v18785_v62 = vadd.f32 %v6945_v41, %v6943_v43  ;;  %v21200_v43 = vld [vmem:[#allocation131_spill] sm:$0xff]  ;;  %v21201_v41 = vld [vmem:[#allocation132_spill] sm:$0xff]  ;;  %v21202_v38 = vld [vmem:[#allocation133_spill] sm:$0xff] }
 0x85e   : > { %v6928_v22 = vadd.f32 1.0, %v15945_v23  ;;  %v18787_v1 = vadd.f32 %v6946_v37, %v6944_v46  ;;  %v21203_v46 = vld [vmem:[#allocation134_spill] sm:$0xff]  ;;  %v21204_v37 = vld [vmem:[#allocation135_spill] sm:$0xff]  ;;  %v21205_v23 = vld [vmem:[#allocation136_spill] sm:$0xff] }
 0x85f   : > { %15946 = vrcp.f32 %v6927_v15  ;;  %v21206_v15 = vld [vmem:[#allocation137_spill] sm:$0xff] }
 0x860   : > { %15948 = vtanh.f32 %v18785_v62 }
 0x861   : > { %15950 = vrcp.f32 %v6928_v22  ;;  %v21207_v22 = vld [vmem:[#allocation138_spill] sm:$0xff] }
 0x862   : > { %15952 = vtanh.f32 %v18787_v1 }
 0x869   : > { %v15947_v9 = vpop.eup %15946 }
 0x86a   : > { %v15949_v34 = vpop.eup %15948 }
 0x86b   : > { %v15951_v40 = vpop.eup %15950  ;;  %v18791_v17 = vmul.f32 %v15949_v34, %v15947_v9  ;;  %v21208_v9 = vld [vmem:[#allocation139_spill] sm:$0xff]  ;;  %v21209_v34 = vld [vmem:[#allocation140_spill] sm:$0xff] }
 0x86c   : > { %v15953_v6 = vpop.eup %15952 }
 0x86d   : > { %v18793_v53 = vmul.f32 %v15953_v6, %v15951_v40  ;;  %v18799_v11 = vpack.c.bf16 %v18791_v17, %v18791_v17  ;;  %v21210_v40 = vld [vmem:[#allocation141_spill] sm:$0xff]  ;;  %v21211_v6 = vld [vmem:[#allocation142_spill] sm:$0xff] }
 0x86f   : > { %v6956_v54 = vpack.c.bf16 %v18793_v53, %v18793_v53 }
 0x871   : > { %7765 = vmatprep.mubr.bf16.mxu0 %v6956_v54  ;;  %7806 = vmatprep.mubr.bf16.mxu1 %v6956_v54 }
 0x872   : > { %7766 = vmatmul.mubr.bf16.vlgmr.msra.gmra.mrb[72].mxu0 %v18799_v11  ;;  %7807 = vmatmul.mubr.bf16.vlgmr.msra.gmra.mrb[88].mxu1 %v18799_v11 }
 0x873   : > { %7816 = vmatpush1.bf16.msra.mxu0 %v18489_v39  ;;  %7857 = vmatpush1.bf16.msra.mxu1 %v18491_v58  ;;  %v21174_v39 = vld [vmem:[#allocation41_spill] sm:$0xff]  ;;  %v21175_v58 = vld [vmem:[#allocation54_spill] sm:$0xff] }
 0x874   : > { %7847 = vmatprep.mubr.bf16.mxu0 %v6956_v54  ;;  %7888 = vmatprep.mubr.bf16.mxu1 %v6956_v54  ;;  %v21212_v54 = vld [vmem:[#allocation143_spill] sm:$0xff] }
 0x875   : > { %7817 = vmatprep.subr.bf16.mxu0 %v21166_v49  ;;  %7858 = vmatprep.subr.bf16.mxu1 %v21167_v25  ;;  %v21213_v49 = vld [vmem:[#allocation144_spill] sm:$0xff] }
 0x877   : > { %7818 = vmatpush1.bf16.msra.mxu0 %v21168_v33  ;;  %7859 = vmatpush1.bf16.msra.mxu1 %v21169_v51  ;;  %v7978_v51 = vld [vmem:[#allocation7 + $0x68] sm:$0xff] }
 0x878   : > { %7819 = vmatprep.subr.bf16.mxu0 %v21170_v7  ;;  %7860 = vmatprep.subr.bf16.mxu1 %v21171_v52  ;;  %v7985_v7 = vld [vmem:[#allocation7 + $0xa0] sm:$0xff]  ;;  %v7982_v52 = vld [vmem:[#allocation7 + $0x88] sm:$0xff] }
 0x87b   : > { %7820 = vmatpush1.bf16.msra.mxu0 %v21172_v13  ;;  %7861 = vmatpush1.bf16.msra.mxu1 %v21173_v59  ;;  %v7986_v13 = vld [vmem:[#allocation7 + $0xa8] sm:$0xff] }
 0x87c   : > { %7821 = vmatprep.subr.bf16.mxu0 %v21174_v39  ;;  %7862 = vmatprep.subr.bf16.mxu1 %v21175_v58  ;;  %v14775_v58 = vcombine.high %v7982_v52, %v7986_v13 }
 0x87f   : > { %7822 = vmatpush1.bf16.msra.mxu0 %v21176_v12  ;;  %7863 = vmatpush1.bf16.msra.mxu1 %v21177_v32  ;;  %v7989_v12 = vld [vmem:[#allocation7 + $0xc0] sm:$0xff] }
 0x880   : > { %7823 = vmatprep.subr.bf16.mxu0 %v21178_v45  ;;  %7864 = vmatprep.subr.bf16.mxu1 %v21179_v27  ;;  %v7993_v32 = vld [vmem:[#allocation7 + $0xe0] sm:$0xff]  ;;  %v7990_v45 = vld [vmem:[#allocation7 + $0xc8] sm:$0xff] }
 0x881   : > { %v7994_v27 = vld [vmem:[#allocation7 + $0xe8] sm:$0xff] }
 0x883   : > { %7824 = vmatpush1.bf16.msra.mxu0 %v21180_v60  ;;  %7865 = vmatpush1.bf16.msra.mxu1 %v21181_v35  ;;  %v14774_v35 = vcombine.low %v7982_v52, %v7986_v13  ;;  %v8042_v52 = vld [vmem:[#allocation7 + $0x268] sm:$0xff] }
 0x884   : > { %7825 = vmatprep.subr.bf16.mxu0 %v21182_v61  ;;  %7866 = vmatprep.subr.bf16.mxu1 %v21183_v30  ;;  %v14781_v61 = vcombine.high %v7989_v12, %v7993_v32  ;;  %v14783_v30 = vcombine.high %v7990_v45, %v7994_v27 }
 0x887   : > { %7826 = vmatpush1.bf16.msra.mxu0 %v21184_v16  ;;  %7867 = vmatpush1.bf16.msra.mxu1 %v21185_v48  ;;  %v7997_v16 = vld [vmem:[#allocation7 + $0x100] sm:$0xff] }
 0x888   : > { %7827 = vmatprep.subr.bf16.mxu0 %v21186_v36  ;;  %7868 = vmatprep.subr.bf16.mxu1 %v21187_v56  ;;  %v8001_v48 = vld [vmem:[#allocation7 + $0x120] sm:$0xff]  ;;  %v7998_v36 = vld [vmem:[#allocation7 + $0x108] sm:$0xff] }
 0x889   : > { %v8002_v56 = vld [vmem:[#allocation7 + $0x128] sm:$0xff] }
 0x88b   : > { %7828 = vmatpush1.bf16.msra.mxu0 %v21188_v19  ;;  %7869 = vmatpush1.bf16.msra.mxu1 %v21189_v24  ;;  %v14780_v19 = vcombine.low %v7989_v12, %v7993_v32  ;;  %v14782_v24 = vcombine.low %v7990_v45, %v7994_v27  ;;  %v8046_v12 = vld [vmem:[#allocation7 + $0x288] sm:$0xff] }
 0x88c   : > { %7829 = vmatprep.subr.bf16.mxu0 %v21190_v14  ;;  %7870 = vmatprep.subr.bf16.mxu1 %v21191_v29  ;;  %v14789_v14 = vcombine.high %v7997_v16, %v8001_v48  ;;  %v14791_v29 = vcombine.high %v7998_v36, %v8002_v56  ;;  %v8050_v45 = vld [vmem:[#allocation7 + $0x2a8] sm:$0xff] }
 0x88f   : > { %7830 = vmatpush1.bf16.msra.mxu0 %v21192_v63  ;;  %7871 = vmatpush1.bf16.msra.mxu1 %v21193_v5  ;;  %v8005_v63 = vld [vmem:[#allocation7 + $0x140] sm:$0xff] }
 0x890   : > { %7831 = vmatprep.subr.bf16.mxu0 %v21194_v28  ;;  %7872 = vmatprep.subr.bf16.mxu1 %v21195_v44  ;;  %v8009_v5 = vld [vmem:[#allocation7 + $0x160] sm:$0xff]  ;;  %v8006_v28 = vld [vmem:[#allocation7 + $0x148] sm:$0xff] }
 0x891   : > { %v8010_v44 = vld [vmem:[#allocation7 + $0x168] sm:$0xff] }
 0x893   : > { %7832 = vmatpush1.bf16.msra.mxu0 %v21196_v26  ;;  %7873 = vmatpush1.bf16.msra.mxu1 %v21197_v42  ;;  %v14788_v26 = vcombine.low %v7997_v16, %v8001_v48  ;;  %v14790_v42 = vcombine.low %v7998_v36, %v8002_v56  ;;  %v8054_v16 = vld [vmem:[#allocation7 + $0x2c8] sm:$0xff] }
 0x894   : > { %7833 = vmatprep.subr.bf16.mxu0 %v21198_v8  ;;  %7874 = vmatprep.subr.bf16.mxu1 %v21199_v2  ;;  %v14797_v8 = vcombine.high %v8005_v63, %v8009_v5  ;;  %v14799_v2 = vcombine.high %v8006_v28, %v8010_v44  ;;  %v8058_v36 = vld [vmem:[#allocation7 + $0x2e8] sm:$0xff] }
 0x897   : > { %7834 = vmatpush1.bf16.msra.mxu0 %v21200_v43  ;;  %7875 = vmatpush1.bf16.msra.mxu1 %v21201_v41  ;;  %v8013_v43 = vld [vmem:[#allocation7 + $0x180] sm:$0xff] }
 0x898   : > { %7835 = vmatprep.subr.bf16.mxu0 %v21202_v38  ;;  %7876 = vmatprep.subr.bf16.mxu1 %v21203_v46  ;;  %v8017_v41 = vld [vmem:[#allocation7 + $0x1a0] sm:$0xff]  ;;  %v8014_v38 = vld [vmem:[#allocation7 + $0x188] sm:$0xff] }
 0x899   : > { %v8018_v46 = vld [vmem:[#allocation7 + $0x1a8] sm:$0xff] }
 0x89b   : > { %7836 = vmatpush1.bf16.msra.mxu0 %v21204_v37  ;;  %7877 = vmatpush1.bf16.msra.mxu1 %v21205_v23  ;;  %v14796_v37 = vcombine.low %v8005_v63, %v8009_v5  ;;  %v14798_v23 = vcombine.low %v8006_v28, %v8010_v44  ;;  %v8062_v63 = vld [vmem:[#allocation7 + $0x308] sm:$0xff] }
 0x89c   : > { %7837 = vmatprep.subr.bf16.mxu0 %v21206_v15  ;;  %7878 = vmatprep.subr.bf16.mxu1 %v21207_v22  ;;  %v14805_v15 = vcombine.high %v8013_v43, %v8017_v41  ;;  %v14807_v22 = vcombine.high %v8014_v38, %v8018_v46  ;;  %v8066_v28 = vld [vmem:[#allocation7 + $0x328] sm:$0xff] }
 0x89f   : > { %7838 = vmatpush1.bf16.msra.mxu0 %v21208_v9  ;;  %7879 = vmatpush1.bf16.msra.mxu1 %v21209_v34  ;;  %v8021_v9 = vld [vmem:[#allocation7 + $0x1c0] sm:$0xff] }
 0x8a0   : > { %7839 = vmatprep.subr.bf16.mxu0 %v21210_v40  ;;  %7880 = vmatprep.subr.bf16.mxu1 %v21211_v6  ;;  %v8025_v34 = vld [vmem:[#allocation7 + $0x1e0] sm:$0xff]  ;;  %v8022_v40 = vld [vmem:[#allocation7 + $0x1c8] sm:$0xff] }
 0x8a1   : > { %v8026_v6 = vld [vmem:[#allocation7 + $0x1e8] sm:$0xff] }
 0x8a3   : > { %7840 = vmatpush1.bf16.msra.mxu0 %v18663_v18  ;;  %7881 = vmatpush1.bf16.msra.mxu1 %v18665_v20  ;;  %v7965_v18 = vld [vmem:[#allocation7] sm:$0xff] }
 0x8a4   : > { %7841 = vmatprep.subr.bf16.mxu0 %v18669_v4  ;;  %7882 = vmatprep.subr.bf16.mxu1 %v21212_v54  ;;  %v7969_v20 = vld [vmem:[#allocation7 + $0x20] sm:$0xff]  ;;  %v7966_v4 = vld [vmem:[#allocation7 + $0x8] sm:$0xff]  ;;  %v14804_v54 = vcombine.low %v8013_v43, %v8017_v41 }
 0x8a5   : > { %v8070_v43 = vld [vmem:[#allocation7 + $0x348] sm:$0xff] }
 0x8a7   : > { %7842 = vmatpush1.bf16.msra.mxu0 %v21213_v49  ;;  %7883 = vmatpush1.bf16.msra.mxu1 %v18677_v10  ;;  %v14756_v10 = vcombine.low %v7965_v18, %v7969_v20  ;;  %v14806_v49 = vcombine.low %v8014_v38, %v8018_v46  ;;  %v8074_v46 = vld [vmem:[#allocation7 + $0x368] sm:$0xff] }
 0x8a8   : > { %7843 = vmatprep.subr.bf16.mxu0 %v18681_v50  ;;  %7884 = vmatprep.subr.bf16.mxu1 %v18683_v0  ;;  %v14757_v50 = vcombine.high %v7965_v18, %v7969_v20  ;;  %v7970_v0 = vld [vmem:[#allocation7 + $0x28] sm:$0xff]  ;;  %v14813_v18 = vcombine.high %v8021_v9, %v8025_v34  ;;  %v14815_v20 = vcombine.high %v8022_v40, %v8026_v6 }
 0x8a9   : > { %v14758_v25 = vcombine.low %v7966_v4, %v7970_v0 }
 0x8ab   : > { %7844 = vmatpush1.bf16.msra.mxu0 %v18687_v55  ;;  %7885 = vmatpush1.bf16.msra.mxu1 %v18689_v21  ;;  %v7973_v55 = vld [vmem:[#allocation7 + $0x40] sm:$0xff] }
 0x8ac   : > { %7845 = vmatprep.subr.bf16.mxu0 %v18693_v47  ;;  %7886 = vmatprep.subr.bf16.mxu1 %v18695_v3  ;;  %v7977_v21 = vld [vmem:[#allocation7 + $0x60] sm:$0xff]  ;;  %v14759_v47 = vcombine.high %v7966_v4, %v7970_v0  ;;  %v7974_v3 = vld [vmem:[#allocation7 + $0x48] sm:$0xff]  ;;  %v14812_v4 = vcombine.low %v8021_v9, %v8025_v34 }
 0x8ad   : > { %v14765_v33 = vcombine.high %v7973_v55, %v7977_v21  ;;  %v14766_v59 = vcombine.low %v7974_v3, %v7978_v51  ;;  %v8033_v0 = vld [vmem:[#allocation7 + $0x220] sm:$0xff]  ;;  %v8078_v34 = vld [vmem:[#allocation7 + $0x388] sm:$0xff] }
 0x8af   : > { %7846 = vmatpush1.bf16.msra.mxu0 %v18699_v57  ;;  %7887 = vmatpush1.bf16.msra.mxu1 %v18701_v31  ;;  %v7981_v57 = vld [vmem:[#allocation7 + $0x80] sm:$0xff]  ;;  %v14767_v31 = vcombine.high %v7974_v3, %v7978_v51 }
 0x8b0   : > { %8733 = vmatprep.subr.bf16.mxu0 %v14757_v50  ;;  %8774 = vmatprep.subr.bf16.mxu1 %v14759_v47  ;;  %v14773_v39 = vcombine.high %v7981_v57, %v7985_v7  ;;  %v14772_v60 = vcombine.low %v7981_v57, %v7985_v7  ;;  %v8029_v50 = vld [vmem:[#allocation7 + $0x200] sm:$0xff] }
 0x8b1   : > { %v14820_v47 = vcombine.low %v8029_v50, %v8033_v0  ;;  %v8037_v51 = vld [vmem:[#allocation7 + $0x240] sm:$0xff] }
 0x8b2   : > { %7848 = vmatmul.mubr.bf16.vlgmr.msra.gmra.mrb[76].mxu0 %v18799_v11  ;;  %7889 = vmatmul.mubr.bf16.vlgmr.msra.gmra.mrb[92].mxu1 %v18799_v11  ;;  %v14764_v11 = vcombine.low %v7973_v55, %v7977_v21  ;;  %v8030_v55 = vld [vmem:[#allocation7 + $0x208] sm:$0xff]  ;;  %v14821_v21 = vcombine.high %v8029_v50, %v8033_v0  ;;  %v8041_v57 = vld [vmem:[#allocation7 + $0x260] sm:$0xff] }
 0x8b3   : > { %8734 = vmatpush1.bf16.msra.mxu0 %v14756_v10  ;;  %8775 = vmatpush1.bf16.msra.mxu1 %v14758_v25  ;;  %v14814_v10 = vcombine.low %v8022_v40, %v8026_v6  ;;  %v8034_v25 = vld [vmem:[#allocation7 + $0x228] sm:$0xff]  ;;  %v14829_v7 = vcombine.high %v8037_v51, %v8041_v57  ;;  %v14828_v13 = vcombine.low %v8037_v51, %v8041_v57  ;;  %v8085_v6 = vld [vmem:[#allocation7 + $0x3c0] sm:$0xff]  ;;  %v18875_v51 = vld [vmem:[#allocation7 + $0x38] sm:$0xff] }
 0x8b4   : > { %8735 = vmatprep.subr.bf16.mxu0 %v14765_v33  ;;  %8776 = vmatprep.subr.bf16.mxu1 %v14767_v31  ;;  %v14822_v33 = vcombine.low %v8030_v55, %v8034_v25  ;;  %v14823_v3 = vcombine.high %v8030_v55, %v8034_v25  ;;  %v8038_v31 = vld [vmem:[#allocation7 + $0x248] sm:$0xff]  ;;  %v18867_v25 = vld [vmem:[#allocation7 + $0x10] sm:$0xff] }
 0x8b5   : > { %v8082_v40 = vld [vmem:[#allocation7 + $0x3a8] sm:$0xff] }
 0x8b7   : > { %8736 = vmatpush1.bf16.msra.mxu0 %v14764_v11  ;;  %8777 = vmatpush1.bf16.msra.mxu1 %v14766_v59  ;;  %v14830_v11 = vcombine.low %v8038_v31, %v8042_v52  ;;  %v14831_v59 = vcombine.high %v8038_v31, %v8042_v52 }
 0x8b8   : > { %8737 = vmatprep.subr.bf16.mxu0 %v14773_v39  ;;  %8778 = vmatprep.subr.bf16.mxu1 %v14775_v58  ;;  %v8045_v39 = vld [vmem:[#allocation7 + $0x280] sm:$0xff] }
 0x8b9   : > { %v8049_v58 = vld [vmem:[#allocation7 + $0x2a0] sm:$0xff] }
 0x8ba   : > { %v14837_v32 = vcombine.high %v8045_v39, %v8049_v58  ;;  %v14836_v27 = vcombine.low %v8045_v39, %v8049_v58  ;;  %v21215_v39 = vld [vmem:[#allocation66_spill] sm:$0xff] }
 0x8bb   : > { %8738 = vmatpush1.bf16.msra.mxu0 %v14772_v60  ;;  %8779 = vmatpush1.bf16.msra.mxu1 %v14774_v35  ;;  %v14838_v60 = vcombine.low %v8046_v12, %v8050_v45  ;;  %v14839_v35 = vcombine.high %v8046_v12, %v8050_v45  ;;  %v21216_v45 = vld [vmem:[#allocation38_spill] sm:$0xff] }
 0x8bc   : > { %8739 = vmatprep.subr.bf16.mxu0 %v14781_v61  ;;  %8780 = vmatprep.subr.bf16.mxu1 %v14783_v30  ;;  %v8053_v61 = vld [vmem:[#allocation7 + $0x2c0] sm:$0xff] }
 0x8bd   : > { %v8057_v30 = vld [vmem:[#allocation7 + $0x2e0] sm:$0xff] }
 0x8be   : > { %v14845_v48 = vcombine.high %v8053_v61, %v8057_v30  ;;  %v14844_v56 = vcombine.low %v8053_v61, %v8057_v30 }
 0x8bf   : > { %8740 = vmatpush1.bf16.msra.mxu0 %v14780_v19  ;;  %8781 = vmatpush1.bf16.msra.mxu1 %v14782_v24  ;;  %v14846_v19 = vcombine.low %v8054_v16, %v8058_v36  ;;  %v14847_v24 = vcombine.high %v8054_v16, %v8058_v36 }
 0x8c0   : > { %8741 = vmatprep.subr.bf16.mxu0 %v14789_v14  ;;  %8782 = vmatprep.subr.bf16.mxu1 %v14791_v29  ;;  %v8061_v14 = vld [vmem:[#allocation7 + $0x300] sm:$0xff] }
 0x8c1   : > { %v8065_v29 = vld [vmem:[#allocation7 + $0x320] sm:$0xff] }
 0x8c2   : > { %v14853_v5 = vcombine.high %v8061_v14, %v8065_v29  ;;  %v14852_v44 = vcombine.low %v8061_v14, %v8065_v29 }
 0x8c3   : > { %8742 = vmatpush1.bf16.msra.mxu0 %v14788_v26  ;;  %8783 = vmatpush1.bf16.msra.mxu1 %v14790_v42  ;;  %v14854_v26 = vcombine.low %v8062_v63, %v8066_v28  ;;  %v14855_v42 = vcombine.high %v8062_v63, %v8066_v28 }
 0x8c4   : > { %8743 = vmatprep.subr.bf16.mxu0 %v14797_v8  ;;  %8784 = vmatprep.subr.bf16.mxu1 %v14799_v2  ;;  %v8069_v8 = vld [vmem:[#allocation7 + $0x340] sm:$0xff] }
 0x8c5   : > { %v8073_v2 = vld [vmem:[#allocation7 + $0x360] sm:$0xff] }
 0x8c6   : > { %v14860_v41 = vcombine.low %v8069_v8, %v8073_v2  ;;  %v14861_v38 = vcombine.high %v8069_v8, %v8073_v2 }
 0x8c7   : > { %8744 = vmatpush1.bf16.msra.mxu0 %v14796_v37  ;;  %8785 = vmatpush1.bf16.msra.mxu1 %v14798_v23  ;;  %v8077_v37 = vld [vmem:[#allocation7 + $0x380] sm:$0xff] }
 0x8c8   : > { %8745 = vmatprep.subr.bf16.mxu0 %v14805_v15  ;;  %8786 = vmatprep.subr.bf16.mxu1 %v14807_v22  ;;  %v8081_v23 = vld [vmem:[#allocation7 + $0x3a0] sm:$0xff]  ;;  %v14862_v15 = vcombine.low %v8070_v43, %v8074_v46  ;;  %v14863_v22 = vcombine.high %v8070_v43, %v8074_v46  ;;  %v21218_v43 = vld [vmem:[#allocation67_spill] sm:$0xff] }
 0x8c9   : > { %v14869_v9 = vcombine.high %v8077_v37, %v8081_v23 }
 0x8cb   : > { %8746 = vmatpush1.bf16.msra.mxu0 %v14804_v54  ;;  %8787 = vmatpush1.bf16.msra.mxu1 %v14806_v49  ;;  %v14871_v54 = vcombine.high %v8078_v34, %v8082_v40  ;;  %v8089_v49 = vld [vmem:[#allocation7 + $0x3e0] sm:$0xff] }
 0x8cc   : > { %8747 = vmatprep.subr.bf16.mxu0 %v14813_v18  ;;  %8788 = vmatprep.subr.bf16.mxu1 %v14815_v20  ;;  %v8086_v18 = vld [vmem:[#allocation7 + $0x3c8] sm:$0xff]  ;;  %v14877_v50 = vcombine.high %v8085_v6, %v8089_v49  ;;  %v14876_v55 = vcombine.low %v8085_v6, %v8089_v49 }
 0x8cd   : > { %v8090_v20 = vld [vmem:[#allocation7 + $0x3e8] sm:$0xff] }
 0x8ce   : > { %v14879_v0 = vcombine.high %v8086_v18, %v8090_v20 }
 0x8cf   : > { %8748 = vmatpush1.bf16.msra.mxu0 %v14812_v4  ;;  %8789 = vmatpush1.bf16.msra.mxu1 %v14814_v10  ;;  %v14868_v4 = vcombine.low %v8077_v37, %v8081_v23  ;;  %v14870_v10 = vcombine.low %v8078_v34, %v8082_v40 }
 0x8d0   : > { %8749 = vmatprep.subr.bf16.mxu0 %v14821_v21  ;;  %8790 = vmatprep.subr.bf16.mxu1 %v14823_v3  ;;  %v14878_v21 = vcombine.low %v8086_v18, %v8090_v20 }
 0x8d3   : > { %8750 = vmatpush1.bf16.msra.mxu0 %v14820_v47  ;;  %8791 = vmatpush1.bf16.msra.mxu1 %v14822_v33  ;;  %v18869_v47 = vld [vmem:[#allocation7 + $0x30] sm:$0xff]  ;;  %v18871_v33 = vld [vmem:[#allocation7 + $0x18] sm:$0xff] }
 0x8d4   : > { %8751 = vmatprep.subr.bf16.mxu0 %v14829_v7  ;;  %8792 = vmatprep.subr.bf16.mxu1 %v14831_v59  ;;  %v14761_v3 = vcombine.high %v18867_v25, %v18869_v47  ;;  %v14760_v57 = vcombine.low %v18867_v25, %v18869_v47  ;;  %v14762_v31 = vcombine.low %v18871_v33, %v18875_v51 }
 0x8d5   : > { %v14763_v7 = vcombine.high %v18871_v33, %v18875_v51 }
 0x8d7   : > { %8752 = vmatpush1.bf16.msra.mxu0 %v14828_v13  ;;  %8793 = vmatpush1.bf16.msra.mxu1 %v14830_v11  ;;  %v21214_v11 = vld [vmem:[#allocation36_spill] sm:$0xff] }
 0x8d8   : > { %8753 = vmatprep.subr.bf16.mxu0 %v14837_v32  ;;  %8794 = vmatprep.subr.bf16.mxu1 %v14839_v35 }
 0x8db   : > { %8754 = vmatpush1.bf16.msra.mxu0 %v14836_v27  ;;  %8795 = vmatpush1.bf16.msra.mxu1 %v14838_v60  ;;  %v21217_v60 = vld [vmem:[#allocation68_spill] sm:$0xff] }
 0x8dc   : > { %8755 = vmatprep.subr.bf16.mxu0 %v14845_v48  ;;  %8796 = vmatprep.subr.bf16.mxu1 %v14847_v24 }
 0x8df   : > { %8756 = vmatpush1.bf16.msra.mxu0 %v14844_v56  ;;  %8797 = vmatpush1.bf16.msra.mxu1 %v14846_v19 }
 0x8e0   : > { %8757 = vmatprep.subr.bf16.mxu0 %v14853_v5  ;;  %8798 = vmatprep.subr.bf16.mxu1 %v14855_v42 }
 0x8e3   : > { %8758 = vmatpush1.bf16.msra.mxu0 %v14852_v44  ;;  %8799 = vmatpush1.bf16.msra.mxu1 %v14854_v26 }
 0x8e4   : > { %8759 = vmatprep.subr.bf16.mxu0 %v14861_v38  ;;  %8800 = vmatprep.subr.bf16.mxu1 %v14863_v22  ;;  %v21219_v38 = vld [vmem:[#allocation112_spill] sm:$0xff] }
 0x8e7   : > { %8760 = vmatpush1.bf16.msra.mxu0 %v14860_v41  ;;  %8801 = vmatpush1.bf16.msra.mxu1 %v14862_v15  ;;  %v21220_v15 = vld [vmem:[#allocation69_spill] sm:$0xff] }
 0x8e8   : > { %8761 = vmatprep.subr.bf16.mxu0 %v14869_v9  ;;  %8802 = vmatprep.subr.bf16.mxu1 %v14871_v54  ;;  %v21221_v9 = vld [vmem:[#allocation113_spill] sm:$0xff] }
 0x8eb   : > { %8762 = vmatpush1.bf16.msra.mxu0 %v14868_v4  ;;  %8803 = vmatpush1.bf16.msra.mxu1 %v14870_v10 }
 0x8ec   : > { %8763 = vmatprep.subr.bf16.mxu0 %v14877_v50  ;;  %8804 = vmatprep.subr.bf16.mxu1 %v14879_v0 }
 0x8ef   : > { %8764 = vmatpush1.bf16.msra.mxu0 %v14876_v55  ;;  %8805 = vmatpush1.bf16.msra.mxu1 %v14878_v21 }
 0x8f0   : > { %8815 = vmatprep.subr.bf16.mxu0 %v14761_v3  ;;  %8856 = vmatprep.subr.bf16.mxu1 %v14763_v7 }
 0x945   : > { %v7767_v52 = vpop.f32.mrb[72].mxu0  ;;  %v7808_v13 = vpop.f32.mrb[88].mxu1 }
 0x946   : > { %v7897_v59 = vadd.f32 %v7767_v52, %v21214_v11  ;;  %v7899_v58 = vadd.f32 %v7808_v13, %v21215_v39  ;;  %v7769_v12 = vpop.f32.mrb[73].mxu0  ;;  %v7810_v32 = vpop.f32.mrb[89].mxu1 }
 0x947   : > { %v7898_v27 = vadd.f32 %v7769_v12, %v21216_v45  ;;  %v7900_v35 = vadd.f32 %v7810_v32, %v21217_v60  ;;  %v7771_v61 = vpop.f32.mrb[74].mxu0  ;;  %v7812_v30 = vpop.f32.mrb[90].mxu1 }
 0x948   : > { %v7772_v16 = vpop.f32.mrb[75].mxu0  ;;  %v7813_v48 = vpop.f32.mrb[91].mxu1  ;;  %v14750_v36 = vmul.f32 -1.442695, %v7897_v59  ;;  %v14752_v56 = vmul.f32 -1.442695, %v7899_v58 }
 0x949   : > { %v14751_v19 = vmul.f32 -1.442695, %v7898_v27  ;;  %v14753_v24 = vmul.f32 -1.442695, %v7900_v35  ;;  %v7975_v61 = vld [vmem:[#allocation7 + $0x50] sm:$0xff]  ;;  %v7976_v16 = vld [vmem:[#allocation7 + $0x58] sm:$0xff] }
 0x94a   : > { %15954 = vpow2.f32 %v14750_v36  ;;  %v7979_v30 = vld [vmem:[#allocation7 + $0x70] sm:$0xff]  ;;  %v7980_v48 = vld [vmem:[#allocation7 + $0x78] sm:$0xff] }
 0x94b   : > { %15956 = vpow2.f32 %v14752_v56 }
 0x94c   : > { %15958 = vpow2.f32 %v14751_v19  ;;  %v7983_v19 = vld [vmem:[#allocation7 + $0x90] sm:$0xff] }
 0x94d   : > { %15960 = vpow2.f32 %v14753_v24  ;;  %v14769_v24 = vcombine.high %v7975_v61, %v7979_v30 }
 0x954   : > { %v15955_v14 = vpop.eup %15954 }
 0x955   : > { %v15957_v29 = vpop.eup %15956  ;;  %v7923_v28 = vadd.f32 1.0, %v15955_v14  ;;  %v14771_v14 = vcombine.high %v7976_v16, %v7980_v48 }
 0x956   : > { %v15959_v63 = vpop.eup %15958  ;;  %v7925_v44 = vadd.f32 1.0, %v15957_v29  ;;  %v7987_v29 = vld [vmem:[#allocation7 + $0xb0] sm:$0xff] }
 0x957   : > { %v15961_v5 = vpop.eup %15960  ;;  %v7924_v26 = vadd.f32 1.0, %v15959_v63  ;;  %15962 = vrcp.f32 %v7923_v28  ;;  %v7984_v63 = vld [vmem:[#allocation7 + $0x98] sm:$0xff]  ;;  %v14768_v28 = vcombine.low %v7975_v61, %v7979_v30  ;;  %v14776_v25 = vcombine.low %v7983_v19, %v7987_v29 }
 0x958   : > { %v7926_v42 = vadd.f32 1.0, %v15961_v5  ;;  %15964 = vrcp.f32 %v7925_v44  ;;  %v7988_v5 = vld [vmem:[#allocation7 + $0xb8] sm:$0xff]  ;;  %v14770_v44 = vcombine.low %v7976_v16, %v7980_v48 }
 0x959   : > { %15966 = vrcp.f32 %v7924_v26  ;;  %v14777_v26 = vcombine.high %v7983_v19, %v7987_v29  ;;  %v14778_v47 = vcombine.low %v7984_v63, %v7988_v5  ;;  %v8032_v61 = vld [vmem:[#allocation7 + $0x218] sm:$0xff] }
 0x95a   : > { %15968 = vrcp.f32 %v7926_v42  ;;  %v14779_v42 = vcombine.high %v7984_v63, %v7988_v5  ;;  %v8036_v30 = vld [vmem:[#allocation7 + $0x238] sm:$0xff] }
 0x95b   : > { %v14827_v19 = vcombine.high %v8032_v61, %v8036_v30  ;;  %v8040_v29 = vld [vmem:[#allocation7 + $0x258] sm:$0xff] }
 0x95c   : > { %v8044_v63 = vld [vmem:[#allocation7 + $0x278] sm:$0xff] }
 0x961   : > { %v15963_v4 = vpop.eup %15962 }
 0x962   : > { %v15965_v10 = vpop.eup %15964 }
 0x963   : > { %v15967_v50 = vpop.eup %15966  ;;  %v7943_v3 = vmul.f32 %v15965_v10, %v18785_v62  ;;  %v8019_v10 = vld [vmem:[#allocation7 + $0x1b0] sm:$0xff] }
 0x964   : > { %v15969_v0 = vpop.eup %15968 }
 0x965   : > { %v7944_v13 = vmul.f32 %v15969_v0, %v18787_v1  ;;  %v8020_v0 = vld [vmem:[#allocation7 + $0x1b8] sm:$0xff] }
 0x985   : > { %v7849_v8 = vpop.f32.mrb[76].mxu0  ;;  %v7890_v2 = vpop.f32.mrb[92].mxu1 }
 0x986   : > { %v7901_v41 = vadd.f32 %v7849_v8, %v21218_v43  ;;  %v7903_v46 = vadd.f32 %v7890_v2, %v21219_v38  ;;  %v7851_v37 = vpop.f32.mrb[77].mxu0  ;;  %v7892_v23 = vpop.f32.mrb[93].mxu1  ;;  %v7991_v8 = vld [vmem:[#allocation7 + $0xd0] sm:$0xff]  ;;  %v7992_v43 = vld [vmem:[#allocation7 + $0xd8] sm:$0xff] }
 0x987   : > { %v7902_v22 = vadd.f32 %v7851_v37, %v21220_v15  ;;  %v7904_v34 = vadd.f32 %v7892_v23, %v21221_v9  ;;  %v7853_v40 = vpop.f32.mrb[78].mxu0  ;;  %v7894_v6 = vpop.f32.mrb[94].mxu1  ;;  %v7995_v2 = vld [vmem:[#allocation7 + $0xf0] sm:$0xff]  ;;  %v8000_v38 = vld [vmem:[#allocation7 + $0x118] sm:$0xff] }
 0x988   : > { %v14754_v54 = vmul.f32 -1.442695, %v7901_v41  ;;  %15970 = vtanh.f32 %v7903_v46  ;;  %v7854_v49 = vpop.f32.mrb[79].mxu0  ;;  %v7895_v18 = vpop.f32.mrb[95].mxu1  ;;  %v7996_v41 = vld [vmem:[#allocation7 + $0xf8] sm:$0xff]  ;;  %v14785_v33 = vcombine.high %v7991_v8, %v7995_v2  ;;  %v14784_v37 = vcombine.low %v7991_v8, %v7995_v2  ;;  %v8007_v9 = vld [vmem:[#allocation7 + $0x150] sm:$0xff] }
 0x989   : > { %v14755_v20 = vmul.f32 -1.442695, %v7902_v22  ;;  %15972 = vtanh.f32 %v7904_v34  ;;  %v14787_v51 = vcombine.high %v7992_v43, %v7996_v41  ;;  %v8004_v46 = vld [vmem:[#allocation7 + $0x138] sm:$0xff]  ;;  %v14786_v23 = vcombine.low %v7992_v43, %v7996_v41  ;;  %v8011_v34 = vld [vmem:[#allocation7 + $0x170] sm:$0xff] }
 0x98a   : > { %15974 = vpow2.f32 %v14754_v54  ;;  %v14795_v22 = vcombine.high %v8000_v38, %v8004_v46  ;;  %v8008_v40 = vld [vmem:[#allocation7 + $0x158] sm:$0xff]  ;;  %v14794_v49 = vcombine.low %v8000_v38, %v8004_v46  ;;  %v14801_v18 = vcombine.high %v8007_v9, %v8011_v34  ;;  %v8051_v8 = vld [vmem:[#allocation7 + $0x2b0] sm:$0xff] }
 0x98b   : > { %15976 = vpow2.f32 %v14755_v20  ;;  %v8012_v6 = vld [vmem:[#allocation7 + $0x178] sm:$0xff] }
 0x98c   : > { %v14803_v20 = vcombine.high %v8008_v40, %v8012_v6  ;;  %v8048_v2 = vld [vmem:[#allocation7 + $0x298] sm:$0xff] }
 0x98d   : > { %v8052_v43 = vld [vmem:[#allocation7 + $0x2b8] sm:$0xff] }
 0x98e   : > { %v8060_v38 = vld [vmem:[#allocation7 + $0x2f8] sm:$0xff] }
 0x992   : > { %v15971_v55 = vpop.eup %15970 }
 0x993   : > { %v15973_v21 = vpop.eup %15972  ;;  %v7945_v7 = vmul.f32 %v15971_v55, %v15963_v4  ;;  %v8015_v4 = vld [vmem:[#allocation7 + $0x190] sm:$0xff]  ;;  %v14800_v55 = vcombine.low %v8007_v9, %v8011_v34  ;;  %v8064_v34 = vld [vmem:[#allocation7 + $0x318] sm:$0xff] }
 0x994   : > { %v15975_v52 = vpop.eup %15974  ;;  %v7946_v11 = vmul.f32 %v15973_v21, %v15967_v50  ;;  %v8016_v50 = vld [vmem:[#allocation7 + $0x198] sm:$0xff]  ;;  %v14802_v21 = vcombine.low %v8008_v40, %v8012_v6  ;;  %v8067_v9 = vld [vmem:[#allocation7 + $0x330] sm:$0xff] }
 0x995   : > { %v15977_v59 = vpop.eup %15976  ;;  %v7927_v39 = vadd.f32 1.0, %v15975_v52  ;;  %v18893_v58 = vadd.f32 %v7945_v7, %v7943_v3  ;;  %v14809_v3 = vcombine.high %v8015_v4, %v8019_v10  ;;  %v14811_v7 = vcombine.high %v8016_v50, %v8020_v0  ;;  %v8023_v52 = vld [vmem:[#allocation7 + $0x1d0] sm:$0xff]  ;;  %v8068_v40 = vld [vmem:[#allocation7 + $0x338] sm:$0xff] }
 0x996   : > { %v7928_v12 = vadd.f32 1.0, %v15977_v59  ;;  %v18895_v32 = vadd.f32 %v7946_v11, %v7944_v13  ;;  %v8027_v13 = vld [vmem:[#allocation7 + $0x1f0] sm:$0xff]  ;;  %v8024_v11 = vld [vmem:[#allocation7 + $0x1d8] sm:$0xff] }
 0x997   : > { %15978 = vrcp.f32 %v7927_v39  ;;  %v8028_v59 = vld [vmem:[#allocation7 + $0x1f8] sm:$0xff]  ;;  %v14808_v39 = vcombine.low %v8015_v4, %v8019_v10  ;;  %v14816_v16 = vcombine.low %v8023_v52, %v8027_v13  ;;  %v8075_v4 = vld [vmem:[#allocation7 + $0x370] sm:$0xff] }
 0x998   : > { %15980 = vtanh.f32 %v18893_v58  ;;  %v14818_v48 = vcombine.low %v8024_v11, %v8028_v59  ;;  %v8072_v10 = vld [vmem:[#allocation7 + $0x358] sm:$0xff] }
 0x999   : > { %15982 = vrcp.f32 %v7928_v12  ;;  %v14810_v12 = vcombine.low %v8016_v50, %v8020_v0  ;;  %v8076_v50 = vld [vmem:[#allocation7 + $0x378] sm:$0xff] }
 0x99a   : > { %15984 = vtanh.f32 %v18895_v32 }
 0x9a1   : > { %v15979_v45 = vpop.eup %15978 }
 0x9a2   : > { %v15981_v62 = vpop.eup %15980 }
 0x9a3   : > { %v15983_v27 = vpop.eup %15982  ;;  %v18899_v35 = vmul.f32 %v15981_v62, %v15979_v45  ;;  %v14817_v45 = vcombine.high %v8023_v52, %v8027_v13  ;;  %v14819_v62 = vcombine.high %v8024_v11, %v8028_v59  ;;  %v8083_v52 = vld [vmem:[#allocation7 + $0x3b0] sm:$0xff]  ;;  %v8080_v13 = vld [vmem:[#allocation7 + $0x398] sm:$0xff] }
 0x9a4   : > { %v15985_v60 = vpop.eup %15984  ;;  %v8084_v11 = vld [vmem:[#allocation7 + $0x3b8] sm:$0xff] }
 0x9a5   : > { %v18901_v1 = vmul.f32 %v15985_v60, %v15983_v27  ;;  %v18907_v56 = vpack.c.bf16 %v18899_v35, %v18899_v35  ;;  %v8031_v27 = vld [vmem:[#allocation7 + $0x210] sm:$0xff] }
 0x9a6   : > { %v8035_v60 = vld [vmem:[#allocation7 + $0x230] sm:$0xff] }
 0x9a7   : > { %v7956_v36 = vpack.c.bf16 %v18901_v1, %v18901_v1  ;;  %v14824_v5 = vcombine.low %v8031_v27, %v8035_v60 }
 0x9a9   : > { %8765 = vmatprep.mubr.bf16.mxu0 %v7956_v36  ;;  %8806 = vmatprep.mubr.bf16.mxu1 %v7956_v36 }
 0x9aa   : > { %8766 = vmatmul.mubr.bf16.vlgmr.msra.gmra.mrb[80].mxu0 %v18907_v56  ;;  %8807 = vmatmul.mubr.bf16.vlgmr.msra.gmra.mrb[96].mxu1 %v18907_v56 }
 0x9ab   : > { %8816 = vmatpush1.bf16.msra.mxu0 %v14760_v57  ;;  %8857 = vmatpush1.bf16.msra.mxu1 %v14762_v31  ;;  %v7999_v57 = vld [vmem:[#allocation7 + $0x110] sm:$0xff] }
 0x9ac   : > { %8847 = vmatprep.mubr.bf16.mxu0 %v7956_v36  ;;  %8888 = vmatprep.mubr.bf16.mxu1 %v7956_v36  ;;  %v8003_v31 = vld [vmem:[#allocation7 + $0x130] sm:$0xff]  ;;  %v14825_v36 = vcombine.high %v8031_v27, %v8035_v60  ;;  %v8088_v60 = vld [vmem:[#allocation7 + $0x3d8] sm:$0xff] }
 0x9ad   : > { %8817 = vmatprep.subr.bf16.mxu0 %v14769_v24  ;;  %8858 = vmatprep.subr.bf16.mxu1 %v14771_v14  ;;  %v14793_v15 = vcombine.high %v7999_v57, %v8003_v31  ;;  %v14792_v54 = vcombine.low %v7999_v57, %v8003_v31  ;;  %v8039_v24 = vld [vmem:[#allocation7 + $0x250] sm:$0xff]  ;;  %v8056_v31 = vld [vmem:[#allocation7 + $0x2d8] sm:$0xff] }
 0x9ae   : > { %v8043_v14 = vld [vmem:[#allocation7 + $0x270] sm:$0xff] }
 0x9af   : > { %8818 = vmatpush1.bf16.msra.mxu0 %v14768_v28  ;;  %8859 = vmatpush1.bf16.msra.mxu1 %v14770_v44  ;;  %v14826_v28 = vcombine.low %v8032_v61, %v8036_v30  ;;  %v14833_v44 = vcombine.high %v8039_v24, %v8043_v14  ;;  %v14832_v41 = vcombine.low %v8039_v24, %v8043_v14  ;;  %v8059_v57 = vld [vmem:[#allocation7 + $0x2f0] sm:$0xff]  ;;  %v8092_v61 = vld [vmem:[#allocation7 + $0x3f8] sm:$0xff] }
 0x9b0   : > { %8819 = vmatprep.subr.bf16.mxu0 %v14777_v26  ;;  %8860 = vmatprep.subr.bf16.mxu1 %v14779_v42  ;;  %v14835_v26 = vcombine.high %v8040_v29, %v8044_v63  ;;  %v8047_v42 = vld [vmem:[#allocation7 + $0x290] sm:$0xff]  ;;  %v14882_v24 = vcombine.low %v8088_v60, %v8092_v61 }
 0x9b1   : > { %v14840_v46 = vcombine.low %v8047_v42, %v8051_v8  ;;  %v8091_v27 = vld [vmem:[#allocation7 + $0x3f0] sm:$0xff] }
 0x9b2   : > { %v15468_v14 = vld [vmem:[%s20360_s4 + $0x4] ss:$16 sps:$4 sm:$0xff]  }
 0x9b3   : > { %8820 = vmatpush1.bf16.msra.mxu0 %v14776_v25  ;;  %8861 = vmatpush1.bf16.msra.mxu1 %v14778_v47  ;;  %v14834_v25 = vcombine.low %v8040_v29, %v8044_v63  ;;  %v14841_v47 = vcombine.high %v8047_v42, %v8051_v8  ;;  %v15471_v29 = vld [vmem:[%s20360_s4 + $0xc] ss:$16 sps:$4 sm:$0xff]   ;;  %v15466_v63 = vld [vmem:[%s20360_s4] ss:$16 sps:$4 sm:$0xff]   ;;  %v15474_v42 = vld [vmem:[%s20360_s4 + $0x24] ss:$16 sps:$4 sm:$0xff]  }
 0x9b4   : > { %8821 = vmatprep.subr.bf16.mxu0 %v14785_v33  ;;  %8862 = vmatprep.subr.bf16.mxu1 %v14787_v51  ;;  %v14843_v33 = vcombine.high %v8048_v2, %v8052_v43  ;;  %v8055_v51 = vld [vmem:[#allocation7 + $0x2d0] sm:$0xff]  ;;  %v15477_v8 = vld [vmem:[%s20360_s4 + $0x2c] ss:$16 sps:$4 sm:$0xff]  }
 0x9b5   : > { %v14848_v6 = vcombine.low %v8055_v51, %v8059_v57 }
 0x9b7   : > { %8822 = vmatpush1.bf16.msra.mxu0 %v14784_v37  ;;  %8863 = vmatpush1.bf16.msra.mxu1 %v14786_v23  ;;  %v14842_v37 = vcombine.low %v8048_v2, %v8052_v43  ;;  %v14849_v23 = vcombine.high %v8055_v51, %v8059_v57  ;;  %v15472_v2 = vld [vmem:[%s20360_s4 + $0x20] ss:$16 sps:$4 sm:$0xff]   ;;  %v15475_v43 = vld [vmem:[%s20360_s4 + $0x28] ss:$16 sps:$4 sm:$0xff]   ;;  %v15489_v51 = vld [vmem:[%s20360_s4 + $0x6c] ss:$16 sps:$4 sm:$0xff]  }
 0x9b8   : > { %8823 = vmatprep.subr.bf16.mxu0 %v14793_v15  ;;  %8864 = vmatprep.subr.bf16.mxu1 %v14795_v22  ;;  %v14851_v15 = vcombine.high %v8056_v31, %v8060_v38  ;;  %v8063_v22 = vld [vmem:[#allocation7 + $0x310] sm:$0xff] }
 0x9b9   : > { %v14856_v0 = vcombine.low %v8063_v22, %v8067_v9  ;;  %v15484_v57 = vld [vmem:[%s20360_s4 + $0x60] ss:$16 sps:$4 sm:$0xff]  }
 0x9bb   : > { %8824 = vmatpush1.bf16.msra.mxu0 %v14792_v54  ;;  %8865 = vmatpush1.bf16.msra.mxu1 %v14794_v49  ;;  %v14850_v54 = vcombine.low %v8056_v31, %v8060_v38  ;;  %v14857_v49 = vcombine.high %v8063_v22, %v8067_v9  ;;  %v15487_v31 = vld [vmem:[%s20360_s4 + $0x68] ss:$16 sps:$4 sm:$0xff]   ;;  %v15492_v38 = vld [vmem:[%s20360_s4 + $0x84] ss:$16 sps:$4 sm:$0xff]   ;;  %v15501_v22 = vld [vmem:[%s20360_s4 + $0xac] ss:$16 sps:$4 sm:$0xff]  }
 0x9bc   : > { %8825 = vmatprep.subr.bf16.mxu0 %v14801_v18  ;;  %8866 = vmatprep.subr.bf16.mxu1 %v14803_v20  ;;  %v14859_v18 = vcombine.high %v8064_v34, %v8068_v40  ;;  %v8071_v20 = vld [vmem:[#allocation7 + $0x350] sm:$0xff] }
 0x9bd   : > { %v14864_v59 = vcombine.low %v8071_v20, %v8075_v4  ;;  %v15496_v9 = vld [vmem:[%s20360_s4 + $0xa0] ss:$16 sps:$4 sm:$0xff]  }
 0x9bf   : > { %8826 = vmatpush1.bf16.msra.mxu0 %v14800_v55  ;;  %8867 = vmatpush1.bf16.msra.mxu1 %v14802_v21  ;;  %v14858_v55 = vcombine.low %v8064_v34, %v8068_v40  ;;  %v14865_v21 = vcombine.high %v8071_v20, %v8075_v4  ;;  %v15499_v34 = vld [vmem:[%s20360_s4 + $0xa8] ss:$16 sps:$4 sm:$0xff]   ;;  %v15504_v40 = vld [vmem:[%s20360_s4 + $0xc4] ss:$16 sps:$4 sm:$0xff]   ;;  %v15513_v20 = vld [vmem:[%s20360_s4 + $0xec] ss:$16 sps:$4 sm:$0xff]  }
 0x9c0   : > { %8827 = vmatprep.subr.bf16.mxu0 %v14809_v3  ;;  %8868 = vmatprep.subr.bf16.mxu1 %v14811_v7  ;;  %v14867_v3 = vcombine.high %v8072_v10, %v8076_v50  ;;  %v8079_v7 = vld [vmem:[#allocation7 + $0x390] sm:$0xff] }
 0x9c1   : > { %v14872_v30 = vcombine.low %v8079_v7, %v8083_v52  ;;  %v15508_v4 = vld [vmem:[%s20360_s4 + $0xe0] ss:$16 sps:$4 sm:$0xff]  }
 0x9c3   : > { %8828 = vmatpush1.bf16.msra.mxu0 %v14808_v39  ;;  %8869 = vmatpush1.bf16.msra.mxu1 %v14810_v12  ;;  %v14866_v39 = vcombine.low %v8072_v10, %v8076_v50  ;;  %v14873_v12 = vcombine.high %v8079_v7, %v8083_v52  ;;  %v15511_v10 = vld [vmem:[%s20360_s4 + $0xe8] ss:$16 sps:$4 sm:$0xff]   ;;  %v15516_v50 = vld [vmem:[%s20360_s4 + $0x104] ss:$16 sps:$4 sm:$0xff]   ;;  %v15525_v7 = vld [vmem:[%s20360_s4 + $0x12c] ss:$16 sps:$4 sm:$0xff]  }
 0x9c4   : > { %8829 = vmatprep.subr.bf16.mxu0 %v14817_v45  ;;  %8870 = vmatprep.subr.bf16.mxu1 %v14819_v62  ;;  %v14875_v45 = vcombine.high %v8080_v13, %v8084_v11  ;;  %v8087_v62 = vld [vmem:[#allocation7 + $0x3d0] sm:$0xff] }
 0x9c5   : > { %v15520_v52 = vld [vmem:[%s20360_s4 + $0x120] ss:$16 sps:$4 sm:$0xff]  }
 0x9c7   : > { %8830 = vmatpush1.bf16.msra.mxu0 %v14816_v16  ;;  %8871 = vmatpush1.bf16.msra.mxu1 %v14818_v48  ;;  %v14874_v16 = vcombine.low %v8080_v13, %v8084_v11  ;;  %v14881_v48 = vcombine.high %v8087_v62, %v8091_v27  ;;  %v15523_v13 = vld [vmem:[%s20360_s4 + $0x128] ss:$16 sps:$4 sm:$0xff]   ;;  %v15528_v11 = vld [vmem:[%s20360_s4 + $0x144] ss:$16 sps:$4 sm:$0xff]  }
 0x9c8   : > { %8831 = vmatprep.subr.bf16.mxu0 %v14825_v36  ;;  %8872 = vmatprep.subr.bf16.mxu1 %v14827_v19  ;;  %v14883_v36 = vcombine.high %v8088_v60, %v8092_v61  ;;  %v14880_v19 = vcombine.low %v8087_v62, %v8091_v27  ;;  %v15537_v62 = vld [vmem:[%s20360_s4 + $0x16c] ss:$16 sps:$4 sm:$0xff]   ;;  %v15532_v27 = vld [vmem:[%s20360_s4 + $0x160] ss:$16 sps:$4 sm:$0xff]   ;;  %v15535_v60 = vld [vmem:[%s20360_s4 + $0x168] ss:$16 sps:$4 sm:$0xff]  }
 0x9c9   : > { %v15540_v61 = vld [vmem:[%s20360_s4 + $0x184] ss:$16 sps:$4 sm:$0xff]  }
 0x9cb   : > { %8832 = vmatpush1.bf16.msra.mxu0 %v14824_v5  ;;  %8873 = vmatpush1.bf16.msra.mxu1 %v14826_v28  ;;  %v15469_v5 = vld [vmem:[%s20360_s4 + $0x8] ss:$16 sps:$4 sm:$0xff]   ;;  %v21222_v28 = vld [vmem:[#allocation122_spill] sm:$0xff] }
 0x9cc   : > { %8833 = vmatprep.subr.bf16.mxu0 %v14833_v44  ;;  %8874 = vmatprep.subr.bf16.mxu1 %v14835_v26  ;;  %v21223_v44 = vld [vmem:[#allocation73_spill] sm:$0xff] }
 0x9cd   : > { %v8972_v26 = vpack.c.bf16 %v21223_v44, %v21222_v28  ;;  %v15553_v28 = vld [vmem:[%s20360_s4 + $0x1c8] ss:$16 sps:$4 sm:$0xff]   ;;  %v15558_v44 = vld [vmem:[%s20360_s4 + $0x1e4] ss:$16 sps:$4 sm:$0xff]  }
 0x9cf   : > { %8834 = vmatpush1.bf16.msra.mxu0 %v14832_v41  ;;  %8875 = vmatpush1.bf16.msra.mxu1 %v14834_v25  ;;  %v15480_v41 = vld [vmem:[%s20360_s4 + $0x44] ss:$16 sps:$4 sm:$0xff]   ;;  %v15478_v25 = vld [vmem:[%s20360_s4 + $0x40] ss:$16 sps:$4 sm:$0xff]  }
 0x9d0   : > { %8835 = vmatprep.subr.bf16.mxu0 %v14841_v47  ;;  %8876 = vmatprep.subr.bf16.mxu1 %v14843_v33  ;;  %v15481_v47 = vld [vmem:[%s20360_s4 + $0x48] ss:$16 sps:$4 sm:$0xff]   ;;  %v15486_v33 = vld [vmem:[%s20360_s4 + $0x64] ss:$16 sps:$4 sm:$0xff]  }
 0x9d3   : > { %8836 = vmatpush1.bf16.msra.mxu0 %v14840_v46  ;;  %8877 = vmatpush1.bf16.msra.mxu1 %v14842_v37  ;;  %v15495_v46 = vld [vmem:[%s20360_s4 + $0x8c] ss:$16 sps:$4 sm:$0xff]   ;;  %v15490_v37 = vld [vmem:[%s20360_s4 + $0x80] ss:$16 sps:$4 sm:$0xff]  }
 0x9d4   : > { %8837 = vmatprep.subr.bf16.mxu0 %v14849_v23  ;;  %8878 = vmatprep.subr.bf16.mxu1 %v14851_v15  ;;  %v15493_v23 = vld [vmem:[%s20360_s4 + $0x88] ss:$16 sps:$4 sm:$0xff]   ;;  %v15498_v15 = vld [vmem:[%s20360_s4 + $0xa4] ss:$16 sps:$4 sm:$0xff]  }
 0x9d7   : > { %8838 = vmatpush1.bf16.msra.mxu0 %v14848_v6  ;;  %8879 = vmatpush1.bf16.msra.mxu1 %v14850_v54  ;;  %v15507_v6 = vld [vmem:[%s20360_s4 + $0xcc] ss:$16 sps:$4 sm:$0xff]   ;;  %v15502_v54 = vld [vmem:[%s20360_s4 + $0xc0] ss:$16 sps:$4 sm:$0xff]  }
 0x9d8   : > { %8839 = vmatprep.subr.bf16.mxu0 %v14857_v49  ;;  %8880 = vmatprep.subr.bf16.mxu1 %v14859_v18  ;;  %v15505_v49 = vld [vmem:[%s20360_s4 + $0xc8] ss:$16 sps:$4 sm:$0xff]   ;;  %v15510_v18 = vld [vmem:[%s20360_s4 + $0xe4] ss:$16 sps:$4 sm:$0xff]  }
 0x9db   : > { %8840 = vmatpush1.bf16.msra.mxu0 %v14856_v0  ;;  %8881 = vmatpush1.bf16.msra.mxu1 %v14858_v55  ;;  %v15519_v0 = vld [vmem:[%s20360_s4 + $0x10c] ss:$16 sps:$4 sm:$0xff]   ;;  %v15514_v55 = vld [vmem:[%s20360_s4 + $0x100] ss:$16 sps:$4 sm:$0xff]  }
 0x9dc   : > { %8841 = vmatprep.subr.bf16.mxu0 %v14865_v21  ;;  %8882 = vmatprep.subr.bf16.mxu1 %v14867_v3  ;;  %v15517_v21 = vld [vmem:[%s20360_s4 + $0x108] ss:$16 sps:$4 sm:$0xff]   ;;  %v15522_v3 = vld [vmem:[%s20360_s4 + $0x124] ss:$16 sps:$4 sm:$0xff]  }
 0x9df   : > { %8842 = vmatpush1.bf16.msra.mxu0 %v14864_v59  ;;  %8883 = vmatpush1.bf16.msra.mxu1 %v14866_v39  ;;  %v15531_v59 = vld [vmem:[%s20360_s4 + $0x14c] ss:$16 sps:$4 sm:$0xff]   ;;  %v15526_v39 = vld [vmem:[%s20360_s4 + $0x140] ss:$16 sps:$4 sm:$0xff]  }
 0x9e0   : > { %8843 = vmatprep.subr.bf16.mxu0 %v14873_v12  ;;  %8884 = vmatprep.subr.bf16.mxu1 %v14875_v45  ;;  %v15529_v12 = vld [vmem:[%s20360_s4 + $0x148] ss:$16 sps:$4 sm:$0xff]   ;;  %v15534_v45 = vld [vmem:[%s20360_s4 + $0x164] ss:$16 sps:$4 sm:$0xff]  }
 0x9e3   : > { %8844 = vmatpush1.bf16.msra.mxu0 %v14872_v30  ;;  %8885 = vmatpush1.bf16.msra.mxu1 %v14874_v16  ;;  %v15543_v30 = vld [vmem:[%s20360_s4 + $0x18c] ss:$16 sps:$4 sm:$0xff]   ;;  %v15538_v16 = vld [vmem:[%s20360_s4 + $0x180] ss:$16 sps:$4 sm:$0xff]  }
 0x9e4   : > { %8845 = vmatprep.subr.bf16.mxu0 %v14881_v48  ;;  %8886 = vmatprep.subr.bf16.mxu1 %v14883_v36  ;;  %v15541_v48 = vld [vmem:[%s20360_s4 + $0x188] ss:$16 sps:$4 sm:$0xff]   ;;  %v15546_v36 = vld [vmem:[%s20360_s4 + $0x1a4] ss:$16 sps:$4 sm:$0xff]  }
 0x9e7   : > { %8846 = vmatpush1.bf16.msra.mxu0 %v14880_v19  ;;  %8887 = vmatpush1.bf16.msra.mxu1 %v14882_v24  ;;  %v15549_v19 = vld [vmem:[%s20360_s4 + $0x1ac] ss:$16 sps:$4 sm:$0xff]   ;;  %v15544_v24 = vld [vmem:[%s20360_s4 + $0x1a0] ss:$16 sps:$4 sm:$0xff]  }
 0x9e8   : > { %9385 = vmatprep.subr.bf16.mxu0 %v15468_v14  ;;  %9458 = vmatprep.subr.bf16.mxu1 %v15471_v29  ;;  %v15547_v14 = vld [vmem:[%s20360_s4 + $0x1a8] ss:$16 sps:$4 sm:$0xff]   ;;  %v15552_v29 = vld [vmem:[%s20360_s4 + $0x1c4] ss:$16 sps:$4 sm:$0xff]  }
 0x9ea   : > { %8848 = vmatmul.mubr.bf16.vlgmr.msra.gmra.mrb[84].mxu0 %v18907_v56  ;;  %8889 = vmatmul.mubr.bf16.vlgmr.msra.gmra.mrb[100].mxu1 %v18907_v56  ;;  %v15483_v56 = vld [vmem:[%s20360_s4 + $0x4c] ss:$16 sps:$4 sm:$0xff]  }
 0x9eb   : > { %9386 = vmatpush1.bf16.msra.mxu0 %v15466_v63  ;;  %9417 = vmatprep.mubr.bf16.mxu0 %v8972_v26  ;;  %v15555_v63 = vld [vmem:[%s20360_s4 + $0x1cc] ss:$16 sps:$4 sm:$0xff]  }
 0x9ec   : > { %9459 = vmatpush1.bf16.msra.mxu1 %v15469_v5  ;;  %9490 = vmatprep.mubr.bf16.mxu1 %v8972_v26  ;;  %v15550_v5 = vld [vmem:[%s20360_s4 + $0x1c0] ss:$16 sps:$4 sm:$0xff]   ;;  %v15561_v26 = vld [vmem:[%s20360_s4 + $0x1ec] ss:$16 sps:$4 sm:$0xff]  }
 0x9ed   : > { %9387 = vmatprep.subr.bf16.mxu0 %v15474_v42  ;;  %9460 = vmatprep.subr.bf16.mxu1 %v15477_v8  ;;  %v15556_v42 = vld [vmem:[%s20360_s4 + $0x1e0] ss:$16 sps:$4 sm:$0xff]   ;;  %v15559_v8 = vld [vmem:[%s20360_s4 + $0x1e8] ss:$16 sps:$4 sm:$0xff]  }
 0x9ef   : > { %9388 = vmatpush1.bf16.msra.mxu0 %v15472_v2  ;;  %v21224_v2 = vld [vmem:[#allocation121_spill] sm:$0xff] }
 0x9f0   : > { %9461 = vmatpush1.bf16.msra.mxu1 %v15475_v43  ;;  %9389 = vmatprep.subr.bf16.mxu0 %v15480_v41  ;;  %v21225_v43 = vld [vmem:[#allocation70_spill] sm:$0xff] }
 0x9f1   : > { %9462 = vmatprep.subr.bf16.mxu1 %v15483_v56  ;;  %v8971_v41 = vpack.c.bf16 %v21225_v43, %v21224_v2  ;;  %v21226_v56 = vld [vmem:[#allocation118_spill] sm:$0xff] }
 0x9f3   : > { %9390 = vmatpush1.bf16.msra.mxu0 %v15478_v25  ;;  %v21227_v25 = vld [vmem:[#allocation162_spill] sm:$0xff] }
 0x9f4   : > { %9463 = vmatpush1.bf16.msra.mxu1 %v15481_v47  ;;  %9391 = vmatprep.subr.bf16.mxu0 %v15486_v33  ;;  %v8974_v47 = vpack.c.bf16 %v21227_v25, %v21226_v56  ;;  %v21228_v33 = vld [vmem:[#allocation116_spill] sm:$0xff] }
 0x9f5   : > { %9464 = vmatprep.subr.bf16.mxu1 %v15489_v51  ;;  %v21229_v51 = vld [vmem:[#allocation161_spill] sm:$0xff] }
 0x9f7   : > { %9392 = vmatpush1.bf16.msra.mxu0 %v15484_v57  ;;  %v8973_v57 = vpack.c.bf16 %v21229_v51, %v21228_v33 }
 0x9f8   : > { %9465 = vmatpush1.bf16.msra.mxu1 %v15487_v31  ;;  %9393 = vmatprep.subr.bf16.mxu0 %v15492_v38  ;;  %v21230_v31 = vld [vmem:[#allocation103_spill] sm:$0xff] }
 0x9f9   : > { %9466 = vmatprep.subr.bf16.mxu1 %v15495_v46  ;;  %v8976_v38 = vpack.c.bf16 %v18793_v53, %v21230_v31  ;;  %v21231_v46 = vld [vmem:[#allocation99_spill] sm:$0xff]  ;;  %v19135_v53 = vld [vmem:[#allocation10 + $0x24] ss:$16 sps:$4 sm:$0xff]  }
 0x9fb   : > { %9394 = vmatpush1.bf16.msra.mxu0 %v15490_v37  ;;  %v8975_v37 = vpack.c.bf16 %v18791_v17, %v21231_v46  ;;  %v19137_v17 = vld [vmem:[#allocation10 + $0x2c] ss:$16 sps:$4 sm:$0xff]  }
 0x9fc   : > { %9467 = vmatpush1.bf16.msra.mxu1 %v15493_v23  ;;  %9395 = vmatprep.subr.bf16.mxu0 %v15498_v15  ;;  %v19123_v23 = vld [vmem:[#allocation10 + $0x4] ss:$16 sps:$4 sm:$0xff]   ;;  %v19125_v15 = vld [vmem:[#allocation10 + $0xc] ss:$16 sps:$4 sm:$0xff]  }
 0x9fd   : > { %9468 = vmatprep.subr.bf16.mxu1 %v15501_v22  ;;  %v19127_v22 = vld [vmem:[#allocation10] ss:$16 sps:$4 sm:$0xff]  }
 0x9ff   : > { %9396 = vmatpush1.bf16.msra.mxu0 %v15496_v9  ;;  %v19129_v9 = vld [vmem:[#allocation10 + $0x8] ss:$16 sps:$4 sm:$0xff]  }
 0xa00   : > { %9469 = vmatpush1.bf16.msra.mxu1 %v15499_v34  ;;  %9397 = vmatprep.subr.bf16.mxu0 %v15504_v40  ;;  %v19139_v34 = vld [vmem:[#allocation10 + $0x20] ss:$16 sps:$4 sm:$0xff]   ;;  %v19141_v40 = vld [vmem:[#allocation10 + $0x28] ss:$16 sps:$4 sm:$0xff]  }
 0xa01   : > { %9470 = vmatprep.subr.bf16.mxu1 %v15507_v6  ;;  %v19147_v6 = vld [vmem:[#allocation10 + $0x44] ss:$16 sps:$4 sm:$0xff]  }
 0xa03   : > { %9398 = vmatpush1.bf16.msra.mxu0 %v15502_v54  ;;  %v19149_v54 = vld [vmem:[#allocation10 + $0x4c] ss:$16 sps:$4 sm:$0xff]  }
 0xa04   : > { %9471 = vmatpush1.bf16.msra.mxu1 %v15505_v49  ;;  %9399 = vmatprep.subr.bf16.mxu0 %v15510_v18  ;;  %v19151_v49 = vld [vmem:[#allocation10 + $0x40] ss:$16 sps:$4 sm:$0xff]   ;;  %v19153_v18 = vld [vmem:[#allocation10 + $0x48] ss:$16 sps:$4 sm:$0xff]  }
 0xa05   : > { %9472 = vmatprep.subr.bf16.mxu1 %v15513_v20  ;;  %v19157_v20 = vld [vmem:[#allocation10 + $0x64] ss:$16 sps:$4 sm:$0xff]  }
 0xa07   : > { %9400 = vmatpush1.bf16.msra.mxu0 %v15508_v4  ;;  %v19161_v4 = vld [vmem:[#allocation10 + $0x60] ss:$16 sps:$4 sm:$0xff]  }
 0xa08   : > { %9473 = vmatpush1.bf16.msra.mxu1 %v15511_v10  ;;  %9401 = vmatprep.subr.bf16.mxu0 %v15516_v50  ;;  %v19163_v10 = vld [vmem:[#allocation10 + $0x68] ss:$16 sps:$4 sm:$0xff]   ;;  %v19165_v50 = vld [vmem:[#allocation10 + $0x6c] ss:$16 sps:$4 sm:$0xff]  }
 0xa09   : > { %9474 = vmatprep.subr.bf16.mxu1 %v15519_v0  ;;  %v19168_v0 = vld [vmem:[#allocation10 + $0x84] ss:$16 sps:$4 sm:$0xff]  }
 0xa0b   : > { %9402 = vmatpush1.bf16.msra.mxu0 %v15514_v55  ;;  %v19170_v55 = vld [vmem:[#allocation10 + $0x8c] ss:$16 sps:$4 sm:$0xff]  }
 0xa0c   : > { %9475 = vmatpush1.bf16.msra.mxu1 %v15517_v21  ;;  %9403 = vmatprep.subr.bf16.mxu0 %v15522_v3  ;;  %v19175_v21 = vld [vmem:[#allocation10 + $0x80] ss:$16 sps:$4 sm:$0xff]   ;;  %v19177_v3 = vld [vmem:[#allocation10 + $0x88] ss:$16 sps:$4 sm:$0xff]  }
 0xa0d   : > { %9476 = vmatprep.subr.bf16.mxu1 %v15525_v7  ;;  %v19181_v7 = vld [vmem:[#allocation10 + $0xa4] ss:$16 sps:$4 sm:$0xff]  }
 0xa0f   : > { %9404 = vmatpush1.bf16.msra.mxu0 %v15520_v52  ;;  %v19183_v52 = vld [vmem:[#allocation10 + $0xac] ss:$16 sps:$4 sm:$0xff]  }
 0xa10   : > { %9477 = vmatpush1.bf16.msra.mxu1 %v15523_v13  ;;  %9405 = vmatprep.subr.bf16.mxu0 %v15528_v11  ;;  %v19187_v13 = vld [vmem:[#allocation10 + $0xa0] ss:$16 sps:$4 sm:$0xff]   ;;  %v19189_v11 = vld [vmem:[#allocation10 + $0xa8] ss:$16 sps:$4 sm:$0xff]  }
 0xa11   : > { %9478 = vmatprep.subr.bf16.mxu1 %v15531_v59  ;;  %v19195_v59 = vld [vmem:[#allocation10 + $0xc4] ss:$16 sps:$4 sm:$0xff]  }
 0xa13   : > { %9406 = vmatpush1.bf16.msra.mxu0 %v15526_v39  ;;  %v19197_v39 = vld [vmem:[#allocation10 + $0xcc] ss:$16 sps:$4 sm:$0xff]  }
 0xa14   : > { %9479 = vmatpush1.bf16.msra.mxu1 %v15529_v12  ;;  %9407 = vmatprep.subr.bf16.mxu0 %v15534_v45  ;;  %v19199_v12 = vld [vmem:[#allocation10 + $0xc0] ss:$16 sps:$4 sm:$0xff]   ;;  %v19201_v45 = vld [vmem:[#allocation10 + $0xc8] ss:$16 sps:$4 sm:$0xff]  }
 0xa15   : > { %9480 = vmatprep.subr.bf16.mxu1 %v15537_v62  ;;  %v19205_v62 = vld [vmem:[#allocation10 + $0xe4] ss:$16 sps:$4 sm:$0xff]  }
 0xa17   : > { %9408 = vmatpush1.bf16.msra.mxu0 %v15532_v27  ;;  %v19209_v27 = vld [vmem:[#allocation10 + $0xe0] ss:$16 sps:$4 sm:$0xff]  }
 0xa18   : > { %9481 = vmatpush1.bf16.msra.mxu1 %v15535_v60  ;;  %9409 = vmatprep.subr.bf16.mxu0 %v15540_v61  ;;  %v19211_v60 = vld [vmem:[#allocation10 + $0xe8] ss:$16 sps:$4 sm:$0xff]   ;;  %v19213_v61 = vld [vmem:[#allocation10 + $0xec] ss:$16 sps:$4 sm:$0xff]  }
 0xa19   : > { %9482 = vmatprep.subr.bf16.mxu1 %v15543_v30 }
 0xa1b   : > { %9410 = vmatpush1.bf16.msra.mxu0 %v15538_v16 }
 0xa1c   : > { %9483 = vmatpush1.bf16.msra.mxu1 %v15541_v48  ;;  %9411 = vmatprep.subr.bf16.mxu0 %v15546_v36  ;;  %v21232_v48 = vld [vmem:[#allocation40_spill] sm:$0xff] }
 0xa1d   : > { %9484 = vmatprep.subr.bf16.mxu1 %v15549_v19  ;;  %v21233_v19 = vld [vmem:[#allocation71_spill] sm:$0xff] }
 0xa1f   : > { %9412 = vmatpush1.bf16.msra.mxu0 %v15544_v24 }
 0xa20   : > { %9485 = vmatpush1.bf16.msra.mxu1 %v15547_v14  ;;  %9413 = vmatprep.subr.bf16.mxu0 %v15552_v29 }
 0xa21   : > { %9486 = vmatprep.subr.bf16.mxu1 %v15555_v63  ;;  %v21234_v63 = vld [vmem:[#allocation42_spill] sm:$0xff] }
 0xa23   : > { %9414 = vmatpush1.bf16.msra.mxu0 %v15550_v5 }
 0xa24   : > { %9487 = vmatpush1.bf16.msra.mxu1 %v15553_v28  ;;  %9415 = vmatprep.subr.bf16.mxu0 %v15558_v44  ;;  %v21235_v28 = vld [vmem:[#allocation74_spill] sm:$0xff] }
 0xa25   : > { %9488 = vmatprep.subr.bf16.mxu1 %v15561_v26 }
 0xa27   : > { %9416 = vmatpush1.bf16.msra.mxu0 %v15556_v42 }
 0xa28   : > { %9489 = vmatpush1.bf16.msra.mxu1 %v15559_v8  ;;  %9759 = vmatprep.subr.bf16.mxu0 %v19123_v23 }
 0xa29   : > { %9800 = vmatprep.subr.bf16.mxu1 %v19125_v15 }
 0xa2a   : > { %9418 = vmatmul.mubr.bf16.vlgmr.msra.gmra.mrb[88].mxu0 %v8971_v41 }
 0xa2b   : > { %9491 = vmatmul.mubr.bf16.vlgmr.msra.gmra.mrb[104].mxu1 %v8971_v41  ;;  %9427 = vmatprep.mubr.bf16.mxu0 %v8974_v47 }
 0xa2c   : > { %9500 = vmatprep.mubr.bf16.mxu1 %v8974_v47  ;;  %9760 = vmatpush1.bf16.msra.mxu0 %v19127_v22 }
 0xa2d   : > { %9801 = vmatpush1.bf16.msra.mxu1 %v19129_v9  ;;  %9761 = vmatprep.subr.bf16.mxu0 %v19135_v53 }
 0xa2e   : > { %9802 = vmatprep.subr.bf16.mxu1 %v19137_v17 }
 0xa30   : > { %9762 = vmatpush1.bf16.msra.mxu0 %v19139_v34 }
 0xa31   : > { %9803 = vmatpush1.bf16.msra.mxu1 %v19141_v40  ;;  %9763 = vmatprep.subr.bf16.mxu0 %v19147_v6 }
 0xa32   : > { %9428 = vmatmul.mubr.bf16.gmra.mrb[92].mxu0 %v8973_v57  ;;  %9804 = vmatprep.subr.bf16.mxu1 %v19149_v54 }
 0xa33   : > { %9501 = vmatmul.mubr.bf16.gmra.mrb[108].mxu1 %v8973_v57  ;;  %9437 = vmatprep.mubr.bf16.mxu0 %v8976_v38 }
 0xa34   : > { %9510 = vmatprep.mubr.bf16.mxu1 %v8976_v38  ;;  %9764 = vmatpush1.bf16.msra.mxu0 %v19151_v49 }
 0xa35   : > { %9805 = vmatpush1.bf16.msra.mxu1 %v19153_v18  ;;  %9765 = vmatprep.subr.bf16.mxu0 %v19157_v20 }
 0xa36   : > { %9806 = vmatprep.subr.bf16.mxu1 %v19165_v50 }
 0xa38   : > { %9766 = vmatpush1.bf16.msra.mxu0 %v19161_v4 }
 0xa39   : > { %9807 = vmatpush1.bf16.msra.mxu1 %v19163_v10  ;;  %9767 = vmatprep.subr.bf16.mxu0 %v19168_v0 }
 0xa3a   : > { %9438 = vmatmul.mubr.bf16.gmra.mrb[96].mxu0 %v8975_v37  ;;  %9808 = vmatprep.subr.bf16.mxu1 %v19170_v55 }
 0xa3b   : > { %9511 = vmatmul.mubr.bf16.gmra.mrb[112].mxu1 %v8975_v37 }
 0xa3c   : > { %9768 = vmatpush1.bf16.msra.mxu0 %v19175_v21 }
 0xa3d   : > { %9809 = vmatpush1.bf16.msra.mxu1 %v19177_v3  ;;  %9769 = vmatprep.subr.bf16.mxu0 %v19181_v7 }
 0xa3e   : > { %9810 = vmatprep.subr.bf16.mxu1 %v19183_v52 }
 0xa40   : > { %9770 = vmatpush1.bf16.msra.mxu0 %v19187_v13 }
 0xa41   : > { %9811 = vmatpush1.bf16.msra.mxu1 %v19189_v11  ;;  %9771 = vmatprep.subr.bf16.mxu0 %v19195_v59 }
 0xa42   : > { %9812 = vmatprep.subr.bf16.mxu1 %v19197_v39 }
 0xa44   : > { %9772 = vmatpush1.bf16.msra.mxu0 %v19199_v12 }
 0xa45   : > { %9813 = vmatpush1.bf16.msra.mxu1 %v19201_v45  ;;  %9773 = vmatprep.subr.bf16.mxu0 %v19205_v62 }
 0xa46   : > { %9814 = vmatprep.subr.bf16.mxu1 %v19213_v61 }
 0xa48   : > { %9774 = vmatpush1.bf16.msra.mxu0 %v19209_v27 }
 0xa49   : > { %9815 = vmatpush1.bf16.msra.mxu1 %v19211_v60  ;;  %10067 = vmatprep.subr.bf16.mxu0 %v19123_v23 }
 0xa4a   : > { %10108 = vmatprep.subr.bf16.mxu1 %v19125_v15 }
 0xa7d   : > { %v8767_v30 = vpop.f32.mrb[80].mxu0  ;;  %v8808_v16 = vpop.f32.mrb[96].mxu1 }
 0xa7e   : > { %v8897_v36 = vadd.f32 %v8767_v30, %v21232_v48  ;;  %v8899_v24 = vadd.f32 %v8808_v16, %v21233_v19  ;;  %v8769_v14 = vpop.f32.mrb[81].mxu0  ;;  %v8810_v29 = vpop.f32.mrb[97].mxu1  ;;  %v21236_v48 = vld [vmem:[#allocation72_spill] sm:$0xff]  ;;  %v21237_v19 = vld [vmem:[#allocation115_spill] sm:$0xff] }
 0xa7f   : > { %v8898_v5 = vadd.f32 %v8769_v14, %v21234_v63  ;;  %v8900_v44 = vadd.f32 %v8810_v29, %v21235_v28  ;;  %v8771_v26 = vpop.f32.mrb[82].mxu0  ;;  %v8812_v42 = vpop.f32.mrb[98].mxu1  ;;  %v21238_v63 = vld [vmem:[#allocation75_spill] sm:$0xff]  ;;  %v21239_v28 = vld [vmem:[#allocation117_spill] sm:$0xff] }
 0xa80   : > { %v8772_v8 = vpop.f32.mrb[83].mxu0  ;;  %v8813_v2 = vpop.f32.mrb[99].mxu1  ;;  %v14884_v43 = vmul.f32 -1.442695, %v8897_v36  ;;  %v14886_v41 = vmul.f32 -1.442695, %v8899_v24 }
 0xa81   : > { %v14885_v56 = vmul.f32 -1.442695, %v8898_v5  ;;  %v14887_v25 = vmul.f32 -1.442695, %v8900_v44 }
 0xa82   : > { %15986 = vpow2.f32 %v14884_v43 }
 0xa83   : > { %15988 = vpow2.f32 %v14886_v41 }
 0xa84   : > { %15990 = vpow2.f32 %v14885_v56 }
 0xa85   : > { %15992 = vpow2.f32 %v14887_v25 }
 0xa8c   : > { %v15987_v47 = vpop.eup %15986 }
 0xa8d   : > { %v15989_v33 = vpop.eup %15988  ;;  %v8923_v31 = vadd.f32 1.0, %v15987_v47 }
 0xa8e   : > { %v15991_v51 = vpop.eup %15990  ;;  %v8925_v38 = vadd.f32 1.0, %v15989_v33 }
 0xa8f   : > { %v15993_v57 = vpop.eup %15992  ;;  %v8924_v46 = vadd.f32 1.0, %v15991_v51  ;;  %15994 = vrcp.f32 %v8923_v31 }
 0xa90   : > { %v8926_v37 = vadd.f32 1.0, %v15993_v57  ;;  %15996 = vrcp.f32 %v8925_v38 }
 0xa91   : > { %15998 = vrcp.f32 %v8924_v46 }
 0xa92   : > { %16000 = vrcp.f32 %v8926_v37 }
 0xa99   : > { %v15995_v56 = vpop.eup %15994 }
 0xa9a   : > { %v15997_v25 = vpop.eup %15996 }
 0xa9b   : > { %v15999_v47 = vpop.eup %15998  ;;  %v8943_v31 = vmul.f32 %v15997_v25, %v18893_v58 }
 0xa9c   : > { %v16001_v33 = vpop.eup %16000 }
 0xa9d   : > { %v8944_v37 = vmul.f32 %v16001_v33, %v18895_v32 }
 0xabd   : > { %v8849_v30 = vpop.f32.mrb[84].mxu0  ;;  %v8890_v16 = vpop.f32.mrb[100].mxu1 }
 0xabe   : > { %v8901_v36 = vadd.f32 %v8849_v30, %v21236_v48  ;;  %v8903_v24 = vadd.f32 %v8890_v16, %v21237_v19  ;;  %v8851_v14 = vpop.f32.mrb[85].mxu0  ;;  %v8892_v29 = vpop.f32.mrb[101].mxu1 }
 0xabf   : > { %v8902_v5 = vadd.f32 %v8851_v14, %v21238_v63  ;;  %v8904_v44 = vadd.f32 %v8892_v29, %v21239_v28  ;;  %v8853_v26 = vpop.f32.mrb[86].mxu0  ;;  %v8894_v42 = vpop.f32.mrb[102].mxu1 }
 0xac0   : > { %v14888_v8 = vmul.f32 -1.442695, %v8901_v36  ;;  %16002 = vtanh.f32 %v8903_v24  ;;  %v8854_v2 = vpop.f32.mrb[87].mxu0  ;;  %v8895_v43 = vpop.f32.mrb[103].mxu1  ;;  %v21240_v26 = vmov 0  }
 0xac1   : > { %v14889_v41 = vmul.f32 -1.442695, %v8902_v5  ;;  %16004 = vtanh.f32 %v8904_v44 }
 0xac2   : > { %16006 = vpow2.f32 %v14888_v8 }
 0xac3   : > { %16008 = vpow2.f32 %v14889_v41 }
 0xaca   : > { %v16003_v51 = vpop.eup %16002 }
 0xacb   : > { %v16005_v57 = vpop.eup %16004  ;;  %v8945_v38 = vmul.f32 %v16003_v51, %v15995_v56 }
 0xacc   : > { %v16007_v46 = vpop.eup %16006  ;;  %v8946_v30 = vmul.f32 %v16005_v57, %v15999_v47 }
 0xacd   : > { %v16009_v16 = vpop.eup %16008  ;;  %v8927_v48 = vadd.f32 1.0, %v16007_v46  ;;  %v8947_v36 = vadd.f32 %v8945_v38, %v8943_v31 }
 0xace   : > { %v8928_v19 = vadd.f32 1.0, %v16009_v16  ;;  %v8948_v24 = vadd.f32 %v8946_v30, %v8944_v37 }
 0xacf   : > { %16010 = vrcp.f32 %v8927_v48 }
 0xad0   : > { %16012 = vtanh.f32 %v8947_v36 }
 0xad1   : > { %16014 = vrcp.f32 %v8928_v19 }
 0xad2   : > { %16016 = vtanh.f32 %v8948_v24 }
 0xad9   : > { %v16011_v14 = vpop.eup %16010 }
 0xada   : > { %v16013_v29 = vpop.eup %16012 }
 0xadb   : > { %v16015_v63 = vpop.eup %16014  ;;  %v8951_v5 = vmul.f32 %v16013_v29, %v16011_v14  ;;  %v9043_v29 = vld [vmem:[%s20361_s5] sm:$0xf] }
 0xadc   : > { %v16017_v28 = vpop.eup %16016 }
 0xadd   : > { %v8952_v58 = vmul.f32 %v16017_v28, %v16015_v63  ;;  %v8977_v32 = vpack.c.bf16 %v8951_v5, %v18899_v35 }
 0xadf   : > { %v8978_v44 = vpack.c.bf16 %v8952_v58, %v18901_v1 }
 0xae1   : > { %9447 = vmatprep.mubr.bf16.mxu0 %v8978_v44  ;;  %9520 = vmatprep.mubr.bf16.mxu1 %v8978_v44 }
 0xae2   : > { %9448 = vmatmul.mubr.bf16.gmra.mrb[100].mxu0 %v8977_v32  ;;  %9521 = vmatmul.mubr.bf16.gmra.mrb[116].mxu1 %v8977_v32 }
 0xae3   : > { %9791 = vmatprep.mubr.bf16.mxu0 %v21240_v26  ;;  %9832 = vmatprep.mubr.bf16.mxu1 %v21240_v26 }
 0xaea   : > { %9792 = vmatmul.mubr.bf16.vlgmr.msra.gmra.mrb[104].mxu0 %v21240_v26  ;;  %9833 = vmatmul.mubr.bf16.vlgmr.msra.gmra.mrb[120].mxu1 %v21240_v26 }
 0xaeb   : > { %10068 = vmatpush1.bf16.msra.mxu0 %v19127_v22  ;;  %10109 = vmatpush1.bf16.msra.mxu1 %v19129_v9 }
 0xaec   : > { %10069 = vmatprep.subr.bf16.mxu0 %v19135_v53  ;;  %10110 = vmatprep.subr.bf16.mxu1 %v19137_v17 }
 0xaed   : > { %10099 = vmatprep.mubr.bf16.mxu0 %v21240_v26  ;;  %10140 = vmatprep.mubr.bf16.mxu1 %v21240_v26 }
 0xaef   : > { %10070 = vmatpush1.bf16.msra.mxu0 %v19139_v34  ;;  %10111 = vmatpush1.bf16.msra.mxu1 %v19141_v40 }
 0xaf0   : > { %10071 = vmatprep.subr.bf16.mxu0 %v19147_v6  ;;  %10112 = vmatprep.subr.bf16.mxu1 %v19149_v54 }
 0xaf3   : > { %10072 = vmatpush1.bf16.msra.mxu0 %v19151_v49  ;;  %10113 = vmatpush1.bf16.msra.mxu1 %v19153_v18 }
 0xaf4   : > { %10073 = vmatprep.subr.bf16.mxu0 %v19157_v20  ;;  %10114 = vmatprep.subr.bf16.mxu1 %v19165_v50 }
 0xaf7   : > { %10074 = vmatpush1.bf16.msra.mxu0 %v19161_v4  ;;  %10115 = vmatpush1.bf16.msra.mxu1 %v19163_v10 }
 0xaf8   : > { %10075 = vmatprep.subr.bf16.mxu0 %v19168_v0  ;;  %10116 = vmatprep.subr.bf16.mxu1 %v19170_v55 }
 0xafb   : > { %10076 = vmatpush1.bf16.msra.mxu0 %v19175_v21  ;;  %10117 = vmatpush1.bf16.msra.mxu1 %v19177_v3 }
 0xafc   : > { %10077 = vmatprep.subr.bf16.mxu0 %v19181_v7  ;;  %10118 = vmatprep.subr.bf16.mxu1 %v19183_v52 }
 0xafd   : > { %v9419_v35 = vpop.f32.mrb[88].mxu0 }
 0xafe   : > { %v9492_v1 = vpop.f32.mrb[104].mxu1  ;;  %v9421_v42 = vpop.f32.mrb[89].mxu0 }
 0xaff   : > { %v9494_v8 = vpop.f32.mrb[105].mxu1  ;;  %v19259_v2 = vpop.f32.mrb[90].mxu0  ;;  %10078 = vmatpush1.bf16.msra.mxu0 %v19187_v13  ;;  %10119 = vmatpush1.bf16.msra.mxu1 %v19189_v11 }
 0xb00   : > { %v19263_v43 = vpop.f32.mrb[106].mxu1  ;;  %v19265_v41 = vpop.f32.mrb[91].mxu0  ;;  %10079 = vmatprep.subr.bf16.mxu0 %v19195_v59  ;;  %10120 = vmatprep.subr.bf16.mxu1 %v19197_v39 }
 0xb01   : > { %v19269_v56 = vpop.f32.mrb[107].mxu1 }
 0xb03   : > { %10080 = vmatpush1.bf16.msra.mxu0 %v19199_v12  ;;  %10121 = vmatpush1.bf16.msra.mxu1 %v19201_v45 }
 0xb04   : > { %10081 = vmatprep.subr.bf16.mxu0 %v19205_v62  ;;  %10122 = vmatprep.subr.bf16.mxu1 %v19213_v61 }
 0xb05   : > { %v19275_v25 = vpop.f32.mrb[92].mxu0 }
 0xb06   : > { %v19277_v47 = vpop.f32.mrb[108].mxu1  ;;  %v19279_v33 = vpop.f32.mrb[93].mxu0 }
 0xb07   : > { %21241 = vst [vmem:[#allocation145_spill] sm:$0xff] %v19277_v47  ;;  %21242 = vst [vmem:[#allocation146_spill] sm:$0xff] %v19279_v33  ;;  %v19281_v51 = vpop.f32.mrb[109].mxu1  ;;  %v19283_v57 = vpop.f32.mrb[94].mxu0  ;;  %10082 = vmatpush1.bf16.msra.mxu0 %v19209_v27  ;;  %10123 = vmatpush1.bf16.msra.mxu1 %v19211_v60 }
 0xb08   : > { %21243 = vst [vmem:[#allocation147_spill] sm:$0xff] %v19281_v51  ;;  %21244 = vst [vmem:[#allocation148_spill] sm:$0xff] %v19283_v57  ;;  %v19287_v31 = vpop.f32.mrb[110].mxu1  ;;  %v19289_v38 = vpop.f32.mrb[95].mxu0  ;;  %10375 = vmatprep.subr.bf16.mxu0 %v19123_v23  ;;  %10416 = vmatprep.subr.bf16.mxu1 %v19125_v15 }
 0xb09   : > { %21245 = vst [vmem:[#allocation149_spill] sm:$0xff] %v19287_v31  ;;  %21246 = vst [vmem:[#allocation150_spill] sm:$0xff] %v19289_v38  ;;  %v19293_v46 = vpop.f32.mrb[111].mxu1 }
 0xb0a   : > { %21247 = vst [vmem:[#allocation151_spill] sm:$0xff] %v19293_v46 }
 0xb0d   : > { %v19295_v37 = vpop.f32.mrb[96].mxu0 }
 0xb0e   : > { %21248 = vst [vmem:[#allocation152_spill] sm:$0xff] %v19295_v37  ;;  %v19297_v30 = vpop.f32.mrb[112].mxu1  ;;  %v19299_v16 = vpop.f32.mrb[97].mxu0 }
 0xb0f   : > { %21249 = vst [vmem:[#allocation153_spill] sm:$0xff] %v19297_v30  ;;  %21250 = vst [vmem:[#allocation154_spill] sm:$0xff] %v19299_v16  ;;  %v19301_v48 = vpop.f32.mrb[113].mxu1  ;;  %v19303_v36 = vpop.f32.mrb[98].mxu0 }
 0xb10   : > { %21251 = vst [vmem:[#allocation155_spill] sm:$0xff] %v19301_v48  ;;  %21252 = vst [vmem:[#allocation156_spill] sm:$0xff] %v19303_v36  ;;  %v19305_v19 = vpop.f32.mrb[114].mxu1  ;;  %v19307_v24 = vpop.f32.mrb[99].mxu0 }
 0xb11   : > { %21253 = vst [vmem:[#allocation157_spill] sm:$0xff] %v19305_v19  ;;  %21254 = vst [vmem:[#allocation158_spill] sm:$0xff] %v19307_v24  ;;  %v19309_v14 = vpop.f32.mrb[115].mxu1  ;;  %v21262_v19 = vld [vmem:[#allocation28_spill] sm:$0xff] }
 0xb12   : > { %21255 = vst [vmem:[#allocation159_spill] sm:$0xff] %v19309_v14  ;;  %v19327_v24 = vrot.slane %v9043_v29, %v21262_v19  ;;  %v21263_v14 = vld [vmem:[#allocation44_spill] sm:$0xff] }
 0xb13   : > { %v19330_v36 = vrot.slane %v9043_v29, %v21263_v14 }
 0xbb5   : > { %v19314_v63 = vpop.f32.mrb[100].mxu0  ;;  %v19316_v5 = vpop.f32.mrb[116].mxu1 }
 0xbb6   : > { %21256 = vst [vmem:[#allocation160_spill] sm:$0xff] %v19314_v63  ;;  %21257 = vst [vmem:[#allocation30_spill] sm:$0xff] %v19316_v5  ;;  %v19318_v28 = vpop.f32.mrb[101].mxu0  ;;  %v19320_v58 = vpop.f32.mrb[117].mxu1  ;;  %v21266_v63 = vld [vmem:[#allocation29_spill] sm:$0xff] }
 0xbb7   : > { %21258 = vst [vmem:[#allocation58_spill] sm:$0xff] %v19318_v28  ;;  %21259 = vst [vmem:[#allocation31_spill] sm:$0xff] %v19320_v58  ;;  %v19322_v44 = vpop.f32.mrb[102].mxu0  ;;  %v19324_v32 = vpop.f32.mrb[118].mxu1  ;;  %v19337_v5 = vrot.slane %v9043_v29, %v21266_v63  ;;  %v21267_v28 = vld [vmem:[#allocation45_spill] sm:$0xff] }
 0xbb8   : > { %21260 = vst [vmem:[#allocation60_spill] sm:$0xff] %v19322_v44  ;;  %21261 = vst [vmem:[#allocation59_spill] sm:$0xff] %v19324_v32  ;;  %v19332_v48 = vpop.f32.mrb[103].mxu0  ;;  %v19334_v16 = vpop.f32.mrb[119].mxu1  ;;  %v19340_v30 = vrot.slane %v9043_v29, %v21267_v28  ;;  %v9420_v44 = vadd.f32 %v9419_v35, %v19327_v24  ;;  %v9493_v32 = vadd.f32 %v9492_v1, %v19330_v36 }
 0xbb9   : > { %21264 = vst [vmem:[#allocation100_spill] sm:$0xff] %v19332_v48  ;;  %21265 = vst [vmem:[#allocation61_spill] sm:$0xff] %v19334_v16  ;;  %v9422_v19 = vadd.f32 %v9421_v42, %v19337_v5 }
 0xbba   : > { %v9495_v58 = vadd.f32 %v9494_v8, %v19340_v30 }
 0xbbd   : > { %v9793_v14 = vpop.f32.mrb[104].mxu0  ;;  %v9834_v37 = vpop.f32.mrb[120].mxu1 }
 0xbbe   : > { %v9841_v46 = vadd.f32 %v9793_v14, %v9420_v44  ;;  %v9843_v48 = vadd.f32 %v9834_v37, %v9493_v32  ;;  %v9795_v38 = vpop.f32.mrb[105].mxu0  ;;  %v9836_v16 = vpop.f32.mrb[121].mxu1  ;;  %v9426_v44 = vadd.f32 %v19265_v41, %v19337_v5  ;;  %v9499_v32 = vadd.f32 %v19269_v56, %v19340_v30 }
 0xbbf   : > { %v9842_v31 = vadd.f32 %v9795_v38, %v9422_v19  ;;  %v9844_v63 = vadd.f32 %v9836_v16, %v9495_v58  ;;  %v9797_v57 = vpop.f32.mrb[106].mxu0  ;;  %v9838_v51 = vpop.f32.mrb[122].mxu1  ;;  %v9497_v58 = vadd.f32 %v19263_v43, %v19330_v36 }
 0xbc0   : > { %v14986_v29 = vmul.f32 -1.442695, %v9841_v46  ;;  %v9798_v28 = vpop.f32.mrb[107].mxu0  ;;  %v9839_v33 = vpop.f32.mrb[123].mxu1  ;;  %v14988_v1 = vmul.f32 -1.442695, %v9843_v48 }
 0xbc1   : > { %v14987_v35 = vmul.f32 -1.442695, %v9842_v31  ;;  %v9424_v28 = vadd.f32 %v19259_v2, %v19327_v24 }
 0xbc2   : > { %16018 = vpow2.f32 %v14986_v29 }
 0xbc3   : > { %16020 = vpow2.f32 %v14987_v35 }
 0xbc4   : > { %16022 = vtanh.f32 %v9844_v63 }
 0xbc5   : > { %16024 = vpow2.f32 %v14988_v1 }
 0xbcc   : > { %v16019_v42 = vpop.eup %16018 }
 0xbcd   : > { %v9854_v47 = vadd.f32 1.0, %v16019_v42  ;;  %v16021_v8 = vpop.eup %16020 }
 0xbce   : > { %v9855_v37 = vadd.f32 1.0, %v16021_v8  ;;  %v16023_v14 = vpop.eup %16022 }
 0xbcf   : > { %16026 = vrcp.f32 %v9854_v47  ;;  %v16025_v38 = vpop.eup %16024 }
 0xbd0   : > { %16028 = vrcp.f32 %v9855_v37  ;;  %v9856_v46 = vadd.f32 1.0, %v16025_v38 }
 0xbd2   : > { %16030 = vrcp.f32 %v9856_v46 }
 0xbd9   : > { %v16027_v16 = vpop.eup %16026 }
 0xbda   : > { %v9865_v57 = vmul.f32 %v16027_v16, %v16023_v14  ;;  %v16029_v51 = vpop.eup %16028 }
 0xbdb   : > { %v9864_v19 = vmul.f32 0.0, %v16029_v51 }
 0xbdc   : > { %v16031_v31 = vpop.eup %16030 }
 0xbdd   : > { %v19346_v33 = vadd.f32 %v9865_v57, %v9864_v19 }
 0xbdf   : > { %16032 = vtanh.f32 %v19346_v33 }
 0xbe9   : > { %v16033_v48 = vpop.eup %16032 }
 0xbea   : > { %v19349_v63 = vmul.f32 %v16033_v48, %v16031_v31 }
 0xbec   : > { %v9870_v47 = vpack.c.bf16 %v19349_v63, %v19349_v63 }
 0xbee   : > { %10100 = vmatmul.mubr.bf16.vlgmr.msra.gmra.mrb[108].mxu0 %v9870_v47  ;;  %10141 = vmatmul.mubr.bf16.vlgmr.msra.gmra.mrb[124].mxu1 %v9870_v47 }
 0xbef   : > { %10376 = vmatpush1.bf16.msra.mxu0 %v19127_v22  ;;  %10417 = vmatpush1.bf16.msra.mxu1 %v19129_v9 }
 0xbf0   : > { %10377 = vmatprep.subr.bf16.mxu0 %v19135_v53  ;;  %10418 = vmatprep.subr.bf16.mxu1 %v19137_v17 }
 0xbf1   : > { %10407 = vmatprep.mubr.bf16.mxu0 %v21240_v26  ;;  %10448 = vmatprep.mubr.bf16.mxu1 %v21240_v26 }
 0xbf3   : > { %10378 = vmatpush1.bf16.msra.mxu0 %v19139_v34  ;;  %10419 = vmatpush1.bf16.msra.mxu1 %v19141_v40 }
 0xbf4   : > { %10379 = vmatprep.subr.bf16.mxu0 %v19147_v6  ;;  %10420 = vmatprep.subr.bf16.mxu1 %v19149_v54 }
 0xbf7   : > { %10380 = vmatpush1.bf16.msra.mxu0 %v19151_v49  ;;  %10421 = vmatpush1.bf16.msra.mxu1 %v19153_v18 }
 0xbf8   : > { %10381 = vmatprep.subr.bf16.mxu0 %v19157_v20  ;;  %10422 = vmatprep.subr.bf16.mxu1 %v19165_v50 }
 0xbfb   : > { %10382 = vmatpush1.bf16.msra.mxu0 %v19161_v4  ;;  %10423 = vmatpush1.bf16.msra.mxu1 %v19163_v10 }
 0xbfc   : > { %10383 = vmatprep.subr.bf16.mxu0 %v19168_v0  ;;  %10424 = vmatprep.subr.bf16.mxu1 %v19170_v55 }
 0xbff   : > { %10384 = vmatpush1.bf16.msra.mxu0 %v19175_v21  ;;  %10425 = vmatpush1.bf16.msra.mxu1 %v19177_v3 }
 0xc00   : > { %10385 = vmatprep.subr.bf16.mxu0 %v19181_v7  ;;  %10426 = vmatprep.subr.bf16.mxu1 %v19183_v52 }
 0xc03   : > { %10386 = vmatpush1.bf16.msra.mxu0 %v19187_v13  ;;  %10427 = vmatpush1.bf16.msra.mxu1 %v19189_v11 }
 0xc04   : > { %10387 = vmatprep.subr.bf16.mxu0 %v19195_v59  ;;  %10428 = vmatprep.subr.bf16.mxu1 %v19197_v39 }
 0xc07   : > { %10388 = vmatpush1.bf16.msra.mxu0 %v19199_v12  ;;  %10429 = vmatpush1.bf16.msra.mxu1 %v19201_v45 }
 0xc08   : > { %10389 = vmatprep.subr.bf16.mxu0 %v19205_v62  ;;  %10430 = vmatprep.subr.bf16.mxu1 %v19213_v61 }
 0xc0b   : > { %10390 = vmatpush1.bf16.msra.mxu0 %v19209_v27  ;;  %10431 = vmatpush1.bf16.msra.mxu1 %v19211_v60 }
 0xc0c   : > { %10683 = vmatprep.subr.bf16.mxu0 %v19123_v23  ;;  %10724 = vmatprep.subr.bf16.mxu1 %v19125_v15 }
 0xcc1   : > { %v10101_v29 = vpop.f32.mrb[108].mxu0  ;;  %v10142_v35 = vpop.f32.mrb[124].mxu1 }
 0xcc2   : > { %v10149_v1 = vadd.f32 %v10101_v29, %v9424_v28  ;;  %v10151_v42 = vadd.f32 %v10142_v35, %v9497_v58  ;;  %v10103_v8 = vpop.f32.mrb[109].mxu0  ;;  %v10144_v23 = vpop.f32.mrb[125].mxu1 }
 0xcc3   : > { %v10150_v37 = vadd.f32 %v10103_v8, %v9426_v44  ;;  %v10152_v15 = vadd.f32 %v10144_v23, %v9499_v32  ;;  %v10105_v14 = vpop.f32.mrb[110].mxu0  ;;  %v10146_v38 = vpop.f32.mrb[126].mxu1 }
 0xcc4   : > { %v15021_v2 = vmul.f32 -1.442695, %v10149_v1  ;;  %v10106_v16 = vpop.f32.mrb[111].mxu0  ;;  %v10147_v57 = vpop.f32.mrb[127].mxu1  ;;  %v15023_v41 = vmul.f32 -1.442695, %v10151_v42 }
 0xcc5   : > { %v15022_v43 = vmul.f32 -1.442695, %v10150_v37  ;;  %v19453_v16 = vld [vmem:[#allocation10 + $0x4] ss:$16 sps:$4 sm:$0xff]   ;;  %v19455_v57 = vld [vmem:[#allocation10 + $0xc] ss:$16 sps:$4 sm:$0xff]  }
 0xcc6   : > { %16034 = vpow2.f32 %v15021_v2 }
 0xcc7   : > { %16036 = vpow2.f32 %v15022_v43  ;;  %v19457_v43 = vld [vmem:[#allocation10] ss:$16 sps:$4 sm:$0xff]  }
 0xcc8   : > { %16038 = vtanh.f32 %v10152_v15 }
 0xcc9   : > { %16040 = vpow2.f32 %v15023_v41  ;;  %v19459_v41 = vld [vmem:[#allocation10 + $0x8] ss:$16 sps:$4 sm:$0xff]  }
 0xcd0   : > { %v16035_v51 = vpop.eup %16034 }
 0xcd1   : > { %v10162_v46 = vadd.f32 1.0, %v16035_v51  ;;  %v16037_v56 = vpop.eup %16036  ;;  %v19465_v51 = vld [vmem:[#allocation10 + $0x24] ss:$16 sps:$4 sm:$0xff]  }
 0xcd2   : > { %v10163_v19 = vadd.f32 1.0, %v16037_v56  ;;  %v16039_v31 = vpop.eup %16038  ;;  %v19469_v56 = vld [vmem:[#allocation10 + $0x20] ss:$16 sps:$4 sm:$0xff]  }
 0xcd3   : > { %16042 = vrcp.f32 %v10162_v46  ;;  %v16041_v48 = vpop.eup %16040  ;;  %v19467_v46 = vld [vmem:[#allocation10 + $0x2c] ss:$16 sps:$4 sm:$0xff]  }
 0xcd4   : > { %16044 = vrcp.f32 %v10163_v19  ;;  %v10164_v44 = vadd.f32 1.0, %v16041_v48  ;;  %v19471_v19 = vld [vmem:[#allocation10 + $0x28] ss:$16 sps:$4 sm:$0xff]   ;;  %v19479_v48 = vld [vmem:[#allocation10 + $0x4c] ss:$16 sps:$4 sm:$0xff]  }
 0xcd6   : > { %16046 = vrcp.f32 %v10164_v44  ;;  %v19491_v44 = vld [vmem:[#allocation10 + $0x6c] ss:$16 sps:$4 sm:$0xff]  }
 0xcdd   : > { %v16043_v47 = vpop.eup %16042 }
 0xcde   : > { %v10173_v28 = vmul.f32 %v16043_v47, %v16039_v31  ;;  %v16045_v58 = vpop.eup %16044  ;;  %v19477_v31 = vld [vmem:[#allocation10 + $0x44] ss:$16 sps:$4 sm:$0xff]   ;;  %v19481_v47 = vld [vmem:[#allocation10 + $0x40] ss:$16 sps:$4 sm:$0xff]  }
 0xcdf   : > { %v10172_v32 = vmul.f32 %v16045_v58, %v19346_v33  ;;  %v19489_v58 = vld [vmem:[#allocation10 + $0x64] ss:$16 sps:$4 sm:$0xff]  }
 0xce0   : > { %v16047_v35 = vpop.eup %16046 }
 0xce1   : > { %v19396_v29 = vadd.f32 %v10173_v28, %v10172_v32  ;;  %v19483_v28 = vld [vmem:[#allocation10 + $0x48] ss:$16 sps:$4 sm:$0xff]   ;;  %v19493_v32 = vld [vmem:[#allocation10 + $0x60] ss:$16 sps:$4 sm:$0xff]  }
 0xce3   : > { %16048 = vtanh.f32 %v19396_v29 }
 0xced   : > { %v16049_v1 = vpop.eup %16048 }
 0xcee   : > { %v19399_v42 = vmul.f32 %v16049_v1, %v16047_v35  ;;  %v19501_v35 = vld [vmem:[#allocation10 + $0x84] ss:$16 sps:$4 sm:$0xff]   ;;  %v19503_v1 = vld [vmem:[#allocation10 + $0x8c] ss:$16 sps:$4 sm:$0xff]  }
 0xcf0   : > { %v10178_v8 = vpack.c.bf16 %v19399_v42, %v19399_v42 }
 0xcf2   : > { %10408 = vmatmul.mubr.bf16.vlgmr.msra.gmra.mrb[112].mxu0 %v10178_v8  ;;  %10449 = vmatmul.mubr.bf16.vlgmr.msra.gmra.mrb[128].mxu1 %v10178_v8  ;;  %v19505_v8 = vld [vmem:[#allocation10 + $0x80] ss:$16 sps:$4 sm:$0xff]  }
 0xcf3   : > { %10684 = vmatpush1.bf16.msra.mxu0 %v19127_v22  ;;  %10725 = vmatpush1.bf16.msra.mxu1 %v19129_v9  ;;  %v9430_v22 = vadd.f32 %v19275_v25, %v19327_v24  ;;  %v21268_v9 = vld [vmem:[#allocation145_spill] sm:$0xff] }
 0xcf4   : > { %10685 = vmatprep.subr.bf16.mxu0 %v19135_v53  ;;  %10726 = vmatprep.subr.bf16.mxu1 %v19137_v17  ;;  %v9503_v53 = vadd.f32 %v21268_v9, %v19330_v36  ;;  %v21269_v17 = vld [vmem:[#allocation146_spill] sm:$0xff] }
 0xcf5   : > { %10715 = vmatprep.mubr.bf16.mxu0 %v21240_v26  ;;  %10756 = vmatprep.mubr.bf16.mxu1 %v21240_v26  ;;  %v19513_v9 = vld [vmem:[#allocation10 + $0xa0] ss:$16 sps:$4 sm:$0xff]  }
 0xcf7   : > { %10686 = vmatpush1.bf16.msra.mxu0 %v19139_v34  ;;  %10727 = vmatpush1.bf16.msra.mxu1 %v19141_v40  ;;  %v9432_v34 = vadd.f32 %v21269_v17, %v19337_v5  ;;  %v21270_v40 = vld [vmem:[#allocation147_spill] sm:$0xff] }
 0xcf8   : > { %10687 = vmatprep.subr.bf16.mxu0 %v19147_v6  ;;  %10728 = vmatprep.subr.bf16.mxu1 %v19149_v54  ;;  %v9505_v6 = vadd.f32 %v21270_v40, %v19340_v30  ;;  %v19517_v17 = vld [vmem:[#allocation10 + $0xa8] ss:$16 sps:$4 sm:$0xff]   ;;  %v19521_v40 = vld [vmem:[#allocation10 + $0xc4] ss:$16 sps:$4 sm:$0xff]  }
 0xcfb   : > { %10688 = vmatpush1.bf16.msra.mxu0 %v19151_v49  ;;  %10729 = vmatpush1.bf16.msra.mxu1 %v19153_v18 }
 0xcfc   : > { %10689 = vmatprep.subr.bf16.mxu0 %v19157_v20  ;;  %10730 = vmatprep.subr.bf16.mxu1 %v19165_v50 }
 0xcff   : > { %10690 = vmatpush1.bf16.msra.mxu0 %v19161_v4  ;;  %10731 = vmatpush1.bf16.msra.mxu1 %v19163_v10 }
 0xd00   : > { %10691 = vmatprep.subr.bf16.mxu0 %v19168_v0  ;;  %10732 = vmatprep.subr.bf16.mxu1 %v19170_v55 }
 0xd03   : > { %10692 = vmatpush1.bf16.msra.mxu0 %v19175_v21  ;;  %10733 = vmatpush1.bf16.msra.mxu1 %v19177_v3 }
 0xd04   : > { %10693 = vmatprep.subr.bf16.mxu0 %v19181_v7  ;;  %10734 = vmatprep.subr.bf16.mxu1 %v19183_v52 }
 0xd07   : > { %10694 = vmatpush1.bf16.msra.mxu0 %v19187_v13  ;;  %10735 = vmatpush1.bf16.msra.mxu1 %v19189_v11 }
 0xd08   : > { %10695 = vmatprep.subr.bf16.mxu0 %v19195_v59  ;;  %10736 = vmatprep.subr.bf16.mxu1 %v19197_v39 }
 0xd0b   : > { %10696 = vmatpush1.bf16.msra.mxu0 %v19199_v12  ;;  %10737 = vmatpush1.bf16.msra.mxu1 %v19201_v45 }
 0xd0c   : > { %10697 = vmatprep.subr.bf16.mxu0 %v19205_v62  ;;  %10738 = vmatprep.subr.bf16.mxu1 %v19213_v61 }
 0xd0f   : > { %10698 = vmatpush1.bf16.msra.mxu0 %v19209_v27  ;;  %10739 = vmatpush1.bf16.msra.mxu1 %v19211_v60 }
 0xd10   : > { %10991 = vmatprep.subr.bf16.mxu0 %v19453_v16  ;;  %11032 = vmatprep.subr.bf16.mxu1 %v19455_v57 }
 0xdc5   : > { %v10409_v54 = vpop.f32.mrb[112].mxu0  ;;  %v10450_v49 = vpop.f32.mrb[128].mxu1 }
 0xdc6   : > { %v10457_v18 = vadd.f32 %v10409_v54, %v9430_v22  ;;  %v10459_v20 = vadd.f32 %v10450_v49, %v9503_v53  ;;  %v10411_v4 = vpop.f32.mrb[113].mxu0  ;;  %v10452_v10 = vpop.f32.mrb[129].mxu1  ;;  %v19507_v22 = vld [vmem:[#allocation10 + $0x88] ss:$16 sps:$4 sm:$0xff]   ;;  %v19515_v53 = vld [vmem:[#allocation10 + $0xa4] ss:$16 sps:$4 sm:$0xff]  }
 0xdc7   : > { %v10458_v50 = vadd.f32 %v10411_v4, %v9432_v34  ;;  %v10460_v0 = vadd.f32 %v10452_v10, %v9505_v6  ;;  %v10413_v55 = vpop.f32.mrb[114].mxu0  ;;  %v10454_v21 = vpop.f32.mrb[130].mxu1  ;;  %v19519_v34 = vld [vmem:[#allocation10 + $0xac] ss:$16 sps:$4 sm:$0xff]   ;;  %v19529_v54 = vld [vmem:[#allocation10 + $0xc0] ss:$16 sps:$4 sm:$0xff]  }
 0xdc8   : > { %v15056_v3 = vmul.f32 -1.442695, %v10457_v18  ;;  %v10414_v7 = vpop.f32.mrb[115].mxu0  ;;  %v10455_v52 = vpop.f32.mrb[131].mxu1  ;;  %v15058_v11 = vmul.f32 -1.442695, %v10459_v20 }
 0xdc9   : > { %v15057_v13 = vmul.f32 -1.442695, %v10458_v50  ;;  %v19524_v6 = vld [vmem:[#allocation10 + $0xcc] ss:$16 sps:$4 sm:$0xff]   ;;  %v19531_v49 = vld [vmem:[#allocation10 + $0xc8] ss:$16 sps:$4 sm:$0xff]  }
 0xdca   : > { %16050 = vpow2.f32 %v15056_v3  ;;  %v19535_v18 = vld [vmem:[#allocation10 + $0xe4] ss:$16 sps:$4 sm:$0xff]   ;;  %v19537_v20 = vld [vmem:[#allocation10 + $0xec] ss:$16 sps:$4 sm:$0xff]   ;;  %v19541_v4 = vld [vmem:[#allocation10 + $0xe0] ss:$16 sps:$4 sm:$0xff]  }
 0xdcb   : > { %16052 = vpow2.f32 %v15057_v13  ;;  %v19543_v10 = vld [vmem:[#allocation10 + $0xe8] ss:$16 sps:$4 sm:$0xff]   ;;  %v21271_v50 = vld [vmem:[#allocation148_spill] sm:$0xff]  ;;  %v21273_v3 = vld [vmem:[#allocation150_spill] sm:$0xff] }
 0xdcc   : > { %16054 = vtanh.f32 %v10460_v0  ;;  %v9434_v0 = vadd.f32 %v21271_v50, %v19327_v24  ;;  %v21272_v55 = vld [vmem:[#allocation149_spill] sm:$0xff]  ;;  %v9436_v7 = vadd.f32 %v21273_v3, %v19337_v5  ;;  %v21274_v52 = vld [vmem:[#allocation151_spill] sm:$0xff] }
 0xdcd   : > { %16056 = vpow2.f32 %v15058_v11  ;;  %v9507_v21 = vadd.f32 %v21272_v55, %v19330_v36  ;;  %v9509_v13 = vadd.f32 %v21274_v52, %v19340_v30 }
 0xdd4   : > { %v16051_v59 = vpop.eup %16050 }
 0xdd5   : > { %v10470_v39 = vadd.f32 1.0, %v16051_v59  ;;  %v16053_v12 = vpop.eup %16052 }
 0xdd6   : > { %v10471_v45 = vadd.f32 1.0, %v16053_v12  ;;  %v16055_v62 = vpop.eup %16054 }
 0xdd7   : > { %16058 = vrcp.f32 %v10470_v39  ;;  %v16057_v27 = vpop.eup %16056 }
 0xdd8   : > { %16060 = vrcp.f32 %v10471_v45  ;;  %v10472_v33 = vadd.f32 1.0, %v16057_v27 }
 0xdda   : > { %16062 = vrcp.f32 %v10472_v33 }
 0xde1   : > { %v16059_v60 = vpop.eup %16058 }
 0xde2   : > { %v10481_v61 = vmul.f32 %v16059_v60, %v16055_v62  ;;  %v16061_v25 = vpop.eup %16060 }
 0xde3   : > { %v10480_v23 = vmul.f32 %v16061_v25, %v19396_v29  ;;  %v19495_v29 = vld [vmem:[#allocation10 + $0x68] ss:$16 sps:$4 sm:$0xff]  }
 0xde4   : > { %v16063_v15 = vpop.eup %16062 }
 0xde5   : > { %v19444_v37 = vadd.f32 %v10481_v61, %v10480_v23 }
 0xde7   : > { %16064 = vtanh.f32 %v19444_v37 }
 0xdf1   : > { %v16065_v14 = vpop.eup %16064 }
 0xdf2   : > { %v19447_v38 = vmul.f32 %v16065_v14, %v16063_v15 }
 0xdf4   : > { %v10486_v2 = vpack.c.bf16 %v19447_v38, %v19447_v38 }
 0xdf6   : > { %10716 = vmatmul.mubr.bf16.vlgmr.msra.gmra.mrb[116].mxu0 %v10486_v2  ;;  %10757 = vmatmul.mubr.bf16.vlgmr.msra.gmra.mrb[132].mxu1 %v10486_v2 }
 0xdf7   : > { %11023 = vmatprep.mubr.bf16.mxu0 %v21240_v26  ;;  %11064 = vmatprep.mubr.bf16.mxu1 %v21240_v26 }
 0xdf8   : > { %10992 = vmatpush1.bf16.msra.mxu0 %v19457_v43  ;;  %11033 = vmatpush1.bf16.msra.mxu1 %v19459_v41 }
 0xdf9   : > { %10993 = vmatprep.subr.bf16.mxu0 %v19465_v51  ;;  %11034 = vmatprep.subr.bf16.mxu1 %v19467_v46 }
 0xdfc   : > { %10994 = vmatpush1.bf16.msra.mxu0 %v19469_v56  ;;  %11035 = vmatpush1.bf16.msra.mxu1 %v19471_v19 }
 0xdfd   : > { %10995 = vmatprep.subr.bf16.mxu0 %v19477_v31  ;;  %11036 = vmatprep.subr.bf16.mxu1 %v19479_v48 }
 0xe00   : > { %10996 = vmatpush1.bf16.msra.mxu0 %v19481_v47  ;;  %11037 = vmatpush1.bf16.msra.mxu1 %v19483_v28 }
 0xe01   : > { %10997 = vmatprep.subr.bf16.mxu0 %v19489_v58  ;;  %11038 = vmatprep.subr.bf16.mxu1 %v19491_v44 }
 0xe04   : > { %10998 = vmatpush1.bf16.msra.mxu0 %v19493_v32  ;;  %11039 = vmatpush1.bf16.msra.mxu1 %v19495_v29 }
 0xe05   : > { %10999 = vmatprep.subr.bf16.mxu0 %v19501_v35  ;;  %11040 = vmatprep.subr.bf16.mxu1 %v19503_v1 }
 0xe08   : > { %11000 = vmatpush1.bf16.msra.mxu0 %v19505_v8  ;;  %11041 = vmatpush1.bf16.msra.mxu1 %v19507_v22 }
 0xe09   : > { %11001 = vmatprep.subr.bf16.mxu0 %v19515_v53  ;;  %11042 = vmatprep.subr.bf16.mxu1 %v19519_v34 }
 0xe0c   : > { %11002 = vmatpush1.bf16.msra.mxu0 %v19513_v9  ;;  %11043 = vmatpush1.bf16.msra.mxu1 %v19517_v17 }
 0xe0d   : > { %11003 = vmatprep.subr.bf16.mxu0 %v19521_v40  ;;  %11044 = vmatprep.subr.bf16.mxu1 %v19524_v6 }
 0xe10   : > { %11004 = vmatpush1.bf16.msra.mxu0 %v19529_v54  ;;  %11045 = vmatpush1.bf16.msra.mxu1 %v19531_v49 }
 0xe11   : > { %11005 = vmatprep.subr.bf16.mxu0 %v19535_v18  ;;  %11046 = vmatprep.subr.bf16.mxu1 %v19537_v20 }
 0xe14   : > { %11006 = vmatpush1.bf16.msra.mxu0 %v19541_v4  ;;  %11047 = vmatpush1.bf16.msra.mxu1 %v19543_v10 }
 0xe15   : > { %11299 = vmatprep.subr.bf16.mxu0 %v19453_v16  ;;  %11340 = vmatprep.subr.bf16.mxu1 %v19455_v57 }
 0xec9   : > { %v10717_v11 = vpop.f32.mrb[116].mxu0  ;;  %v10758_v59 = vpop.f32.mrb[132].mxu1 }
 0xeca   : > { %v10765_v39 = vadd.f32 %v10717_v11, %v9434_v0  ;;  %v10767_v12 = vadd.f32 %v10758_v59, %v9507_v21  ;;  %v10719_v45 = vpop.f32.mrb[117].mxu0  ;;  %v10760_v62 = vpop.f32.mrb[133].mxu1 }
 0xecb   : > { %v10766_v27 = vadd.f32 %v10719_v45, %v9436_v7  ;;  %v10768_v60 = vadd.f32 %v10760_v62, %v9509_v13  ;;  %v10721_v61 = vpop.f32.mrb[118].mxu0  ;;  %v10762_v25 = vpop.f32.mrb[134].mxu1 }
 0xecc   : > { %v15091_v33 = vmul.f32 -1.442695, %v10765_v39  ;;  %v10722_v23 = vpop.f32.mrb[119].mxu0  ;;  %v10763_v15 = vpop.f32.mrb[135].mxu1  ;;  %v15093_v2 = vmul.f32 -1.442695, %v10767_v12 }
 0xecd   : > { %v15092_v14 = vmul.f32 -1.442695, %v10766_v27  ;;  %v21276_v25 = vld [vmem:[#allocation153_spill] sm:$0xff]  ;;  %v21277_v23 = vld [vmem:[#allocation154_spill] sm:$0xff] }
 0xece   : > { %16066 = vpow2.f32 %v15091_v33  ;;  %v9513_v33 = vadd.f32 %v21276_v25, %v19330_v36  ;;  %v9442_v15 = vadd.f32 %v21277_v23, %v19337_v5 }
 0xecf   : > { %16068 = vpow2.f32 %v15092_v14  ;;  %v21278_v14 = vld [vmem:[#allocation155_spill] sm:$0xff] }
 0xed0   : > { %16070 = vtanh.f32 %v10768_v60 }
 0xed1   : > { %16072 = vpow2.f32 %v15093_v2  ;;  %v9515_v2 = vadd.f32 %v21278_v14, %v19340_v30 }
 0xed8   : > { %v16067_v50 = vpop.eup %16066 }
 0xed9   : > { %v10778_v55 = vadd.f32 1.0, %v16067_v50  ;;  %v16069_v3 = vpop.eup %16068 }
 0xeda   : > { %v10779_v0 = vadd.f32 1.0, %v16069_v3  ;;  %v16071_v21 = vpop.eup %16070 }
 0xedb   : > { %16074 = vrcp.f32 %v10778_v55  ;;  %v16073_v7 = vpop.eup %16072 }
 0xedc   : > { %16076 = vrcp.f32 %v10779_v0  ;;  %v10780_v59 = vadd.f32 1.0, %v16073_v7 }
 0xede   : > { %16078 = vrcp.f32 %v10780_v59 }
 0xee5   : > { %v16075_v52 = vpop.eup %16074 }
 0xee6   : > { %v10789_v13 = vmul.f32 %v16075_v52, %v16071_v21  ;;  %v16077_v11 = vpop.eup %16076 }
 0xee7   : > { %v10788_v39 = vmul.f32 %v16077_v11, %v19444_v37  ;;  %v21275_v37 = vld [vmem:[#allocation152_spill] sm:$0xff] }
 0xee8   : > { %v16079_v12 = vpop.eup %16078  ;;  %v9440_v61 = vadd.f32 %v21275_v37, %v19327_v24 }
 0xee9   : > { %v19560_v45 = vadd.f32 %v10789_v13, %v10788_v39 }
 0xeeb   : > { %16080 = vtanh.f32 %v19560_v45 }
 0xef5   : > { %v16081_v62 = vpop.eup %16080 }
 0xef6   : > { %v19563_v27 = vmul.f32 %v16081_v62, %v16079_v12 }
 0xef8   : > { %v10794_v60 = vpack.c.bf16 %v19563_v27, %v19563_v27 }
 0xefa   : > { %11024 = vmatmul.mubr.bf16.vlgmr.msra.gmra.mrb[120].mxu0 %v10794_v60  ;;  %11065 = vmatmul.mubr.bf16.vlgmr.msra.gmra.mrb[136].mxu1 %v10794_v60 }
 0xefb   : > { %11300 = vmatpush1.bf16.msra.mxu0 %v19457_v43  ;;  %11341 = vmatpush1.bf16.msra.mxu1 %v19459_v41 }
 0xefc   : > { %11301 = vmatprep.subr.bf16.mxu0 %v19465_v51  ;;  %11342 = vmatprep.subr.bf16.mxu1 %v19467_v46 }
 0xefd   : > { %11331 = vmatprep.mubr.bf16.mxu0 %v21240_v26  ;;  %11372 = vmatprep.mubr.bf16.mxu1 %v21240_v26 }
 0xeff   : > { %11302 = vmatpush1.bf16.msra.mxu0 %v19469_v56  ;;  %11343 = vmatpush1.bf16.msra.mxu1 %v19471_v19 }
 0xf00   : > { %11303 = vmatprep.subr.bf16.mxu0 %v19477_v31  ;;  %11344 = vmatprep.subr.bf16.mxu1 %v19479_v48 }
 0xf03   : > { %11304 = vmatpush1.bf16.msra.mxu0 %v19481_v47  ;;  %11345 = vmatpush1.bf16.msra.mxu1 %v19483_v28 }
 0xf04   : > { %11305 = vmatprep.subr.bf16.mxu0 %v19489_v58  ;;  %11346 = vmatprep.subr.bf16.mxu1 %v19491_v44 }
 0xf07   : > { %11306 = vmatpush1.bf16.msra.mxu0 %v19493_v32  ;;  %11347 = vmatpush1.bf16.msra.mxu1 %v19495_v29 }
 0xf08   : > { %11307 = vmatprep.subr.bf16.mxu0 %v19501_v35  ;;  %11348 = vmatprep.subr.bf16.mxu1 %v19503_v1 }
 0xf0b   : > { %11308 = vmatpush1.bf16.msra.mxu0 %v19505_v8  ;;  %11349 = vmatpush1.bf16.msra.mxu1 %v19507_v22 }
 0xf0c   : > { %11309 = vmatprep.subr.bf16.mxu0 %v19515_v53  ;;  %11350 = vmatprep.subr.bf16.mxu1 %v19519_v34 }
 0xf0f   : > { %11310 = vmatpush1.bf16.msra.mxu0 %v19513_v9  ;;  %11351 = vmatpush1.bf16.msra.mxu1 %v19517_v17 }
 0xf10   : > { %11311 = vmatprep.subr.bf16.mxu0 %v19521_v40  ;;  %11352 = vmatprep.subr.bf16.mxu1 %v19524_v6 }
 0xf13   : > { %11312 = vmatpush1.bf16.msra.mxu0 %v19529_v54  ;;  %11353 = vmatpush1.bf16.msra.mxu1 %v19531_v49 }
 0xf14   : > { %11313 = vmatprep.subr.bf16.mxu0 %v19535_v18  ;;  %11354 = vmatprep.subr.bf16.mxu1 %v19537_v20 }
 0xf17   : > { %11314 = vmatpush1.bf16.msra.mxu0 %v19541_v4  ;;  %11355 = vmatpush1.bf16.msra.mxu1 %v19543_v10 }
 0xf18   : > { %11607 = vmatprep.subr.bf16.mxu0 %v19453_v16  ;;  %11648 = vmatprep.subr.bf16.mxu1 %v19455_v57 }
 0xfcd   : > { %v11025_v50 = vpop.f32.mrb[120].mxu0  ;;  %v11066_v55 = vpop.f32.mrb[136].mxu1 }
 0xfce   : > { %v11073_v3 = vadd.f32 %v11025_v50, %v9440_v61  ;;  %v11075_v0 = vadd.f32 %v11066_v55, %v9513_v33  ;;  %v11027_v21 = vpop.f32.mrb[121].mxu0  ;;  %v11068_v7 = vpop.f32.mrb[137].mxu1 }
 0xfcf   : > { %v11074_v52 = vadd.f32 %v11027_v21, %v9442_v15  ;;  %v11076_v13 = vadd.f32 %v11068_v7, %v9515_v2  ;;  %v11029_v11 = vpop.f32.mrb[122].mxu0  ;;  %v11070_v59 = vpop.f32.mrb[138].mxu1 }
 0xfd0   : > { %v15126_v39 = vmul.f32 -1.442695, %v11073_v3  ;;  %v11030_v12 = vpop.f32.mrb[123].mxu0  ;;  %v11071_v62 = vpop.f32.mrb[139].mxu1  ;;  %v15128_v37 = vmul.f32 -1.442695, %v11075_v0 }
 0xfd1   : > { %v15127_v60 = vmul.f32 -1.442695, %v11074_v52  ;;  %v21281_v62 = vld [vmem:[#allocation158_spill] sm:$0xff] }
 0xfd2   : > { %16082 = vpow2.f32 %v15126_v39  ;;  %v21280_v39 = vld [vmem:[#allocation157_spill] sm:$0xff] }
 0xfd3   : > { %16084 = vpow2.f32 %v15127_v60  ;;  %v9517_v12 = vadd.f32 %v21280_v39, %v19330_v36  ;;  %v9446_v60 = vadd.f32 %v21281_v62, %v19337_v5 }
 0xfd4   : > { %16086 = vtanh.f32 %v11076_v13 }
 0xfd5   : > { %16088 = vpow2.f32 %v15128_v37  ;;  %v21282_v37 = vld [vmem:[#allocation159_spill] sm:$0xff] }
 0xfdc   : > { %v16083_v25 = vpop.eup %16082 }
 0xfdd   : > { %v11086_v23 = vadd.f32 1.0, %v16083_v25  ;;  %v16085_v14 = vpop.eup %16084  ;;  %v9519_v25 = vadd.f32 %v21282_v37, %v19340_v30 }
 0xfde   : > { %v11087_v61 = vadd.f32 1.0, %v16085_v14  ;;  %v16087_v33 = vpop.eup %16086 }
 0xfdf   : > { %16090 = vrcp.f32 %v11086_v23  ;;  %v16089_v15 = vpop.eup %16088 }
 0xfe0   : > { %16092 = vrcp.f32 %v11087_v61  ;;  %v11088_v3 = vadd.f32 1.0, %v16089_v15 }
 0xfe2   : > { %16094 = vrcp.f32 %v11088_v3 }
 0xfe9   : > { %v16091_v2 = vpop.eup %16090 }
 0xfea   : > { %v11097_v50 = vmul.f32 %v16091_v2, %v16087_v33  ;;  %v16093_v55 = vpop.eup %16092 }
 0xfeb   : > { %v11096_v21 = vmul.f32 %v16093_v55, %v19560_v45  ;;  %v21279_v45 = vld [vmem:[#allocation156_spill] sm:$0xff] }
 0xfec   : > { %v16095_v0 = vpop.eup %16094  ;;  %v9444_v59 = vadd.f32 %v21279_v45, %v19327_v24 }
 0xfed   : > { %v19610_v7 = vadd.f32 %v11097_v50, %v11096_v21 }
 0xfef   : > { %16096 = vtanh.f32 %v19610_v7 }
 0xff9   : > { %v16097_v52 = vpop.eup %16096 }
 0xffa   : > { %v19613_v13 = vmul.f32 %v16097_v52, %v16095_v0 }
 0xffc   : > { %v11102_v11 = vpack.c.bf16 %v19613_v13, %v19613_v13 }
 0xffe   : > { %11332 = vmatmul.mubr.bf16.vlgmr.msra.gmra.mrb[124].mxu0 %v11102_v11  ;;  %11373 = vmatmul.mubr.bf16.vlgmr.msra.gmra.mrb[140].mxu1 %v11102_v11 }
 0xfff   : > { %11608 = vmatpush1.bf16.msra.mxu0 %v19457_v43  ;;  %11649 = vmatpush1.bf16.msra.mxu1 %v19459_v41 }
0x1000   : > { %11609 = vmatprep.subr.bf16.mxu0 %v19465_v51  ;;  %11650 = vmatprep.subr.bf16.mxu1 %v19467_v46 }
0x1001   : > { %11639 = vmatprep.mubr.bf16.mxu0 %v21240_v26  ;;  %11680 = vmatprep.mubr.bf16.mxu1 %v21240_v26 }
0x1003   : > { %11610 = vmatpush1.bf16.msra.mxu0 %v19469_v56  ;;  %11651 = vmatpush1.bf16.msra.mxu1 %v19471_v19 }
0x1004   : > { %11611 = vmatprep.subr.bf16.mxu0 %v19477_v31  ;;  %11652 = vmatprep.subr.bf16.mxu1 %v19479_v48 }
0x1007   : > { %11612 = vmatpush1.bf16.msra.mxu0 %v19481_v47  ;;  %11653 = vmatpush1.bf16.msra.mxu1 %v19483_v28 }
0x1008   : > { %11613 = vmatprep.subr.bf16.mxu0 %v19489_v58  ;;  %11654 = vmatprep.subr.bf16.mxu1 %v19491_v44 }
0x100b   : > { %11614 = vmatpush1.bf16.msra.mxu0 %v19493_v32  ;;  %11655 = vmatpush1.bf16.msra.mxu1 %v19495_v29 }
0x100c   : > { %11615 = vmatprep.subr.bf16.mxu0 %v19501_v35  ;;  %11656 = vmatprep.subr.bf16.mxu1 %v19503_v1 }
0x100f   : > { %11616 = vmatpush1.bf16.msra.mxu0 %v19505_v8  ;;  %11657 = vmatpush1.bf16.msra.mxu1 %v19507_v22 }
0x1010   : > { %11617 = vmatprep.subr.bf16.mxu0 %v19515_v53  ;;  %11658 = vmatprep.subr.bf16.mxu1 %v19519_v34 }
0x1013   : > { %11618 = vmatpush1.bf16.msra.mxu0 %v19513_v9  ;;  %11659 = vmatpush1.bf16.msra.mxu1 %v19517_v17 }
0x1014   : > { %11619 = vmatprep.subr.bf16.mxu0 %v19521_v40  ;;  %11660 = vmatprep.subr.bf16.mxu1 %v19524_v6 }
0x1017   : > { %11620 = vmatpush1.bf16.msra.mxu0 %v19529_v54  ;;  %11661 = vmatpush1.bf16.msra.mxu1 %v19531_v49 }
0x1018   : > { %11621 = vmatprep.subr.bf16.mxu0 %v19535_v18  ;;  %11662 = vmatprep.subr.bf16.mxu1 %v19537_v20 }
0x101b   : > { %11622 = vmatpush1.bf16.msra.mxu0 %v19541_v4  ;;  %11663 = vmatpush1.bf16.msra.mxu1 %v19543_v10 }
0x101c   : > { %11915 = vmatprep.subr.bf16.mxu0 %v19453_v16  ;;  %11956 = vmatprep.subr.bf16.mxu1 %v19455_v57 }
0x10d1   : > { %v11333_v23 = vpop.f32.mrb[124].mxu0  ;;  %v11374_v14 = vpop.f32.mrb[140].mxu1 }
0x10d2   : > { %v11381_v61 = vadd.f32 %v11333_v23, %v9444_v59  ;;  %v11383_v33 = vadd.f32 %v11374_v14, %v9517_v12  ;;  %v11335_v15 = vpop.f32.mrb[125].mxu0  ;;  %v11376_v16 = vpop.f32.mrb[141].mxu1 }
0x10d3   : > { %v11382_v2 = vadd.f32 %v11335_v15, %v9446_v60  ;;  %v11384_v57 = vadd.f32 %v11376_v16, %v9519_v25  ;;  %v11337_v50 = vpop.f32.mrb[126].mxu0  ;;  %v11378_v55 = vpop.f32.mrb[142].mxu1 }
0x10d4   : > { %v15161_v3 = vmul.f32 -1.442695, %v11381_v61  ;;  %v11338_v21 = vpop.f32.mrb[127].mxu0  ;;  %v11379_v0 = vpop.f32.mrb[143].mxu1  ;;  %v15163_v11 = vmul.f32 -1.442695, %v11383_v33 }
0x10d5   : > { %v15162_v52 = vmul.f32 -1.442695, %v11382_v2 }
0x10d6   : > { %16098 = vpow2.f32 %v15161_v3 }
0x10d7   : > { %16100 = vpow2.f32 %v15162_v52 }
0x10d8   : > { %16102 = vtanh.f32 %v11384_v57 }
0x10d9   : > { %16104 = vpow2.f32 %v15163_v11 }
0x10e0   : > { %v16099_v45 = vpop.eup %16098 }
0x10e1   : > { %v11394_v39 = vadd.f32 1.0, %v16099_v45  ;;  %v16101_v62 = vpop.eup %16100 }
0x10e2   : > { %v11395_v59 = vadd.f32 1.0, %v16101_v62  ;;  %v16103_v12 = vpop.eup %16102  ;;  %v15658_v62 = vld [vmem:[#allocation12] ss:$16 sps:$4 sm:$0xff]  }
0x10e3   : > { %16106 = vrcp.f32 %v11394_v39  ;;  %v16105_v60 = vpop.eup %16104 }
0x10e4   : > { %16108 = vrcp.f32 %v11395_v59  ;;  %v11396_v14 = vadd.f32 1.0, %v16105_v60  ;;  %v15661_v59 = vld [vmem:[#allocation12 + $0x8] ss:$16 sps:$4 sm:$0xff]   ;;  %v15666_v60 = vld [vmem:[#allocation12 + $0x24] ss:$16 sps:$4 sm:$0xff]  }
0x10e6   : > { %16110 = vrcp.f32 %v11396_v14  ;;  %v15672_v14 = vld [vmem:[#allocation12 + $0x44] ss:$16 sps:$4 sm:$0xff]  }
0x10ed   : > { %v16107_v37 = vpop.eup %16106 }
0x10ee   : > { %v11405_v25 = vmul.f32 %v16107_v37, %v16103_v12  ;;  %v16109_v23 = vpop.eup %16108  ;;  %v15669_v37 = vld [vmem:[#allocation12 + $0x2c] ss:$16 sps:$4 sm:$0xff]  }
0x10ef   : > { %v11404_v61 = vmul.f32 %v16109_v23, %v19610_v7  ;;  %v15667_v23 = vld [vmem:[#allocation12 + $0x28] ss:$16 sps:$4 sm:$0xff]  }
0x10f0   : > { %v16111_v33 = vpop.eup %16110 }
0x10f1   : > { %v19660_v15 = vadd.f32 %v11405_v25, %v11404_v61  ;;  %v15664_v25 = vld [vmem:[#allocation12 + $0x20] ss:$16 sps:$4 sm:$0xff]   ;;  %v15675_v61 = vld [vmem:[#allocation12 + $0x4c] ss:$16 sps:$4 sm:$0xff]  }
0x10f3   : > { %16112 = vtanh.f32 %v19660_v15 }
0x10fd   : > { %v16113_v16 = vpop.eup %16112 }
0x10fe   : > { %v19663_v2 = vmul.f32 %v16113_v16, %v16111_v33  ;;  %v15673_v33 = vld [vmem:[#allocation12 + $0x48] ss:$16 sps:$4 sm:$0xff]   ;;  %v15678_v16 = vld [vmem:[#allocation12 + $0x64] ss:$16 sps:$4 sm:$0xff]  }
0x1100   : > { %v11410_v57 = vpack.c.bf16 %v19663_v2, %v19663_v2 }
0x1102   : > { %11640 = vmatmul.mubr.bf16.vlgmr.msra.gmra.mrb[128].mxu0 %v11410_v57  ;;  %11681 = vmatmul.mubr.bf16.vlgmr.msra.gmra.mrb[144].mxu1 %v11410_v57  ;;  %v15681_v57 = vld [vmem:[#allocation12 + $0x6c] ss:$16 sps:$4 sm:$0xff]  }
0x1103   : > { %11916 = vmatpush1.bf16.msra.mxu0 %v19457_v43  ;;  %11957 = vmatpush1.bf16.msra.mxu1 %v19459_v41  ;;  %v15660_v43 = vld [vmem:[#allocation12 + $0x4] ss:$16 sps:$4 sm:$0xff]   ;;  %v15663_v41 = vld [vmem:[#allocation12 + $0xc] ss:$16 sps:$4 sm:$0xff]  }
0x1104   : > { %11917 = vmatprep.subr.bf16.mxu0 %v19465_v51  ;;  %11958 = vmatprep.subr.bf16.mxu1 %v19467_v46  ;;  %v21283_v51 = vld [vmem:[#allocation160_spill] sm:$0xff] }
0x1105   : > { %11947 = vmatprep.mubr.bf16.mxu0 %v21240_v26  ;;  %11988 = vmatprep.mubr.bf16.mxu1 %v21240_v26  ;;  %v9450_v46 = vadd.f32 %v21283_v51, %v19327_v24  ;;  %v15684_v51 = vld [vmem:[#allocation12 + $0x84] ss:$16 sps:$4 sm:$0xff]  }
0x1107   : > { %11918 = vmatpush1.bf16.msra.mxu0 %v19469_v56  ;;  %11959 = vmatpush1.bf16.msra.mxu1 %v19471_v19  ;;  %v21284_v56 = vld [vmem:[#allocation30_spill] sm:$0xff] }
0x1108   : > { %11919 = vmatprep.subr.bf16.mxu0 %v19477_v31  ;;  %11960 = vmatprep.subr.bf16.mxu1 %v19479_v48  ;;  %v9523_v19 = vadd.f32 %v21284_v56, %v19330_v36  ;;  %v21285_v31 = vld [vmem:[#allocation58_spill] sm:$0xff] }
0x1109   : > { %v9452_v48 = vadd.f32 %v21285_v31, %v19337_v5  ;;  %v15682_v56 = vld [vmem:[#allocation12 + $0x80] ss:$16 sps:$4 sm:$0xff]   ;;  %v15690_v31 = vld [vmem:[#allocation12 + $0xa4] ss:$16 sps:$4 sm:$0xff]  }
0x110b   : > { %11920 = vmatpush1.bf16.msra.mxu0 %v19481_v47  ;;  %11961 = vmatpush1.bf16.msra.mxu1 %v19483_v28  ;;  %v21286_v47 = vld [vmem:[#allocation31_spill] sm:$0xff] }
0x110c   : > { %11921 = vmatprep.subr.bf16.mxu0 %v19489_v58  ;;  %11962 = vmatprep.subr.bf16.mxu1 %v19491_v44  ;;  %v9525_v28 = vadd.f32 %v21286_v47, %v19340_v30  ;;  %v15688_v47 = vld [vmem:[#allocation12 + $0xa0] ss:$16 sps:$4 sm:$0xff]  }
0x110f   : > { %11922 = vmatpush1.bf16.msra.mxu0 %v19493_v32  ;;  %11963 = vmatpush1.bf16.msra.mxu1 %v19495_v29 }
0x1110   : > { %11923 = vmatprep.subr.bf16.mxu0 %v19501_v35  ;;  %11964 = vmatprep.subr.bf16.mxu1 %v19503_v1 }
0x1113   : > { %11924 = vmatpush1.bf16.msra.mxu0 %v19505_v8  ;;  %11965 = vmatpush1.bf16.msra.mxu1 %v19507_v22 }
0x1114   : > { %11925 = vmatprep.subr.bf16.mxu0 %v19515_v53  ;;  %11966 = vmatprep.subr.bf16.mxu1 %v19519_v34 }
0x1117   : > { %11926 = vmatpush1.bf16.msra.mxu0 %v19513_v9  ;;  %11967 = vmatpush1.bf16.msra.mxu1 %v19517_v17 }
0x1118   : > { %11927 = vmatprep.subr.bf16.mxu0 %v19521_v40  ;;  %11968 = vmatprep.subr.bf16.mxu1 %v19524_v6 }
0x111b   : > { %11928 = vmatpush1.bf16.msra.mxu0 %v19529_v54  ;;  %11969 = vmatpush1.bf16.msra.mxu1 %v19531_v49 }
0x111c   : > { %11929 = vmatprep.subr.bf16.mxu0 %v19535_v18  ;;  %11970 = vmatprep.subr.bf16.mxu1 %v19537_v20 }
0x111f   : > { %11930 = vmatpush1.bf16.msra.mxu0 %v19541_v4  ;;  %11971 = vmatpush1.bf16.msra.mxu1 %v19543_v10 }
0x1120   : > { %12252 = vmatprep.subr.bf16.mxu0 %v15660_v43  ;;  %12325 = vmatprep.subr.bf16.mxu1 %v15663_v41  ;;  %v15676_v43 = vld [vmem:[#allocation12 + $0x60] ss:$16 sps:$4 sm:$0xff]   ;;  %v15679_v41 = vld [vmem:[#allocation12 + $0x68] ss:$16 sps:$4 sm:$0xff]  }
0x11d5   : > { %v11641_v58 = vpop.f32.mrb[128].mxu0  ;;  %v11682_v44 = vpop.f32.mrb[144].mxu1 }
0x11d6   : > { %v11689_v32 = vadd.f32 %v11641_v58, %v9450_v46  ;;  %v11691_v29 = vadd.f32 %v11682_v44, %v9523_v19  ;;  %v11643_v35 = vpop.f32.mrb[129].mxu0  ;;  %v11684_v1 = vpop.f32.mrb[145].mxu1  ;;  %v15687_v46 = vld [vmem:[#allocation12 + $0x8c] ss:$16 sps:$4 sm:$0xff]   ;;  %v15685_v19 = vld [vmem:[#allocation12 + $0x88] ss:$16 sps:$4 sm:$0xff]  }
0x11d7   : > { %v11690_v8 = vadd.f32 %v11643_v35, %v9452_v48  ;;  %v11692_v22 = vadd.f32 %v11684_v1, %v9525_v28  ;;  %v11645_v9 = vpop.f32.mrb[130].mxu0  ;;  %v11686_v53 = vpop.f32.mrb[146].mxu1  ;;  %v15693_v48 = vld [vmem:[#allocation12 + $0xac] ss:$16 sps:$4 sm:$0xff]   ;;  %v15691_v28 = vld [vmem:[#allocation12 + $0xa8] ss:$16 sps:$4 sm:$0xff]  }
0x11d8   : > { %v15196_v17 = vmul.f32 -1.442695, %v11689_v32  ;;  %v11646_v34 = vpop.f32.mrb[131].mxu0  ;;  %v11687_v40 = vpop.f32.mrb[147].mxu1  ;;  %v15198_v54 = vmul.f32 -1.442695, %v11691_v29  ;;  %v12034_v9 = vpack.c.bf16 %v19399_v42, %v19349_v63  ;;  %v12035_v53 = vpack.c.bf16 %v19563_v27, %v19447_v38 }
0x11d9   : > { %v15197_v6 = vmul.f32 -1.442695, %v11690_v8  ;;  %v15696_v58 = vld [vmem:[#allocation12 + $0xc4] ss:$16 sps:$4 sm:$0xff]   ;;  %v15699_v44 = vld [vmem:[#allocation12 + $0xcc] ss:$16 sps:$4 sm:$0xff]  }
0x11da   : > { %16114 = vpow2.f32 %v15196_v17  ;;  %v15694_v32 = vld [vmem:[#allocation12 + $0xc0] ss:$16 sps:$4 sm:$0xff]   ;;  %v15697_v29 = vld [vmem:[#allocation12 + $0xc8] ss:$16 sps:$4 sm:$0xff]   ;;  %v15702_v35 = vld [vmem:[#allocation12 + $0xe4] ss:$16 sps:$4 sm:$0xff]   ;;  %v12036_v17 = vpack.c.bf16 %v19663_v2, %v19613_v13 }
0x11db   : > { %16116 = vpow2.f32 %v15197_v6  ;;  %v15705_v1 = vld [vmem:[#allocation12 + $0xec] ss:$16 sps:$4 sm:$0xff]   ;;  %v15700_v8 = vld [vmem:[#allocation12 + $0xe0] ss:$16 sps:$4 sm:$0xff]   ;;  %v19729_v63 = vld [vmem:[#allocation13 + $0x4] ss:$16 sps:$4 sm:$0xff]  }
0x11dc   : > { %16118 = vtanh.f32 %v11692_v22  ;;  %v15703_v22 = vld [vmem:[#allocation12 + $0xe8] ss:$16 sps:$4 sm:$0xff]   ;;  %v19731_v42 = vld [vmem:[#allocation13 + $0xc] ss:$16 sps:$4 sm:$0xff]   ;;  %v19733_v38 = vld [vmem:[#allocation13] ss:$16 sps:$4 sm:$0xff]  }
0x11dd   : > { %16120 = vpow2.f32 %v15198_v54  ;;  %v19735_v27 = vld [vmem:[#allocation13 + $0x8] ss:$16 sps:$4 sm:$0xff]   ;;  %v19741_v13 = vld [vmem:[#allocation13 + $0x24] ss:$16 sps:$4 sm:$0xff]   ;;  %v19743_v2 = vld [vmem:[#allocation13 + $0x2c] ss:$16 sps:$4 sm:$0xff]  }
0x11de   : > { %v19745_v34 = vld [vmem:[#allocation13 + $0x20] ss:$16 sps:$4 sm:$0xff]   ;;  %v19747_v40 = vld [vmem:[#allocation13 + $0x28] ss:$16 sps:$4 sm:$0xff]   ;;  %v19753_v6 = vld [vmem:[#allocation13 + $0x44] ss:$16 sps:$4 sm:$0xff]  }
0x11df   : > { %v19755_v54 = vld [vmem:[#allocation13 + $0x4c] ss:$16 sps:$4 sm:$0xff]  }
0x11e4   : > { %v16115_v49 = vpop.eup %16114 }
0x11e5   : > { %v11702_v18 = vadd.f32 1.0, %v16115_v49  ;;  %v16117_v20 = vpop.eup %16116  ;;  %v19757_v49 = vld [vmem:[#allocation13 + $0x40] ss:$16 sps:$4 sm:$0xff]  }
0x11e6   : > { %v11703_v4 = vadd.f32 1.0, %v16117_v20  ;;  %v16119_v10 = vpop.eup %16118  ;;  %v19765_v20 = vld [vmem:[#allocation13 + $0x64] ss:$16 sps:$4 sm:$0xff]  }
0x11e7   : > { %16122 = vrcp.f32 %v11702_v18  ;;  %v16121_v7 = vpop.eup %16120  ;;  %v19759_v18 = vld [vmem:[#allocation13 + $0x48] ss:$16 sps:$4 sm:$0xff]  }
0x11e8   : > { %16124 = vrcp.f32 %v11703_v4  ;;  %v11704_v21 = vadd.f32 1.0, %v16121_v7  ;;  %v19767_v4 = vld [vmem:[#allocation13 + $0x6c] ss:$16 sps:$4 sm:$0xff]   ;;  %v19771_v7 = vld [vmem:[#allocation13 + $0x68] ss:$16 sps:$4 sm:$0xff]  }
0x11ea   : > { %16126 = vrcp.f32 %v11704_v21  ;;  %v19783_v21 = vld [vmem:[#allocation13 + $0x88] ss:$16 sps:$4 sm:$0xff]  }
0x11f1   : > { %v16123_v50 = vpop.eup %16122 }
0x11f2   : > { %v11713_v55 = vmul.f32 %v16123_v50, %v16119_v10  ;;  %v16125_v3 = vpop.eup %16124  ;;  %v19769_v10 = vld [vmem:[#allocation13 + $0x60] ss:$16 sps:$4 sm:$0xff]   ;;  %v19777_v50 = vld [vmem:[#allocation13 + $0x84] ss:$16 sps:$4 sm:$0xff]  }
0x11f3   : > { %v11712_v0 = vmul.f32 %v16125_v3, %v19660_v15  ;;  %v15670_v15 = vld [vmem:[#allocation12 + $0x40] ss:$16 sps:$4 sm:$0xff]  }
0x11f4   : > { %v16127_v11 = vpop.eup %16126  ;;  %v19781_v3 = vld [vmem:[#allocation13 + $0x80] ss:$16 sps:$4 sm:$0xff]  }
0x11f5   : > { %v19708_v52 = vadd.f32 %v11713_v55, %v11712_v0  ;;  %v19779_v55 = vld [vmem:[#allocation13 + $0x8c] ss:$16 sps:$4 sm:$0xff]   ;;  %v19789_v0 = vld [vmem:[#allocation13 + $0xa4] ss:$16 sps:$4 sm:$0xff]  }
0x11f7   : > { %16128 = vtanh.f32 %v19708_v52 }
0x1201   : > { %v16129_v45 = vpop.eup %16128 }
0x1202   : > { %v19711_v39 = vmul.f32 %v16129_v45, %v16127_v11  ;;  %v19791_v11 = vld [vmem:[#allocation13 + $0xac] ss:$16 sps:$4 sm:$0xff]   ;;  %v19793_v45 = vld [vmem:[#allocation13 + $0xa0] ss:$16 sps:$4 sm:$0xff]  }
0x1204   : > { %v11718_v12 = vpack.c.bf16 %v19711_v39, %v19711_v39 }
0x1206   : > { %11948 = vmatmul.mubr.bf16.vlgmr.msra.gmra.mrb[132].mxu0 %v11718_v12  ;;  %11989 = vmatmul.mubr.bf16.vlgmr.msra.gmra.mrb[148].mxu1 %v11718_v12  ;;  %v19803_v12 = vld [vmem:[#allocation13 + $0xcc] ss:$16 sps:$4 sm:$0xff]  }
0x1207   : > { %12253 = vmatpush1.bf16.msra.mxu0 %v15658_v62  ;;  %12326 = vmatpush1.bf16.msra.mxu1 %v15661_v59  ;;  %v19795_v62 = vld [vmem:[#allocation13 + $0xa8] ss:$16 sps:$4 sm:$0xff]   ;;  %v19801_v59 = vld [vmem:[#allocation13 + $0xc4] ss:$16 sps:$4 sm:$0xff]  }
0x1208   : > { %12254 = vmatprep.subr.bf16.mxu0 %v15666_v60  ;;  %12327 = vmatprep.subr.bf16.mxu1 %v15669_v37  ;;  %v19805_v60 = vld [vmem:[#allocation13 + $0xc0] ss:$16 sps:$4 sm:$0xff]   ;;  %v19807_v37 = vld [vmem:[#allocation13 + $0xc8] ss:$16 sps:$4 sm:$0xff]  }
0x1209   : > { %12284 = vmatprep.mubr.bf16.mxu0 %v21240_v26  ;;  %12357 = vmatprep.mubr.bf16.mxu1 %v21240_v26 }
0x120b   : > { %12255 = vmatpush1.bf16.msra.mxu0 %v15664_v25  ;;  %12328 = vmatpush1.bf16.msra.mxu1 %v15667_v23  ;;  %v19813_v25 = vld [vmem:[#allocation13 + $0xe4] ss:$16 sps:$4 sm:$0xff]   ;;  %v19815_v23 = vld [vmem:[#allocation13 + $0xec] ss:$16 sps:$4 sm:$0xff]  }
0x120c   : > { %12256 = vmatprep.subr.bf16.mxu0 %v15672_v14  ;;  %12329 = vmatprep.subr.bf16.mxu1 %v15675_v61  ;;  %v19817_v14 = vld [vmem:[#allocation13 + $0xe0] ss:$16 sps:$4 sm:$0xff]   ;;  %v19819_v61 = vld [vmem:[#allocation13 + $0xe8] ss:$16 sps:$4 sm:$0xff]  }
0x120f   : > { %12257 = vmatpush1.bf16.msra.mxu0 %v15670_v15  ;;  %12330 = vmatpush1.bf16.msra.mxu1 %v15673_v33  ;;  %v21287_v15 = vld [vmem:[#allocation60_spill] sm:$0xff] }
0x1210   : > { %12258 = vmatprep.subr.bf16.mxu0 %v15678_v16  ;;  %12331 = vmatprep.subr.bf16.mxu1 %v15681_v57  ;;  %v9454_v33 = vadd.f32 %v21287_v15, %v19327_v24  ;;  %v21288_v16 = vld [vmem:[#allocation59_spill] sm:$0xff] }
0x1211   : > { %v9527_v57 = vadd.f32 %v21288_v16, %v19330_v36 }
0x1213   : > { %12259 = vmatpush1.bf16.msra.mxu0 %v15676_v43  ;;  %12332 = vmatpush1.bf16.msra.mxu1 %v15679_v41  ;;  %v21289_v43 = vld [vmem:[#allocation100_spill] sm:$0xff] }
0x1214   : > { %12260 = vmatprep.subr.bf16.mxu0 %v15684_v51  ;;  %12333 = vmatprep.subr.bf16.mxu1 %v15687_v46  ;;  %v9456_v41 = vadd.f32 %v21289_v43, %v19337_v5  ;;  %v21290_v51 = vld [vmem:[#allocation61_spill] sm:$0xff] }
0x1215   : > { %v9529_v46 = vadd.f32 %v21290_v51, %v19340_v30 }
0x1217   : > { %12261 = vmatpush1.bf16.msra.mxu0 %v15682_v56  ;;  %12334 = vmatpush1.bf16.msra.mxu1 %v15685_v19 }
0x1218   : > { %12262 = vmatprep.subr.bf16.mxu0 %v15690_v31  ;;  %12335 = vmatprep.subr.bf16.mxu1 %v15693_v48 }
0x121b   : > { %12263 = vmatpush1.bf16.msra.mxu0 %v15688_v47  ;;  %12336 = vmatpush1.bf16.msra.mxu1 %v15691_v28 }
0x121c   : > { %12264 = vmatprep.subr.bf16.mxu0 %v15696_v58  ;;  %12337 = vmatprep.subr.bf16.mxu1 %v15699_v44 }
0x121f   : > { %12265 = vmatpush1.bf16.msra.mxu0 %v15694_v32  ;;  %12338 = vmatpush1.bf16.msra.mxu1 %v15697_v29 }
0x1220   : > { %12266 = vmatprep.subr.bf16.mxu0 %v15702_v35  ;;  %12339 = vmatprep.subr.bf16.mxu1 %v15705_v1 }
0x1223   : > { %12267 = vmatpush1.bf16.msra.mxu0 %v15700_v8  ;;  %12340 = vmatpush1.bf16.msra.mxu1 %v15703_v22 }
0x1224   : > { %12626 = vmatprep.subr.bf16.mxu0 %v19729_v63  ;;  %12667 = vmatprep.subr.bf16.mxu1 %v19731_v42 }
0x1226   : > { %12285 = vmatmul.mubr.bf16.vlgmr.msra.gmra.mrb[136].mxu0 %v12034_v9  ;;  %12358 = vmatmul.mubr.bf16.vlgmr.msra.gmra.mrb[152].mxu1 %v12034_v9 }
0x1227   : > { %12294 = vmatprep.mubr.bf16.mxu0 %v21240_v26  ;;  %12367 = vmatprep.mubr.bf16.mxu1 %v21240_v26 }
0x1228   : > { %12627 = vmatpush1.bf16.msra.mxu0 %v19733_v38  ;;  %12668 = vmatpush1.bf16.msra.mxu1 %v19735_v27 }
0x1229   : > { %12628 = vmatprep.subr.bf16.mxu0 %v19741_v13  ;;  %12669 = vmatprep.subr.bf16.mxu1 %v19743_v2 }
0x122c   : > { %12629 = vmatpush1.bf16.msra.mxu0 %v19745_v34  ;;  %12670 = vmatpush1.bf16.msra.mxu1 %v19747_v40 }
0x122d   : > { %12630 = vmatprep.subr.bf16.mxu0 %v19753_v6  ;;  %12671 = vmatprep.subr.bf16.mxu1 %v19755_v54 }
0x122e   : > { %12295 = vmatmul.mubr.bf16.gmra.mrb[140].mxu0 %v12035_v53  ;;  %12368 = vmatmul.mubr.bf16.gmra.mrb[156].mxu1 %v12035_v53 }
0x122f   : > { %12304 = vmatprep.mubr.bf16.mxu0 %v21240_v26  ;;  %12377 = vmatprep.mubr.bf16.mxu1 %v21240_v26 }
0x1230   : > { %12631 = vmatpush1.bf16.msra.mxu0 %v19757_v49  ;;  %12672 = vmatpush1.bf16.msra.mxu1 %v19759_v18 }
0x1231   : > { %12632 = vmatprep.subr.bf16.mxu0 %v19765_v20  ;;  %12673 = vmatprep.subr.bf16.mxu1 %v19767_v4 }
0x1234   : > { %12633 = vmatpush1.bf16.msra.mxu0 %v19769_v10  ;;  %12674 = vmatpush1.bf16.msra.mxu1 %v19771_v7 }
0x1235   : > { %12634 = vmatprep.subr.bf16.mxu0 %v19777_v50  ;;  %12675 = vmatprep.subr.bf16.mxu1 %v19779_v55 }
0x1236   : > { %12305 = vmatmul.mubr.bf16.gmra.mrb[144].mxu0 %v12036_v17  ;;  %12378 = vmatmul.mubr.bf16.gmra.mrb[160].mxu1 %v12036_v17 }
0x1237   : > { %12314 = vmatprep.mubr.bf16.mxu0 %v21240_v26  ;;  %12387 = vmatprep.mubr.bf16.mxu1 %v21240_v26 }
0x1238   : > { %12635 = vmatpush1.bf16.msra.mxu0 %v19781_v3  ;;  %12676 = vmatpush1.bf16.msra.mxu1 %v19783_v21 }
0x1239   : > { %12636 = vmatprep.subr.bf16.mxu0 %v19789_v0  ;;  %12677 = vmatprep.subr.bf16.mxu1 %v19791_v11 }
0x123c   : > { %12637 = vmatpush1.bf16.msra.mxu0 %v19793_v45  ;;  %12678 = vmatpush1.bf16.msra.mxu1 %v19795_v62 }
0x123d   : > { %12638 = vmatprep.subr.bf16.mxu0 %v19801_v59  ;;  %12679 = vmatprep.subr.bf16.mxu1 %v19803_v12 }
0x1240   : > { %12639 = vmatpush1.bf16.msra.mxu0 %v19805_v60  ;;  %12680 = vmatpush1.bf16.msra.mxu1 %v19807_v37 }
0x1241   : > { %12640 = vmatprep.subr.bf16.mxu0 %v19813_v25  ;;  %12681 = vmatprep.subr.bf16.mxu1 %v19815_v23 }
0x1244   : > { %12641 = vmatpush1.bf16.msra.mxu0 %v19817_v14  ;;  %12682 = vmatpush1.bf16.msra.mxu1 %v19819_v61 }
0x1245   : > { %12741 = vmatprep.subr.bf16.mxu0 %v19729_v63  ;;  %12782 = vmatprep.subr.bf16.mxu1 %v19731_v42 }
0x12d9   : > { %v11949_v56 = vpop.f32.mrb[132].mxu0  ;;  %v11990_v19 = vpop.f32.mrb[148].mxu1 }
0x12da   : > { %v11997_v31 = vadd.f32 %v11949_v56, %v9454_v33  ;;  %v11999_v48 = vadd.f32 %v11990_v19, %v9527_v57  ;;  %v11951_v47 = vpop.f32.mrb[133].mxu0  ;;  %v11992_v28 = vpop.f32.mrb[149].mxu1 }
0x12db   : > { %v11998_v58 = vadd.f32 %v11951_v47, %v9456_v41  ;;  %v12000_v44 = vadd.f32 %v11992_v28, %v9529_v46  ;;  %v11953_v32 = vpop.f32.mrb[134].mxu0  ;;  %v11994_v29 = vpop.f32.mrb[150].mxu1 }
0x12dc   : > { %v15231_v24 = vmul.f32 -1.442695, %v11997_v31  ;;  %v11954_v35 = vpop.f32.mrb[135].mxu0  ;;  %v11995_v1 = vpop.f32.mrb[151].mxu1  ;;  %v15233_v5 = vmul.f32 -1.442695, %v11999_v48 }
0x12dd   : > { %v15232_v36 = vmul.f32 -1.442695, %v11998_v58 }
0x12de   : > { %16130 = vpow2.f32 %v15231_v24 }
0x12df   : > { %16132 = vpow2.f32 %v15232_v36 }
0x12e0   : > { %16134 = vtanh.f32 %v12000_v44 }
0x12e1   : > { %16136 = vpow2.f32 %v15233_v5 }
0x12e8   : > { %v16131_v8 = vpop.eup %16130 }
0x12e9   : > { %v12010_v22 = vadd.f32 1.0, %v16131_v8  ;;  %v16133_v30 = vpop.eup %16132 }
0x12ea   : > { %v12011_v9 = vadd.f32 1.0, %v16133_v30  ;;  %v16135_v53 = vpop.eup %16134 }
0x12eb   : > { %16138 = vrcp.f32 %v12010_v22  ;;  %v16137_v17 = vpop.eup %16136 }
0x12ec   : > { %16140 = vrcp.f32 %v12011_v9  ;;  %v12012_v57 = vadd.f32 1.0, %v16137_v17 }
0x12ee   : > { %16142 = vrcp.f32 %v12012_v57 }
0x12f5   : > { %v16139_v15 = vpop.eup %16138 }
0x12f6   : > { %v12021_v33 = vmul.f32 %v16139_v15, %v16135_v53  ;;  %v16141_v16 = vpop.eup %16140 }
0x12f7   : > { %v12020_v43 = vmul.f32 %v16141_v16, %v19708_v52 }
0x12f8   : > { %v16143_v36 = vpop.eup %16142 }
0x12f9   : > { %v19836_v41 = vpop.f32.mrb[136].mxu0  ;;  %v19838_v51 = vpop.f32.mrb[152].mxu1  ;;  %v12022_v46 = vadd.f32 %v12021_v33, %v12020_v43 }
0x12fa   : > { %v19840_v56 = vpop.f32.mrb[137].mxu0  ;;  %v19842_v19 = vpop.f32.mrb[153].mxu1 }
0x12fb   : > { %v19844_v31 = vpop.f32.mrb[138].mxu0  ;;  %v19846_v48 = vpop.f32.mrb[154].mxu1  ;;  %16144 = vtanh.f32 %v12022_v46 }
0x12fc   : > { %v19848_v47 = vpop.f32.mrb[139].mxu0  ;;  %v19850_v28 = vpop.f32.mrb[155].mxu1 }
0x1301   : > { %v19852_v52 = vpop.f32.mrb[140].mxu0  ;;  %v19854_v58 = vpop.f32.mrb[156].mxu1 }
0x1302   : > { %21291 = vst [vmem:[#allocation104_spill] sm:$0xff] %v19854_v58  ;;  %v19856_v44 = vpop.f32.mrb[141].mxu0  ;;  %v19858_v32 = vpop.f32.mrb[157].mxu1 }
0x1303   : > { %21292 = vst [vmem:[#allocation163_spill] sm:$0xff] %v19856_v44  ;;  %21293 = vst [vmem:[#allocation164_spill] sm:$0xff] %v19858_v32  ;;  %v19860_v29 = vpop.f32.mrb[142].mxu0  ;;  %v19862_v24 = vpop.f32.mrb[158].mxu1 }
0x1304   : > { %21294 = vst [vmem:[#allocation39_spill] sm:$0xff] %v19860_v29  ;;  %21295 = vst [vmem:[#allocation37_spill] sm:$0xff] %v19862_v24  ;;  %v19864_v35 = vpop.f32.mrb[143].mxu0  ;;  %v19866_v1 = vpop.f32.mrb[159].mxu1 }
0x1305   : > { %21296 = vst [vmem:[#allocation50_spill] sm:$0xff] %v19864_v35  ;;  %21297 = vst [vmem:[#allocation52_spill] sm:$0xff] %v19866_v1  ;;  %v16145_v5 = vpop.eup %16144 }
0x1306   : > { %v12024_v8 = vmul.f32 %v16145_v5, %v16143_v36 }
0x1308   : > { %v12037_v9 = vpack.c.bf16 %v12024_v8, %v19711_v39  ;;  %v12070_v39 = vld [vmem:[%s20364_s8] sm:$0xf] }
0x1309   : > { %v19868_v22 = vpop.f32.mrb[144].mxu0  ;;  %v19870_v30 = vpop.f32.mrb[160].mxu1 }
0x130a   : > { %21298 = vst [vmem:[#allocation53_spill] sm:$0xff] %v19868_v22  ;;  %21299 = vst [vmem:[#allocation51_spill] sm:$0xff] %v19870_v30  ;;  %v19873_v53 = vpop.f32.mrb[145].mxu0  ;;  %v19875_v17 = vpop.f32.mrb[161].mxu1  ;;  %12315 = vmatmul.mubr.bf16.gmra.mrb[148].mxu0 %v12037_v9  ;;  %12388 = vmatmul.mubr.bf16.gmra.mrb[164].mxu1 %v12037_v9 }
0x130b   : > { %21300 = vst [vmem:[#allocation88_spill] sm:$0xff] %v19873_v53  ;;  %21301 = vst [vmem:[#allocation92_spill] sm:$0xff] %v19875_v17  ;;  %v19877_v15 = vpop.f32.mrb[146].mxu0  ;;  %v19879_v33 = vpop.f32.mrb[162].mxu1  ;;  %12658 = vmatprep.mubr.bf16.mxu0 %v21240_v26  ;;  %12699 = vmatprep.mubr.bf16.mxu1 %v21240_v26 }
0x130c   : > { %21302 = vst [vmem:[#allocation79_spill] sm:$0xff] %v19877_v15  ;;  %21303 = vst [vmem:[#allocation76_spill] sm:$0xff] %v19879_v33  ;;  %v19881_v16 = vpop.f32.mrb[147].mxu0  ;;  %v19883_v57 = vpop.f32.mrb[163].mxu1  ;;  %v21313_v33 = vld [vmem:[#allocation44_spill] sm:$0xff] }
0x130d   : > { %21304 = vst [vmem:[#allocation77_spill] sm:$0xff] %v19881_v16  ;;  %21305 = vst [vmem:[#allocation78_spill] sm:$0xff] %v19883_v57  ;;  %v21312_v57 = vld [vmem:[#allocation28_spill] sm:$0xff]  ;;  %v19942_v15 = vrot.slane %v12070_v39, %v21313_v33 }
0x130e   : > { %v19939_v16 = vrot.slane %v12070_v39, %v21312_v57 }
0x130f   : > { %v12360_v57 = vadd.f32 %v19838_v51, %v19942_v15 }
0x1312   : > { %12659 = vmatmul.mubr.bf16.vlgmr.msra.gmra.mrb[152].mxu0 %v21240_v26  ;;  %12700 = vmatmul.mubr.bf16.vlgmr.msra.gmra.mrb[168].mxu1 %v21240_v26 }
0x1313   : > { %12742 = vmatpush1.bf16.msra.mxu0 %v19733_v38  ;;  %12783 = vmatpush1.bf16.msra.mxu1 %v19735_v27 }
0x1314   : > { %12743 = vmatprep.subr.bf16.mxu0 %v19741_v13  ;;  %12784 = vmatprep.subr.bf16.mxu1 %v19743_v2 }
0x1315   : > { %12773 = vmatprep.mubr.bf16.mxu0 %v21240_v26  ;;  %12814 = vmatprep.mubr.bf16.mxu1 %v21240_v26 }
0x1317   : > { %12744 = vmatpush1.bf16.msra.mxu0 %v19745_v34  ;;  %12785 = vmatpush1.bf16.msra.mxu1 %v19747_v40 }
0x1318   : > { %12745 = vmatprep.subr.bf16.mxu0 %v19753_v6  ;;  %12786 = vmatprep.subr.bf16.mxu1 %v19755_v54 }
0x131b   : > { %12746 = vmatpush1.bf16.msra.mxu0 %v19757_v49  ;;  %12787 = vmatpush1.bf16.msra.mxu1 %v19759_v18 }
0x131c   : > { %12747 = vmatprep.subr.bf16.mxu0 %v19765_v20  ;;  %12788 = vmatprep.subr.bf16.mxu1 %v19767_v4 }
0x131f   : > { %12748 = vmatpush1.bf16.msra.mxu0 %v19769_v10  ;;  %12789 = vmatpush1.bf16.msra.mxu1 %v19771_v7 }
0x1320   : > { %12749 = vmatprep.subr.bf16.mxu0 %v19777_v50  ;;  %12790 = vmatprep.subr.bf16.mxu1 %v19779_v55 }
0x1323   : > { %12750 = vmatpush1.bf16.msra.mxu0 %v19781_v3  ;;  %12791 = vmatpush1.bf16.msra.mxu1 %v19783_v21 }
0x1324   : > { %12751 = vmatprep.subr.bf16.mxu0 %v19789_v0  ;;  %12792 = vmatprep.subr.bf16.mxu1 %v19791_v11 }
0x1327   : > { %12752 = vmatpush1.bf16.msra.mxu0 %v19793_v45  ;;  %12793 = vmatpush1.bf16.msra.mxu1 %v19795_v62 }
0x1328   : > { %12753 = vmatprep.subr.bf16.mxu0 %v19801_v59  ;;  %12794 = vmatprep.subr.bf16.mxu1 %v19803_v12 }
0x132b   : > { %12754 = vmatpush1.bf16.msra.mxu0 %v19805_v60  ;;  %12795 = vmatpush1.bf16.msra.mxu1 %v19807_v37 }
0x132c   : > { %12755 = vmatprep.subr.bf16.mxu0 %v19813_v25  ;;  %12796 = vmatprep.subr.bf16.mxu1 %v19815_v23 }
0x132f   : > { %12756 = vmatpush1.bf16.msra.mxu0 %v19817_v14  ;;  %12797 = vmatpush1.bf16.msra.mxu1 %v19819_v61 }
0x1330   : > { %12856 = vmatprep.subr.bf16.mxu0 %v19729_v63  ;;  %12897 = vmatprep.subr.bf16.mxu1 %v19731_v42 }
0x13dd   : > { %v19926_v43 = vpop.f32.mrb[148].mxu0  ;;  %v19928_v46 = vpop.f32.mrb[164].mxu1 }
0x13de   : > { %21306 = vst [vmem:[#allocation85_spill] sm:$0xff] %v19926_v43  ;;  %21307 = vst [vmem:[#allocation80_spill] sm:$0xff] %v19928_v46  ;;  %v19930_v36 = vpop.f32.mrb[149].mxu0  ;;  %v19932_v5 = vpop.f32.mrb[165].mxu1  ;;  %v21316_v43 = vld [vmem:[#allocation29_spill] sm:$0xff] }
0x13df   : > { %21308 = vst [vmem:[#allocation83_spill] sm:$0xff] %v19930_v36  ;;  %21309 = vst [vmem:[#allocation86_spill] sm:$0xff] %v19932_v5  ;;  %v19934_v8 = vpop.f32.mrb[150].mxu0  ;;  %v19936_v9 = vpop.f32.mrb[166].mxu1  ;;  %v19949_v46 = vrot.slane %v12070_v39, %v21316_v43  ;;  %v21317_v36 = vld [vmem:[#allocation45_spill] sm:$0xff] }
0x13e0   : > { %21310 = vst [vmem:[#allocation84_spill] sm:$0xff] %v19934_v8  ;;  %21311 = vst [vmem:[#allocation87_spill] sm:$0xff] %v19936_v9  ;;  %v19944_v17 = vpop.f32.mrb[151].mxu0  ;;  %v19946_v53 = vpop.f32.mrb[167].mxu1  ;;  %v19952_v30 = vrot.slane %v12070_v39, %v21317_v36  ;;  %v12287_v8 = vadd.f32 %v19836_v41, %v19939_v16 }
0x13e1   : > { %21314 = vst [vmem:[#allocation90_spill] sm:$0xff] %v19944_v17  ;;  %21315 = vst [vmem:[#allocation91_spill] sm:$0xff] %v19946_v53  ;;  %v12289_v33 = vadd.f32 %v19840_v56, %v19949_v46 }
0x13e2   : > { %v12362_v17 = vadd.f32 %v19842_v19, %v19952_v30 }
0x13e5   : > { %v12660_v9 = vpop.f32.mrb[152].mxu0  ;;  %v12701_v53 = vpop.f32.mrb[168].mxu1 }
0x13e6   : > { %v12708_v5 = vadd.f32 %v12660_v9, %v12287_v8  ;;  %v12710_v43 = vadd.f32 %v12701_v53, %v12360_v57  ;;  %v12662_v22 = vpop.f32.mrb[153].mxu0  ;;  %v12703_v1 = vpop.f32.mrb[169].mxu1 }
0x13e7   : > { %v12709_v39 = vadd.f32 %v12662_v22, %v12289_v33  ;;  %v12711_v36 = vadd.f32 %v12703_v1, %v12362_v17  ;;  %v12664_v35 = vpop.f32.mrb[154].mxu0  ;;  %v12705_v24 = vpop.f32.mrb[170].mxu1  ;;  %v12364_v33 = vadd.f32 %v19846_v48, %v19942_v15 }
0x13e8   : > { %v15298_v41 = vmul.f32 -1.442695, %v12708_v5  ;;  %v12665_v29 = vpop.f32.mrb[155].mxu0  ;;  %v12706_v32 = vpop.f32.mrb[171].mxu1  ;;  %v15300_v56 = vmul.f32 -1.442695, %v12710_v43  ;;  %v12293_v43 = vadd.f32 %v19848_v47, %v19949_v46 }
0x13e9   : > { %v15299_v51 = vmul.f32 -1.442695, %v12709_v39  ;;  %v12366_v39 = vadd.f32 %v19850_v28, %v19952_v30 }
0x13ea   : > { %16146 = vpow2.f32 %v15298_v41 }
0x13eb   : > { %16148 = vpow2.f32 %v15299_v51 }
0x13ec   : > { %16150 = vtanh.f32 %v12711_v36 }
0x13ed   : > { %16152 = vpow2.f32 %v15300_v56 }
0x13f4   : > { %v16147_v44 = vpop.eup %16146 }
0x13f5   : > { %v12721_v58 = vadd.f32 1.0, %v16147_v44  ;;  %v16149_v19 = vpop.eup %16148 }
0x13f6   : > { %v12722_v53 = vadd.f32 1.0, %v16149_v19  ;;  %v16151_v8 = vpop.eup %16150 }
0x13f7   : > { %16154 = vrcp.f32 %v12721_v58  ;;  %v16153_v22 = vpop.eup %16152  ;;  %v12291_v58 = vadd.f32 %v19844_v31, %v19939_v16 }
0x13f8   : > { %16156 = vrcp.f32 %v12722_v53  ;;  %v12723_v17 = vadd.f32 1.0, %v16153_v22 }
0x13fa   : > { %16158 = vrcp.f32 %v12723_v17 }
0x1401   : > { %v16155_v1 = vpop.eup %16154 }
0x1402   : > { %v12732_v35 = vmul.f32 %v16155_v1, %v16151_v8  ;;  %v16157_v24 = vpop.eup %16156 }
0x1403   : > { %v12731_v29 = vmul.f32 0.0, %v16157_v24 }
0x1404   : > { %v16159_v5 = vpop.eup %16158 }
0x1405   : > { %v19962_v32 = vadd.f32 %v12732_v35, %v12731_v29 }
0x1407   : > { %16160 = vtanh.f32 %v19962_v32 }
0x1411   : > { %v16161_v44 = vpop.eup %16160 }
0x1412   : > { %v12735_v9 = vmul.f32 %v16161_v44, %v16159_v5 }
0x1414   : > { %v12736_v57 = vpack.c.bf16 %v12735_v9, %v12735_v9 }
0x1416   : > { %12774 = vmatmul.mubr.bf16.vlgmr.msra.gmra.mrb[156].mxu0 %v12736_v57  ;;  %12815 = vmatmul.mubr.bf16.vlgmr.msra.gmra.mrb[172].mxu1 %v12736_v57 }
0x1417   : > { %12857 = vmatpush1.bf16.msra.mxu0 %v19733_v38  ;;  %12898 = vmatpush1.bf16.msra.mxu1 %v19735_v27 }
0x1418   : > { %12858 = vmatprep.subr.bf16.mxu0 %v19741_v13  ;;  %12899 = vmatprep.subr.bf16.mxu1 %v19743_v2 }
0x1419   : > { %12888 = vmatprep.mubr.bf16.mxu0 %v21240_v26  ;;  %12929 = vmatprep.mubr.bf16.mxu1 %v21240_v26 }
0x141b   : > { %12859 = vmatpush1.bf16.msra.mxu0 %v19745_v34  ;;  %12900 = vmatpush1.bf16.msra.mxu1 %v19747_v40 }
0x141c   : > { %12860 = vmatprep.subr.bf16.mxu0 %v19753_v6  ;;  %12901 = vmatprep.subr.bf16.mxu1 %v19755_v54 }
0x141f   : > { %12861 = vmatpush1.bf16.msra.mxu0 %v19757_v49  ;;  %12902 = vmatpush1.bf16.msra.mxu1 %v19759_v18 }
0x1420   : > { %12862 = vmatprep.subr.bf16.mxu0 %v19765_v20  ;;  %12903 = vmatprep.subr.bf16.mxu1 %v19767_v4 }
0x1423   : > { %12863 = vmatpush1.bf16.msra.mxu0 %v19769_v10  ;;  %12904 = vmatpush1.bf16.msra.mxu1 %v19771_v7 }
0x1424   : > { %12864 = vmatprep.subr.bf16.mxu0 %v19777_v50  ;;  %12905 = vmatprep.subr.bf16.mxu1 %v19779_v55 }
0x1427   : > { %12865 = vmatpush1.bf16.msra.mxu0 %v19781_v3  ;;  %12906 = vmatpush1.bf16.msra.mxu1 %v19783_v21 }
0x1428   : > { %12866 = vmatprep.subr.bf16.mxu0 %v19789_v0  ;;  %12907 = vmatprep.subr.bf16.mxu1 %v19791_v11 }
0x142b   : > { %12867 = vmatpush1.bf16.msra.mxu0 %v19793_v45  ;;  %12908 = vmatpush1.bf16.msra.mxu1 %v19795_v62 }
0x142c   : > { %12868 = vmatprep.subr.bf16.mxu0 %v19801_v59  ;;  %12909 = vmatprep.subr.bf16.mxu1 %v19803_v12 }
0x142f   : > { %12869 = vmatpush1.bf16.msra.mxu0 %v19805_v60  ;;  %12910 = vmatpush1.bf16.msra.mxu1 %v19807_v37 }
0x1430   : > { %12870 = vmatprep.subr.bf16.mxu0 %v19813_v25  ;;  %12911 = vmatprep.subr.bf16.mxu1 %v19815_v23 }
0x1433   : > { %12871 = vmatpush1.bf16.msra.mxu0 %v19817_v14  ;;  %12912 = vmatpush1.bf16.msra.mxu1 %v19819_v61 }
0x1434   : > { %12971 = vmatprep.subr.bf16.mxu0 %v19729_v63  ;;  %13012 = vmatprep.subr.bf16.mxu1 %v19731_v42 }
0x14e9   : > { %v12775_v36 = vpop.f32.mrb[156].mxu0  ;;  %v12816_v41 = vpop.f32.mrb[172].mxu1 }
0x14ea   : > { %v12823_v51 = vadd.f32 %v12775_v36, %v12291_v58  ;;  %v12825_v56 = vadd.f32 %v12816_v41, %v12364_v33  ;;  %v12777_v19 = vpop.f32.mrb[157].mxu0  ;;  %v12818_v53 = vpop.f32.mrb[173].mxu1 }
0x14eb   : > { %v12824_v8 = vadd.f32 %v12777_v19, %v12293_v43  ;;  %v12826_v22 = vadd.f32 %v12818_v53, %v12366_v39  ;;  %v12779_v1 = vpop.f32.mrb[158].mxu0  ;;  %v12820_v35 = vpop.f32.mrb[174].mxu1 }
0x14ec   : > { %v15301_v31 = vmul.f32 -1.442695, %v12823_v51  ;;  %v12780_v24 = vpop.f32.mrb[159].mxu0  ;;  %v12821_v17 = vpop.f32.mrb[175].mxu1  ;;  %v15303_v47 = vmul.f32 -1.442695, %v12825_v56 }
0x14ed   : > { %v15302_v48 = vmul.f32 -1.442695, %v12824_v8  ;;  %v21318_v8 = vld [vmem:[#allocation104_spill] sm:$0xff]  ;;  %v21319_v1 = vld [vmem:[#allocation163_spill] sm:$0xff] }
0x14ee   : > { %16162 = vpow2.f32 %v15301_v31  ;;  %v12299_v35 = vadd.f32 %v21319_v1, %v19949_v46  ;;  %v21320_v31 = vld [vmem:[#allocation164_spill] sm:$0xff] }
0x14ef   : > { %16164 = vpow2.f32 %v15302_v48  ;;  %v12372_v24 = vadd.f32 %v21320_v31, %v19952_v30 }
0x14f0   : > { %16166 = vtanh.f32 %v12826_v22  ;;  %v12370_v22 = vadd.f32 %v21318_v8, %v19942_v15 }
0x14f1   : > { %16168 = vpow2.f32 %v15303_v47 }
0x14f8   : > { %v16163_v29 = vpop.eup %16162 }
0x14f9   : > { %v12836_v5 = vadd.f32 1.0, %v16163_v29  ;;  %v16165_v28 = vpop.eup %16164 }
0x14fa   : > { %v12837_v44 = vadd.f32 1.0, %v16165_v28  ;;  %v16167_v9 = vpop.eup %16166 }
0x14fb   : > { %16170 = vrcp.f32 %v12836_v5  ;;  %v16169_v57 = vpop.eup %16168 }
0x14fc   : > { %16172 = vrcp.f32 %v12837_v44  ;;  %v12838_v39 = vadd.f32 1.0, %v16169_v57 }
0x14fe   : > { %16174 = vrcp.f32 %v12838_v39 }
0x1505   : > { %v16171_v58 = vpop.eup %16170 }
0x1506   : > { %v12847_v33 = vmul.f32 %v16171_v58, %v16167_v9  ;;  %v16173_v43 = vpop.eup %16172 }
0x1507   : > { %v12846_v36 = vmul.f32 %v16173_v43, %v19962_v32  ;;  %v12297_v32 = vadd.f32 %v19852_v52, %v19939_v16 }
0x1508   : > { %v16175_v51 = vpop.eup %16174 }
0x1509   : > { %v20008_v41 = vadd.f32 %v12847_v33, %v12846_v36 }
0x150b   : > { %16176 = vtanh.f32 %v20008_v41 }
0x1515   : > { %v16177_v56 = vpop.eup %16176 }
0x1516   : > { %v12850_v19 = vmul.f32 %v16177_v56, %v16175_v51 }
0x1518   : > { %v12851_v53 = vpack.c.bf16 %v12850_v19, %v12850_v19 }
0x151a   : > { %12889 = vmatmul.mubr.bf16.vlgmr.msra.gmra.mrb[160].mxu0 %v12851_v53  ;;  %12930 = vmatmul.mubr.bf16.vlgmr.msra.gmra.mrb[176].mxu1 %v12851_v53 }
0x151b   : > { %12972 = vmatpush1.bf16.msra.mxu0 %v19733_v38  ;;  %13013 = vmatpush1.bf16.msra.mxu1 %v19735_v27 }
0x151c   : > { %12973 = vmatprep.subr.bf16.mxu0 %v19741_v13  ;;  %13014 = vmatprep.subr.bf16.mxu1 %v19743_v2 }
0x151d   : > { %13003 = vmatprep.mubr.bf16.mxu0 %v21240_v26  ;;  %13044 = vmatprep.mubr.bf16.mxu1 %v21240_v26 }
0x151f   : > { %12974 = vmatpush1.bf16.msra.mxu0 %v19745_v34  ;;  %13015 = vmatpush1.bf16.msra.mxu1 %v19747_v40 }
0x1520   : > { %12975 = vmatprep.subr.bf16.mxu0 %v19753_v6  ;;  %13016 = vmatprep.subr.bf16.mxu1 %v19755_v54 }
0x1523   : > { %12976 = vmatpush1.bf16.msra.mxu0 %v19757_v49  ;;  %13017 = vmatpush1.bf16.msra.mxu1 %v19759_v18 }
0x1524   : > { %12977 = vmatprep.subr.bf16.mxu0 %v19765_v20  ;;  %13018 = vmatprep.subr.bf16.mxu1 %v19767_v4 }
0x1527   : > { %12978 = vmatpush1.bf16.msra.mxu0 %v19769_v10  ;;  %13019 = vmatpush1.bf16.msra.mxu1 %v19771_v7 }
0x1528   : > { %12979 = vmatprep.subr.bf16.mxu0 %v19777_v50  ;;  %13020 = vmatprep.subr.bf16.mxu1 %v19779_v55 }
0x152b   : > { %12980 = vmatpush1.bf16.msra.mxu0 %v19781_v3  ;;  %13021 = vmatpush1.bf16.msra.mxu1 %v19783_v21 }
0x152c   : > { %12981 = vmatprep.subr.bf16.mxu0 %v19789_v0  ;;  %13022 = vmatprep.subr.bf16.mxu1 %v19791_v11 }
0x152f   : > { %12982 = vmatpush1.bf16.msra.mxu0 %v19793_v45  ;;  %13023 = vmatpush1.bf16.msra.mxu1 %v19795_v62 }
0x1530   : > { %12983 = vmatprep.subr.bf16.mxu0 %v19801_v59  ;;  %13024 = vmatprep.subr.bf16.mxu1 %v19803_v12 }
0x1533   : > { %12984 = vmatpush1.bf16.msra.mxu0 %v19805_v60  ;;  %13025 = vmatpush1.bf16.msra.mxu1 %v19807_v37 }
0x1534   : > { %12985 = vmatprep.subr.bf16.mxu0 %v19813_v25  ;;  %13026 = vmatprep.subr.bf16.mxu1 %v19815_v23 }
0x1537   : > { %12986 = vmatpush1.bf16.msra.mxu0 %v19817_v14  ;;  %13027 = vmatpush1.bf16.msra.mxu1 %v19819_v61 }
0x1538   : > { %13086 = vmatprep.subr.bf16.mxu0 %v19729_v63  ;;  %13127 = vmatprep.subr.bf16.mxu1 %v19731_v42 }
0x15ed   : > { %v12890_v17 = vpop.f32.mrb[160].mxu0  ;;  %v12931_v48 = vpop.f32.mrb[176].mxu1 }
0x15ee   : > { %v12938_v47 = vadd.f32 %v12890_v17, %v12297_v32  ;;  %v12940_v29 = vadd.f32 %v12931_v48, %v12370_v22  ;;  %v12892_v5 = vpop.f32.mrb[161].mxu0  ;;  %v12933_v28 = vpop.f32.mrb[177].mxu1 }
0x15ef   : > { %v12939_v44 = vadd.f32 %v12892_v5, %v12299_v35  ;;  %v12941_v9 = vadd.f32 %v12933_v28, %v12372_v24  ;;  %v12894_v57 = vpop.f32.mrb[162].mxu0  ;;  %v12935_v58 = vpop.f32.mrb[178].mxu1 }
0x15f0   : > { %v15304_v52 = vmul.f32 -1.442695, %v12938_v47  ;;  %v12895_v33 = vpop.f32.mrb[163].mxu0  ;;  %v12936_v43 = vpop.f32.mrb[179].mxu1  ;;  %v15306_v36 = vmul.f32 -1.442695, %v12940_v29 }
0x15f1   : > { %v15305_v39 = vmul.f32 -1.442695, %v12939_v44  ;;  %v21322_v44 = vld [vmem:[#allocation37_spill] sm:$0xff]  ;;  %v21323_v57 = vld [vmem:[#allocation50_spill] sm:$0xff] }
0x15f2   : > { %16178 = vpow2.f32 %v15304_v52  ;;  %v12303_v58 = vadd.f32 %v21323_v57, %v19949_v46  ;;  %v21324_v52 = vld [vmem:[#allocation52_spill] sm:$0xff] }
0x15f3   : > { %16180 = vpow2.f32 %v15305_v39  ;;  %v12376_v33 = vadd.f32 %v21324_v52, %v19952_v30 }
0x15f4   : > { %16182 = vtanh.f32 %v12941_v9  ;;  %v12374_v9 = vadd.f32 %v21322_v44, %v19942_v15 }
0x15f5   : > { %16184 = vpow2.f32 %v15306_v36 }
0x15fc   : > { %v16179_v51 = vpop.eup %16178 }
0x15fd   : > { %v12951_v56 = vadd.f32 1.0, %v16179_v51  ;;  %v16181_v19 = vpop.eup %16180 }
0x15fe   : > { %v12952_v53 = vadd.f32 1.0, %v16181_v19  ;;  %v16183_v32 = vpop.eup %16182 }
0x15ff   : > { %16186 = vrcp.f32 %v12951_v56  ;;  %v16185_v8 = vpop.eup %16184 }
0x1600   : > { %16188 = vrcp.f32 %v12952_v53  ;;  %v12953_v31 = vadd.f32 1.0, %v16185_v8 }
0x1602   : > { %16190 = vrcp.f32 %v12953_v31 }
0x1609   : > { %v16187_v22 = vpop.eup %16186 }
0x160a   : > { %v12962_v1 = vmul.f32 %v16187_v22, %v16183_v32  ;;  %v16189_v35 = vpop.eup %16188 }
0x160b   : > { %v12961_v24 = vmul.f32 %v16189_v35, %v20008_v41  ;;  %v21321_v41 = vld [vmem:[#allocation39_spill] sm:$0xff] }
0x160c   : > { %v16191_v48 = vpop.eup %16190  ;;  %v12301_v28 = vadd.f32 %v21321_v41, %v19939_v16 }
0x160d   : > { %v20054_v17 = vadd.f32 %v12962_v1, %v12961_v24 }
0x160f   : > { %16192 = vtanh.f32 %v20054_v17 }
0x1619   : > { %v16193_v47 = vpop.eup %16192 }
0x161a   : > { %v12965_v29 = vmul.f32 %v16193_v47, %v16191_v48 }
0x161c   : > { %v12966_v5 = vpack.c.bf16 %v12965_v29, %v12965_v29 }
0x161e   : > { %13004 = vmatmul.mubr.bf16.vlgmr.msra.gmra.mrb[164].mxu0 %v12966_v5  ;;  %13045 = vmatmul.mubr.bf16.vlgmr.msra.gmra.mrb[180].mxu1 %v12966_v5 }
0x161f   : > { %13087 = vmatpush1.bf16.msra.mxu0 %v19733_v38  ;;  %13128 = vmatpush1.bf16.msra.mxu1 %v19735_v27 }
0x1620   : > { %13088 = vmatprep.subr.bf16.mxu0 %v19741_v13  ;;  %13129 = vmatprep.subr.bf16.mxu1 %v19743_v2 }
0x1621   : > { %13118 = vmatprep.mubr.bf16.mxu0 %v21240_v26  ;;  %13159 = vmatprep.mubr.bf16.mxu1 %v21240_v26 }
0x1623   : > { %13089 = vmatpush1.bf16.msra.mxu0 %v19745_v34  ;;  %13130 = vmatpush1.bf16.msra.mxu1 %v19747_v40 }
0x1624   : > { %13090 = vmatprep.subr.bf16.mxu0 %v19753_v6  ;;  %13131 = vmatprep.subr.bf16.mxu1 %v19755_v54 }
0x1627   : > { %13091 = vmatpush1.bf16.msra.mxu0 %v19757_v49  ;;  %13132 = vmatpush1.bf16.msra.mxu1 %v19759_v18 }
0x1628   : > { %13092 = vmatprep.subr.bf16.mxu0 %v19765_v20  ;;  %13133 = vmatprep.subr.bf16.mxu1 %v19767_v4 }
0x162b   : > { %13093 = vmatpush1.bf16.msra.mxu0 %v19769_v10  ;;  %13134 = vmatpush1.bf16.msra.mxu1 %v19771_v7 }
0x162c   : > { %13094 = vmatprep.subr.bf16.mxu0 %v19777_v50  ;;  %13135 = vmatprep.subr.bf16.mxu1 %v19779_v55 }
0x162f   : > { %13095 = vmatpush1.bf16.msra.mxu0 %v19781_v3  ;;  %13136 = vmatpush1.bf16.msra.mxu1 %v19783_v21 }
0x1630   : > { %13096 = vmatprep.subr.bf16.mxu0 %v19789_v0  ;;  %13137 = vmatprep.subr.bf16.mxu1 %v19791_v11 }
0x1633   : > { %13097 = vmatpush1.bf16.msra.mxu0 %v19793_v45  ;;  %13138 = vmatpush1.bf16.msra.mxu1 %v19795_v62 }
0x1634   : > { %13098 = vmatprep.subr.bf16.mxu0 %v19801_v59  ;;  %13139 = vmatprep.subr.bf16.mxu1 %v19803_v12 }
0x1637   : > { %13099 = vmatpush1.bf16.msra.mxu0 %v19805_v60  ;;  %13140 = vmatpush1.bf16.msra.mxu1 %v19807_v37 }
0x1638   : > { %13100 = vmatprep.subr.bf16.mxu0 %v19813_v25  ;;  %13141 = vmatprep.subr.bf16.mxu1 %v19815_v23 }
0x163b   : > { %13101 = vmatpush1.bf16.msra.mxu0 %v19817_v14  ;;  %13142 = vmatpush1.bf16.msra.mxu1 %v19819_v61 }
0x163c   : > { %13201 = vmatprep.subr.bf16.mxu0 %v19729_v63  ;;  %13242 = vmatprep.subr.bf16.mxu1 %v19731_v42 }
0x16f1   : > { %v13005_v43 = vpop.f32.mrb[164].mxu0  ;;  %v13046_v39 = vpop.f32.mrb[180].mxu1 }
0x16f2   : > { %v13053_v36 = vadd.f32 %v13005_v43, %v12301_v28  ;;  %v13055_v51 = vadd.f32 %v13046_v39, %v12374_v9  ;;  %v13007_v56 = vpop.f32.mrb[165].mxu0  ;;  %v13048_v19 = vpop.f32.mrb[181].mxu1 }
0x16f3   : > { %v13054_v53 = vadd.f32 %v13007_v56, %v12303_v58  ;;  %v13056_v32 = vadd.f32 %v13048_v19, %v12376_v33  ;;  %v13009_v8 = vpop.f32.mrb[166].mxu0  ;;  %v13050_v22 = vpop.f32.mrb[182].mxu1 }
0x16f4   : > { %v15307_v1 = vmul.f32 -1.442695, %v13053_v36  ;;  %v13010_v35 = vpop.f32.mrb[167].mxu0  ;;  %v13051_v31 = vpop.f32.mrb[183].mxu1  ;;  %v15309_v48 = vmul.f32 -1.442695, %v13055_v51 }
0x16f5   : > { %v15308_v24 = vmul.f32 -1.442695, %v13054_v53  ;;  %v20149_v35 = vld [vmem:[#allocation13] ss:$16 sps:$4 sm:$0xff]   ;;  %v20152_v31 = vld [vmem:[#allocation13 + $0x8] ss:$16 sps:$4 sm:$0xff]  }
0x16f6   : > { %16194 = vpow2.f32 %v15307_v1 }
0x16f7   : > { %16196 = vpow2.f32 %v15308_v24  ;;  %v20155_v24 = vld [vmem:[#allocation13 + $0x24] ss:$16 sps:$4 sm:$0xff]  }
0x16f8   : > { %16198 = vtanh.f32 %v13056_v32 }
0x16f9   : > { %16200 = vpow2.f32 %v15309_v48  ;;  %v20158_v48 = vld [vmem:[#allocation13 + $0x2c] ss:$16 sps:$4 sm:$0xff]  }
0x1700   : > { %v16195_v47 = vpop.eup %16194 }
0x1701   : > { %v13066_v29 = vadd.f32 1.0, %v16195_v47  ;;  %v16197_v5 = vpop.eup %16196  ;;  %v20163_v47 = vld [vmem:[#allocation13 + $0x20] ss:$16 sps:$4 sm:$0xff]  }
0x1702   : > { %v13067_v41 = vadd.f32 1.0, %v16197_v5  ;;  %v16199_v28 = vpop.eup %16198  ;;  %v20169_v5 = vld [vmem:[#allocation13 + $0x44] ss:$16 sps:$4 sm:$0xff]  }
0x1703   : > { %16202 = vrcp.f32 %v13066_v29  ;;  %v16201_v44 = vpop.eup %16200  ;;  %v20166_v29 = vld [vmem:[#allocation13 + $0x28] ss:$16 sps:$4 sm:$0xff]  }
0x1704   : > { %16204 = vrcp.f32 %v13067_v41  ;;  %v13068_v52 = vadd.f32 1.0, %v16201_v44  ;;  %v20172_v41 = vld [vmem:[#allocation13 + $0x4c] ss:$16 sps:$4 sm:$0xff]   ;;  %v20178_v44 = vld [vmem:[#allocation13 + $0x48] ss:$16 sps:$4 sm:$0xff]  }
0x1706   : > { %16206 = vrcp.f32 %v13068_v52  ;;  %v20190_v52 = vld [vmem:[#allocation13 + $0x68] ss:$16 sps:$4 sm:$0xff]  }
0x170d   : > { %v16203_v9 = vpop.eup %16202 }
0x170e   : > { %v13077_v57 = vmul.f32 %v16203_v9, %v16199_v28  ;;  %v16205_v58 = vpop.eup %16204  ;;  %v20175_v28 = vld [vmem:[#allocation13 + $0x40] ss:$16 sps:$4 sm:$0xff]   ;;  %v20181_v9 = vld [vmem:[#allocation13 + $0x64] ss:$16 sps:$4 sm:$0xff]  }
0x170f   : > { %v13076_v33 = vmul.f32 %v16205_v58, %v20054_v17  ;;  %v20187_v58 = vld [vmem:[#allocation13 + $0x60] ss:$16 sps:$4 sm:$0xff]  }
0x1710   : > { %v16207_v39 = vpop.eup %16206 }
0x1711   : > { %v20100_v43 = vadd.f32 %v13077_v57, %v13076_v33  ;;  %v20184_v57 = vld [vmem:[#allocation13 + $0x6c] ss:$16 sps:$4 sm:$0xff]   ;;  %v20193_v33 = vld [vmem:[#allocation13 + $0x84] ss:$16 sps:$4 sm:$0xff]  }
0x1713   : > { %16208 = vtanh.f32 %v20100_v43 }
0x171d   : > { %v16209_v36 = vpop.eup %16208 }
0x171e   : > { %v13080_v51 = vmul.f32 %v16209_v36, %v16207_v39  ;;  %v20199_v39 = vld [vmem:[#allocation13 + $0x80] ss:$16 sps:$4 sm:$0xff]   ;;  %v20202_v36 = vld [vmem:[#allocation13 + $0x88] ss:$16 sps:$4 sm:$0xff]  }
0x1720   : > { %v13081_v56 = vpack.c.bf16 %v13080_v51, %v13080_v51  ;;  %v20205_v51 = vld [vmem:[#allocation13 + $0xa4] ss:$16 sps:$4 sm:$0xff]  }
0x1722   : > { %13119 = vmatmul.mubr.bf16.vlgmr.msra.gmra.mrb[168].mxu0 %v13081_v56  ;;  %13160 = vmatmul.mubr.bf16.vlgmr.msra.gmra.mrb[184].mxu1 %v13081_v56  ;;  %v20208_v56 = vld [vmem:[#allocation13 + $0xac] ss:$16 sps:$4 sm:$0xff]  }
0x1723   : > { %13202 = vmatpush1.bf16.msra.mxu0 %v19733_v38  ;;  %13243 = vmatpush1.bf16.msra.mxu1 %v19735_v27  ;;  %v21325_v38 = vld [vmem:[#allocation53_spill] sm:$0xff] }
0x1724   : > { %13203 = vmatprep.subr.bf16.mxu0 %v19741_v13  ;;  %13244 = vmatprep.subr.bf16.mxu1 %v19743_v2  ;;  %v12307_v27 = vadd.f32 %v21325_v38, %v19939_v16  ;;  %v21326_v13 = vld [vmem:[#allocation51_spill] sm:$0xff]  ;;  %v20211_v38 = vld [vmem:[#allocation13 + $0xa0] ss:$16 sps:$4 sm:$0xff]  }
0x1725   : > { %13233 = vmatprep.mubr.bf16.mxu0 %v21240_v26  ;;  %13274 = vmatprep.mubr.bf16.mxu1 %v21240_v26  ;;  %v12380_v2 = vadd.f32 %v21326_v13, %v19942_v15  ;;  %v20217_v13 = vld [vmem:[#allocation13 + $0xc4] ss:$16 sps:$4 sm:$0xff]  }
0x1727   : > { %13204 = vmatpush1.bf16.msra.mxu0 %v19745_v34  ;;  %13245 = vmatpush1.bf16.msra.mxu1 %v19747_v40  ;;  %v21327_v34 = vld [vmem:[#allocation88_spill] sm:$0xff] }
0x1728   : > { %13205 = vmatprep.subr.bf16.mxu0 %v19753_v6  ;;  %13246 = vmatprep.subr.bf16.mxu1 %v19755_v54  ;;  %v12309_v40 = vadd.f32 %v21327_v34, %v19949_v46  ;;  %v21328_v6 = vld [vmem:[#allocation92_spill] sm:$0xff] }
0x1729   : > { %v12382_v54 = vadd.f32 %v21328_v6, %v19952_v30  ;;  %v20223_v34 = vld [vmem:[#allocation13 + $0xc0] ss:$16 sps:$4 sm:$0xff]   ;;  %v20229_v6 = vld [vmem:[#allocation13 + $0xe4] ss:$16 sps:$4 sm:$0xff]  }
0x172b   : > { %13206 = vmatpush1.bf16.msra.mxu0 %v19757_v49  ;;  %13247 = vmatpush1.bf16.msra.mxu1 %v19759_v18 }
0x172c   : > { %13207 = vmatprep.subr.bf16.mxu0 %v19765_v20  ;;  %13248 = vmatprep.subr.bf16.mxu1 %v19767_v4 }
0x172f   : > { %13208 = vmatpush1.bf16.msra.mxu0 %v19769_v10  ;;  %13249 = vmatpush1.bf16.msra.mxu1 %v19771_v7 }
0x1730   : > { %13209 = vmatprep.subr.bf16.mxu0 %v19777_v50  ;;  %13250 = vmatprep.subr.bf16.mxu1 %v19779_v55 }
0x1733   : > { %13210 = vmatpush1.bf16.msra.mxu0 %v19781_v3  ;;  %13251 = vmatpush1.bf16.msra.mxu1 %v19783_v21 }
0x1734   : > { %13211 = vmatprep.subr.bf16.mxu0 %v19789_v0  ;;  %13252 = vmatprep.subr.bf16.mxu1 %v19791_v11 }
0x1737   : > { %13212 = vmatpush1.bf16.msra.mxu0 %v19793_v45  ;;  %13253 = vmatpush1.bf16.msra.mxu1 %v19795_v62 }
0x1738   : > { %13213 = vmatprep.subr.bf16.mxu0 %v19801_v59  ;;  %13254 = vmatprep.subr.bf16.mxu1 %v19803_v12 }
0x173b   : > { %13214 = vmatpush1.bf16.msra.mxu0 %v19805_v60  ;;  %13255 = vmatpush1.bf16.msra.mxu1 %v19807_v37 }
0x173c   : > { %13215 = vmatprep.subr.bf16.mxu0 %v19813_v25  ;;  %13256 = vmatprep.subr.bf16.mxu1 %v19815_v23 }
0x173f   : > { %13216 = vmatpush1.bf16.msra.mxu0 %v19817_v14  ;;  %13257 = vmatpush1.bf16.msra.mxu1 %v19819_v61 }
0x1740   : > { %13316 = vmatprep.subr.bf16.mxu0 %v19729_v63  ;;  %13357 = vmatprep.subr.bf16.mxu1 %v19731_v42 }
0x17f5   : > { %v13120_v49 = vpop.f32.mrb[168].mxu0  ;;  %v13161_v18 = vpop.f32.mrb[184].mxu1 }
0x17f6   : > { %v13168_v20 = vadd.f32 %v13120_v49, %v12307_v27  ;;  %v13170_v4 = vadd.f32 %v13161_v18, %v12380_v2  ;;  %v13122_v10 = vpop.f32.mrb[169].mxu0  ;;  %v13163_v63 = vpop.f32.mrb[185].mxu1  ;;  %v20214_v27 = vld [vmem:[#allocation13 + $0xa8] ss:$16 sps:$4 sm:$0xff]   ;;  %v20220_v2 = vld [vmem:[#allocation13 + $0xcc] ss:$16 sps:$4 sm:$0xff]  }
0x17f7   : > { %v13169_v7 = vadd.f32 %v13122_v10, %v12309_v40  ;;  %v13171_v42 = vadd.f32 %v13163_v63, %v12382_v54  ;;  %v13124_v50 = vpop.f32.mrb[170].mxu0  ;;  %v13165_v55 = vpop.f32.mrb[186].mxu1  ;;  %v20226_v40 = vld [vmem:[#allocation13 + $0xc8] ss:$16 sps:$4 sm:$0xff]   ;;  %v20232_v54 = vld [vmem:[#allocation13 + $0xec] ss:$16 sps:$4 sm:$0xff]  }
0x17f8   : > { %v15310_v3 = vmul.f32 -1.442695, %v13168_v20  ;;  %v13125_v21 = vpop.f32.mrb[171].mxu0  ;;  %v13166_v0 = vpop.f32.mrb[187].mxu1  ;;  %v15312_v45 = vmul.f32 -1.442695, %v13170_v4 }
0x17f9   : > { %v15311_v11 = vmul.f32 -1.442695, %v13169_v7  ;;  %v20235_v49 = vld [vmem:[#allocation13 + $0xe0] ss:$16 sps:$4 sm:$0xff]   ;;  %v20238_v18 = vld [vmem:[#allocation13 + $0xe8] ss:$16 sps:$4 sm:$0xff]  }
0x17fa   : > { %16210 = vpow2.f32 %v15310_v3  ;;  %v16304_v20 = vld [vmem:[#allocation13 + $0x4] ss:$16 sps:$4 sm:$0xff]   ;;  %v16305_v4 = vld [vmem:[#allocation13 + $0xc] ss:$16 sps:$4 sm:$0xff]  }
0x17fb   : > { %16212 = vpow2.f32 %v15311_v11  ;;  %v21329_v10 = vld [vmem:[#allocation79_spill] sm:$0xff]  ;;  %v21330_v7 = vld [vmem:[#allocation76_spill] sm:$0xff]  ;;  %v21331_v50 = vld [vmem:[#allocation77_spill] sm:$0xff] }
0x17fc   : > { %16214 = vtanh.f32 %v13171_v42  ;;  %v12311_v63 = vadd.f32 %v21329_v10, %v19939_v16  ;;  %v12384_v42 = vadd.f32 %v21330_v7, %v19942_v15  ;;  %v12313_v55 = vadd.f32 %v21331_v50, %v19949_v46  ;;  %v21332_v3 = vld [vmem:[#allocation78_spill] sm:$0xff] }
0x17fd   : > { %16216 = vpow2.f32 %v15312_v45  ;;  %v12386_v21 = vadd.f32 %v21332_v3, %v19952_v30 }
0x1804   : > { %v16211_v62 = vpop.eup %16210 }
0x1805   : > { %v13181_v59 = vadd.f32 1.0, %v16211_v62  ;;  %v16213_v12 = vpop.eup %16212 }
0x1806   : > { %v13182_v60 = vadd.f32 1.0, %v16213_v12  ;;  %v16215_v37 = vpop.eup %16214 }
0x1807   : > { %16218 = vrcp.f32 %v13181_v59  ;;  %v16217_v25 = vpop.eup %16216 }
0x1808   : > { %16220 = vrcp.f32 %v13182_v60  ;;  %v13183_v17 = vadd.f32 1.0, %v16217_v25 }
0x180a   : > { %16222 = vrcp.f32 %v13183_v17 }
0x1811   : > { %v16219_v23 = vpop.eup %16218 }
0x1812   : > { %v13192_v14 = vmul.f32 %v16219_v23, %v16215_v37  ;;  %v16221_v61 = vpop.eup %16220 }
0x1813   : > { %v13191_v19 = vmul.f32 %v16221_v61, %v20100_v43  ;;  %v20196_v43 = vld [vmem:[#allocation13 + $0x8c] ss:$16 sps:$4 sm:$0xff]  }
0x1814   : > { %v16223_v32 = vpop.eup %16222 }
0x1815   : > { %v20146_v53 = vadd.f32 %v13192_v14, %v13191_v19 }
0x1817   : > { %16224 = vtanh.f32 %v20146_v53 }
0x1821   : > { %v16225_v8 = vpop.eup %16224 }
0x1822   : > { %v13195_v22 = vmul.f32 %v16225_v8, %v16223_v32 }
0x1824   : > { %v13196_v1 = vpack.c.bf16 %v13195_v22, %v13195_v22 }
0x1826   : > { %13234 = vmatmul.mubr.bf16.vlgmr.msra.gmra.mrb[172].mxu0 %v13196_v1  ;;  %13275 = vmatmul.mubr.bf16.vlgmr.msra.gmra.mrb[188].mxu1 %v13196_v1 }
0x1827   : > { %13317 = vmatpush1.bf16.msra.mxu0 %v20149_v35  ;;  %13358 = vmatpush1.bf16.msra.mxu1 %v20152_v31 }
0x1828   : > { %13318 = vmatprep.subr.bf16.mxu0 %v20155_v24  ;;  %13359 = vmatprep.subr.bf16.mxu1 %v20158_v48 }
0x1829   : > { %13348 = vmatprep.mubr.bf16.mxu0 %v21240_v26  ;;  %13389 = vmatprep.mubr.bf16.mxu1 %v21240_v26 }
0x182b   : > { %13319 = vmatpush1.bf16.msra.mxu0 %v20163_v47  ;;  %13360 = vmatpush1.bf16.msra.mxu1 %v20166_v29 }
0x182c   : > { %13320 = vmatprep.subr.bf16.mxu0 %v20169_v5  ;;  %13361 = vmatprep.subr.bf16.mxu1 %v20172_v41 }
0x182f   : > { %13321 = vmatpush1.bf16.msra.mxu0 %v20175_v28  ;;  %13362 = vmatpush1.bf16.msra.mxu1 %v20178_v44 }
0x1830   : > { %13322 = vmatprep.subr.bf16.mxu0 %v20181_v9  ;;  %13363 = vmatprep.subr.bf16.mxu1 %v20184_v57 }
0x1833   : > { %13323 = vmatpush1.bf16.msra.mxu0 %v20187_v58  ;;  %13364 = vmatpush1.bf16.msra.mxu1 %v20190_v52 }
0x1834   : > { %13324 = vmatprep.subr.bf16.mxu0 %v20193_v33  ;;  %13365 = vmatprep.subr.bf16.mxu1 %v20196_v43 }
0x1837   : > { %13325 = vmatpush1.bf16.msra.mxu0 %v20199_v39  ;;  %13366 = vmatpush1.bf16.msra.mxu1 %v20202_v36 }
0x1838   : > { %13326 = vmatprep.subr.bf16.mxu0 %v20205_v51  ;;  %13367 = vmatprep.subr.bf16.mxu1 %v20208_v56 }
0x183b   : > { %13327 = vmatpush1.bf16.msra.mxu0 %v20211_v38  ;;  %13368 = vmatpush1.bf16.msra.mxu1 %v20214_v27 }
0x183c   : > { %13328 = vmatprep.subr.bf16.mxu0 %v20217_v13  ;;  %13369 = vmatprep.subr.bf16.mxu1 %v20220_v2 }
0x183f   : > { %13329 = vmatpush1.bf16.msra.mxu0 %v20223_v34  ;;  %13370 = vmatpush1.bf16.msra.mxu1 %v20226_v40 }
0x1840   : > { %13330 = vmatprep.subr.bf16.mxu0 %v20229_v6  ;;  %13371 = vmatprep.subr.bf16.mxu1 %v20232_v54 }
0x1843   : > { %13331 = vmatpush1.bf16.msra.mxu0 %v20235_v49  ;;  %13372 = vmatpush1.bf16.msra.mxu1 %v20238_v18 }
0x1844   : > { %13431 = vmatprep.subr.bf16.mxu0 %v16304_v20  ;;  %13472 = vmatprep.subr.bf16.mxu1 %v16305_v4 }
0x18f9   : > { %v13235_v0 = vpop.f32.mrb[172].mxu0  ;;  %v13276_v11 = vpop.f32.mrb[188].mxu1 }
0x18fa   : > { %v13283_v45 = vadd.f32 %v13235_v0, %v12311_v63  ;;  %v13285_v62 = vadd.f32 %v13276_v11, %v12384_v42  ;;  %v13237_v59 = vpop.f32.mrb[173].mxu0  ;;  %v13278_v12 = vpop.f32.mrb[189].mxu1 }
0x18fb   : > { %v13284_v60 = vadd.f32 %v13237_v59, %v12313_v55  ;;  %v13286_v37 = vadd.f32 %v13278_v12, %v12386_v21  ;;  %v13239_v25 = vpop.f32.mrb[174].mxu0  ;;  %v13280_v23 = vpop.f32.mrb[190].mxu1 }
0x18fc   : > { %v15313_v14 = vmul.f32 -1.442695, %v13283_v45  ;;  %v13240_v61 = vpop.f32.mrb[175].mxu0  ;;  %v13281_v17 = vpop.f32.mrb[191].mxu1  ;;  %v15315_v32 = vmul.f32 -1.442695, %v13285_v62 }
0x18fd   : > { %v15314_v19 = vmul.f32 -1.442695, %v13284_v60  ;;  %v16534_v61 = vmov 0.0   ;;  %v15755_v17 = vld [vmem:[#allocation15 + $0x8] sm:$0xff]  }
0x18fe   : > { %16226 = vpow2.f32 %v15313_v14  ;;  %v15754_v14 = vld [vmem:[#allocation15] sm:$0xff]  }
0x18ff   : > { %16228 = vpow2.f32 %v15314_v19  ;;  %v15756_v19 = vld [vmem:[#allocation15 + $0x10] sm:$0xff]  }
0x1900   : > { %16230 = vtanh.f32 %v13286_v37 }
0x1901   : > { %16232 = vpow2.f32 %v15315_v32  ;;  %v15757_v32 = vld [vmem:[#allocation15 + $0x18] sm:$0xff]  }
0x1908   : > { %v16227_v8 = vpop.eup %16226 }
0x1909   : > { %v13296_v22 = vadd.f32 1.0, %v16227_v8  ;;  %v16229_v1 = vpop.eup %16228  ;;  %v15758_v8 = vld [vmem:[#allocation15 + $0x20] sm:$0xff]  }
0x190a   : > { %v13297_v20 = vadd.f32 1.0, %v16229_v1  ;;  %v16231_v4 = vpop.eup %16230  ;;  %v15760_v1 = vld [vmem:[#allocation15 + $0x30] sm:$0xff]  }
0x190b   : > { %16234 = vrcp.f32 %v13296_v22  ;;  %v16233_v10 = vpop.eup %16232  ;;  %v15759_v22 = vld [vmem:[#allocation15 + $0x28] sm:$0xff]  }
0x190c   : > { %16236 = vrcp.f32 %v13297_v20  ;;  %v13298_v50 = vadd.f32 1.0, %v16233_v10  ;;  %v15761_v20 = vld [vmem:[#allocation15 + $0x38] sm:$0xff]  }
0x190e   : > { %16238 = vrcp.f32 %v13298_v50 }
0x1915   : > { %v16235_v63 = vpop.eup %16234 }
0x1916   : > { %v13307_v7 = vmul.f32 %v16235_v63, %v16231_v4  ;;  %v16237_v42 = vpop.eup %16236  ;;  %v21337_v4 = vld [vmem:[#allocation84_spill] sm:$0xff]  ;;  %v21338_v63 = vld [vmem:[#allocation87_spill] sm:$0xff] }
0x1917   : > { %v13306_v55 = vmul.f32 %v16237_v42, %v20146_v53  ;;  %v12321_v10 = vadd.f32 %v21337_v4, %v19939_v16  ;;  %v21339_v42 = vld [vmem:[#allocation90_spill] sm:$0xff] }
0x1918   : > { %v16239_v21 = vpop.eup %16238  ;;  %v12323_v50 = vadd.f32 %v21339_v42, %v19949_v46 }
0x1919   : > { %v20250_v3 = vadd.f32 %v13307_v7, %v13306_v55  ;;  %v12394_v7 = vadd.f32 %v21338_v63, %v19942_v15  ;;  %v21340_v55 = vld [vmem:[#allocation91_spill] sm:$0xff] }
0x191b   : > { %16240 = vtanh.f32 %v20250_v3 }
0x1925   : > { %v16241_v0 = vpop.eup %16240 }
0x1926   : > { %v13310_v11 = vmul.f32 %v16241_v0, %v16239_v21 }
0x1928   : > { %v13311_v45 = vpack.c.bf16 %v13310_v11, %v13310_v11 }
0x192a   : > { %13349 = vmatmul.mubr.bf16.vlgmr.msra.gmra.mrb[176].mxu0 %v13311_v45  ;;  %13390 = vmatmul.mubr.bf16.vlgmr.msra.gmra.mrb[192].mxu1 %v13311_v45 }
0x192b   : > { %13432 = vmatpush1.bf16.msra.mxu0 %v20149_v35  ;;  %13473 = vmatpush1.bf16.msra.mxu1 %v20152_v31  ;;  %v21334_v35 = vld [vmem:[#allocation80_spill] sm:$0xff] }
0x192c   : > { %13433 = vmatprep.subr.bf16.mxu0 %v20155_v24  ;;  %13474 = vmatprep.subr.bf16.mxu1 %v20158_v48  ;;  %v12390_v31 = vadd.f32 %v21334_v35, %v19942_v15  ;;  %v21335_v24 = vld [vmem:[#allocation83_spill] sm:$0xff] }
0x192d   : > { %13463 = vmatprep.mubr.bf16.mxu0 %v21240_v26  ;;  %13504 = vmatprep.mubr.bf16.mxu1 %v21240_v26  ;;  %v21333_v26 = vld [vmem:[#allocation85_spill] sm:$0xff]  ;;  %v12319_v48 = vadd.f32 %v21335_v24, %v19949_v46 }
0x192e   : > { %v12317_v53 = vadd.f32 %v21333_v26, %v19939_v16 }
0x192f   : > { %13434 = vmatpush1.bf16.msra.mxu0 %v20163_v47  ;;  %13475 = vmatpush1.bf16.msra.mxu1 %v20166_v29  ;;  %v21336_v47 = vld [vmem:[#allocation86_spill] sm:$0xff] }
0x1930   : > { %13435 = vmatprep.subr.bf16.mxu0 %v20169_v5  ;;  %13476 = vmatprep.subr.bf16.mxu1 %v20172_v41  ;;  %v12392_v29 = vadd.f32 %v21336_v47, %v19952_v30 }
0x1933   : > { %13436 = vmatpush1.bf16.msra.mxu0 %v20175_v28  ;;  %13477 = vmatpush1.bf16.msra.mxu1 %v20178_v44 }
0x1934   : > { %13437 = vmatprep.subr.bf16.mxu0 %v20181_v9  ;;  %13478 = vmatprep.subr.bf16.mxu1 %v20184_v57 }
0x1937   : > { %13438 = vmatpush1.bf16.msra.mxu0 %v20187_v58  ;;  %13479 = vmatpush1.bf16.msra.mxu1 %v20190_v52 }
0x1938   : > { %13439 = vmatprep.subr.bf16.mxu0 %v20193_v33  ;;  %13480 = vmatprep.subr.bf16.mxu1 %v20196_v43 }
0x193b   : > { %13440 = vmatpush1.bf16.msra.mxu0 %v20199_v39  ;;  %13481 = vmatpush1.bf16.msra.mxu1 %v20202_v36 }
0x193c   : > { %13441 = vmatprep.subr.bf16.mxu0 %v20205_v51  ;;  %13482 = vmatprep.subr.bf16.mxu1 %v20208_v56 }
0x193f   : > { %13442 = vmatpush1.bf16.msra.mxu0 %v20211_v38  ;;  %13483 = vmatpush1.bf16.msra.mxu1 %v20214_v27 }
0x1940   : > { %13443 = vmatprep.subr.bf16.mxu0 %v20217_v13  ;;  %13484 = vmatprep.subr.bf16.mxu1 %v20220_v2 }
0x1943   : > { %13444 = vmatpush1.bf16.msra.mxu0 %v20223_v34  ;;  %13485 = vmatpush1.bf16.msra.mxu1 %v20226_v40 }
0x1944   : > { %13445 = vmatprep.subr.bf16.mxu0 %v20229_v6  ;;  %13486 = vmatprep.subr.bf16.mxu1 %v20232_v54 }
0x1947   : > { %13446 = vmatpush1.bf16.msra.mxu0 %v20235_v49  ;;  %13487 = vmatpush1.bf16.msra.mxu1 %v20238_v18 }
0x1948   : > { %15345 = vmatprep.subr.bf16.mxu0 %v16534_v61 }
0x19fd   : > { %v13350_v5 = vpop.f32.mrb[176].mxu0  ;;  %v13391_v41 = vpop.f32.mrb[192].mxu1 }
0x19fe   : > { %v13398_v28 = vadd.f32 %v13350_v5, %v12317_v53  ;;  %v13400_v44 = vadd.f32 %v13391_v41, %v12390_v31  ;;  %v13352_v9 = vpop.f32.mrb[177].mxu0  ;;  %v13393_v57 = vpop.f32.mrb[193].mxu1 }
0x19ff   : > { %v13399_v58 = vadd.f32 %v13352_v9, %v12319_v48  ;;  %v13401_v52 = vadd.f32 %v13393_v57, %v12392_v29  ;;  %v13354_v33 = vpop.f32.mrb[178].mxu0  ;;  %v13395_v43 = vpop.f32.mrb[194].mxu1 }
0x1a00   : > { %v15316_v39 = vmul.f32 -1.442695, %v13398_v28  ;;  %v13355_v36 = vpop.f32.mrb[179].mxu0  ;;  %v13396_v51 = vpop.f32.mrb[195].mxu1  ;;  %v15318_v38 = vmul.f32 -1.442695, %v13400_v44 }
0x1a01   : > { %v15317_v56 = vmul.f32 -1.442695, %v13399_v58 }
0x1a02   : > { %16242 = vpow2.f32 %v15316_v39 }
0x1a03   : > { %16244 = vpow2.f32 %v15317_v56 }
0x1a04   : > { %16246 = vtanh.f32 %v13401_v52 }
0x1a05   : > { %16248 = vpow2.f32 %v15318_v38 }
0x1a0c   : > { %v16243_v27 = vpop.eup %16242 }
0x1a0d   : > { %v13411_v13 = vadd.f32 1.0, %v16243_v27  ;;  %v16245_v2 = vpop.eup %16244  ;;  %v15322_v27 = vld [vmem:[%s20367_s11] ss:$0 sm:$0xff] }
0x1a0e   : > { %v13412_v34 = vadd.f32 1.0, %v16245_v2  ;;  %v16247_v40 = vpop.eup %16246 }
0x1a0f   : > { %16250 = vrcp.f32 %v13411_v13  ;;  %v16249_v6 = vpop.eup %16248 }
0x1a10   : > { %16252 = vrcp.f32 %v13412_v34  ;;  %v13413_v62 = vadd.f32 1.0, %v16249_v6 }
0x1a12   : > { %16254 = vrcp.f32 %v13413_v62 }
0x1a19   : > { %v16251_v54 = vpop.eup %16250 }
0x1a1a   : > { %v13422_v49 = vmul.f32 %v16251_v54, %v16247_v40  ;;  %v16253_v18 = vpop.eup %16252 }
0x1a1b   : > { %v13421_v59 = vmul.f32 %v16253_v18, %v20250_v3  ;;  %v12396_v3 = vadd.f32 %v21340_v55, %v19952_v30 }
0x1a1c   : > { %v16255_v60 = vpop.eup %16254 }
0x1a1d   : > { %v20294_v12 = vadd.f32 %v13422_v49, %v13421_v59 }
0x1a1f   : > { %16256 = vtanh.f32 %v20294_v12 }
0x1a29   : > { %v16257_v37 = vpop.eup %16256 }
0x1a2a   : > { %v13425_v25 = vmul.f32 %v16257_v37, %v16255_v60 }
0x1a2c   : > { %v13426_v23 = vpack.c.bf16 %v13425_v25, %v13425_v25 }
0x1a2e   : > { %13464 = vmatmul.mubr.bf16.vlgmr.msra.gmra.mrb[180].mxu0 %v13426_v23  ;;  %13505 = vmatmul.mubr.bf16.vlgmr.msra.gmra.mrb[196].mxu1 %v13426_v23 }
0x1a2f   : > { %15346 = vmatpush3.bf16.msra.mxu0 %v15754_v14  ;;  %15361 = vmatprep.mubr.msk.bf16.mxu0 %vm16535_vm1, %v16534_v61 }
0x1a30   : > { %15347 = vmatprep.subr.bf16.mxu0 %v16534_v61 }
0x1a33   : > { %15348 = vmatpush3.bf16.msra.mxu0 %v15755_v17 }
0x1a34   : > { %15349 = vmatprep.subr.bf16.mxu0 %v16534_v61 }
0x1a37   : > { %15350 = vmatpush3.bf16.msra.mxu0 %v15756_v19 }
0x1a38   : > { %15351 = vmatprep.subr.bf16.mxu0 %v16534_v61 }
0x1a3b   : > { %15352 = vmatpush3.bf16.msra.mxu0 %v15757_v32 }
0x1a3c   : > { %15353 = vmatprep.subr.bf16.mxu0 %v16534_v61 }
0x1a3f   : > { %15354 = vmatpush3.bf16.msra.mxu0 %v15758_v8 }
0x1a40   : > { %15355 = vmatprep.subr.bf16.mxu0 %v16534_v61 }
0x1a43   : > { %15356 = vmatpush3.bf16.msra.mxu0 %v15759_v22 }
0x1a44   : > { %15357 = vmatprep.subr.bf16.mxu0 %v16534_v61 }
0x1a47   : > { %15358 = vmatpush3.bf16.msra.mxu0 %v15760_v1 }
0x1a48   : > { %15359 = vmatprep.subr.bf16.mxu0 %v16534_v61 }
0x1a4b   : > { %15360 = vmatpush3.bf16.msra.mxu0 %v15761_v20 }
0x1b01   : > { %v13465_v21 = vpop.f32.mrb[180].mxu0  ;;  %v13506_v0 = vpop.f32.mrb[196].mxu1 }
0x1b02   : > { %v13513_v11 = vadd.f32 %v13465_v21, %v12321_v10  ;;  %v13515_v45 = vadd.f32 %v13506_v0, %v12394_v7  ;;  %v13467_v26 = vpop.f32.mrb[181].mxu0  ;;  %v13508_v53 = vpop.f32.mrb[197].mxu1 }
0x1b03   : > { %v13514_v35 = vadd.f32 %v13467_v26, %v12323_v50  ;;  %v13516_v31 = vadd.f32 %v13508_v53, %v12396_v3  ;;  %v13469_v24 = vpop.f32.mrb[182].mxu0  ;;  %v13510_v48 = vpop.f32.mrb[198].mxu1 }
0x1b04   : > { %v15319_v16 = vmul.f32 -1.442695, %v13513_v11  ;;  %v13470_v47 = vpop.f32.mrb[183].mxu0  ;;  %v13511_v29 = vpop.f32.mrb[199].mxu1  ;;  %v15321_v46 = vmul.f32 -1.442695, %v13515_v45 }
0x1b05   : > { %v15320_v15 = vmul.f32 -1.442695, %v13514_v35 }
0x1b06   : > { %16258 = vpow2.f32 %v15319_v16 }
0x1b07   : > { %16260 = vpow2.f32 %v15320_v15 }
0x1b08   : > { %16262 = vtanh.f32 %v13516_v31 }
0x1b09   : > { %16264 = vpow2.f32 %v15321_v46 }
0x1b10   : > { %v16259_v5 = vpop.eup %16258 }
0x1b11   : > { %v13526_v41 = vadd.f32 1.0, %v16259_v5  ;;  %v16261_v30 = vpop.eup %16260 }
0x1b12   : > { %v13527_v28 = vadd.f32 1.0, %v16261_v30  ;;  %v16263_v44 = vpop.eup %16262 }
0x1b13   : > { %16266 = vrcp.f32 %v13526_v41  ;;  %v16265_v9 = vpop.eup %16264 }
0x1b14   : > { %16268 = vrcp.f32 %v13527_v28  ;;  %v13528_v33 = vadd.f32 1.0, %v16265_v9 }
0x1b16   : > { %16270 = vrcp.f32 %v13528_v33 }
0x1b1d   : > { %v16267_v57 = vpop.eup %16266 }
0x1b1e   : > { %v13537_v58 = vmul.f32 %v16267_v57, %v16263_v44  ;;  %v16269_v52 = vpop.eup %16268 }
0x1b1f   : > { %v13536_v43 = vmul.f32 %v16269_v52, %v20294_v12 }
0x1b20   : > { %v16271_v36 = vpop.eup %16270 }
0x1b21   : > { %v13538_v39 = vadd.f32 %v13537_v58, %v13536_v43 }
0x1b23   : > { %16272 = vtanh.f32 %v13538_v39 }
0x1b2d   : > { %v16273_v51 = vpop.eup %16272 }
0x1b2e   : > { %v13540_v56 = vmul.f32 %v16273_v51, %v16271_v36 }
0x1b30   : > { %v13541_v38 = vpack.c.bf16 %v13540_v56, %v13540_v56 }
0x1b32   : > { %15362 = vmatmul.mubr.bf16.vlgmr.msra.gmra.mrb[184].mxu0 %v13541_v38 }
0x1c05   : > { %v13647_v13 = vpop.f32.mrb[184].mxu0 }
0x1c06   : > { %v13648_v2 = vadd.f32 %v15322_v27, %v13647_v13  ;;  %v15363_v34 = vpop.f32.mrb[185].mxu0 }
0x1c07   : > { %v13650_v40 = vpop.f32.mrb[186].mxu0 }
0x1c08   : > { %13653 = vst [vmem:[%s479_s21] sm:$0xff] %v13648_v2  ;;  %v15364_v6 = vpop.f32.mrb[187].mxu0 }
0x1c09   : > { %16459 = shalt.err (!%p16456_p10)
}
0x1c0a   : > { %s16460_s14 = scalar_lea.hbm %s20314_s23, 128  ;;  %s16464_s19 = scalar_lea.hbm %s21342_s26, 256 }
0x1c0b   : > { %p16461_p0 = scmp.ne.s32.totalorder %s20314_s23, %s16460_s14  ;;  %p16465_p4 = scmp.lt.u32.totalorder %s20314_s23, %s21342_s26 }
0x1c0c   : > { %p16466_p12 = scmp.lt.u32.totalorder %s16464_s19, %s16460_s14  ;;  %p16468_p8 = scmp.lt.u32.totalorder %s16460_s14, %s20314_s23 }
0x1c0d   : > { %p16462_p2 = pnand %p16461_p0, %p21343_p11 }
0x1c0e   : > { %p16467_p7 = por %p16466_p12, %p16465_p4 }
0x1c0f   : > { %p16463_p3 = pneg %p16462_p2 }
0x1c10   : > { %p16469_p13 = por %p16468_p8, %p16467_p7 }
0x1c12   : > { %p16470_p1 = pnand %p16469_p13, %p16463_p3 }
0x1c14   : > { %16473 = shalt.err (!%p16470_p1)
}
0x1c15   : > { %15387 = dma.vmem_to_hbm [thread:$0]  (%p21343_p11), %s20316_s24, 128, %s20314_s23, %s13655_s29  }
0x1c16 PF: > { %s21344_s9 = sld [smem:[#allocation23_spill]]  ;;  %s21345_s12 = sld [smem:[#allocation21_spill]] }
0x1c17   : > { %s21346_s21 = sld [smem:[#allocation27_spill]] }
0x1c1c   : > { %p15419_p6 = scmp.ge.s32.totalorder %s21344_s9, 2  ;;  %s13680_s13 = sand.u32 1, %s21345_s12  }
0x1c1d   : > { %p21347_p9 = scmp.ne.s32.totalorder %s21346_s21, 0  ;;  %s13681_s16 = scalar_lea.sflag [#allocation9], %s13680_s13 }
0x1c1f   : > { %p15406_p5 = pnand %p15419_p6, %p21347_p9 }
0x1c21   : > { %16503 = dma.done.wait (!%p15406_p5), %s13681_s16, 128  }
0x1c22   : > { %16505 = vsyncadd (!%p15406_p5), %s13681_s16, 4294967168  ;;  %s21348_s24 = sld [smem:[#allocation24_spill]]  ;;  %s21349_s25 = sld [smem:[#allocation22_spill]] }
0x1c23   : > { %s21350_s23 = sld [smem:[#allocation25_spill]]  ;;  %s21351_s21 = smov %s16512_s22 }
0x1c28   : > { %p25_p10 = scmp.ge.s32.totalorder %s21348_s24, 4   ;;  %s21352_s22 = smov %s21349_s25 }
0x1c2a   :  { %27 = sbr.rel (!%p25_p10) target bundleno = 10 (0xa), region = 124 }
0x1c31   :  { %13686 = vsyncpa [#allocation8], 1 }
0x1c32   :  { %13688 = vsyncpa [#allocation8 + $0x1], 1 }
0x1c33   :  { %13689 = vsyncpa [#allocation11], 1 }
0x1c34   :  { %13690 = vsyncpa [#allocation14], 1 }
0x1c35   :  { %13691 = vsyncpa [#allocation9], 1 }
0x1c36   :  { %13693 = vsyncpa [#allocation9 + $0x1], 1 }

</bundles_post_ra>
